<compile_context>
chip_gen: v7x
topology: tpu7x:2x2x1
jax: 0.10.0
libtpu: 0.0.40
codegen_flags: <defaults>
</compile_context>

<pallas_src>
import functools

import numpy as np
import jax
import jax.numpy as jnp
from jax.experimental import pallas as pl
from jax.experimental.pallas import tpu as pltpu


# ---------------------------------------------------------------------------
# helpers
# ---------------------------------------------------------------------------
def _pick_tile(dim, target, mult):
    """Largest tile <= target that divides dim, stepping in multiples of mult."""
    if dim <= target:
        return dim
    t = (target // mult) * mult
    while t >= mult:
        if dim % t == 0:
            return t
        t -= mult
    return dim


# ---------------------------------------------------------------------------
# Pallas kernels
# ---------------------------------------------------------------------------
def _conv3x3_kernel(x_ref, w_ref, b_ref, o_ref, *, H, W, Cin, Cout, act):
    """x_ref: (1, H+2, W+2, Cin) padded image; w_ref: (9, Cin, Cout); b: (1, Cout)."""
    acc = jnp.zeros((H * W, Cout), jnp.float32)
    for kh in range(3):
        for kw in range(3):
            k = kh * 3 + kw
            win = x_ref[0, pl.ds(kh, H), pl.ds(kw, W), :].reshape(H * W, Cin)
            if Cin == 1:
                # rank-1 update on the VPU (skip a degenerate K=1 MXU matmul)
                acc = acc + win * w_ref[k]
            else:
                acc = acc + jnp.dot(win.astype(jnp.bfloat16), w_ref[k],
                                    preferred_element_type=jnp.float32)
    y = acc + b_ref[...]
    if act == "relu":
        y = jnp.maximum(y, 0.0)
    o_ref[0] = y.reshape(H, W, Cout).astype(o_ref.dtype)


def _maxpool_kernel(x_ref, o_ref, *, C):
    """x_ref: (1, 2*tr, Wo, 2C) -- W-pairs pre-merged onto lanes in the wrapper."""
    x = x_ref[0]
    x = x.reshape(x.shape[0] // 2, 2, x.shape[1], x.shape[2])
    r = jnp.max(x, axis=1)                                 # max over the h-pair
    o_ref[0] = jnp.maximum(r[:, :, :C], r[:, :, C:])       # max over the w-pair


def _spatial_attn_kernel(x_ref, w_ref, b_ref, o_ref, pa_ref, pm_ref, *, H, W):
    """Fused SpatialAttention: mean/max over C, 3x3 2->1 conv, sigmoid, scale."""
    x = x_ref[0]                                           # (H, W, C) f32
    pa_ref[...] = jnp.zeros_like(pa_ref)                   # zero-padded halo buffers
    pm_ref[...] = jnp.zeros_like(pm_ref)
    pa_ref[pl.ds(1, H), pl.ds(1, W)] = jnp.mean(x, axis=-1)
    pm_ref[pl.ds(1, H), pl.ds(1, W)] = jnp.max(x, axis=-1)
    att = jnp.zeros((H, W), jnp.float32) + b_ref[0]
    for kh in range(3):
        for kw in range(3):
            k = kh * 3 + kw
            att += w_ref[k] * pa_ref[pl.ds(kh, H), pl.ds(kw, W)]
            att += w_ref[9 + k] * pm_ref[pl.ds(kh, H), pl.ds(kw, W)]
    att = jax.nn.sigmoid(att)
    o_ref[0] = (x * att[:, :, None]).astype(o_ref.dtype)


def _bn_stats_kernel(x_ref, s_ref):
    @pl.when(pl.program_id(0) == 0)
    def _():
        s_ref[...] = jnp.zeros_like(s_ref)
    x = x_ref[...].astype(jnp.float32)
    s_ref[...] += jnp.stack([jnp.sum(x, axis=0), jnp.sum(x * x, axis=0)])


def _bn_apply_kernel(x_ref, s_ref, g_ref, b_ref, o_ref, *, count):
    x = x_ref[...].astype(jnp.float32)
    mean = s_ref[0, :] * (1.0 / count)
    var = s_ref[1, :] * (1.0 / count) - mean * mean
    inv = jax.lax.rsqrt(var + 1e-5)
    o_ref[...] = ((x - mean) * inv * g_ref[0, :] + b_ref[0, :]).astype(o_ref.dtype)


def _linear_kernel(x_ref, w_ref, b_ref, o_ref, acc_ref, *, act):
    k = pl.program_id(2)

    @pl.when(k == 0)
    def _():
        acc_ref[...] = jnp.zeros_like(acc_ref)

    acc_ref[...] += jnp.dot(x_ref[...].astype(jnp.bfloat16), w_ref[...],
                            preferred_element_type=jnp.float32)

    @pl.when(k == pl.num_programs(2) - 1)
    def _():
        y = acc_ref[...] + b_ref[...]
        if act == "relu":
            y = jnp.maximum(y, 0.0)
        o_ref[...] = y.astype(o_ref.dtype)


# ---------------------------------------------------------------------------
# Wrappers (glue: padding / reshapes / BlockSpec setup)
# ---------------------------------------------------------------------------
def conv3x3(x, w, b, act="relu"):
    """SAME 3x3 conv, NHWC activations, HWIO weights, fused bias + activation."""
    N, H, W, Cin = x.shape
    Cout = w.shape[-1]
    xp = jnp.pad(x, ((0, 0), (1, 1), (1, 1), (0, 0)))
    wdt = jnp.float32 if Cin == 1 else jnp.bfloat16
    w9 = w.reshape(9, Cin, Cout).astype(wdt)
    b2 = b.reshape(1, Cout).astype(jnp.float32)
    kernel = functools.partial(_conv3x3_kernel, H=H, W=W, Cin=Cin, Cout=Cout, act=act)
    return pl.pallas_call(
        kernel,
        out_shape=jax.ShapeDtypeStruct((N, H, W, Cout), jnp.float32),
        grid=(N,),
        in_specs=[
            pl.BlockSpec((1, H + 2, W + 2, Cin), lambda n: (n, 0, 0, 0)),
            pl.BlockSpec((9, Cin, Cout), lambda n: (0, 0, 0)),
            pl.BlockSpec((1, Cout), lambda n: (0, 0)),
        ],
        out_specs=pl.BlockSpec((1, H, W, Cout), lambda n: (n, 0, 0, 0)),
        compiler_params=pltpu.CompilerParams(dimension_semantics=("parallel",)),
    )(xp, w9, b2)


def maxpool_2x2(x):
    N, H, W, C = x.shape
    Ho, Wo = H // 2, W // 2
    xr = x.reshape(N, H, Wo, 2 * C)          # free merge: (w-pair, C) onto lanes
    tr = _pick_tile(Ho, 64, 1)               # output rows per block
    kernel = functools.partial(_maxpool_kernel, C=C)
    return pl.pallas_call(
        kernel,
        out_shape=jax.ShapeDtypeStruct((N, Ho, Wo, C), jnp.float32),
        grid=(N, Ho // tr),
        in_specs=[pl.BlockSpec((1, 2 * tr, Wo, 2 * C), lambda n, i: (n, i, 0, 0))],
        out_specs=pl.BlockSpec((1, tr, Wo, C), lambda n, i: (n, i, 0, 0)),
        compiler_params=pltpu.CompilerParams(
            dimension_semantics=("parallel", "parallel")),
    )(xr)


def spatial_attention(x, att_w, att_b):
    """torch SpatialAttention, fused into a single per-image pass."""
    N, H, W, C = x.shape
    # HWIO (3,3,2,1) -> (18,): taps [kh*3+kw] for the avg channel, then max channel.
    wf = jnp.concatenate([att_w[:, :, 0, 0].reshape(-1),
                          att_w[:, :, 1, 0].reshape(-1)]).astype(jnp.float32)
    bf = att_b.reshape(1).astype(jnp.float32)
    kernel = functools.partial(_spatial_attn_kernel, H=H, W=W)
    return pl.pallas_call(
        kernel,
        out_shape=jax.ShapeDtypeStruct((N, H, W, C), jnp.float32),
        grid=(N,),
        in_specs=[
            pl.BlockSpec((1, H, W, C), lambda n: (n, 0, 0, 0)),
            pl.BlockSpec(memory_space=pltpu.MemorySpace.SMEM),
            pl.BlockSpec(memory_space=pltpu.MemorySpace.SMEM),
        ],
        out_specs=pl.BlockSpec((1, H, W, C), lambda n: (n, 0, 0, 0)),
        scratch_shapes=[pltpu.VMEM((H + 2, W + 2), jnp.float32),
                        pltpu.VMEM((H + 2, W + 2), jnp.float32)],
        compiler_params=pltpu.CompilerParams(dimension_semantics=("parallel",)),
    )(x, wf, bf)


def batch_norm(x, gamma, beta):
    """Train-mode BatchNorm2d: per-channel batch stats over (N, H, W), eps=1e-5."""
    N, H, W, C = x.shape
    M = N * H * W
    xf = x.reshape(M, C)
    tm = _pick_tile(M, 512, 8)
    stats = pl.pallas_call(
        _bn_stats_kernel,
        out_shape=jax.ShapeDtypeStruct((2, C), jnp.float32),
        grid=(M // tm,),
        in_specs=[pl.BlockSpec((tm, C), lambda i: (i, 0))],
        out_specs=pl.BlockSpec((2, C), lambda i: (0, 0)),
        compiler_params=pltpu.CompilerParams(dimension_semantics=("arbitrary",)),
    )(xf)
    out = pl.pallas_call(
        functools.partial(_bn_apply_kernel, count=float(M)),
        out_shape=jax.ShapeDtypeStruct((M, C), jnp.float32),
        grid=(M // tm,),
        in_specs=[
            pl.BlockSpec((tm, C), lambda i: (i, 0)),
            pl.BlockSpec((2, C), lambda i: (0, 0)),
            pl.BlockSpec((1, C), lambda i: (0, 0)),
            pl.BlockSpec((1, C), lambda i: (0, 0)),
        ],
        out_specs=pl.BlockSpec((tm, C), lambda i: (i, 0)),
        compiler_params=pltpu.CompilerParams(dimension_semantics=("parallel",)),
    )(xf, stats, gamma.reshape(1, C).astype(jnp.float32),
      beta.reshape(1, C).astype(jnp.float32))
    return out.reshape(N, H, W, C)


def linear(x, w, b, act="none"):
    """(M, K) @ (K, N) + b, 3-D tiled with an f32 accumulator and bf16 operands."""
    M, K = x.shape
    Nc = w.shape[1]
    tm = _pick_tile(M, 256, 8)
    tk = _pick_tile(K, 512, 128)
    tn = _pick_tile(Nc, 256, 128)
    kernel = functools.partial(_linear_kernel, act=act)
    return pl.pallas_call(
        kernel,
        out_shape=jax.ShapeDtypeStruct((M, Nc), jnp.float32),
        grid=(M // tm, Nc // tn, K // tk),
        in_specs=[
            pl.BlockSpec((tm, tk), lambda i, j, k: (i, k)),
            pl.BlockSpec((tk, tn), lambda i, j, k: (k, j)),
            pl.BlockSpec((1, tn), lambda i, j, k: (0, j)),
        ],
        out_specs=pl.BlockSpec((tm, tn), lambda i, j, k: (i, j)),
        scratch_shapes=[pltpu.VMEM((tm, tn), jnp.float32)],
        compiler_params=pltpu.CompilerParams(
            dimension_semantics=("parallel", "parallel", "arbitrary")),
    )(x, w.astype(jnp.bfloat16), b.reshape(1, Nc).astype(jnp.float32))


# ---------------------------------------------------------------------------
# Full forward pass (mirrors CNNWithSpatialAttention.forward, default branch)
# ---------------------------------------------------------------------------
def forward(x_nchw, p):
    x = jnp.transpose(x_nchw, (0, 2, 3, 1))                      # NCHW -> NHWC
    x = conv3x3(x, p["w1"], p["b1"], act="relu")                 # conv1 + relu
    x = conv3x3(x, p["w2"], p["b2"], act="relu")                 # conv2 + relu
    x = maxpool_2x2(x)                                           # pool
    x = spatial_attention(x, p["att_w"], p["att_b"])             # shared attention
    x = batch_norm(x, p["g1"], p["beta1"])                       # batch_norm1
    x = conv3x3(x, p["w3"], p["b3"], act="relu")                 # conv3 + relu
    x = conv3x3(x, p["w4"], p["b4"], act="relu")                 # conv4 + relu
    x = maxpool_2x2(x)                                           # pool
    x = spatial_attention(x, p["att_w"], p["att_b"])             # shared attention
    x = batch_norm(x, p["g2"], p["beta2"])                       # batch_norm2
    n = x.shape[0]
    xf = jnp.transpose(x, (0, 3, 1, 2)).reshape(n, -1)           # torch .view order
    h = linear(xf, p["fc1_w"], p["fc1_b"], act="relu")
    return linear(h, p["fc2_w"], p["fc2_b"], act="none")


def init_params(key, H, W, num_classes=10):
    ks = jax.random.split(key, 18)

    def conv_w(k, cin, cout):
        return jax.random.normal(k, (3, 3, cin, cout), jnp.float32) * np.sqrt(2.0 / (9 * cin))

    def vec(k, n, scale=0.01):
        return jax.random.normal(k, (n,), jnp.float32) * scale

    fc1_in = 128 * (H // 4) * (W // 4)
    return {
        "w1": conv_w(ks[0], 1, 32),    "b1": vec(ks[1], 32),
        "w2": conv_w(ks[2], 32, 64),   "b2": vec(ks[3], 64),
        "w3": conv_w(ks[4], 64, 128),  "b3": vec(ks[5], 128),
        "w4": conv_w(ks[6], 128, 128), "b4": vec(ks[7], 128),
        "att_w": conv_w(ks[8], 2, 1),  "att_b": vec(ks[9], 1),
        "g1": 1.0 + vec(ks[10], 64, 0.1),  "beta1": vec(ks[11], 64, 0.1),
        "g2": 1.0 + vec(ks[12], 128, 0.1), "beta2": vec(ks[13], 128, 0.1),
        "fc1_w": jax.random.normal(ks[14], (fc1_in, 512), jnp.float32) * np.sqrt(2.0 / fc1_in),
        "fc1_b": vec(ks[15], 512),
        "fc2_w": jax.random.normal(ks[16], (512, num_classes), jnp.float32) * np.sqrt(2.0 / 512),
        "fc2_b": vec(ks[17], num_classes),
    }


# ---------------------------------------------------------------------------
# Pure-JAX (XLA) reference, mirroring the kernels' bf16-operand / f32-accum
# precision on the MXU paths, for a like-for-like correctness check.
# ---------------------------------------------------------------------------
def ref_forward(x_nchw, p):
    hp = jax.lax.Precision.HIGHEST
    x = jnp.transpose(x_nchw, (0, 2, 3, 1))

    def conv(x, w, b, bf16):
        if bf16:
            x = x.astype(jnp.bfloat16)
            w = w.astype(jnp.bfloat16)
        y = jax.lax.conv_general_dilated(
            x, w, (1, 1), "SAME",
            dimension_numbers=("NHWC", "HWIO", "NHWC"),
            preferred_element_type=jnp.float32, precision=hp)
        return y + b

    def pool(x):
        return jax.lax.reduce_window(x, -jnp.inf, jax.lax.max,
                                     (1, 2, 2, 1), (1, 2, 2, 1), "VALID")

    def attn(x):
        avg = jnp.mean(x, -1, keepdims=True)
        mx = jnp.max(x, -1, keepdims=True)
        a = jax.nn.sigmoid(conv(jnp.concatenate([avg, mx], -1),
                                p["att_w"], p["att_b"], bf16=False))
        return x * a

    def bn(x, g, b):
        m = jnp.mean(x, axis=(0, 1, 2), keepdims=True)
        v = jnp.mean(x * x, axis=(0, 1, 2), keepdims=True) - m * m
        return (x - m) * jax.lax.rsqrt(v + 1e-5) * g + b

    def fc(a, w, b):
        return jnp.dot(a.astype(jnp.bfloat16), w.astype(jnp.bfloat16),
                       preferred_element_type=jnp.float32, precision=hp) + b

    x = jax.nn.relu(conv(x, p["w1"], p["b1"], bf16=False))
    x = pool(jax.nn.relu(conv(x, p["w2"], p["b2"], bf16=True)))
    x = bn(attn(x), p["g1"], p["beta1"])
    x = jax.nn.relu(conv(x, p["w3"], p["b3"], bf16=True))
    x = pool(jax.nn.relu(conv(x, p["w4"], p["b4"], bf16=True)))
    x = bn(attn(x), p["g2"], p["beta2"])
    n = x.shape[0]
    xf = jnp.transpose(x, (0, 3, 1, 2)).reshape(n, -1)
    h = jax.nn.relu(fc(xf, p["fc1_w"], p["fc1_b"]))
    return fc(h, p["fc2_w"], p["fc2_b"])


if __name__ == "__main__":
    key = jax.random.PRNGKey(0)
    kx, kp = jax.random.split(key)
    N, H, W = 2, 16, 16
    x = jax.random.normal(kx, (N, 1, H, W), jnp.float32)   # NCHW, like the torch module
    params = init_params(kp, H, W, num_classes=10)

    out = jax.block_until_ready(jax.jit(forward)(x, params))
    ref = jax.block_until_ready(jax.jit(ref_forward)(x, params))

    np.testing.assert_allclose(np.asarray(out), np.asarray(ref), rtol=2e-2, atol=2e-2)
    assert out.shape == (N, 10)
    print("KERNEL_OK")
</pallas_src>

<mosaic_0001>
module attributes {stable_mosaic.version = 11 : i64} {
  func.func @_conv3x3_kernel(%arg0: i32, %arg1: memref<1x18x18x1xf32, #tpu.memory_space<vmem>>, %arg2: memref<9x1x32xf32, #tpu.memory_space<vmem>>, %arg3: memref<1x32xf32, #tpu.memory_space<vmem>>, %arg4: memref<1x16x16x32xf32, #tpu.memory_space<vmem>>) attributes {dimension_semantics = [#tpu.dimension_semantics<parallel>], iteration_bounds = array<i64: 2>, scalar_prefetch = 0 : i64, scratch_operands = 0 : i64, tpu.core_type = #tpu.core_type<tc>, window_params = [{transform_indices = @transform_0, window_bounds = array<i64: 1, 18, 18, 1>}, {pipeline_mode = #tpu.pipeline_mode<synchronous>, transform_indices = @transform_1, window_bounds = array<i64: 9, 1, 32>}, {pipeline_mode = #tpu.pipeline_mode<synchronous>, transform_indices = @transform_2, window_bounds = array<i64: 1, 32>}, {transform_indices = @transform_3, window_bounds = array<i64: 1, 16, 16, 32>}]} {
    %cst = arith.constant 0.000000e+00 : f32
    %0 = vector.broadcast %cst : f32 to vector<256x32xf32>
    %c0 = arith.constant 0 : index
    %c0_0 = arith.constant 0 : index
    %c0_1 = arith.constant 0 : index
    %c0_2 = arith.constant 0 : index
    %1 = vector.load %arg1[%c0, %c0_0, %c0_1, %c0_2] : memref<1x18x18x1xf32, #tpu.memory_space<vmem>>, vector<1x16x16x1xf32>
    %2 = vector.shape_cast %1 : vector<1x16x16x1xf32> to vector<16x16x1xf32>
    %3 = vector.shape_cast %2 : vector<16x16x1xf32> to vector<256x1xf32>
    %c0_3 = arith.constant 0 : index
    %c0_4 = arith.constant 0 : index
    %c0_5 = arith.constant 0 : index
    %4 = vector.load %arg2[%c0_3, %c0_4, %c0_5] : memref<9x1x32xf32, #tpu.memory_space<vmem>>, vector<1x1x32xf32>
    %5 = vector.shape_cast %4 : vector<1x1x32xf32> to vector<1x32xf32>
    %6 = vector.broadcast %3 : vector<256x1xf32> to vector<256x32xf32>
    %7 = vector.broadcast %5 : vector<1x32xf32> to vector<256x32xf32>
    %8 = arith.mulf %6, %7 : vector<256x32xf32>
    %9 = arith.addf %0, %8 : vector<256x32xf32>
    %c0_6 = arith.constant 0 : index
    %c0_7 = arith.constant 0 : index
    %c1 = arith.constant 1 : index
    %c0_8 = arith.constant 0 : index
    %10 = vector.load %arg1[%c0_6, %c0_7, %c1, %c0_8] : memref<1x18x18x1xf32, #tpu.memory_space<vmem>>, vector<1x16x16x1xf32>
    %11 = vector.shape_cast %10 : vector<1x16x16x1xf32> to vector<16x16x1xf32>
    %12 = vector.shape_cast %11 : vector<16x16x1xf32> to vector<256x1xf32>
    %c1_9 = arith.constant 1 : index
    %c0_10 = arith.constant 0 : index
    %c0_11 = arith.constant 0 : index
    %13 = vector.load %arg2[%c1_9, %c0_10, %c0_11] : memref<9x1x32xf32, #tpu.memory_space<vmem>>, vector<1x1x32xf32>
    %14 = vector.shape_cast %13 : vector<1x1x32xf32> to vector<1x32xf32>
    %15 = vector.broadcast %12 : vector<256x1xf32> to vector<256x32xf32>
    %16 = vector.broadcast %14 : vector<1x32xf32> to vector<256x32xf32>
    %17 = arith.mulf %15, %16 : vector<256x32xf32>
    %18 = arith.addf %9, %17 : vector<256x32xf32>
    %c0_12 = arith.constant 0 : index
    %c0_13 = arith.constant 0 : index
    %c2 = arith.constant 2 : index
    %c0_14 = arith.constant 0 : index
    %19 = vector.load %arg1[%c0_12, %c0_13, %c2, %c0_14] : memref<1x18x18x1xf32, #tpu.memory_space<vmem>>, vector<1x16x16x1xf32>
    %20 = vector.shape_cast %19 : vector<1x16x16x1xf32> to vector<16x16x1xf32>
    %21 = vector.shape_cast %20 : vector<16x16x1xf32> to vector<256x1xf32>
    %c2_15 = arith.constant 2 : index
    %c0_16 = arith.constant 0 : index
    %c0_17 = arith.constant 0 : index
    %22 = vector.load %arg2[%c2_15, %c0_16, %c0_17] : memref<9x1x32xf32, #tpu.memory_space<vmem>>, vector<1x1x32xf32>
    %23 = vector.shape_cast %22 : vector<1x1x32xf32> to vector<1x32xf32>
    %24 = vector.broadcast %21 : vector<256x1xf32> to vector<256x32xf32>
    %25 = vector.broadcast %23 : vector<1x32xf32> to vector<256x32xf32>
    %26 = arith.mulf %24, %25 : vector<256x32xf32>
    %27 = arith.addf %18, %26 : vector<256x32xf32>
    %c0_18 = arith.constant 0 : index
    %c1_19 = arith.constant 1 : index
    %c0_20 = arith.constant 0 : index
    %c0_21 = arith.constant 0 : index
    %28 = vector.load %arg1[%c0_18, %c1_19, %c0_20, %c0_21] : memref<1x18x18x1xf32, #tpu.memory_space<vmem>>, vector<1x16x16x1xf32>
    %29 = vector.shape_cast %28 : vector<1x16x16x1xf32> to vector<16x16x1xf32>
    %30 = vector.shape_cast %29 : vector<16x16x1xf32> to vector<256x1xf32>
    %c3 = arith.constant 3 : index
    %c0_22 = arith.constant 0 : index
    %c0_23 = arith.constant 0 : index
    %31 = vector.load %arg2[%c3, %c0_22, %c0_23] : memref<9x1x32xf32, #tpu.memory_space<vmem>>, vector<1x1x32xf32>
    %32 = vector.shape_cast %31 : vector<1x1x32xf32> to vector<1x32xf32>
    %33 = vector.broadcast %30 : vector<256x1xf32> to vector<256x32xf32>
    %34 = vector.broadcast %32 : vector<1x32xf32> to vector<256x32xf32>
    %35 = arith.mulf %33, %34 : vector<256x32xf32>
    %36 = arith.addf %27, %35 : vector<256x32xf32>
    %c0_24 = arith.constant 0 : index
    %c1_25 = arith.constant 1 : index
    %c1_26 = arith.constant 1 : index
    %c0_27 = arith.constant 0 : index
    %37 = vector.load %arg1[%c0_24, %c1_25, %c1_26, %c0_27] : memref<1x18x18x1xf32, #tpu.memory_space<vmem>>, vector<1x16x16x1xf32>
    %38 = vector.shape_cast %37 : vector<1x16x16x1xf32> to vector<16x16x1xf32>
    %39 = vector.shape_cast %38 : vector<16x16x1xf32> to vector<256x1xf32>
    %c4 = arith.constant 4 : index
    %c0_28 = arith.constant 0 : index
    %c0_29 = arith.constant 0 : index
    %40 = vector.load %arg2[%c4, %c0_28, %c0_29] : memref<9x1x32xf32, #tpu.memory_space<vmem>>, vector<1x1x32xf32>
    %41 = vector.shape_cast %40 : vector<1x1x32xf32> to vector<1x32xf32>
    %42 = vector.broadcast %39 : vector<256x1xf32> to vector<256x32xf32>
    %43 = vector.broadcast %41 : vector<1x32xf32> to vector<256x32xf32>
    %44 = arith.mulf %42, %43 : vector<256x32xf32>
    %45 = arith.addf %36, %44 : vector<256x32xf32>
    %c0_30 = arith.constant 0 : index
    %c1_31 = arith.constant 1 : index
    %c2_32 = arith.constant 2 : index
    %c0_33 = arith.constant 0 : index
    %46 = vector.load %arg1[%c0_30, %c1_31, %c2_32, %c0_33] : memref<1x18x18x1xf32, #tpu.memory_space<vmem>>, vector<1x16x16x1xf32>
    %47 = vector.shape_cast %46 : vector<1x16x16x1xf32> to vector<16x16x1xf32>
    %48 = vector.shape_cast %47 : vector<16x16x1xf32> to vector<256x1xf32>
    %c5 = arith.constant 5 : index
    %c0_34 = arith.constant 0 : index
    %c0_35 = arith.constant 0 : index
    %49 = vector.load %arg2[%c5, %c0_34, %c0_35] : memref<9x1x32xf32, #tpu.memory_space<vmem>>, vector<1x1x32xf32>
    %50 = vector.shape_cast %49 : vector<1x1x32xf32> to vector<1x32xf32>
    %51 = vector.broadcast %48 : vector<256x1xf32> to vector<256x32xf32>
    %52 = vector.broadcast %50 : vector<1x32xf32> to vector<256x32xf32>
    %53 = arith.mulf %51, %52 : vector<256x32xf32>
    %54 = arith.addf %45, %53 : vector<256x32xf32>
    %c0_36 = arith.constant 0 : index
    %c2_37 = arith.constant 2 : index
    %c0_38 = arith.constant 0 : index
    %c0_39 = arith.constant 0 : index
    %55 = vector.load %arg1[%c0_36, %c2_37, %c0_38, %c0_39] : memref<1x18x18x1xf32, #tpu.memory_space<vmem>>, vector<1x16x16x1xf32>
    %56 = vector.shape_cast %55 : vector<1x16x16x1xf32> to vector<16x16x1xf32>
    %57 = vector.shape_cast %56 : vector<16x16x1xf32> to vector<256x1xf32>
    %c6 = arith.constant 6 : index
    %c0_40 = arith.constant 0 : index
    %c0_41 = arith.constant 0 : index
    %58 = vector.load %arg2[%c6, %c0_40, %c0_41] : memref<9x1x32xf32, #tpu.memory_space<vmem>>, vector<1x1x32xf32>
    %59 = vector.shape_cast %58 : vector<1x1x32xf32> to vector<1x32xf32>
    %60 = vector.broadcast %57 : vector<256x1xf32> to vector<256x32xf32>
    %61 = vector.broadcast %59 : vector<1x32xf32> to vector<256x32xf32>
    %62 = arith.mulf %60, %61 : vector<256x32xf32>
    %63 = arith.addf %54, %62 : vector<256x32xf32>
    %c0_42 = arith.constant 0 : index
    %c2_43 = arith.constant 2 : index
    %c1_44 = arith.constant 1 : index
    %c0_45 = arith.constant 0 : index
    %64 = vector.load %arg1[%c0_42, %c2_43, %c1_44, %c0_45] : memref<1x18x18x1xf32, #tpu.memory_space<vmem>>, vector<1x16x16x1xf32>
    %65 = vector.shape_cast %64 : vector<1x16x16x1xf32> to vector<16x16x1xf32>
    %66 = vector.shape_cast %65 : vector<16x16x1xf32> to vector<256x1xf32>
    %c7 = arith.constant 7 : index
    %c0_46 = arith.constant 0 : index
    %c0_47 = arith.constant 0 : index
    %67 = vector.load %arg2[%c7, %c0_46, %c0_47] : memref<9x1x32xf32, #tpu.memory_space<vmem>>, vector<1x1x32xf32>
    %68 = vector.shape_cast %67 : vector<1x1x32xf32> to vector<1x32xf32>
    %69 = vector.broadcast %66 : vector<256x1xf32> to vector<256x32xf32>
    %70 = vector.broadcast %68 : vector<1x32xf32> to vector<256x32xf32>
    %71 = arith.mulf %69, %70 : vector<256x32xf32>
    %72 = arith.addf %63, %71 : vector<256x32xf32>
    %c0_48 = arith.constant 0 : index
    %c2_49 = arith.constant 2 : index
    %c2_50 = arith.constant 2 : index
    %c0_51 = arith.constant 0 : index
    %73 = vector.load %arg1[%c0_48, %c2_49, %c2_50, %c0_51] : memref<1x18x18x1xf32, #tpu.memory_space<vmem>>, vector<1x16x16x1xf32>
    %74 = vector.shape_cast %73 : vector<1x16x16x1xf32> to vector<16x16x1xf32>
    %75 = vector.shape_cast %74 : vector<16x16x1xf32> to vector<256x1xf32>
    %c8 = arith.constant 8 : index
    %c0_52 = arith.constant 0 : index
    %c0_53 = arith.constant 0 : index
    %76 = vector.load %arg2[%c8, %c0_52, %c0_53] : memref<9x1x32xf32, #tpu.memory_space<vmem>>, vector<1x1x32xf32>
    %77 = vector.shape_cast %76 : vector<1x1x32xf32> to vector<1x32xf32>
    %78 = vector.broadcast %75 : vector<256x1xf32> to vector<256x32xf32>
    %79 = vector.broadcast %77 : vector<1x32xf32> to vector<256x32xf32>
    %80 = arith.mulf %78, %79 : vector<256x32xf32>
    %81 = arith.addf %72, %80 : vector<256x32xf32>
    %c0_54 = arith.constant 0 : index
    %c0_55 = arith.constant 0 : index
    %82 = vector.load %arg3[%c0_54, %c0_55] : memref<1x32xf32, #tpu.memory_space<vmem>>, vector<1x32xf32>
    %83 = vector.broadcast %82 : vector<1x32xf32> to vector<256x32xf32>
    %84 = arith.addf %81, %83 : vector<256x32xf32>
    %cst_56 = arith.constant 0.000000e+00 : f32
    %85 = vector.broadcast %cst_56 : f32 to vector<256x32xf32>
    %86 = arith.maximumf %84, %85 : vector<256x32xf32>
    %87 = vector.shape_cast %86 : vector<256x32xf32> to vector<16x16x32xf32>
    %c0_57 = arith.constant 0 : index
    %c0_58 = arith.constant 0 : index
    %c0_59 = arith.constant 0 : index
    %c0_60 = arith.constant 0 : index
    %88 = vector.load %arg4[%c0_57, %c0_58, %c0_59, %c0_60] : memref<1x16x16x32xf32, #tpu.memory_space<vmem>>, vector<1x16x16x32xf32>
    %89 = vector.shape_cast %88 : vector<1x16x16x32xf32> to vector<16x16x32xf32>
    %90 = vector.shape_cast %87 : vector<16x16x32xf32> to vector<1x16x16x32xf32>
    tpu.vector_store %arg4[%c0_57, %c0_58, %c0_59, %c0_60], %90 {strides = array<i32>} : memref<1x16x16x32xf32, #tpu.memory_space<vmem>>, vector<1x16x16x32xf32>,
    return
  }
  func.func @transform_0(%arg0: i32) -> (i32, i32, i32, i32) {
    %c0_i32 = arith.constant 0 : i32
    %c0_i32_0 = arith.constant 0 : i32
    %c0_i32_1 = arith.constant 0 : i32
    %c0_i32_2 = arith.constant 0 : i32
    return %arg0, %c0_i32, %c0_i32_0, %c0_i32_1 : i32, i32, i32, i32
  }
  func.func @transform_1(%arg0: i32) -> (i32, i32, i32) {
    %c0_i32 = arith.constant 0 : i32
    %c0_i32_0 = arith.constant 0 : i32
    %c0_i32_1 = arith.constant 0 : i32
    %c0_i32_2 = arith.constant 0 : i32
    return %c0_i32, %c0_i32_0, %c0_i32_1 : i32, i32, i32
  }
  func.func @transform_2(%arg0: i32) -> (i32, i32) {
    %c0_i32 = arith.constant 0 : i32
    %c0_i32_0 = arith.constant 0 : i32
    %c0_i32_1 = arith.constant 0 : i32
    return %c0_i32, %c0_i32_0 : i32, i32
  }
  func.func @transform_3(%arg0: i32) -> (i32, i32, i32, i32) {
    %c0_i32 = arith.constant 0 : i32
    %c0_i32_0 = arith.constant 0 : i32
    %c0_i32_1 = arith.constant 0 : i32
    %c0_i32_2 = arith.constant 0 : i32
    return %arg0, %c0_i32, %c0_i32_0, %c0_i32_1 : i32, i32, i32, i32
  }
}

module attributes {stable_mosaic.version = 11 : i64} {
  func.func @_conv3x3_kernel(%arg0: i32, %arg1: memref<1x18x18x32xf32, #tpu.memory_space<vmem>>, %arg2: memref<9x32x64xbf16, #tpu.memory_space<vmem>>, %arg3: memref<1x64xf32, #tpu.memory_space<vmem>>, %arg4: memref<1x16x16x64xf32, #tpu.memory_space<vmem>>) attributes {dimension_semantics = [#tpu.dimension_semantics<parallel>], iteration_bounds = array<i64: 2>, scalar_prefetch = 0 : i64, scratch_operands = 0 : i64, tpu.core_type = #tpu.core_type<tc>, window_params = [{transform_indices = @transform_0, window_bounds = array<i64: 1, 18, 18, 32>}, {pipeline_mode = #tpu.pipeline_mode<synchronous>, transform_indices = @transform_1, window_bounds = array<i64: 9, 32, 64>}, {pipeline_mode = #tpu.pipeline_mode<synchronous>, transform_indices = @transform_2, window_bounds = array<i64: 1, 64>}, {transform_indices = @transform_3, window_bounds = array<i64: 1, 16, 16, 64>}]} {
    %cst = arith.constant 0.000000e+00 : f32
    %0 = vector.broadcast %cst : f32 to vector<256x64xf32>
    %c0 = arith.constant 0 : index
    %c0_0 = arith.constant 0 : index
    %c0_1 = arith.constant 0 : index
    %c0_2 = arith.constant 0 : index
    %1 = vector.load %arg1[%c0, %c0_0, %c0_1, %c0_2] : memref<1x18x18x32xf32, #tpu.memory_space<vmem>>, vector<1x16x16x32xf32>
    %2 = vector.shape_cast %1 : vector<1x16x16x32xf32> to vector<16x16x32xf32>
    %3 = vector.shape_cast %2 : vector<16x16x32xf32> to vector<256x32xf32>
    %4 = arith.truncf %3 : vector<256x32xf32> to vector<256x32xbf16>
    %c0_3 = arith.constant 0 : index
    %c0_4 = arith.constant 0 : index
    %c0_5 = arith.constant 0 : index
    %5 = vector.load %arg2[%c0_3, %c0_4, %c0_5] : memref<9x32x64xbf16, #tpu.memory_space<vmem>>, vector<1x32x64xbf16>
    %6 = vector.shape_cast %5 : vector<1x32x64xbf16> to vector<32x64xbf16>
    %cst_6 = arith.constant dense<0.000000e+00> : vector<256x64xf32>
    %7 = tpu.matmul %4, %6, %cst_6 {dimension_numbers = #tpu.dot_dimension_numbers<[1], [0], [0], [1], [0, 0, 1, 1], [], []>} : vector<256x32xbf16>, vector<32x64xbf16>, vector<256x64xf32> -> vector<256x64xf32>
    %8 = arith.addf %0, %7 : vector<256x64xf32>
    %c0_7 = arith.constant 0 : index
    %c0_8 = arith.constant 0 : index
    %c1 = arith.constant 1 : index
    %c0_9 = arith.constant 0 : index
    %9 = vector.load %arg1[%c0_7, %c0_8, %c1, %c0_9] : memref<1x18x18x32xf32, #tpu.memory_space<vmem>>, vector<1x16x16x32xf32>
    %10 = vector.shape_cast %9 : vector<1x16x16x32xf32> to vector<16x16x32xf32>
    %11 = vector.shape_cast %10 : vector<16x16x32xf32> to vector<256x32xf32>
    %12 = arith.truncf %11 : vector<256x32xf32> to vector<256x32xbf16>
    %c1_10 = arith.constant 1 : index
    %c0_11 = arith.constant 0 : index
    %c0_12 = arith.constant 0 : index
    %13 = vector.load %arg2[%c1_10, %c0_11, %c0_12] : memref<9x32x64xbf16, #tpu.memory_space<vmem>>, vector<1x32x64xbf16>
    %14 = vector.shape_cast %13 : vector<1x32x64xbf16> to vector<32x64xbf16>
    %cst_13 = arith.constant dense<0.000000e+00> : vector<256x64xf32>
    %15 = tpu.matmul %12, %14, %cst_13 {dimension_numbers = #tpu.dot_dimension_numbers<[1], [0], [0], [1], [0, 0, 1, 1], [], []>} : vector<256x32xbf16>, vector<32x64xbf16>, vector<256x64xf32> -> vector<256x64xf32>
    %16 = arith.addf %8, %15 : vector<256x64xf32>
    %c0_14 = arith.constant 0 : index
    %c0_15 = arith.constant 0 : index
    %c2 = arith.constant 2 : index
    %c0_16 = arith.constant 0 : index
    %17 = vector.load %arg1[%c0_14, %c0_15, %c2, %c0_16] : memref<1x18x18x32xf32, #tpu.memory_space<vmem>>, vector<1x16x16x32xf32>
    %18 = vector.shape_cast %17 : vector<1x16x16x32xf32> to vector<16x16x32xf32>
    %19 = vector.shape_cast %18 : vector<16x16x32xf32> to vector<256x32xf32>
    %20 = arith.truncf %19 : vector<256x32xf32> to vector<256x32xbf16>
    %c2_17 = arith.constant 2 : index
    %c0_18 = arith.constant 0 : index
    %c0_19 = arith.constant 0 : index
    %21 = vector.load %arg2[%c2_17, %c0_18, %c0_19] : memref<9x32x64xbf16, #tpu.memory_space<vmem>>, vector<1x32x64xbf16>
    %22 = vector.shape_cast %21 : vector<1x32x64xbf16> to vector<32x64xbf16>
    %cst_20 = arith.constant dense<0.000000e+00> : vector<256x64xf32>
    %23 = tpu.matmul %20, %22, %cst_20 {dimension_numbers = #tpu.dot_dimension_numbers<[1], [0], [0], [1], [0, 0, 1, 1], [], []>} : vector<256x32xbf16>, vector<32x64xbf16>, vector<256x64xf32> -> vector<256x64xf32>
    %24 = arith.addf %16, %23 : vector<256x64xf32>
    %c0_21 = arith.constant 0 : index
    %c1_22 = arith.constant 1 : index
    %c0_23 = arith.constant 0 : index
    %c0_24 = arith.constant 0 : index
    %25 = vector.load %arg1[%c0_21, %c1_22, %c0_23, %c0_24] : memref<1x18x18x32xf32, #tpu.memory_space<vmem>>, vector<1x16x16x32xf32>
    %26 = vector.shape_cast %25 : vector<1x16x16x32xf32> to vector<16x16x32xf32>
    %27 = vector.shape_cast %26 : vector<16x16x32xf32> to vector<256x32xf32>
    %28 = arith.truncf %27 : vector<256x32xf32> to vector<256x32xbf16>
    %c3 = arith.constant 3 : index
    %c0_25 = arith.constant 0 : index
    %c0_26 = arith.constant 0 : index
    %29 = vector.load %arg2[%c3, %c0_25, %c0_26] : memref<9x32x64xbf16, #tpu.memory_space<vmem>>, vector<1x32x64xbf16>
    %30 = vector.shape_cast %29 : vector<1x32x64xbf16> to vector<32x64xbf16>
    %cst_27 = arith.constant dense<0.000000e+00> : vector<256x64xf32>
    %31 = tpu.matmul %28, %30, %cst_27 {dimension_numbers = #tpu.dot_dimension_numbers<[1], [0], [0], [1], [0, 0, 1, 1], [], []>} : vector<256x32xbf16>, vector<32x64xbf16>, vector<256x64xf32> -> vector<256x64xf32>
    %32 = arith.addf %24, %31 : vector<256x64xf32>
    %c0_28 = arith.constant 0 : index
    %c1_29 = arith.constant 1 : index
    %c1_30 = arith.constant 1 : index
    %c0_31 = arith.constant 0 : index
    %33 = vector.load %arg1[%c0_28, %c1_29, %c1_30, %c0_31] : memref<1x18x18x32xf32, #tpu.memory_space<vmem>>, vector<1x16x16x32xf32>
    %34 = vector.shape_cast %33 : vector<1x16x16x32xf32> to vector<16x16x32xf32>
    %35 = vector.shape_cast %34 : vector<16x16x32xf32> to vector<256x32xf32>
    %36 = arith.truncf %35 : vector<256x32xf32> to vector<256x32xbf16>
    %c4 = arith.constant 4 : index
    %c0_32 = arith.constant 0 : index
    %c0_33 = arith.constant 0 : index
    %37 = vector.load %arg2[%c4, %c0_32, %c0_33] : memref<9x32x64xbf16, #tpu.memory_space<vmem>>, vector<1x32x64xbf16>
    %38 = vector.shape_cast %37 : vector<1x32x64xbf16> to vector<32x64xbf16>
    %cst_34 = arith.constant dense<0.000000e+00> : vector<256x64xf32>
    %39 = tpu.matmul %36, %38, %cst_34 {dimension_numbers = #tpu.dot_dimension_numbers<[1], [0], [0], [1], [0, 0, 1, 1], [], []>} : vector<256x32xbf16>, vector<32x64xbf16>, vector<256x64xf32> -> vector<256x64xf32>
    %40 = arith.addf %32, %39 : vector<256x64xf32>
    %c0_35 = arith.constant 0 : index
    %c1_36 = arith.constant 1 : index
    %c2_37 = arith.constant 2 : index
    %c0_38 = arith.constant 0 : index
    %41 = vector.load %arg1[%c0_35, %c1_36, %c2_37, %c0_38] : memref<1x18x18x32xf32, #tpu.memory_space<vmem>>, vector<1x16x16x32xf32>
    %42 = vector.shape_cast %41 : vector<1x16x16x32xf32> to vector<16x16x32xf32>
    %43 = vector.shape_cast %42 : vector<16x16x32xf32> to vector<256x32xf32>
    %44 = arith.truncf %43 : vector<256x32xf32> to vector<256x32xbf16>
    %c5 = arith.constant 5 : index
    %c0_39 = arith.constant 0 : index
    %c0_40 = arith.constant 0 : index
    %45 = vector.load %arg2[%c5, %c0_39, %c0_40] : memref<9x32x64xbf16, #tpu.memory_space<vmem>>, vector<1x32x64xbf16>
    %46 = vector.shape_cast %45 : vector<1x32x64xbf16> to vector<32x64xbf16>
    %cst_41 = arith.constant dense<0.000000e+00> : vector<256x64xf32>
    %47 = tpu.matmul %44, %46, %cst_41 {dimension_numbers = #tpu.dot_dimension_numbers<[1], [0], [0], [1], [0, 0, 1, 1], [], []>} : vector<256x32xbf16>, vector<32x64xbf16>, vector<256x64xf32> -> vector<256x64xf32>
    %48 = arith.addf %40, %47 : vector<256x64xf32>
    %c0_42 = arith.constant 0 : index
    %c2_43 = arith.constant 2 : index
    %c0_44 = arith.constant 0 : index
    %c0_45 = arith.constant 0 : index
    %49 = vector.load %arg1[%c0_42, %c2_43, %c0_44, %c0_45] : memref<1x18x18x32xf32, #tpu.memory_space<vmem>>, vector<1x16x16x32xf32>
    %50 = vector.shape_cast %49 : vector<1x16x16x32xf32> to vector<16x16x32xf32>
    %51 = vector.shape_cast %50 : vector<16x16x32xf32> to vector<256x32xf32>
    %52 = arith.truncf %51 : vector<256x32xf32> to vector<256x32xbf16>
    %c6 = arith.constant 6 : index
    %c0_46 = arith.constant 0 : index
    %c0_47 = arith.constant 0 : index
    %53 = vector.load %arg2[%c6, %c0_46, %c0_47] : memref<9x32x64xbf16, #tpu.memory_space<vmem>>, vector<1x32x64xbf16>
    %54 = vector.shape_cast %53 : vector<1x32x64xbf16> to vector<32x64xbf16>
    %cst_48 = arith.constant dense<0.000000e+00> : vector<256x64xf32>
    %55 = tpu.matmul %52, %54, %cst_48 {dimension_numbers = #tpu.dot_dimension_numbers<[1], [0], [0], [1], [0, 0, 1, 1], [], []>} : vector<256x32xbf16>, vector<32x64xbf16>, vector<256x64xf32> -> vector<256x64xf32>
    %56 = arith.addf %48, %55 : vector<256x64xf32>
    %c0_49 = arith.constant 0 : index
    %c2_50 = arith.constant 2 : index
    %c1_51 = arith.constant 1 : index
    %c0_52 = arith.constant 0 : index
    %57 = vector.load %arg1[%c0_49, %c2_50, %c1_51, %c0_52] : memref<1x18x18x32xf32, #tpu.memory_space<vmem>>, vector<1x16x16x32xf32>
    %58 = vector.shape_cast %57 : vector<1x16x16x32xf32> to vector<16x16x32xf32>
    %59 = vector.shape_cast %58 : vector<16x16x32xf32> to vector<256x32xf32>
    %60 = arith.truncf %59 : vector<256x32xf32> to vector<256x32xbf16>
    %c7 = arith.constant 7 : index
    %c0_53 = arith.constant 0 : index
    %c0_54 = arith.constant 0 : index
    %61 = vector.load %arg2[%c7, %c0_53, %c0_54] : memref<9x32x64xbf16, #tpu.memory_space<vmem>>, vector<1x32x64xbf16>
    %62 = vector.shape_cast %61 : vector<1x32x64xbf16> to vector<32x64xbf16>
    %cst_55 = arith.constant dense<0.000000e+00> : vector<256x64xf32>
    %63 = tpu.matmul %60, %62, %cst_55 {dimension_numbers = #tpu.dot_dimension_numbers<[1], [0], [0], [1], [0, 0, 1, 1], [], []>} : vector<256x32xbf16>, vector<32x64xbf16>, vector<256x64xf32> -> vector<256x64xf32>
    %64 = arith.addf %56, %63 : vector<256x64xf32>
    %c0_56 = arith.constant 0 : index
    %c2_57 = arith.constant 2 : index
    %c2_58 = arith.constant 2 : index
    %c0_59 = arith.constant 0 : index
    %65 = vector.load %arg1[%c0_56, %c2_57, %c2_58, %c0_59] : memref<1x18x18x32xf32, #tpu.memory_space<vmem>>, vector<1x16x16x32xf32>
    %66 = vector.shape_cast %65 : vector<1x16x16x32xf32> to vector<16x16x32xf32>
    %67 = vector.shape_cast %66 : vector<16x16x32xf32> to vector<256x32xf32>
    %68 = arith.truncf %67 : vector<256x32xf32> to vector<256x32xbf16>
    %c8 = arith.constant 8 : index
    %c0_60 = arith.constant 0 : index
    %c0_61 = arith.constant 0 : index
    %69 = vector.load %arg2[%c8, %c0_60, %c0_61] : memref<9x32x64xbf16, #tpu.memory_space<vmem>>, vector<1x32x64xbf16>
    %70 = vector.shape_cast %69 : vector<1x32x64xbf16> to vector<32x64xbf16>
    %cst_62 = arith.constant dense<0.000000e+00> : vector<256x64xf32>
    %71 = tpu.matmul %68, %70, %cst_62 {dimension_numbers = #tpu.dot_dimension_numbers<[1], [0], [0], [1], [0, 0, 1, 1], [], []>} : vector<256x32xbf16>, vector<32x64xbf16>, vector<256x64xf32> -> vector<256x64xf32>
    %72 = arith.addf %64, %71 : vector<256x64xf32>
    %c0_63 = arith.constant 0 : index
    %c0_64 = arith.constant 0 : index
    %73 = vector.load %arg3[%c0_63, %c0_64] : memref<1x64xf32, #tpu.memory_space<vmem>>, vector<1x64xf32>
    %74 = vector.broadcast %73 : vector<1x64xf32> to vector<256x64xf32>
    %75 = arith.addf %72, %74 : vector<256x64xf32>
    %cst_65 = arith.constant 0.000000e+00 : f32
    %76 = vector.broadcast %cst_65 : f32 to vector<256x64xf32>
    %77 = arith.maximumf %75, %76 : vector<256x64xf32>
    %78 = vector.shape_cast %77 : vector<256x64xf32> to vector<16x16x64xf32>
    %c0_66 = arith.constant 0 : index
    %c0_67 = arith.constant 0 : index
    %c0_68 = arith.constant 0 : index
    %c0_69 = arith.constant 0 : index
    %79 = vector.load %arg4[%c0_66, %c0_67, %c0_68, %c0_69] : memref<1x16x16x64xf32, #tpu.memory_space<vmem>>, vector<1x16x16x64xf32>
    %80 = vector.shape_cast %79 : vector<1x16x16x64xf32> to vector<16x16x64xf32>
    %81 = vector.shape_cast %78 : vector<16x16x64xf32> to vector<1x16x16x64xf32>
    tpu.vector_store %arg4[%c0_66, %c0_67, %c0_68, %c0_69], %81 {strides = array<i32>} : memref<1x16x16x64xf32, #tpu.memory_space<vmem>>, vector<1x16x16x64xf32>,
    return
  }
  func.func @transform_0(%arg0: i32) -> (i32, i32, i32, i32) {
    %c0_i32 = arith.constant 0 : i32
    %c0_i32_0 = arith.constant 0 : i32
    %c0_i32_1 = arith.constant 0 : i32
    %c0_i32_2 = arith.constant 0 : i32
    return %arg0, %c0_i32, %c0_i32_0, %c0_i32_1 : i32, i32, i32, i32
  }
  func.func @transform_1(%arg0: i32) -> (i32, i32, i32) {
    %c0_i32 = arith.constant 0 : i32
    %c0_i32_0 = arith.constant 0 : i32
    %c0_i32_1 = arith.constant 0 : i32
    %c0_i32_2 = arith.constant 0 : i32
    return %c0_i32, %c0_i32_0, %c0_i32_1 : i32, i32, i32
  }
  func.func @transform_2(%arg0: i32) -> (i32, i32) {
    %c0_i32 = arith.constant 0 : i32
    %c0_i32_0 = arith.constant 0 : i32
    %c0_i32_1 = arith.constant 0 : i32
    return %c0_i32, %c0_i32_0 : i32, i32
  }
  func.func @transform_3(%arg0: i32) -> (i32, i32, i32, i32) {
    %c0_i32 = arith.constant 0 : i32
    %c0_i32_0 = arith.constant 0 : i32
    %c0_i32_1 = arith.constant 0 : i32
    %c0_i32_2 = arith.constant 0 : i32
    return %arg0, %c0_i32, %c0_i32_0, %c0_i32_1 : i32, i32, i32, i32
  }
}

module attributes {stable_mosaic.version = 11 : i64} {
  func.func @_maxpool_kernel(%arg0: i32, %arg1: i32, %arg2: memref<1x16x8x128xf32, #tpu.memory_space<vmem>>, %arg3: memref<1x8x8x64xf32, #tpu.memory_space<vmem>>) attributes {dimension_semantics = [#tpu.dimension_semantics<parallel>, #tpu.dimension_semantics<parallel>], iteration_bounds = array<i64: 2, 1>, scalar_prefetch = 0 : i64, scratch_operands = 0 : i64, tpu.core_type = #tpu.core_type<tc>, window_params = [{transform_indices = @transform_0, window_bounds = array<i64: 1, 16, 8, 128>}, {transform_indices = @transform_1, window_bounds = array<i64: 1, 8, 8, 64>}]} {
    %c0 = arith.constant 0 : index
    %c0_0 = arith.constant 0 : index
    %c0_1 = arith.constant 0 : index
    %c0_2 = arith.constant 0 : index
    %0 = vector.load %arg2[%c0, %c0_0, %c0_1, %c0_2] : memref<1x16x8x128xf32, #tpu.memory_space<vmem>>, vector<1x16x8x128xf32>
    %1 = vector.shape_cast %0 : vector<1x16x8x128xf32> to vector<16x8x128xf32>
    %2 = vector.shape_cast %1 : vector<16x8x128xf32> to vector<8x2x8x128xf32>
    %cst = arith.constant dense<0xFF800000> : vector<8x8x128xf32>
    %3 = vector.multi_reduction <maximumf>, %2, %cst [1] : vector<8x2x8x128xf32> to vector<8x8x128xf32>
    %4 = vector.extract_strided_slice %3 {offsets = [0, 0, 0], sizes = [8, 8, 64], strides = [1, 1, 1]} : vector<8x8x128xf32> to vector<8x8x64xf32>
    %5 = vector.extract_strided_slice %3 {offsets = [0, 0, 64], sizes = [8, 8, 64], strides = [1, 1, 1]} : vector<8x8x128xf32> to vector<8x8x64xf32>
    %6 = arith.maximumf %4, %5 : vector<8x8x64xf32>
    %c0_3 = arith.constant 0 : index
    %c0_4 = arith.constant 0 : index
    %c0_5 = arith.constant 0 : index
    %c0_6 = arith.constant 0 : index
    %7 = vector.load %arg3[%c0_3, %c0_4, %c0_5, %c0_6] : memref<1x8x8x64xf32, #tpu.memory_space<vmem>>, vector<1x8x8x64xf32>
    %8 = vector.shape_cast %7 : vector<1x8x8x64xf32> to vector<8x8x64xf32>
    %9 = vector.shape_cast %6 : vector<8x8x64xf32> to vector<1x8x8x64xf32>
    tpu.vector_store %arg3[%c0_3, %c0_4, %c0_5, %c0_6], %9 {strides = array<i32>} : memref<1x8x8x64xf32, #tpu.memory_space<vmem>>, vector<1x8x8x64xf32>,
    return
  }
  func.func @transform_0(%arg0: i32, %arg1: i32) -> (i32, i32, i32, i32) {
    %c0_i32 = arith.constant 0 : i32
    %c0_i32_0 = arith.constant 0 : i32
    %c0_i32_1 = arith.constant 0 : i32
    return %arg0, %arg1, %c0_i32, %c0_i32_0 : i32, i32, i32, i32
  }
  func.func @transform_1(%arg0: i32, %arg1: i32) -> (i32, i32, i32, i32) {
    %c0_i32 = arith.constant 0 : i32
    %c0_i32_0 = arith.constant 0 : i32
    %c0_i32_1 = arith.constant 0 : i32
    return %arg0, %arg1, %c0_i32, %c0_i32_0 : i32, i32, i32, i32
  }
}

module attributes {stable_mosaic.version = 11 : i64} {
  func.func @_spatial_attn_kernel(%arg0: i32, %arg1: memref<1x8x8x64xf32, #tpu.memory_space<vmem>>, %arg2: memref<18xf32, #tpu.memory_space<smem>>, %arg3: memref<1xf32, #tpu.memory_space<smem>>, %arg4: memref<1x8x8x64xf32, #tpu.memory_space<vmem>>, %arg5: memref<10x10xf32, #tpu.memory_space<vmem>>, %arg6: memref<10x10xf32, #tpu.memory_space<vmem>>) attributes {dimension_semantics = [#tpu.dimension_semantics<parallel>], iteration_bounds = array<i64: 2>, scalar_prefetch = 0 : i64, scratch_operands = 2 : i64, tpu.core_type = #tpu.core_type<tc>, window_params = [{transform_indices = @transform_0, window_bounds = array<i64: 1, 8, 8, 64>}, {transform_indices = @transform_1, window_bounds = array<i64: 18>}, {transform_indices = @transform_2, window_bounds = array<i64: 1>}, {transform_indices = @transform_3, window_bounds = array<i64: 1, 8, 8, 64>}]} {
    %c0 = arith.constant 0 : index
    %c0_0 = arith.constant 0 : index
    %c0_1 = arith.constant 0 : index
    %c0_2 = arith.constant 0 : index
    %0 = vector.load %arg1[%c0, %c0_0, %c0_1, %c0_2] : memref<1x8x8x64xf32, #tpu.memory_space<vmem>>, vector<1x8x8x64xf32>
    %1 = vector.shape_cast %0 : vector<1x8x8x64xf32> to vector<8x8x64xf32>
    %cst = arith.constant 0.000000e+00 : f32
    %2 = vector.broadcast %cst : f32 to vector<10x10xf32>
    %c0_3 = arith.constant 0 : index
    %c0_4 = arith.constant 0 : index
    %3 = vector.load %arg5[%c0_3, %c0_4] : memref<10x10xf32, #tpu.memory_space<vmem>>, vector<10x10xf32>
    tpu.vector_store %arg5[%c0_3, %c0_4], %2 {strides = array<i32>} : memref<10x10xf32, #tpu.memory_space<vmem>>, vector<10x10xf32>,
    %cst_5 = arith.constant 0.000000e+00 : f32
    %4 = vector.broadcast %cst_5 : f32 to vector<10x10xf32>
    %c0_6 = arith.constant 0 : index
    %c0_7 = arith.constant 0 : index
    %5 = vector.load %arg6[%c0_6, %c0_7] : memref<10x10xf32, #tpu.memory_space<vmem>>, vector<10x10xf32>
    tpu.vector_store %arg6[%c0_6, %c0_7], %4 {strides = array<i32>} : memref<10x10xf32, #tpu.memory_space<vmem>>, vector<10x10xf32>,
    %cst_8 = arith.constant dense<0.000000e+00> : vector<8x8xf32>
    %6 = vector.multi_reduction <add>, %1, %cst_8 [2] : vector<8x8x64xf32> to vector<8x8xf32>
    %cst_9 = arith.constant 6.400000e+01 : f32
    %7 = vector.broadcast %cst_9 : f32 to vector<8x8xf32>
    %8 = arith.divf %6, %7 : vector<8x8xf32>
    %c1 = arith.constant 1 : index
    %c1_10 = arith.constant 1 : index
    %9 = vector.load %arg5[%c1, %c1_10] : memref<10x10xf32, #tpu.memory_space<vmem>>, vector<8x8xf32>
    tpu.vector_store %arg5[%c1, %c1_10], %8 {strides = array<i32>} : memref<10x10xf32, #tpu.memory_space<vmem>>, vector<8x8xf32>,
    %cst_11 = arith.constant dense<0xFF800000> : vector<8x8xf32>
    %10 = vector.multi_reduction <maximumf>, %1, %cst_11 [2] : vector<8x8x64xf32> to vector<8x8xf32>
    %c1_12 = arith.constant 1 : index
    %c1_13 = arith.constant 1 : index
    %11 = vector.load %arg6[%c1_12, %c1_13] : memref<10x10xf32, #tpu.memory_space<vmem>>, vector<8x8xf32>
    tpu.vector_store %arg6[%c1_12, %c1_13], %10 {strides = array<i32>} : memref<10x10xf32, #tpu.memory_space<vmem>>, vector<8x8xf32>,
    %cst_14 = arith.constant 0.000000e+00 : f32
    %12 = vector.broadcast %cst_14 : f32 to vector<8x8xf32>
    %c0_15 = arith.constant 0 : index
    %13 = memref.load %arg3[%c0_15] : memref<1xf32, #tpu.memory_space<smem>>
    %14 = vector.broadcast %13 : f32 to vector<8x8xf32>
    %15 = arith.addf %12, %14 : vector<8x8xf32>
    %c0_16 = arith.constant 0 : index
    %16 = memref.load %arg2[%c0_16] : memref<18xf32, #tpu.memory_space<smem>>
    %c0_17 = arith.constant 0 : index
    %c0_18 = arith.constant 0 : index
    %17 = vector.load %arg5[%c0_17, %c0_18] : memref<10x10xf32, #tpu.memory_space<vmem>>, vector<8x8xf32>
    %18 = vector.broadcast %16 : f32 to vector<8x8xf32>
    %19 = arith.mulf %18, %17 : vector<8x8xf32>
    %20 = arith.addf %15, %19 : vector<8x8xf32>
    %c9 = arith.constant 9 : index
    %21 = memref.load %arg2[%c9] : memref<18xf32, #tpu.memory_space<smem>>
    %c0_19 = arith.constant 0 : index
    %c0_20 = arith.constant 0 : index
    %22 = vector.load %arg6[%c0_19, %c0_20] : memref<10x10xf32, #tpu.memory_space<vmem>>, vector<8x8xf32>
    %23 = vector.broadcast %21 : f32 to vector<8x8xf32>
    %24 = arith.mulf %23, %22 : vector<8x8xf32>
    %25 = arith.addf %20, %24 : vector<8x8xf32>
    %c1_21 = arith.constant 1 : index
    %26 = memref.load %arg2[%c1_21] : memref<18xf32, #tpu.memory_space<smem>>
    %c0_22 = arith.constant 0 : index
    %c1_23 = arith.constant 1 : index
    %27 = vector.load %arg5[%c0_22, %c1_23] : memref<10x10xf32, #tpu.memory_space<vmem>>, vector<8x8xf32>
    %28 = vector.broadcast %26 : f32 to vector<8x8xf32>
    %29 = arith.mulf %28, %27 : vector<8x8xf32>
    %30 = arith.addf %25, %29 : vector<8x8xf32>
    %c10 = arith.constant 10 : index
    %31 = memref.load %arg2[%c10] : memref<18xf32, #tpu.memory_space<smem>>
    %c0_24 = arith.constant 0 : index
    %c1_25 = arith.constant 1 : index
    %32 = vector.load %arg6[%c0_24, %c1_25] : memref<10x10xf32, #tpu.memory_space<vmem>>, vector<8x8xf32>
    %33 = vector.broadcast %31 : f32 to vector<8x8xf32>
    %34 = arith.mulf %33, %32 : vector<8x8xf32>
    %35 = arith.addf %30, %34 : vector<8x8xf32>
    %c2 = arith.constant 2 : index
    %36 = memref.load %arg2[%c2] : memref<18xf32, #tpu.memory_space<smem>>
    %c0_26 = arith.constant 0 : index
    %c2_27 = arith.constant 2 : index
    %37 = vector.load %arg5[%c0_26, %c2_27] : memref<10x10xf32, #tpu.memory_space<vmem>>, vector<8x8xf32>
    %38 = vector.broadcast %36 : f32 to vector<8x8xf32>
    %39 = arith.mulf %38, %37 : vector<8x8xf32>
    %40 = arith.addf %35, %39 : vector<8x8xf32>
    %c11 = arith.constant 11 : index
    %41 = memref.load %arg2[%c11] : memref<18xf32, #tpu.memory_space<smem>>
    %c0_28 = arith.constant 0 : index
    %c2_29 = arith.constant 2 : index
    %42 = vector.load %arg6[%c0_28, %c2_29] : memref<10x10xf32, #tpu.memory_space<vmem>>, vector<8x8xf32>
    %43 = vector.broadcast %41 : f32 to vector<8x8xf32>
    %44 = arith.mulf %43, %42 : vector<8x8xf32>
    %45 = arith.addf %40, %44 : vector<8x8xf32>
    %c3 = arith.constant 3 : index
    %46 = memref.load %arg2[%c3] : memref<18xf32, #tpu.memory_space<smem>>
    %c1_30 = arith.constant 1 : index
    %c0_31 = arith.constant 0 : index
    %47 = vector.load %arg5[%c1_30, %c0_31] : memref<10x10xf32, #tpu.memory_space<vmem>>, vector<8x8xf32>
    %48 = vector.broadcast %46 : f32 to vector<8x8xf32>
    %49 = arith.mulf %48, %47 : vector<8x8xf32>
    %50 = arith.addf %45, %49 : vector<8x8xf32>
    %c12 = arith.constant 12 : index
    %51 = memref.load %arg2[%c12] : memref<18xf32, #tpu.memory_space<smem>>
    %c1_32 = arith.constant 1 : index
    %c0_33 = arith.constant 0 : index
    %52 = vector.load %arg6[%c1_32, %c0_33] : memref<10x10xf32, #tpu.memory_space<vmem>>, vector<8x8xf32>
    %53 = vector.broadcast %51 : f32 to vector<8x8xf32>
    %54 = arith.mulf %53, %52 : vector<8x8xf32>
    %55 = arith.addf %50, %54 : vector<8x8xf32>
    %c4 = arith.constant 4 : index
    %56 = memref.load %arg2[%c4] : memref<18xf32, #tpu.memory_space<smem>>
    %c1_34 = arith.constant 1 : index
    %c1_35 = arith.constant 1 : index
    %57 = vector.load %arg5[%c1_34, %c1_35] : memref<10x10xf32, #tpu.memory_space<vmem>>, vector<8x8xf32>
    %58 = vector.broadcast %56 : f32 to vector<8x8xf32>
    %59 = arith.mulf %58, %57 : vector<8x8xf32>
    %60 = arith.addf %55, %59 : vector<8x8xf32>
    %c13 = arith.constant 13 : index
    %61 = memref.load %arg2[%c13] : memref<18xf32, #tpu.memory_space<smem>>
    %c1_36 = arith.constant 1 : index
    %c1_37 = arith.constant 1 : index
    %62 = vector.load %arg6[%c1_36, %c1_37] : memref<10x10xf32, #tpu.memory_space<vmem>>, vector<8x8xf32>
    %63 = vector.broadcast %61 : f32 to vector<8x8xf32>
    %64 = arith.mulf %63, %62 : vector<8x8xf32>
    %65 = arith.addf %60, %64 : vector<8x8xf32>
    %c5 = arith.constant 5 : index
    %66 = memref.load %arg2[%c5] : memref<18xf32, #tpu.memory_space<smem>>
    %c1_38 = arith.constant 1 : index
    %c2_39 = arith.constant 2 : index
    %67 = vector.load %arg5[%c1_38, %c2_39] : memref<10x10xf32, #tpu.memory_space<vmem>>, vector<8x8xf32>
    %68 = vector.broadcast %66 : f32 to vector<8x8xf32>
    %69 = arith.mulf %68, %67 : vector<8x8xf32>
    %70 = arith.addf %65, %69 : vector<8x8xf32>
    %c14 = arith.constant 14 : index
    %71 = memref.load %arg2[%c14] : memref<18xf32, #tpu.memory_space<smem>>
    %c1_40 = arith.constant 1 : index
    %c2_41 = arith.constant 2 : index
    %72 = vector.load %arg6[%c1_40, %c2_41] : memref<10x10xf32, #tpu.memory_space<vmem>>, vector<8x8xf32>
    %73 = vector.broadcast %71 : f32 to vector<8x8xf32>
    %74 = arith.mulf %73, %72 : vector<8x8xf32>
    %75 = arith.addf %70, %74 : vector<8x8xf32>
    %c6 = arith.constant 6 : index
    %76 = memref.load %arg2[%c6] : memref<18xf32, #tpu.memory_space<smem>>
    %c2_42 = arith.constant 2 : index
    %c0_43 = arith.constant 0 : index
    %77 = vector.load %arg5[%c2_42, %c0_43] : memref<10x10xf32, #tpu.memory_space<vmem>>, vector<8x8xf32>
    %78 = vector.broadcast %76 : f32 to vector<8x8xf32>
    %79 = arith.mulf %78, %77 : vector<8x8xf32>
    %80 = arith.addf %75, %79 : vector<8x8xf32>
    %c15 = arith.constant 15 : index
    %81 = memref.load %arg2[%c15] : memref<18xf32, #tpu.memory_space<smem>>
    %c2_44 = arith.constant 2 : index
    %c0_45 = arith.constant 0 : index
    %82 = vector.load %arg6[%c2_44, %c0_45] : memref<10x10xf32, #tpu.memory_space<vmem>>, vector<8x8xf32>
    %83 = vector.broadcast %81 : f32 to vector<8x8xf32>
    %84 = arith.mulf %83, %82 : vector<8x8xf32>
    %85 = arith.addf %80, %84 : vector<8x8xf32>
    %c7 = arith.constant 7 : index
    %86 = memref.load %arg2[%c7] : memref<18xf32, #tpu.memory_space<smem>>
    %c2_46 = arith.constant 2 : index
    %c1_47 = arith.constant 1 : index
    %87 = vector.load %arg5[%c2_46, %c1_47] : memref<10x10xf32, #tpu.memory_space<vmem>>, vector<8x8xf32>
    %88 = vector.broadcast %86 : f32 to vector<8x8xf32>
    %89 = arith.mulf %88, %87 : vector<8x8xf32>
    %90 = arith.addf %85, %89 : vector<8x8xf32>
    %c16 = arith.constant 16 : index
    %91 = memref.load %arg2[%c16] : memref<18xf32, #tpu.memory_space<smem>>
    %c2_48 = arith.constant 2 : index
    %c1_49 = arith.constant 1 : index
    %92 = vector.load %arg6[%c2_48, %c1_49] : memref<10x10xf32, #tpu.memory_space<vmem>>, vector<8x8xf32>
    %93 = vector.broadcast %91 : f32 to vector<8x8xf32>
    %94 = arith.mulf %93, %92 : vector<8x8xf32>
    %95 = arith.addf %90, %94 : vector<8x8xf32>
    %c8 = arith.constant 8 : index
    %96 = memref.load %arg2[%c8] : memref<18xf32, #tpu.memory_space<smem>>
    %c2_50 = arith.constant 2 : index
    %c2_51 = arith.constant 2 : index
    %97 = vector.load %arg5[%c2_50, %c2_51] : memref<10x10xf32, #tpu.memory_space<vmem>>, vector<8x8xf32>
    %98 = vector.broadcast %96 : f32 to vector<8x8xf32>
    %99 = arith.mulf %98, %97 : vector<8x8xf32>
    %100 = arith.addf %95, %99 : vector<8x8xf32>
    %c17 = arith.constant 17 : index
    %101 = memref.load %arg2[%c17] : memref<18xf32, #tpu.memory_space<smem>>
    %c2_52 = arith.constant 2 : index
    %c2_53 = arith.constant 2 : index
    %102 = vector.load %arg6[%c2_52, %c2_53] : memref<10x10xf32, #tpu.memory_space<vmem>>, vector<8x8xf32>
    %103 = vector.broadcast %101 : f32 to vector<8x8xf32>
    %104 = arith.mulf %103, %102 : vector<8x8xf32>
    %105 = arith.addf %100, %104 : vector<8x8xf32>
    %106 = arith.negf %105 : vector<8x8xf32>
    %107 = math.exp %106 : vector<8x8xf32>
    %cst_54 = arith.constant 1.000000e+00 : f32
    %108 = vector.broadcast %cst_54 : f32 to vector<8x8xf32>
    %109 = arith.addf %108, %107 : vector<8x8xf32>
    %110 = arith.divf %108, %109 : vector<8x8xf32>
    %111 = vector.shape_cast %110 : vector<8x8xf32> to vector<8x8x1xf32>
    %112 = vector.broadcast %111 : vector<8x8x1xf32> to vector<8x8x64xf32>
    %113 = arith.mulf %1, %112 : vector<8x8x64xf32>
    %c0_55 = arith.constant 0 : index
    %c0_56 = arith.constant 0 : index
    %c0_57 = arith.constant 0 : index
    %c0_58 = arith.constant 0 : index
    %114 = vector.load %arg4[%c0_55, %c0_56, %c0_57, %c0_58] : memref<1x8x8x64xf32, #tpu.memory_space<vmem>>, vector<1x8x8x64xf32>
    %115 = vector.shape_cast %114 : vector<1x8x8x64xf32> to vector<8x8x64xf32>
    %116 = vector.shape_cast %113 : vector<8x8x64xf32> to vector<1x8x8x64xf32>
    tpu.vector_store %arg4[%c0_55, %c0_56, %c0_57, %c0_58], %116 {strides = array<i32>} : memref<1x8x8x64xf32, #tpu.memory_space<vmem>>, vector<1x8x8x64xf32>,
    return
  }
  func.func @transform_0(%arg0: i32) -> (i32, i32, i32, i32) {
    %c0_i32 = arith.constant 0 : i32
    %c0_i32_0 = arith.constant 0 : i32
    %c0_i32_1 = arith.constant 0 : i32
    %c0_i32_2 = arith.constant 0 : i32
    return %arg0, %c0_i32, %c0_i32_0, %c0_i32_1 : i32, i32, i32, i32
  }
  func.func @transform_1(%arg0: i32) -> i32 {
    %c0_i32 = arith.constant 0 : i32
    %c0_i32_0 = arith.constant 0 : i32
    return %c0_i32 : i32
  }
  func.func @transform_2(%arg0: i32) -> i32 {
    %c0_i32 = arith.constant 0 : i32
    %c0_i32_0 = arith.constant 0 : i32
    return %c0_i32 : i32
  }
  func.func @transform_3(%arg0: i32) -> (i32, i32, i32, i32) {
    %c0_i32 = arith.constant 0 : i32
    %c0_i32_0 = arith.constant 0 : i32
    %c0_i32_1 = arith.constant 0 : i32
    %c0_i32_2 = arith.constant 0 : i32
    return %arg0, %c0_i32, %c0_i32_0, %c0_i32_1 : i32, i32, i32, i32
  }
}

module attributes {stable_mosaic.version = 11 : i64} {
  func.func @_bn_apply_kernel(%arg0: i32, %arg1: memref<128x64xf32, #tpu.memory_space<vmem>>, %arg2: memref<2x64xf32, #tpu.memory_space<vmem>>, %arg3: memref<1x64xf32, #tpu.memory_space<vmem>>, %arg4: memref<1x64xf32, #tpu.memory_space<vmem>>, %arg5: memref<128x64xf32, #tpu.memory_space<vmem>>) attributes {dimension_semantics = [#tpu.dimension_semantics<parallel>], iteration_bounds = array<i64: 1>, scalar_prefetch = 0 : i64, scratch_operands = 0 : i64, tpu.core_type = #tpu.core_type<tc>, window_params = [{transform_indices = @transform_0, window_bounds = array<i64: 128, 64>}, {pipeline_mode = #tpu.pipeline_mode<synchronous>, transform_indices = @transform_1, window_bounds = array<i64: 2, 64>}, {pipeline_mode = #tpu.pipeline_mode<synchronous>, transform_indices = @transform_2, window_bounds = array<i64: 1, 64>}, {pipeline_mode = #tpu.pipeline_mode<synchronous>, transform_indices = @transform_3, window_bounds = array<i64: 1, 64>}, {transform_indices = @transform_4, window_bounds = array<i64: 128, 64>}]} {
    %c0 = arith.constant 0 : index
    %c0_0 = arith.constant 0 : index
    %0 = vector.load %arg1[%c0, %c0_0] : memref<128x64xf32, #tpu.memory_space<vmem>>, vector<128x64xf32>
    %c0_1 = arith.constant 0 : index
    %c0_2 = arith.constant 0 : index
    %1 = vector.load %arg2[%c0_1, %c0_2] : memref<2x64xf32, #tpu.memory_space<vmem>>, vector<1x64xf32>
    %2 = vector.shape_cast %1 : vector<1x64xf32> to vector<64xf32>
    %cst = arith.constant 7.812500e-03 : f32
    %3 = vector.broadcast %cst : f32 to vector<64xf32>
    %4 = arith.mulf %2, %3 : vector<64xf32>
    %c1 = arith.constant 1 : index
    %c0_3 = arith.constant 0 : index
    %5 = vector.load %arg2[%c1, %c0_3] : memref<2x64xf32, #tpu.memory_space<vmem>>, vector<1x64xf32>
    %6 = vector.shape_cast %5 : vector<1x64xf32> to vector<64xf32>
    %cst_4 = arith.constant 7.812500e-03 : f32
    %7 = vector.broadcast %cst_4 : f32 to vector<64xf32>
    %8 = arith.mulf %6, %7 : vector<64xf32>
    %9 = arith.mulf %4, %4 : vector<64xf32>
    %10 = arith.subf %8, %9 : vector<64xf32>
    %cst_5 = arith.constant 9.99999974E-6 : f32
    %11 = vector.broadcast %cst_5 : f32 to vector<64xf32>
    %12 = arith.addf %10, %11 : vector<64xf32>
    %13 = math.rsqrt %12 : vector<64xf32>
    %14 = vector.shape_cast %4 : vector<64xf32> to vector<1x64xf32>
    %15 = vector.broadcast %14 : vector<1x64xf32> to vector<128x64xf32>
    %16 = arith.subf %0, %15 : vector<128x64xf32>
    %17 = vector.shape_cast %13 : vector<64xf32> to vector<1x64xf32>
    %18 = vector.broadcast %17 : vector<1x64xf32> to vector<128x64xf32>
    %19 = arith.mulf %16, %18 : vector<128x64xf32>
    %c0_6 = arith.constant 0 : index
    %c0_7 = arith.constant 0 : index
    %20 = vector.load %arg3[%c0_6, %c0_7] : memref<1x64xf32, #tpu.memory_space<vmem>>, vector<1x64xf32>
    %21 = vector.shape_cast %20 : vector<1x64xf32> to vector<64xf32>
    %22 = vector.shape_cast %21 : vector<64xf32> to vector<1x64xf32>
    %23 = vector.broadcast %22 : vector<1x64xf32> to vector<128x64xf32>
    %24 = arith.mulf %19, %23 : vector<128x64xf32>
    %c0_8 = arith.constant 0 : index
    %c0_9 = arith.constant 0 : index
    %25 = vector.load %arg4[%c0_8, %c0_9] : memref<1x64xf32, #tpu.memory_space<vmem>>, vector<1x64xf32>
    %26 = vector.shape_cast %25 : vector<1x64xf32> to vector<64xf32>
    %27 = vector.shape_cast %26 : vector<64xf32> to vector<1x64xf32>
    %28 = vector.broadcast %27 : vector<1x64xf32> to vector<128x64xf32>
    %29 = arith.addf %24, %28 : vector<128x64xf32>
    %c0_10 = arith.constant 0 : index
    %c0_11 = arith.constant 0 : index
    %30 = vector.load %arg5[%c0_10, %c0_11] : memref<128x64xf32, #tpu.memory_space<vmem>>, vector<128x64xf32>
    tpu.vector_store %arg5[%c0_10, %c0_11], %29 {strides = array<i32>} : memref<128x64xf32, #tpu.memory_space<vmem>>, vector<128x64xf32>,
    return
  }
  func.func @transform_0(%arg0: i32) -> (i32, i32) {
    %c0_i32 = arith.constant 0 : i32
    %c0_i32_0 = arith.constant 0 : i32
    return %arg0, %c0_i32 : i32, i32
  }
  func.func @transform_1(%arg0: i32) -> (i32, i32) {
    %c0_i32 = arith.constant 0 : i32
    %c0_i32_0 = arith.constant 0 : i32
    %c0_i32_1 = arith.constant 0 : i32
    return %c0_i32, %c0_i32_0 : i32, i32
  }
  func.func @transform_2(%arg0: i32) -> (i32, i32) {
    %c0_i32 = arith.constant 0 : i32
    %c0_i32_0 = arith.constant 0 : i32
    %c0_i32_1 = arith.constant 0 : i32
    return %c0_i32, %c0_i32_0 : i32, i32
  }
  func.func @transform_3(%arg0: i32) -> (i32, i32) {
    %c0_i32 = arith.constant 0 : i32
    %c0_i32_0 = arith.constant 0 : i32
    %c0_i32_1 = arith.constant 0 : i32
    return %c0_i32, %c0_i32_0 : i32, i32
  }
  func.func @transform_4(%arg0: i32) -> (i32, i32) {
    %c0_i32 = arith.constant 0 : i32
    %c0_i32_0 = arith.constant 0 : i32
    return %arg0, %c0_i32 : i32, i32
  }
}

module attributes {stable_mosaic.version = 11 : i64} {
  func.func @_bn_stats_kernel(%arg0: i32, %arg1: memref<128x64xf32, #tpu.memory_space<vmem>>, %arg2: memref<2x64xf32, #tpu.memory_space<vmem>>) attributes {dimension_semantics = [#tpu.dimension_semantics<arbitrary>], iteration_bounds = array<i64: 1>, scalar_prefetch = 0 : i64, scratch_operands = 0 : i64, tpu.core_type = #tpu.core_type<tc>, window_params = [{transform_indices = @transform_0, window_bounds = array<i64: 128, 64>}, {pipeline_mode = #tpu.pipeline_mode<synchronous>, transform_indices = @transform_1, window_bounds = array<i64: 2, 64>}]} {
    %c0_i32 = arith.constant 0 : i32
    %0 = arith.cmpi eq, %arg0, %c0_i32 : i32
    %1 = arith.extui %0 : i1 to i32
    %c0_i32_0 = arith.constant 0 : i32
    %2 = arith.cmpi ne, %1, %c0_i32_0 : i32
    scf.if %2 {
      %cst_7 = arith.constant 0.000000e+00 : f32
      %13 = vector.broadcast %cst_7 : f32 to vector<2x64xf32>
      %c0_8 = arith.constant 0 : index
      %c0_9 = arith.constant 0 : index
      %14 = vector.load %arg2[%c0_8, %c0_9] : memref<2x64xf32, #tpu.memory_space<vmem>>, vector<2x64xf32>
      tpu.vector_store %arg2[%c0_8, %c0_9], %13 {strides = array<i32>} : memref<2x64xf32, #tpu.memory_space<vmem>>, vector<2x64xf32>,
    } else {
    }
    %c0 = arith.constant 0 : index
    %c0_1 = arith.constant 0 : index
    %3 = vector.load %arg1[%c0, %c0_1] : memref<128x64xf32, #tpu.memory_space<vmem>>, vector<128x64xf32>
    %c0_2 = arith.constant 0 : index
    %c0_3 = arith.constant 0 : index
    %4 = vector.load %arg2[%c0_2, %c0_3] : memref<2x64xf32, #tpu.memory_space<vmem>>, vector<2x64xf32>
    %cst = arith.constant dense<0.000000e+00> : vector<64xf32>
    %5 = vector.multi_reduction <add>, %3, %cst [0] : vector<128x64xf32> to vector<64xf32>
    %6 = arith.mulf %3, %3 : vector<128x64xf32>
    %cst_4 = arith.constant dense<0.000000e+00> : vector<64xf32>
    %7 = vector.multi_reduction <add>, %6, %cst_4 [0] : vector<128x64xf32> to vector<64xf32>
    %8 = vector.shape_cast %5 : vector<64xf32> to vector<1x64xf32>
    %9 = vector.shape_cast %7 : vector<64xf32> to vector<1x64xf32>
    %10 = tpu.concatenate %8, %9 in 0 : vector<1x64xf32>, vector<1x64xf32> -> vector<2x64xf32>
    %11 = arith.addf %4, %10 : vector<2x64xf32>
    %c0_5 = arith.constant 0 : index
    %c0_6 = arith.constant 0 : index
    %12 = vector.load %arg2[%c0_5, %c0_6] : memref<2x64xf32, #tpu.memory_space<vmem>>, vector<2x64xf32>
    tpu.vector_store %arg2[%c0_5, %c0_6], %11 {strides = array<i32>} : memref<2x64xf32, #tpu.memory_space<vmem>>, vector<2x64xf32>,
    return
  }
  func.func @transform_0(%arg0: i32) -> (i32, i32) {
    %c0_i32 = arith.constant 0 : i32
    %c0_i32_0 = arith.constant 0 : i32
    return %arg0, %c0_i32 : i32, i32
  }
  func.func @transform_1(%arg0: i32) -> (i32, i32) {
    %c0_i32 = arith.constant 0 : i32
    %c0_i32_0 = arith.constant 0 : i32
    %c0_i32_1 = arith.constant 0 : i32
    return %c0_i32, %c0_i32_0 : i32, i32
  }
}

module attributes {stable_mosaic.version = 11 : i64} {
  func.func @_conv3x3_kernel(%arg0: i32, %arg1: memref<1x10x10x64xf32, #tpu.memory_space<vmem>>, %arg2: memref<9x64x128xbf16, #tpu.memory_space<vmem>>, %arg3: memref<1x128xf32, #tpu.memory_space<vmem>>, %arg4: memref<1x8x8x128xf32, #tpu.memory_space<vmem>>) attributes {dimension_semantics = [#tpu.dimension_semantics<parallel>], iteration_bounds = array<i64: 2>, scalar_prefetch = 0 : i64, scratch_operands = 0 : i64, tpu.core_type = #tpu.core_type<tc>, window_params = [{transform_indices = @transform_0, window_bounds = array<i64: 1, 10, 10, 64>}, {pipeline_mode = #tpu.pipeline_mode<synchronous>, transform_indices = @transform_1, window_bounds = array<i64: 9, 64, 128>}, {pipeline_mode = #tpu.pipeline_mode<synchronous>, transform_indices = @transform_2, window_bounds = array<i64: 1, 128>}, {transform_indices = @transform_3, window_bounds = array<i64: 1, 8, 8, 128>}]} {
    %cst = arith.constant 0.000000e+00 : f32
    %0 = vector.broadcast %cst : f32 to vector<64x128xf32>
    %c0 = arith.constant 0 : index
    %c0_0 = arith.constant 0 : index
    %c0_1 = arith.constant 0 : index
    %c0_2 = arith.constant 0 : index
    %1 = vector.load %arg1[%c0, %c0_0, %c0_1, %c0_2] : memref<1x10x10x64xf32, #tpu.memory_space<vmem>>, vector<1x8x8x64xf32>
    %2 = vector.shape_cast %1 : vector<1x8x8x64xf32> to vector<8x8x64xf32>
    %3 = vector.shape_cast %2 : vector<8x8x64xf32> to vector<64x64xf32>
    %4 = arith.truncf %3 : vector<64x64xf32> to vector<64x64xbf16>
    %c0_3 = arith.constant 0 : index
    %c0_4 = arith.constant 0 : index
    %c0_5 = arith.constant 0 : index
    %5 = vector.load %arg2[%c0_3, %c0_4, %c0_5] : memref<9x64x128xbf16, #tpu.memory_space<vmem>>, vector<1x64x128xbf16>
    %6 = vector.shape_cast %5 : vector<1x64x128xbf16> to vector<64x128xbf16>
    %cst_6 = arith.constant dense<0.000000e+00> : vector<64x128xf32>
    %7 = tpu.matmul %4, %6, %cst_6 {dimension_numbers = #tpu.dot_dimension_numbers<[1], [0], [0], [1], [0, 0, 1, 1], [], []>} : vector<64x64xbf16>, vector<64x128xbf16>, vector<64x128xf32> -> vector<64x128xf32>
    %8 = arith.addf %0, %7 : vector<64x128xf32>
    %c0_7 = arith.constant 0 : index
    %c0_8 = arith.constant 0 : index
    %c1 = arith.constant 1 : index
    %c0_9 = arith.constant 0 : index
    %9 = vector.load %arg1[%c0_7, %c0_8, %c1, %c0_9] : memref<1x10x10x64xf32, #tpu.memory_space<vmem>>, vector<1x8x8x64xf32>
    %10 = vector.shape_cast %9 : vector<1x8x8x64xf32> to vector<8x8x64xf32>
    %11 = vector.shape_cast %10 : vector<8x8x64xf32> to vector<64x64xf32>
    %12 = arith.truncf %11 : vector<64x64xf32> to vector<64x64xbf16>
    %c1_10 = arith.constant 1 : index
    %c0_11 = arith.constant 0 : index
    %c0_12 = arith.constant 0 : index
    %13 = vector.load %arg2[%c1_10, %c0_11, %c0_12] : memref<9x64x128xbf16, #tpu.memory_space<vmem>>, vector<1x64x128xbf16>
    %14 = vector.shape_cast %13 : vector<1x64x128xbf16> to vector<64x128xbf16>
    %cst_13 = arith.constant dense<0.000000e+00> : vector<64x128xf32>
    %15 = tpu.matmul %12, %14, %cst_13 {dimension_numbers = #tpu.dot_dimension_numbers<[1], [0], [0], [1], [0, 0, 1, 1], [], []>} : vector<64x64xbf16>, vector<64x128xbf16>, vector<64x128xf32> -> vector<64x128xf32>
    %16 = arith.addf %8, %15 : vector<64x128xf32>
    %c0_14 = arith.constant 0 : index
    %c0_15 = arith.constant 0 : index
    %c2 = arith.constant 2 : index
    %c0_16 = arith.constant 0 : index
    %17 = vector.load %arg1[%c0_14, %c0_15, %c2, %c0_16] : memref<1x10x10x64xf32, #tpu.memory_space<vmem>>, vector<1x8x8x64xf32>
    %18 = vector.shape_cast %17 : vector<1x8x8x64xf32> to vector<8x8x64xf32>
    %19 = vector.shape_cast %18 : vector<8x8x64xf32> to vector<64x64xf32>
    %20 = arith.truncf %19 : vector<64x64xf32> to vector<64x64xbf16>
    %c2_17 = arith.constant 2 : index
    %c0_18 = arith.constant 0 : index
    %c0_19 = arith.constant 0 : index
    %21 = vector.load %arg2[%c2_17, %c0_18, %c0_19] : memref<9x64x128xbf16, #tpu.memory_space<vmem>>, vector<1x64x128xbf16>
    %22 = vector.shape_cast %21 : vector<1x64x128xbf16> to vector<64x128xbf16>
    %cst_20 = arith.constant dense<0.000000e+00> : vector<64x128xf32>
    %23 = tpu.matmul %20, %22, %cst_20 {dimension_numbers = #tpu.dot_dimension_numbers<[1], [0], [0], [1], [0, 0, 1, 1], [], []>} : vector<64x64xbf16>, vector<64x128xbf16>, vector<64x128xf32> -> vector<64x128xf32>
    %24 = arith.addf %16, %23 : vector<64x128xf32>
    %c0_21 = arith.constant 0 : index
    %c1_22 = arith.constant 1 : index
    %c0_23 = arith.constant 0 : index
    %c0_24 = arith.constant 0 : index
    %25 = vector.load %arg1[%c0_21, %c1_22, %c0_23, %c0_24] : memref<1x10x10x64xf32, #tpu.memory_space<vmem>>, vector<1x8x8x64xf32>
    %26 = vector.shape_cast %25 : vector<1x8x8x64xf32> to vector<8x8x64xf32>
    %27 = vector.shape_cast %26 : vector<8x8x64xf32> to vector<64x64xf32>
    %28 = arith.truncf %27 : vector<64x64xf32> to vector<64x64xbf16>
    %c3 = arith.constant 3 : index
    %c0_25 = arith.constant 0 : index
    %c0_26 = arith.constant 0 : index
    %29 = vector.load %arg2[%c3, %c0_25, %c0_26] : memref<9x64x128xbf16, #tpu.memory_space<vmem>>, vector<1x64x128xbf16>
    %30 = vector.shape_cast %29 : vector<1x64x128xbf16> to vector<64x128xbf16>
    %cst_27 = arith.constant dense<0.000000e+00> : vector<64x128xf32>
    %31 = tpu.matmul %28, %30, %cst_27 {dimension_numbers = #tpu.dot_dimension_numbers<[1], [0], [0], [1], [0, 0, 1, 1], [], []>} : vector<64x64xbf16>, vector<64x128xbf16>, vector<64x128xf32> -> vector<64x128xf32>
    %32 = arith.addf %24, %31 : vector<64x128xf32>
    %c0_28 = arith.constant 0 : index
    %c1_29 = arith.constant 1 : index
    %c1_30 = arith.constant 1 : index
    %c0_31 = arith.constant 0 : index
    %33 = vector.load %arg1[%c0_28, %c1_29, %c1_30, %c0_31] : memref<1x10x10x64xf32, #tpu.memory_space<vmem>>, vector<1x8x8x64xf32>
    %34 = vector.shape_cast %33 : vector<1x8x8x64xf32> to vector<8x8x64xf32>
    %35 = vector.shape_cast %34 : vector<8x8x64xf32> to vector<64x64xf32>
    %36 = arith.truncf %35 : vector<64x64xf32> to vector<64x64xbf16>
    %c4 = arith.constant 4 : index
    %c0_32 = arith.constant 0 : index
    %c0_33 = arith.constant 0 : index
    %37 = vector.load %arg2[%c4, %c0_32, %c0_33] : memref<9x64x128xbf16, #tpu.memory_space<vmem>>, vector<1x64x128xbf16>
    %38 = vector.shape_cast %37 : vector<1x64x128xbf16> to vector<64x128xbf16>
    %cst_34 = arith.constant dense<0.000000e+00> : vector<64x128xf32>
    %39 = tpu.matmul %36, %38, %cst_34 {dimension_numbers = #tpu.dot_dimension_numbers<[1], [0], [0], [1], [0, 0, 1, 1], [], []>} : vector<64x64xbf16>, vector<64x128xbf16>, vector<64x128xf32> -> vector<64x128xf32>
    %40 = arith.addf %32, %39 : vector<64x128xf32>
    %c0_35 = arith.constant 0 : index
    %c1_36 = arith.constant 1 : index
    %c2_37 = arith.constant 2 : index
    %c0_38 = arith.constant 0 : index
    %41 = vector.load %arg1[%c0_35, %c1_36, %c2_37, %c0_38] : memref<1x10x10x64xf32, #tpu.memory_space<vmem>>, vector<1x8x8x64xf32>
    %42 = vector.shape_cast %41 : vector<1x8x8x64xf32> to vector<8x8x64xf32>
    %43 = vector.shape_cast %42 : vector<8x8x64xf32> to vector<64x64xf32>
    %44 = arith.truncf %43 : vector<64x64xf32> to vector<64x64xbf16>
    %c5 = arith.constant 5 : index
    %c0_39 = arith.constant 0 : index
    %c0_40 = arith.constant 0 : index
    %45 = vector.load %arg2[%c5, %c0_39, %c0_40] : memref<9x64x128xbf16, #tpu.memory_space<vmem>>, vector<1x64x128xbf16>
    %46 = vector.shape_cast %45 : vector<1x64x128xbf16> to vector<64x128xbf16>
    %cst_41 = arith.constant dense<0.000000e+00> : vector<64x128xf32>
    %47 = tpu.matmul %44, %46, %cst_41 {dimension_numbers = #tpu.dot_dimension_numbers<[1], [0], [0], [1], [0, 0, 1, 1], [], []>} : vector<64x64xbf16>, vector<64x128xbf16>, vector<64x128xf32> -> vector<64x128xf32>
    %48 = arith.addf %40, %47 : vector<64x128xf32>
    %c0_42 = arith.constant 0 : index
    %c2_43 = arith.constant 2 : index
    %c0_44 = arith.constant 0 : index
    %c0_45 = arith.constant 0 : index
    %49 = vector.load %arg1[%c0_42, %c2_43, %c0_44, %c0_45] : memref<1x10x10x64xf32, #tpu.memory_space<vmem>>, vector<1x8x8x64xf32>
    %50 = vector.shape_cast %49 : vector<1x8x8x64xf32> to vector<8x8x64xf32>
    %51 = vector.shape_cast %50 : vector<8x8x64xf32> to vector<64x64xf32>
    %52 = arith.truncf %51 : vector<64x64xf32> to vector<64x64xbf16>
    %c6 = arith.constant 6 : index
    %c0_46 = arith.constant 0 : index
    %c0_47 = arith.constant 0 : index
    %53 = vector.load %arg2[%c6, %c0_46, %c0_47] : memref<9x64x128xbf16, #tpu.memory_space<vmem>>, vector<1x64x128xbf16>
    %54 = vector.shape_cast %53 : vector<1x64x128xbf16> to vector<64x128xbf16>
    %cst_48 = arith.constant dense<0.000000e+00> : vector<64x128xf32>
    %55 = tpu.matmul %52, %54, %cst_48 {dimension_numbers = #tpu.dot_dimension_numbers<[1], [0], [0], [1], [0, 0, 1, 1], [], []>} : vector<64x64xbf16>, vector<64x128xbf16>, vector<64x128xf32> -> vector<64x128xf32>
    %56 = arith.addf %48, %55 : vector<64x128xf32>
    %c0_49 = arith.constant 0 : index
    %c2_50 = arith.constant 2 : index
    %c1_51 = arith.constant 1 : index
    %c0_52 = arith.constant 0 : index
    %57 = vector.load %arg1[%c0_49, %c2_50, %c1_51, %c0_52] : memref<1x10x10x64xf32, #tpu.memory_space<vmem>>, vector<1x8x8x64xf32>
    %58 = vector.shape_cast %57 : vector<1x8x8x64xf32> to vector<8x8x64xf32>
    %59 = vector.shape_cast %58 : vector<8x8x64xf32> to vector<64x64xf32>
    %60 = arith.truncf %59 : vector<64x64xf32> to vector<64x64xbf16>
    %c7 = arith.constant 7 : index
    %c0_53 = arith.constant 0 : index
    %c0_54 = arith.constant 0 : index
    %61 = vector.load %arg2[%c7, %c0_53, %c0_54] : memref<9x64x128xbf16, #tpu.memory_space<vmem>>, vector<1x64x128xbf16>
    %62 = vector.shape_cast %61 : vector<1x64x128xbf16> to vector<64x128xbf16>
    %cst_55 = arith.constant dense<0.000000e+00> : vector<64x128xf32>
    %63 = tpu.matmul %60, %62, %cst_55 {dimension_numbers = #tpu.dot_dimension_numbers<[1], [0], [0], [1], [0, 0, 1, 1], [], []>} : vector<64x64xbf16>, vector<64x128xbf16>, vector<64x128xf32> -> vector<64x128xf32>
    %64 = arith.addf %56, %63 : vector<64x128xf32>
    %c0_56 = arith.constant 0 : index
    %c2_57 = arith.constant 2 : index
    %c2_58 = arith.constant 2 : index
    %c0_59 = arith.constant 0 : index
    %65 = vector.load %arg1[%c0_56, %c2_57, %c2_58, %c0_59] : memref<1x10x10x64xf32, #tpu.memory_space<vmem>>, vector<1x8x8x64xf32>
    %66 = vector.shape_cast %65 : vector<1x8x8x64xf32> to vector<8x8x64xf32>
    %67 = vector.shape_cast %66 : vector<8x8x64xf32> to vector<64x64xf32>
    %68 = arith.truncf %67 : vector<64x64xf32> to vector<64x64xbf16>
    %c8 = arith.constant 8 : index
    %c0_60 = arith.constant 0 : index
    %c0_61 = arith.constant 0 : index
    %69 = vector.load %arg2[%c8, %c0_60, %c0_61] : memref<9x64x128xbf16, #tpu.memory_space<vmem>>, vector<1x64x128xbf16>
    %70 = vector.shape_cast %69 : vector<1x64x128xbf16> to vector<64x128xbf16>
    %cst_62 = arith.constant dense<0.000000e+00> : vector<64x128xf32>
    %71 = tpu.matmul %68, %70, %cst_62 {dimension_numbers = #tpu.dot_dimension_numbers<[1], [0], [0], [1], [0, 0, 1, 1], [], []>} : vector<64x64xbf16>, vector<64x128xbf16>, vector<64x128xf32> -> vector<64x128xf32>
    %72 = arith.addf %64, %71 : vector<64x128xf32>
    %c0_63 = arith.constant 0 : index
    %c0_64 = arith.constant 0 : index
    %73 = vector.load %arg3[%c0_63, %c0_64] : memref<1x128xf32, #tpu.memory_space<vmem>>, vector<1x128xf32>
    %74 = vector.broadcast %73 : vector<1x128xf32> to vector<64x128xf32>
    %75 = arith.addf %72, %74 : vector<64x128xf32>
    %cst_65 = arith.constant 0.000000e+00 : f32
    %76 = vector.broadcast %cst_65 : f32 to vector<64x128xf32>
    %77 = arith.maximumf %75, %76 : vector<64x128xf32>
    %78 = vector.shape_cast %77 : vector<64x128xf32> to vector<8x8x128xf32>
    %c0_66 = arith.constant 0 : index
    %c0_67 = arith.constant 0 : index
    %c0_68 = arith.constant 0 : index
    %c0_69 = arith.constant 0 : index
    %79 = vector.load %arg4[%c0_66, %c0_67, %c0_68, %c0_69] : memref<1x8x8x128xf32, #tpu.memory_space<vmem>>, vector<1x8x8x128xf32>
    %80 = vector.shape_cast %79 : vector<1x8x8x128xf32> to vector<8x8x128xf32>
    %81 = vector.shape_cast %78 : vector<8x8x128xf32> to vector<1x8x8x128xf32>
    tpu.vector_store %arg4[%c0_66, %c0_67, %c0_68, %c0_69], %81 {strides = array<i32>} : memref<1x8x8x128xf32, #tpu.memory_space<vmem>>, vector<1x8x8x128xf32>,
    return
  }
  func.func @transform_0(%arg0: i32) -> (i32, i32, i32, i32) {
    %c0_i32 = arith.constant 0 : i32
    %c0_i32_0 = arith.constant 0 : i32
    %c0_i32_1 = arith.constant 0 : i32
    %c0_i32_2 = arith.constant 0 : i32
    return %arg0, %c0_i32, %c0_i32_0, %c0_i32_1 : i32, i32, i32, i32
  }
  func.func @transform_1(%arg0: i32) -> (i32, i32, i32) {
    %c0_i32 = arith.constant 0 : i32
    %c0_i32_0 = arith.constant 0 : i32
    %c0_i32_1 = arith.constant 0 : i32
    %c0_i32_2 = arith.constant 0 : i32
    return %c0_i32, %c0_i32_0, %c0_i32_1 : i32, i32, i32
  }
  func.func @transform_2(%arg0: i32) -> (i32, i32) {
    %c0_i32 = arith.constant 0 : i32
    %c0_i32_0 = arith.constant 0 : i32
    %c0_i32_1 = arith.constant 0 : i32
    return %c0_i32, %c0_i32_0 : i32, i32
  }
  func.func @transform_3(%arg0: i32) -> (i32, i32, i32, i32) {
    %c0_i32 = arith.constant 0 : i32
    %c0_i32_0 = arith.constant 0 : i32
    %c0_i32_1 = arith.constant 0 : i32
    %c0_i32_2 = arith.constant 0 : i32
    return %arg0, %c0_i32, %c0_i32_0, %c0_i32_1 : i32, i32, i32, i32
  }
}

module attributes {stable_mosaic.version = 11 : i64} {
  func.func @_maxpool_kernel(%arg0: i32, %arg1: i32, %arg2: memref<1x8x4x256xf32, #tpu.memory_space<vmem>>, %arg3: memref<1x4x4x128xf32, #tpu.memory_space<vmem>>) attributes {dimension_semantics = [#tpu.dimension_semantics<parallel>, #tpu.dimension_semantics<parallel>], iteration_bounds = array<i64: 2, 1>, scalar_prefetch = 0 : i64, scratch_operands = 0 : i64, tpu.core_type = #tpu.core_type<tc>, window_params = [{transform_indices = @transform_0, window_bounds = array<i64: 1, 8, 4, 256>}, {transform_indices = @transform_1, window_bounds = array<i64: 1, 4, 4, 128>}]} {
    %c0 = arith.constant 0 : index
    %c0_0 = arith.constant 0 : index
    %c0_1 = arith.constant 0 : index
    %c0_2 = arith.constant 0 : index
    %0 = vector.load %arg2[%c0, %c0_0, %c0_1, %c0_2] : memref<1x8x4x256xf32, #tpu.memory_space<vmem>>, vector<1x8x4x256xf32>
    %1 = vector.shape_cast %0 : vector<1x8x4x256xf32> to vector<8x4x256xf32>
    %2 = vector.shape_cast %1 : vector<8x4x256xf32> to vector<4x2x4x256xf32>
    %cst = arith.constant dense<0xFF800000> : vector<4x4x256xf32>
    %3 = vector.multi_reduction <maximumf>, %2, %cst [1] : vector<4x2x4x256xf32> to vector<4x4x256xf32>
    %4 = vector.extract_strided_slice %3 {offsets = [0, 0, 0], sizes = [4, 4, 128], strides = [1, 1, 1]} : vector<4x4x256xf32> to vector<4x4x128xf32>
    %5 = vector.extract_strided_slice %3 {offsets = [0, 0, 128], sizes = [4, 4, 128], strides = [1, 1, 1]} : vector<4x4x256xf32> to vector<4x4x128xf32>
    %6 = arith.maximumf %4, %5 : vector<4x4x128xf32>
    %c0_3 = arith.constant 0 : index
    %c0_4 = arith.constant 0 : index
    %c0_5 = arith.constant 0 : index
    %c0_6 = arith.constant 0 : index
    %7 = vector.load %arg3[%c0_3, %c0_4, %c0_5, %c0_6] : memref<1x4x4x128xf32, #tpu.memory_space<vmem>>, vector<1x4x4x128xf32>
    %8 = vector.shape_cast %7 : vector<1x4x4x128xf32> to vector<4x4x128xf32>
    %9 = vector.shape_cast %6 : vector<4x4x128xf32> to vector<1x4x4x128xf32>
    tpu.vector_store %arg3[%c0_3, %c0_4, %c0_5, %c0_6], %9 {strides = array<i32>} : memref<1x4x4x128xf32, #tpu.memory_space<vmem>>, vector<1x4x4x128xf32>,
    return
  }
  func.func @transform_0(%arg0: i32, %arg1: i32) -> (i32, i32, i32, i32) {
    %c0_i32 = arith.constant 0 : i32
    %c0_i32_0 = arith.constant 0 : i32
    %c0_i32_1 = arith.constant 0 : i32
    return %arg0, %arg1, %c0_i32, %c0_i32_0 : i32, i32, i32, i32
  }
  func.func @transform_1(%arg0: i32, %arg1: i32) -> (i32, i32, i32, i32) {
    %c0_i32 = arith.constant 0 : i32
    %c0_i32_0 = arith.constant 0 : i32
    %c0_i32_1 = arith.constant 0 : i32
    return %arg0, %arg1, %c0_i32, %c0_i32_0 : i32, i32, i32, i32
  }
}

module attributes {stable_mosaic.version = 11 : i64} {
  func.func @_conv3x3_kernel(%arg0: i32, %arg1: memref<1x10x10x128xf32, #tpu.memory_space<vmem>>, %arg2: memref<9x128x128xbf16, #tpu.memory_space<vmem>>, %arg3: memref<1x128xf32, #tpu.memory_space<vmem>>, %arg4: memref<1x8x8x128xf32, #tpu.memory_space<vmem>>) attributes {dimension_semantics = [#tpu.dimension_semantics<parallel>], iteration_bounds = array<i64: 2>, scalar_prefetch = 0 : i64, scratch_operands = 0 : i64, tpu.core_type = #tpu.core_type<tc>, window_params = [{transform_indices = @transform_0, window_bounds = array<i64: 1, 10, 10, 128>}, {pipeline_mode = #tpu.pipeline_mode<synchronous>, transform_indices = @transform_1, window_bounds = array<i64: 9, 128, 128>}, {pipeline_mode = #tpu.pipeline_mode<synchronous>, transform_indices = @transform_2, window_bounds = array<i64: 1, 128>}, {transform_indices = @transform_3, window_bounds = array<i64: 1, 8, 8, 128>}]} {
    %cst = arith.constant 0.000000e+00 : f32
    %0 = vector.broadcast %cst : f32 to vector<64x128xf32>
    %c0 = arith.constant 0 : index
    %c0_0 = arith.constant 0 : index
    %c0_1 = arith.constant 0 : index
    %c0_2 = arith.constant 0 : index
    %1 = vector.load %arg1[%c0, %c0_0, %c0_1, %c0_2] : memref<1x10x10x128xf32, #tpu.memory_space<vmem>>, vector<1x8x8x128xf32>
    %2 = vector.shape_cast %1 : vector<1x8x8x128xf32> to vector<8x8x128xf32>
    %3 = vector.shape_cast %2 : vector<8x8x128xf32> to vector<64x128xf32>
    %4 = arith.truncf %3 : vector<64x128xf32> to vector<64x128xbf16>
    %c0_3 = arith.constant 0 : index
    %c0_4 = arith.constant 0 : index
    %c0_5 = arith.constant 0 : index
    %5 = vector.load %arg2[%c0_3, %c0_4, %c0_5] : memref<9x128x128xbf16, #tpu.memory_space<vmem>>, vector<1x128x128xbf16>
    %6 = vector.shape_cast %5 : vector<1x128x128xbf16> to vector<128x128xbf16>
    %cst_6 = arith.constant dense<0.000000e+00> : vector<64x128xf32>
    %7 = tpu.matmul %4, %6, %cst_6 {dimension_numbers = #tpu.dot_dimension_numbers<[1], [0], [0], [1], [0, 0, 1, 1], [], []>} : vector<64x128xbf16>, vector<128x128xbf16>, vector<64x128xf32> -> vector<64x128xf32>
    %8 = arith.addf %0, %7 : vector<64x128xf32>
    %c0_7 = arith.constant 0 : index
    %c0_8 = arith.constant 0 : index
    %c1 = arith.constant 1 : index
    %c0_9 = arith.constant 0 : index
    %9 = vector.load %arg1[%c0_7, %c0_8, %c1, %c0_9] : memref<1x10x10x128xf32, #tpu.memory_space<vmem>>, vector<1x8x8x128xf32>
    %10 = vector.shape_cast %9 : vector<1x8x8x128xf32> to vector<8x8x128xf32>
    %11 = vector.shape_cast %10 : vector<8x8x128xf32> to vector<64x128xf32>
    %12 = arith.truncf %11 : vector<64x128xf32> to vector<64x128xbf16>
    %c1_10 = arith.constant 1 : index
    %c0_11 = arith.constant 0 : index
    %c0_12 = arith.constant 0 : index
    %13 = vector.load %arg2[%c1_10, %c0_11, %c0_12] : memref<9x128x128xbf16, #tpu.memory_space<vmem>>, vector<1x128x128xbf16>
    %14 = vector.shape_cast %13 : vector<1x128x128xbf16> to vector<128x128xbf16>
    %cst_13 = arith.constant dense<0.000000e+00> : vector<64x128xf32>
    %15 = tpu.matmul %12, %14, %cst_13 {dimension_numbers = #tpu.dot_dimension_numbers<[1], [0], [0], [1], [0, 0, 1, 1], [], []>} : vector<64x128xbf16>, vector<128x128xbf16>, vector<64x128xf32> -> vector<64x128xf32>
    %16 = arith.addf %8, %15 : vector<64x128xf32>
    %c0_14 = arith.constant 0 : index
    %c0_15 = arith.constant 0 : index
    %c2 = arith.constant 2 : index
    %c0_16 = arith.constant 0 : index
    %17 = vector.load %arg1[%c0_14, %c0_15, %c2, %c0_16] : memref<1x10x10x128xf32, #tpu.memory_space<vmem>>, vector<1x8x8x128xf32>
    %18 = vector.shape_cast %17 : vector<1x8x8x128xf32> to vector<8x8x128xf32>
    %19 = vector.shape_cast %18 : vector<8x8x128xf32> to vector<64x128xf32>
    %20 = arith.truncf %19 : vector<64x128xf32> to vector<64x128xbf16>
    %c2_17 = arith.constant 2 : index
    %c0_18 = arith.constant 0 : index
    %c0_19 = arith.constant 0 : index
    %21 = vector.load %arg2[%c2_17, %c0_18, %c0_19] : memref<9x128x128xbf16, #tpu.memory_space<vmem>>, vector<1x128x128xbf16>
    %22 = vector.shape_cast %21 : vector<1x128x128xbf16> to vector<128x128xbf16>
    %cst_20 = arith.constant dense<0.000000e+00> : vector<64x128xf32>
    %23 = tpu.matmul %20, %22, %cst_20 {dimension_numbers = #tpu.dot_dimension_numbers<[1], [0], [0], [1], [0, 0, 1, 1], [], []>} : vector<64x128xbf16>, vector<128x128xbf16>, vector<64x128xf32> -> vector<64x128xf32>
    %24 = arith.addf %16, %23 : vector<64x128xf32>
    %c0_21 = arith.constant 0 : index
    %c1_22 = arith.constant 1 : index
    %c0_23 = arith.constant 0 : index
    %c0_24 = arith.constant 0 : index
    %25 = vector.load %arg1[%c0_21, %c1_22, %c0_23, %c0_24] : memref<1x10x10x128xf32, #tpu.memory_space<vmem>>, vector<1x8x8x128xf32>
    %26 = vector.shape_cast %25 : vector<1x8x8x128xf32> to vector<8x8x128xf32>
    %27 = vector.shape_cast %26 : vector<8x8x128xf32> to vector<64x128xf32>
    %28 = arith.truncf %27 : vector<64x128xf32> to vector<64x128xbf16>
    %c3 = arith.constant 3 : index
    %c0_25 = arith.constant 0 : index
    %c0_26 = arith.constant 0 : index
    %29 = vector.load %arg2[%c3, %c0_25, %c0_26] : memref<9x128x128xbf16, #tpu.memory_space<vmem>>, vector<1x128x128xbf16>
    %30 = vector.shape_cast %29 : vector<1x128x128xbf16> to vector<128x128xbf16>
    %cst_27 = arith.constant dense<0.000000e+00> : vector<64x128xf32>
    %31 = tpu.matmul %28, %30, %cst_27 {dimension_numbers = #tpu.dot_dimension_numbers<[1], [0], [0], [1], [0, 0, 1, 1], [], []>} : vector<64x128xbf16>, vector<128x128xbf16>, vector<64x128xf32> -> vector<64x128xf32>
    %32 = arith.addf %24, %31 : vector<64x128xf32>
    %c0_28 = arith.constant 0 : index
    %c1_29 = arith.constant 1 : index
    %c1_30 = arith.constant 1 : index
    %c0_31 = arith.constant 0 : index
    %33 = vector.load %arg1[%c0_28, %c1_29, %c1_30, %c0_31] : memref<1x10x10x128xf32, #tpu.memory_space<vmem>>, vector<1x8x8x128xf32>
    %34 = vector.shape_cast %33 : vector<1x8x8x128xf32> to vector<8x8x128xf32>
    %35 = vector.shape_cast %34 : vector<8x8x128xf32> to vector<64x128xf32>
    %36 = arith.truncf %35 : vector<64x128xf32> to vector<64x128xbf16>
    %c4 = arith.constant 4 : index
    %c0_32 = arith.constant 0 : index
    %c0_33 = arith.constant 0 : index
    %37 = vector.load %arg2[%c4, %c0_32, %c0_33] : memref<9x128x128xbf16, #tpu.memory_space<vmem>>, vector<1x128x128xbf16>
    %38 = vector.shape_cast %37 : vector<1x128x128xbf16> to vector<128x128xbf16>
    %cst_34 = arith.constant dense<0.000000e+00> : vector<64x128xf32>
    %39 = tpu.matmul %36, %38, %cst_34 {dimension_numbers = #tpu.dot_dimension_numbers<[1], [0], [0], [1], [0, 0, 1, 1], [], []>} : vector<64x128xbf16>, vector<128x128xbf16>, vector<64x128xf32> -> vector<64x128xf32>
    %40 = arith.addf %32, %39 : vector<64x128xf32>
    %c0_35 = arith.constant 0 : index
    %c1_36 = arith.constant 1 : index
    %c2_37 = arith.constant 2 : index
    %c0_38 = arith.constant 0 : index
    %41 = vector.load %arg1[%c0_35, %c1_36, %c2_37, %c0_38] : memref<1x10x10x128xf32, #tpu.memory_space<vmem>>, vector<1x8x8x128xf32>
    %42 = vector.shape_cast %41 : vector<1x8x8x128xf32> to vector<8x8x128xf32>
    %43 = vector.shape_cast %42 : vector<8x8x128xf32> to vector<64x128xf32>
    %44 = arith.truncf %43 : vector<64x128xf32> to vector<64x128xbf16>
    %c5 = arith.constant 5 : index
    %c0_39 = arith.constant 0 : index
    %c0_40 = arith.constant 0 : index
    %45 = vector.load %arg2[%c5, %c0_39, %c0_40] : memref<9x128x128xbf16, #tpu.memory_space<vmem>>, vector<1x128x128xbf16>
    %46 = vector.shape_cast %45 : vector<1x128x128xbf16> to vector<128x128xbf16>
    %cst_41 = arith.constant dense<0.000000e+00> : vector<64x128xf32>
    %47 = tpu.matmul %44, %46, %cst_41 {dimension_numbers = #tpu.dot_dimension_numbers<[1], [0], [0], [1], [0, 0, 1, 1], [], []>} : vector<64x128xbf16>, vector<128x128xbf16>, vector<64x128xf32> -> vector<64x128xf32>
    %48 = arith.addf %40, %47 : vector<64x128xf32>
    %c0_42 = arith.constant 0 : index
    %c2_43 = arith.constant 2 : index
    %c0_44 = arith.constant 0 : index
    %c0_45 = arith.constant 0 : index
    %49 = vector.load %arg1[%c0_42, %c2_43, %c0_44, %c0_45] : memref<1x10x10x128xf32, #tpu.memory_space<vmem>>, vector<1x8x8x128xf32>
    %50 = vector.shape_cast %49 : vector<1x8x8x128xf32> to vector<8x8x128xf32>
    %51 = vector.shape_cast %50 : vector<8x8x128xf32> to vector<64x128xf32>
    %52 = arith.truncf %51 : vector<64x128xf32> to vector<64x128xbf16>
    %c6 = arith.constant 6 : index
    %c0_46 = arith.constant 0 : index
    %c0_47 = arith.constant 0 : index
    %53 = vector.load %arg2[%c6, %c0_46, %c0_47] : memref<9x128x128xbf16, #tpu.memory_space<vmem>>, vector<1x128x128xbf16>
    %54 = vector.shape_cast %53 : vector<1x128x128xbf16> to vector<128x128xbf16>
    %cst_48 = arith.constant dense<0.000000e+00> : vector<64x128xf32>
    %55 = tpu.matmul %52, %54, %cst_48 {dimension_numbers = #tpu.dot_dimension_numbers<[1], [0], [0], [1], [0, 0, 1, 1], [], []>} : vector<64x128xbf16>, vector<128x128xbf16>, vector<64x128xf32> -> vector<64x128xf32>
    %56 = arith.addf %48, %55 : vector<64x128xf32>
    %c0_49 = arith.constant 0 : index
    %c2_50 = arith.constant 2 : index
    %c1_51 = arith.constant 1 : index
    %c0_52 = arith.constant 0 : index
    %57 = vector.load %arg1[%c0_49, %c2_50, %c1_51, %c0_52] : memref<1x10x10x128xf32, #tpu.memory_space<vmem>>, vector<1x8x8x128xf32>
    %58 = vector.shape_cast %57 : vector<1x8x8x128xf32> to vector<8x8x128xf32>
    %59 = vector.shape_cast %58 : vector<8x8x128xf32> to vector<64x128xf32>
    %60 = arith.truncf %59 : vector<64x128xf32> to vector<64x128xbf16>
    %c7 = arith.constant 7 : index
    %c0_53 = arith.constant 0 : index
    %c0_54 = arith.constant 0 : index
    %61 = vector.load %arg2[%c7, %c0_53, %c0_54] : memref<9x128x128xbf16, #tpu.memory_space<vmem>>, vector<1x128x128xbf16>
    %62 = vector.shape_cast %61 : vector<1x128x128xbf16> to vector<128x128xbf16>
    %cst_55 = arith.constant dense<0.000000e+00> : vector<64x128xf32>
    %63 = tpu.matmul %60, %62, %cst_55 {dimension_numbers = #tpu.dot_dimension_numbers<[1], [0], [0], [1], [0, 0, 1, 1], [], []>} : vector<64x128xbf16>, vector<128x128xbf16>, vector<64x128xf32> -> vector<64x128xf32>
    %64 = arith.addf %56, %63 : vector<64x128xf32>
    %c0_56 = arith.constant 0 : index
    %c2_57 = arith.constant 2 : index
    %c2_58 = arith.constant 2 : index
    %c0_59 = arith.constant 0 : index
    %65 = vector.load %arg1[%c0_56, %c2_57, %c2_58, %c0_59] : memref<1x10x10x128xf32, #tpu.memory_space<vmem>>, vector<1x8x8x128xf32>
    %66 = vector.shape_cast %65 : vector<1x8x8x128xf32> to vector<8x8x128xf32>
    %67 = vector.shape_cast %66 : vector<8x8x128xf32> to vector<64x128xf32>
    %68 = arith.truncf %67 : vector<64x128xf32> to vector<64x128xbf16>
    %c8 = arith.constant 8 : index
    %c0_60 = arith.constant 0 : index
    %c0_61 = arith.constant 0 : index
    %69 = vector.load %arg2[%c8, %c0_60, %c0_61] : memref<9x128x128xbf16, #tpu.memory_space<vmem>>, vector<1x128x128xbf16>
    %70 = vector.shape_cast %69 : vector<1x128x128xbf16> to vector<128x128xbf16>
    %cst_62 = arith.constant dense<0.000000e+00> : vector<64x128xf32>
    %71 = tpu.matmul %68, %70, %cst_62 {dimension_numbers = #tpu.dot_dimension_numbers<[1], [0], [0], [1], [0, 0, 1, 1], [], []>} : vector<64x128xbf16>, vector<128x128xbf16>, vector<64x128xf32> -> vector<64x128xf32>
    %72 = arith.addf %64, %71 : vector<64x128xf32>
    %c0_63 = arith.constant 0 : index
    %c0_64 = arith.constant 0 : index
    %73 = vector.load %arg3[%c0_63, %c0_64] : memref<1x128xf32, #tpu.memory_space<vmem>>, vector<1x128xf32>
    %74 = vector.broadcast %73 : vector<1x128xf32> to vector<64x128xf32>
    %75 = arith.addf %72, %74 : vector<64x128xf32>
    %cst_65 = arith.constant 0.000000e+00 : f32
    %76 = vector.broadcast %cst_65 : f32 to vector<64x128xf32>
    %77 = arith.maximumf %75, %76 : vector<64x128xf32>
    %78 = vector.shape_cast %77 : vector<64x128xf32> to vector<8x8x128xf32>
    %c0_66 = arith.constant 0 : index
    %c0_67 = arith.constant 0 : index
    %c0_68 = arith.constant 0 : index
    %c0_69 = arith.constant 0 : index
    %79 = vector.load %arg4[%c0_66, %c0_67, %c0_68, %c0_69] : memref<1x8x8x128xf32, #tpu.memory_space<vmem>>, vector<1x8x8x128xf32>
    %80 = vector.shape_cast %79 : vector<1x8x8x128xf32> to vector<8x8x128xf32>
    %81 = vector.shape_cast %78 : vector<8x8x128xf32> to vector<1x8x8x128xf32>
    tpu.vector_store %arg4[%c0_66, %c0_67, %c0_68, %c0_69], %81 {strides = array<i32>} : memref<1x8x8x128xf32, #tpu.memory_space<vmem>>, vector<1x8x8x128xf32>,
    return
  }
  func.func @transform_0(%arg0: i32) -> (i32, i32, i32, i32) {
    %c0_i32 = arith.constant 0 : i32
    %c0_i32_0 = arith.constant 0 : i32
    %c0_i32_1 = arith.constant 0 : i32
    %c0_i32_2 = arith.constant 0 : i32
    return %arg0, %c0_i32, %c0_i32_0, %c0_i32_1 : i32, i32, i32, i32
  }
  func.func @transform_1(%arg0: i32) -> (i32, i32, i32) {
    %c0_i32 = arith.constant 0 : i32
    %c0_i32_0 = arith.constant 0 : i32
    %c0_i32_1 = arith.constant 0 : i32
    %c0_i32_2 = arith.constant 0 : i32
    return %c0_i32, %c0_i32_0, %c0_i32_1 : i32, i32, i32
  }
  func.func @transform_2(%arg0: i32) -> (i32, i32) {
    %c0_i32 = arith.constant 0 : i32
    %c0_i32_0 = arith.constant 0 : i32
    %c0_i32_1 = arith.constant 0 : i32
    return %c0_i32, %c0_i32_0 : i32, i32
  }
  func.func @transform_3(%arg0: i32) -> (i32, i32, i32, i32) {
    %c0_i32 = arith.constant 0 : i32
    %c0_i32_0 = arith.constant 0 : i32
    %c0_i32_1 = arith.constant 0 : i32
    %c0_i32_2 = arith.constant 0 : i32
    return %arg0, %c0_i32, %c0_i32_0, %c0_i32_1 : i32, i32, i32, i32
  }
}

module attributes {stable_mosaic.version = 11 : i64} {
  func.func @_spatial_attn_kernel(%arg0: i32, %arg1: memref<1x4x4x128xf32, #tpu.memory_space<vmem>>, %arg2: memref<18xf32, #tpu.memory_space<smem>>, %arg3: memref<1xf32, #tpu.memory_space<smem>>, %arg4: memref<1x4x4x128xf32, #tpu.memory_space<vmem>>, %arg5: memref<6x6xf32, #tpu.memory_space<vmem>>, %arg6: memref<6x6xf32, #tpu.memory_space<vmem>>) attributes {dimension_semantics = [#tpu.dimension_semantics<parallel>], iteration_bounds = array<i64: 2>, scalar_prefetch = 0 : i64, scratch_operands = 2 : i64, tpu.core_type = #tpu.core_type<tc>, window_params = [{transform_indices = @transform_0, window_bounds = array<i64: 1, 4, 4, 128>}, {transform_indices = @transform_1, window_bounds = array<i64: 18>}, {transform_indices = @transform_2, window_bounds = array<i64: 1>}, {transform_indices = @transform_3, window_bounds = array<i64: 1, 4, 4, 128>}]} {
    %c0 = arith.constant 0 : index
    %c0_0 = arith.constant 0 : index
    %c0_1 = arith.constant 0 : index
    %c0_2 = arith.constant 0 : index
    %0 = vector.load %arg1[%c0, %c0_0, %c0_1, %c0_2] : memref<1x4x4x128xf32, #tpu.memory_space<vmem>>, vector<1x4x4x128xf32>
    %1 = vector.shape_cast %0 : vector<1x4x4x128xf32> to vector<4x4x128xf32>
    %cst = arith.constant 0.000000e+00 : f32
    %2 = vector.broadcast %cst : f32 to vector<6x6xf32>
    %c0_3 = arith.constant 0 : index
    %c0_4 = arith.constant 0 : index
    %3 = vector.load %arg5[%c0_3, %c0_4] : memref<6x6xf32, #tpu.memory_space<vmem>>, vector<6x6xf32>
    tpu.vector_store %arg5[%c0_3, %c0_4], %2 {strides = array<i32>} : memref<6x6xf32, #tpu.memory_space<vmem>>, vector<6x6xf32>,
    %cst_5 = arith.constant 0.000000e+00 : f32
    %4 = vector.broadcast %cst_5 : f32 to vector<6x6xf32>
    %c0_6 = arith.constant 0 : index
    %c0_7 = arith.constant 0 : index
    %5 = vector.load %arg6[%c0_6, %c0_7] : memref<6x6xf32, #tpu.memory_space<vmem>>, vector<6x6xf32>
    tpu.vector_store %arg6[%c0_6, %c0_7], %4 {strides = array<i32>} : memref<6x6xf32, #tpu.memory_space<vmem>>, vector<6x6xf32>,
    %cst_8 = arith.constant dense<0.000000e+00> : vector<4x4xf32>
    %6 = vector.multi_reduction <add>, %1, %cst_8 [2] : vector<4x4x128xf32> to vector<4x4xf32>
    %cst_9 = arith.constant 1.280000e+02 : f32
    %7 = vector.broadcast %cst_9 : f32 to vector<4x4xf32>
    %8 = arith.divf %6, %7 : vector<4x4xf32>
    %c1 = arith.constant 1 : index
    %c1_10 = arith.constant 1 : index
    %9 = vector.load %arg5[%c1, %c1_10] : memref<6x6xf32, #tpu.memory_space<vmem>>, vector<4x4xf32>
    tpu.vector_store %arg5[%c1, %c1_10], %8 {strides = array<i32>} : memref<6x6xf32, #tpu.memory_space<vmem>>, vector<4x4xf32>,
    %cst_11 = arith.constant dense<0xFF800000> : vector<4x4xf32>
    %10 = vector.multi_reduction <maximumf>, %1, %cst_11 [2] : vector<4x4x128xf32> to vector<4x4xf32>
    %c1_12 = arith.constant 1 : index
    %c1_13 = arith.constant 1 : index
    %11 = vector.load %arg6[%c1_12, %c1_13] : memref<6x6xf32, #tpu.memory_space<vmem>>, vector<4x4xf32>
    tpu.vector_store %arg6[%c1_12, %c1_13], %10 {strides = array<i32>} : memref<6x6xf32, #tpu.memory_space<vmem>>, vector<4x4xf32>,
    %cst_14 = arith.constant 0.000000e+00 : f32
    %12 = vector.broadcast %cst_14 : f32 to vector<4x4xf32>
    %c0_15 = arith.constant 0 : index
    %13 = memref.load %arg3[%c0_15] : memref<1xf32, #tpu.memory_space<smem>>
    %14 = vector.broadcast %13 : f32 to vector<4x4xf32>
    %15 = arith.addf %12, %14 : vector<4x4xf32>
    %c0_16 = arith.constant 0 : index
    %16 = memref.load %arg2[%c0_16] : memref<18xf32, #tpu.memory_space<smem>>
    %c0_17 = arith.constant 0 : index
    %c0_18 = arith.constant 0 : index
    %17 = vector.load %arg5[%c0_17, %c0_18] : memref<6x6xf32, #tpu.memory_space<vmem>>, vector<4x4xf32>
    %18 = vector.broadcast %16 : f32 to vector<4x4xf32>
    %19 = arith.mulf %18, %17 : vector<4x4xf32>
    %20 = arith.addf %15, %19 : vector<4x4xf32>
    %c9 = arith.constant 9 : index
    %21 = memref.load %arg2[%c9] : memref<18xf32, #tpu.memory_space<smem>>
    %c0_19 = arith.constant 0 : index
    %c0_20 = arith.constant 0 : index
    %22 = vector.load %arg6[%c0_19, %c0_20] : memref<6x6xf32, #tpu.memory_space<vmem>>, vector<4x4xf32>
    %23 = vector.broadcast %21 : f32 to vector<4x4xf32>
    %24 = arith.mulf %23, %22 : vector<4x4xf32>
    %25 = arith.addf %20, %24 : vector<4x4xf32>
    %c1_21 = arith.constant 1 : index
    %26 = memref.load %arg2[%c1_21] : memref<18xf32, #tpu.memory_space<smem>>
    %c0_22 = arith.constant 0 : index
    %c1_23 = arith.constant 1 : index
    %27 = vector.load %arg5[%c0_22, %c1_23] : memref<6x6xf32, #tpu.memory_space<vmem>>, vector<4x4xf32>
    %28 = vector.broadcast %26 : f32 to vector<4x4xf32>
    %29 = arith.mulf %28, %27 : vector<4x4xf32>
    %30 = arith.addf %25, %29 : vector<4x4xf32>
    %c10 = arith.constant 10 : index
    %31 = memref.load %arg2[%c10] : memref<18xf32, #tpu.memory_space<smem>>
    %c0_24 = arith.constant 0 : index
    %c1_25 = arith.constant 1 : index
    %32 = vector.load %arg6[%c0_24, %c1_25] : memref<6x6xf32, #tpu.memory_space<vmem>>, vector<4x4xf32>
    %33 = vector.broadcast %31 : f32 to vector<4x4xf32>
    %34 = arith.mulf %33, %32 : vector<4x4xf32>
    %35 = arith.addf %30, %34 : vector<4x4xf32>
    %c2 = arith.constant 2 : index
    %36 = memref.load %arg2[%c2] : memref<18xf32, #tpu.memory_space<smem>>
    %c0_26 = arith.constant 0 : index
    %c2_27 = arith.constant 2 : index
    %37 = vector.load %arg5[%c0_26, %c2_27] : memref<6x6xf32, #tpu.memory_space<vmem>>, vector<4x4xf32>
    %38 = vector.broadcast %36 : f32 to vector<4x4xf32>
    %39 = arith.mulf %38, %37 : vector<4x4xf32>
    %40 = arith.addf %35, %39 : vector<4x4xf32>
    %c11 = arith.constant 11 : index
    %41 = memref.load %arg2[%c11] : memref<18xf32, #tpu.memory_space<smem>>
    %c0_28 = arith.constant 0 : index
    %c2_29 = arith.constant 2 : index
    %42 = vector.load %arg6[%c0_28, %c2_29] : memref<6x6xf32, #tpu.memory_space<vmem>>, vector<4x4xf32>
    %43 = vector.broadcast %41 : f32 to vector<4x4xf32>
    %44 = arith.mulf %43, %42 : vector<4x4xf32>
    %45 = arith.addf %40, %44 : vector<4x4xf32>
    %c3 = arith.constant 3 : index
    %46 = memref.load %arg2[%c3] : memref<18xf32, #tpu.memory_space<smem>>
    %c1_30 = arith.constant 1 : index
    %c0_31 = arith.constant 0 : index
    %47 = vector.load %arg5[%c1_30, %c0_31] : memref<6x6xf32, #tpu.memory_space<vmem>>, vector<4x4xf32>
    %48 = vector.broadcast %46 : f32 to vector<4x4xf32>
    %49 = arith.mulf %48, %47 : vector<4x4xf32>
    %50 = arith.addf %45, %49 : vector<4x4xf32>
    %c12 = arith.constant 12 : index
    %51 = memref.load %arg2[%c12] : memref<18xf32, #tpu.memory_space<smem>>
    %c1_32 = arith.constant 1 : index
    %c0_33 = arith.constant 0 : index
    %52 = vector.load %arg6[%c1_32, %c0_33] : memref<6x6xf32, #tpu.memory_space<vmem>>, vector<4x4xf32>
    %53 = vector.broadcast %51 : f32 to vector<4x4xf32>
    %54 = arith.mulf %53, %52 : vector<4x4xf32>
    %55 = arith.addf %50, %54 : vector<4x4xf32>
    %c4 = arith.constant 4 : index
    %56 = memref.load %arg2[%c4] : memref<18xf32, #tpu.memory_space<smem>>
    %c1_34 = arith.constant 1 : index
    %c1_35 = arith.constant 1 : index
    %57 = vector.load %arg5[%c1_34, %c1_35] : memref<6x6xf32, #tpu.memory_space<vmem>>, vector<4x4xf32>
    %58 = vector.broadcast %56 : f32 to vector<4x4xf32>
    %59 = arith.mulf %58, %57 : vector<4x4xf32>
    %60 = arith.addf %55, %59 : vector<4x4xf32>
    %c13 = arith.constant 13 : index
    %61 = memref.load %arg2[%c13] : memref<18xf32, #tpu.memory_space<smem>>
    %c1_36 = arith.constant 1 : index
    %c1_37 = arith.constant 1 : index
    %62 = vector.load %arg6[%c1_36, %c1_37] : memref<6x6xf32, #tpu.memory_space<vmem>>, vector<4x4xf32>
    %63 = vector.broadcast %61 : f32 to vector<4x4xf32>
    %64 = arith.mulf %63, %62 : vector<4x4xf32>
    %65 = arith.addf %60, %64 : vector<4x4xf32>
    %c5 = arith.constant 5 : index
    %66 = memref.load %arg2[%c5] : memref<18xf32, #tpu.memory_space<smem>>
    %c1_38 = arith.constant 1 : index
    %c2_39 = arith.constant 2 : index
    %67 = vector.load %arg5[%c1_38, %c2_39] : memref<6x6xf32, #tpu.memory_space<vmem>>, vector<4x4xf32>
    %68 = vector.broadcast %66 : f32 to vector<4x4xf32>
    %69 = arith.mulf %68, %67 : vector<4x4xf32>
    %70 = arith.addf %65, %69 : vector<4x4xf32>
    %c14 = arith.constant 14 : index
    %71 = memref.load %arg2[%c14] : memref<18xf32, #tpu.memory_space<smem>>
    %c1_40 = arith.constant 1 : index
    %c2_41 = arith.constant 2 : index
    %72 = vector.load %arg6[%c1_40, %c2_41] : memref<6x6xf32, #tpu.memory_space<vmem>>, vector<4x4xf32>
    %73 = vector.broadcast %71 : f32 to vector<4x4xf32>
    %74 = arith.mulf %73, %72 : vector<4x4xf32>
    %75 = arith.addf %70, %74 : vector<4x4xf32>
    %c6 = arith.constant 6 : index
    %76 = memref.load %arg2[%c6] : memref<18xf32, #tpu.memory_space<smem>>
    %c2_42 = arith.constant 2 : index
    %c0_43 = arith.constant 0 : index
    %77 = vector.load %arg5[%c2_42, %c0_43] : memref<6x6xf32, #tpu.memory_space<vmem>>, vector<4x4xf32>
    %78 = vector.broadcast %76 : f32 to vector<4x4xf32>
    %79 = arith.mulf %78, %77 : vector<4x4xf32>
    %80 = arith.addf %75, %79 : vector<4x4xf32>
    %c15 = arith.constant 15 : index
    %81 = memref.load %arg2[%c15] : memref<18xf32, #tpu.memory_space<smem>>
    %c2_44 = arith.constant 2 : index
    %c0_45 = arith.constant 0 : index
    %82 = vector.load %arg6[%c2_44, %c0_45] : memref<6x6xf32, #tpu.memory_space<vmem>>, vector<4x4xf32>
    %83 = vector.broadcast %81 : f32 to vector<4x4xf32>
    %84 = arith.mulf %83, %82 : vector<4x4xf32>
    %85 = arith.addf %80, %84 : vector<4x4xf32>
    %c7 = arith.constant 7 : index
    %86 = memref.load %arg2[%c7] : memref<18xf32, #tpu.memory_space<smem>>
    %c2_46 = arith.constant 2 : index
    %c1_47 = arith.constant 1 : index
    %87 = vector.load %arg5[%c2_46, %c1_47] : memref<6x6xf32, #tpu.memory_space<vmem>>, vector<4x4xf32>
    %88 = vector.broadcast %86 : f32 to vector<4x4xf32>
    %89 = arith.mulf %88, %87 : vector<4x4xf32>
    %90 = arith.addf %85, %89 : vector<4x4xf32>
    %c16 = arith.constant 16 : index
    %91 = memref.load %arg2[%c16] : memref<18xf32, #tpu.memory_space<smem>>
    %c2_48 = arith.constant 2 : index
    %c1_49 = arith.constant 1 : index
    %92 = vector.load %arg6[%c2_48, %c1_49] : memref<6x6xf32, #tpu.memory_space<vmem>>, vector<4x4xf32>
    %93 = vector.broadcast %91 : f32 to vector<4x4xf32>
    %94 = arith.mulf %93, %92 : vector<4x4xf32>
    %95 = arith.addf %90, %94 : vector<4x4xf32>
    %c8 = arith.constant 8 : index
    %96 = memref.load %arg2[%c8] : memref<18xf32, #tpu.memory_space<smem>>
    %c2_50 = arith.constant 2 : index
    %c2_51 = arith.constant 2 : index
    %97 = vector.load %arg5[%c2_50, %c2_51] : memref<6x6xf32, #tpu.memory_space<vmem>>, vector<4x4xf32>
    %98 = vector.broadcast %96 : f32 to vector<4x4xf32>
    %99 = arith.mulf %98, %97 : vector<4x4xf32>
    %100 = arith.addf %95, %99 : vector<4x4xf32>
    %c17 = arith.constant 17 : index
    %101 = memref.load %arg2[%c17] : memref<18xf32, #tpu.memory_space<smem>>
    %c2_52 = arith.constant 2 : index
    %c2_53 = arith.constant 2 : index
    %102 = vector.load %arg6[%c2_52, %c2_53] : memref<6x6xf32, #tpu.memory_space<vmem>>, vector<4x4xf32>
    %103 = vector.broadcast %101 : f32 to vector<4x4xf32>
    %104 = arith.mulf %103, %102 : vector<4x4xf32>
    %105 = arith.addf %100, %104 : vector<4x4xf32>
    %106 = arith.negf %105 : vector<4x4xf32>
    %107 = math.exp %106 : vector<4x4xf32>
    %cst_54 = arith.constant 1.000000e+00 : f32
    %108 = vector.broadcast %cst_54 : f32 to vector<4x4xf32>
    %109 = arith.addf %108, %107 : vector<4x4xf32>
    %110 = arith.divf %108, %109 : vector<4x4xf32>
    %111 = vector.shape_cast %110 : vector<4x4xf32> to vector<4x4x1xf32>
    %112 = vector.broadcast %111 : vector<4x4x1xf32> to vector<4x4x128xf32>
    %113 = arith.mulf %1, %112 : vector<4x4x128xf32>
    %c0_55 = arith.constant 0 : index
    %c0_56 = arith.constant 0 : index
    %c0_57 = arith.constant 0 : index
    %c0_58 = arith.constant 0 : index
    %114 = vector.load %arg4[%c0_55, %c0_56, %c0_57, %c0_58] : memref<1x4x4x128xf32, #tpu.memory_space<vmem>>, vector<1x4x4x128xf32>
    %115 = vector.shape_cast %114 : vector<1x4x4x128xf32> to vector<4x4x128xf32>
    %116 = vector.shape_cast %113 : vector<4x4x128xf32> to vector<1x4x4x128xf32>
    tpu.vector_store %arg4[%c0_55, %c0_56, %c0_57, %c0_58], %116 {strides = array<i32>} : memref<1x4x4x128xf32, #tpu.memory_space<vmem>>, vector<1x4x4x128xf32>,
    return
  }
  func.func @transform_0(%arg0: i32) -> (i32, i32, i32, i32) {
    %c0_i32 = arith.constant 0 : i32
    %c0_i32_0 = arith.constant 0 : i32
    %c0_i32_1 = arith.constant 0 : i32
    %c0_i32_2 = arith.constant 0 : i32
    return %arg0, %c0_i32, %c0_i32_0, %c0_i32_1 : i32, i32, i32, i32
  }
  func.func @transform_1(%arg0: i32) -> i32 {
    %c0_i32 = arith.constant 0 : i32
    %c0_i32_0 = arith.constant 0 : i32
    return %c0_i32 : i32
  }
  func.func @transform_2(%arg0: i32) -> i32 {
    %c0_i32 = arith.constant 0 : i32
    %c0_i32_0 = arith.constant 0 : i32
    return %c0_i32 : i32
  }
  func.func @transform_3(%arg0: i32) -> (i32, i32, i32, i32) {
    %c0_i32 = arith.constant 0 : i32
    %c0_i32_0 = arith.constant 0 : i32
    %c0_i32_1 = arith.constant 0 : i32
    %c0_i32_2 = arith.constant 0 : i32
    return %arg0, %c0_i32, %c0_i32_0, %c0_i32_1 : i32, i32, i32, i32
  }
}

module attributes {stable_mosaic.version = 11 : i64} {
  func.func @_bn_stats_kernel(%arg0: i32, %arg1: memref<32x128xf32, #tpu.memory_space<vmem>>, %arg2: memref<2x128xf32, #tpu.memory_space<vmem>>) attributes {dimension_semantics = [#tpu.dimension_semantics<arbitrary>], iteration_bounds = array<i64: 1>, scalar_prefetch = 0 : i64, scratch_operands = 0 : i64, tpu.core_type = #tpu.core_type<tc>, window_params = [{transform_indices = @transform_0, window_bounds = array<i64: 32, 128>}, {pipeline_mode = #tpu.pipeline_mode<synchronous>, transform_indices = @transform_1, window_bounds = array<i64: 2, 128>}]} {
    %c0_i32 = arith.constant 0 : i32
    %0 = arith.cmpi eq, %arg0, %c0_i32 : i32
    %1 = arith.extui %0 : i1 to i32
    %c0_i32_0 = arith.constant 0 : i32
    %2 = arith.cmpi ne, %1, %c0_i32_0 : i32
    scf.if %2 {
      %cst_7 = arith.constant 0.000000e+00 : f32
      %13 = vector.broadcast %cst_7 : f32 to vector<2x128xf32>
      %c0_8 = arith.constant 0 : index
      %c0_9 = arith.constant 0 : index
      %14 = vector.load %arg2[%c0_8, %c0_9] : memref<2x128xf32, #tpu.memory_space<vmem>>, vector<2x128xf32>
      tpu.vector_store %arg2[%c0_8, %c0_9], %13 {strides = array<i32>} : memref<2x128xf32, #tpu.memory_space<vmem>>, vector<2x128xf32>,
    } else {
    }
    %c0 = arith.constant 0 : index
    %c0_1 = arith.constant 0 : index
    %3 = vector.load %arg1[%c0, %c0_1] : memref<32x128xf32, #tpu.memory_space<vmem>>, vector<32x128xf32>
    %c0_2 = arith.constant 0 : index
    %c0_3 = arith.constant 0 : index
    %4 = vector.load %arg2[%c0_2, %c0_3] : memref<2x128xf32, #tpu.memory_space<vmem>>, vector<2x128xf32>
    %cst = arith.constant dense<0.000000e+00> : vector<128xf32>
    %5 = vector.multi_reduction <add>, %3, %cst [0] : vector<32x128xf32> to vector<128xf32>
    %6 = arith.mulf %3, %3 : vector<32x128xf32>
    %cst_4 = arith.constant dense<0.000000e+00> : vector<128xf32>
    %7 = vector.multi_reduction <add>, %6, %cst_4 [0] : vector<32x128xf32> to vector<128xf32>
    %8 = vector.shape_cast %5 : vector<128xf32> to vector<1x128xf32>
    %9 = vector.shape_cast %7 : vector<128xf32> to vector<1x128xf32>
    %10 = tpu.concatenate %8, %9 in 0 : vector<1x128xf32>, vector<1x128xf32> -> vector<2x128xf32>
    %11 = arith.addf %4, %10 : vector<2x128xf32>
    %c0_5 = arith.constant 0 : index
    %c0_6 = arith.constant 0 : index
    %12 = vector.load %arg2[%c0_5, %c0_6] : memref<2x128xf32, #tpu.memory_space<vmem>>, vector<2x128xf32>
    tpu.vector_store %arg2[%c0_5, %c0_6], %11 {strides = array<i32>} : memref<2x128xf32, #tpu.memory_space<vmem>>, vector<2x128xf32>,
    return
  }
  func.func @transform_0(%arg0: i32) -> (i32, i32) {
    %c0_i32 = arith.constant 0 : i32
    %c0_i32_0 = arith.constant 0 : i32
    return %arg0, %c0_i32 : i32, i32
  }
  func.func @transform_1(%arg0: i32) -> (i32, i32) {
    %c0_i32 = arith.constant 0 : i32
    %c0_i32_0 = arith.constant 0 : i32
    %c0_i32_1 = arith.constant 0 : i32
    return %c0_i32, %c0_i32_0 : i32, i32
  }
}

module attributes {stable_mosaic.version = 11 : i64} {
  func.func @_bn_apply_kernel(%arg0: i32, %arg1: memref<32x128xf32, #tpu.memory_space<vmem>>, %arg2: memref<2x128xf32, #tpu.memory_space<vmem>>, %arg3: memref<1x128xf32, #tpu.memory_space<vmem>>, %arg4: memref<1x128xf32, #tpu.memory_space<vmem>>, %arg5: memref<32x128xf32, #tpu.memory_space<vmem>>) attributes {dimension_semantics = [#tpu.dimension_semantics<parallel>], iteration_bounds = array<i64: 1>, scalar_prefetch = 0 : i64, scratch_operands = 0 : i64, tpu.core_type = #tpu.core_type<tc>, window_params = [{transform_indices = @transform_0, window_bounds = array<i64: 32, 128>}, {pipeline_mode = #tpu.pipeline_mode<synchronous>, transform_indices = @transform_1, window_bounds = array<i64: 2, 128>}, {pipeline_mode = #tpu.pipeline_mode<synchronous>, transform_indices = @transform_2, window_bounds = array<i64: 1, 128>}, {pipeline_mode = #tpu.pipeline_mode<synchronous>, transform_indices = @transform_3, window_bounds = array<i64: 1, 128>}, {transform_indices = @transform_4, window_bounds = array<i64: 32, 128>}]} {
    %c0 = arith.constant 0 : index
    %c0_0 = arith.constant 0 : index
    %0 = vector.load %arg1[%c0, %c0_0] : memref<32x128xf32, #tpu.memory_space<vmem>>, vector<32x128xf32>
    %c0_1 = arith.constant 0 : index
    %c0_2 = arith.constant 0 : index
    %1 = vector.load %arg2[%c0_1, %c0_2] : memref<2x128xf32, #tpu.memory_space<vmem>>, vector<1x128xf32>
    %2 = vector.shape_cast %1 : vector<1x128xf32> to vector<128xf32>
    %cst = arith.constant 3.125000e-02 : f32
    %3 = vector.broadcast %cst : f32 to vector<128xf32>
    %4 = arith.mulf %2, %3 : vector<128xf32>
    %c1 = arith.constant 1 : index
    %c0_3 = arith.constant 0 : index
    %5 = vector.load %arg2[%c1, %c0_3] : memref<2x128xf32, #tpu.memory_space<vmem>>, vector<1x128xf32>
    %6 = vector.shape_cast %5 : vector<1x128xf32> to vector<128xf32>
    %cst_4 = arith.constant 3.125000e-02 : f32
    %7 = vector.broadcast %cst_4 : f32 to vector<128xf32>
    %8 = arith.mulf %6, %7 : vector<128xf32>
    %9 = arith.mulf %4, %4 : vector<128xf32>
    %10 = arith.subf %8, %9 : vector<128xf32>
    %cst_5 = arith.constant 9.99999974E-6 : f32
    %11 = vector.broadcast %cst_5 : f32 to vector<128xf32>
    %12 = arith.addf %10, %11 : vector<128xf32>
    %13 = math.rsqrt %12 : vector<128xf32>
    %14 = vector.shape_cast %4 : vector<128xf32> to vector<1x128xf32>
    %15 = vector.broadcast %14 : vector<1x128xf32> to vector<32x128xf32>
    %16 = arith.subf %0, %15 : vector<32x128xf32>
    %17 = vector.shape_cast %13 : vector<128xf32> to vector<1x128xf32>
    %18 = vector.broadcast %17 : vector<1x128xf32> to vector<32x128xf32>
    %19 = arith.mulf %16, %18 : vector<32x128xf32>
    %c0_6 = arith.constant 0 : index
    %c0_7 = arith.constant 0 : index
    %20 = vector.load %arg3[%c0_6, %c0_7] : memref<1x128xf32, #tpu.memory_space<vmem>>, vector<1x128xf32>
    %21 = vector.shape_cast %20 : vector<1x128xf32> to vector<128xf32>
    %22 = vector.shape_cast %21 : vector<128xf32> to vector<1x128xf32>
    %23 = vector.broadcast %22 : vector<1x128xf32> to vector<32x128xf32>
    %24 = arith.mulf %19, %23 : vector<32x128xf32>
    %c0_8 = arith.constant 0 : index
    %c0_9 = arith.constant 0 : index
    %25 = vector.load %arg4[%c0_8, %c0_9] : memref<1x128xf32, #tpu.memory_space<vmem>>, vector<1x128xf32>
    %26 = vector.shape_cast %25 : vector<1x128xf32> to vector<128xf32>
    %27 = vector.shape_cast %26 : vector<128xf32> to vector<1x128xf32>
    %28 = vector.broadcast %27 : vector<1x128xf32> to vector<32x128xf32>
    %29 = arith.addf %24, %28 : vector<32x128xf32>
    %c0_10 = arith.constant 0 : index
    %c0_11 = arith.constant 0 : index
    %30 = vector.load %arg5[%c0_10, %c0_11] : memref<32x128xf32, #tpu.memory_space<vmem>>, vector<32x128xf32>
    tpu.vector_store %arg5[%c0_10, %c0_11], %29 {strides = array<i32>} : memref<32x128xf32, #tpu.memory_space<vmem>>, vector<32x128xf32>,
    return
  }
  func.func @transform_0(%arg0: i32) -> (i32, i32) {
    %c0_i32 = arith.constant 0 : i32
    %c0_i32_0 = arith.constant 0 : i32
    return %arg0, %c0_i32 : i32, i32
  }
  func.func @transform_1(%arg0: i32) -> (i32, i32) {
    %c0_i32 = arith.constant 0 : i32
    %c0_i32_0 = arith.constant 0 : i32
    %c0_i32_1 = arith.constant 0 : i32
    return %c0_i32, %c0_i32_0 : i32, i32
  }
  func.func @transform_2(%arg0: i32) -> (i32, i32) {
    %c0_i32 = arith.constant 0 : i32
    %c0_i32_0 = arith.constant 0 : i32
    %c0_i32_1 = arith.constant 0 : i32
    return %c0_i32, %c0_i32_0 : i32, i32
  }
  func.func @transform_3(%arg0: i32) -> (i32, i32) {
    %c0_i32 = arith.constant 0 : i32
    %c0_i32_0 = arith.constant 0 : i32
    %c0_i32_1 = arith.constant 0 : i32
    return %c0_i32, %c0_i32_0 : i32, i32
  }
  func.func @transform_4(%arg0: i32) -> (i32, i32) {
    %c0_i32 = arith.constant 0 : i32
    %c0_i32_0 = arith.constant 0 : i32
    return %arg0, %c0_i32 : i32, i32
  }
}

module attributes {stable_mosaic.version = 11 : i64} {
  func.func @_linear_kernel(%arg0: i32, %arg1: i32, %arg2: i32, %arg3: memref<2x512xf32, #tpu.memory_space<vmem>>, %arg4: memref<512x256xbf16, #tpu.memory_space<vmem>>, %arg5: memref<1x256xf32, #tpu.memory_space<vmem>>, %arg6: memref<2x256xf32, #tpu.memory_space<vmem>>, %arg7: memref<2x256xf32, #tpu.memory_space<vmem>>) attributes {dimension_semantics = [#tpu.dimension_semantics<parallel>, #tpu.dimension_semantics<parallel>, #tpu.dimension_semantics<arbitrary>], iteration_bounds = array<i64: 1, 2, 4>, scalar_prefetch = 0 : i64, scratch_operands = 1 : i64, tpu.core_type = #tpu.core_type<tc>, window_params = [{transform_indices = @transform_0, window_bounds = array<i64: 2, 512>}, {transform_indices = @transform_1, window_bounds = array<i64: 512, 256>}, {transform_indices = @transform_2, window_bounds = array<i64: 1, 256>}, {transform_indices = @transform_3, window_bounds = array<i64: 2, 256>}]} {
    %c0_i32 = arith.constant 0 : i32
    %0 = arith.cmpi eq, %arg2, %c0_i32 : i32
    %1 = arith.extui %0 : i1 to i32
    %c0_i32_0 = arith.constant 0 : i32
    %2 = arith.cmpi ne, %1, %c0_i32_0 : i32
    scf.if %2 {
      %cst_9 = arith.constant 0.000000e+00 : f32
      %13 = vector.broadcast %cst_9 : f32 to vector<2x256xf32>
      %c0_10 = arith.constant 0 : index
      %c0_11 = arith.constant 0 : index
      %14 = vector.load %arg7[%c0_10, %c0_11] : memref<2x256xf32, #tpu.memory_space<vmem>>, vector<2x256xf32>
      tpu.vector_store %arg7[%c0_10, %c0_11], %13 {strides = array<i32>} : memref<2x256xf32, #tpu.memory_space<vmem>>, vector<2x256xf32>,
    } else {
    }
    %c0 = arith.constant 0 : index
    %c0_1 = arith.constant 0 : index
    %3 = vector.load %arg7[%c0, %c0_1] : memref<2x256xf32, #tpu.memory_space<vmem>>, vector<2x256xf32>
    %c0_2 = arith.constant 0 : index
    %c0_3 = arith.constant 0 : index
    %4 = vector.load %arg3[%c0_2, %c0_3] : memref<2x512xf32, #tpu.memory_space<vmem>>, vector<2x512xf32>
    %5 = arith.truncf %4 : vector<2x512xf32> to vector<2x512xbf16>
    %c0_4 = arith.constant 0 : index
    %c0_5 = arith.constant 0 : index
    %6 = vector.load %arg4[%c0_4, %c0_5] : memref<512x256xbf16, #tpu.memory_space<vmem>>, vector<512x256xbf16>
    %cst = arith.constant dense<0.000000e+00> : vector<2x256xf32>
    %7 = tpu.matmul %5, %6, %cst {dimension_numbers = #tpu.dot_dimension_numbers<[1], [0], [0], [1], [0, 0, 1, 1], [], []>} : vector<2x512xbf16>, vector<512x256xbf16>, vector<2x256xf32> -> vector<2x256xf32>
    %8 = arith.addf %3, %7 : vector<2x256xf32>
    %c0_6 = arith.constant 0 : index
    %c0_7 = arith.constant 0 : index
    %9 = vector.load %arg7[%c0_6, %c0_7] : memref<2x256xf32, #tpu.memory_space<vmem>>, vector<2x256xf32>
    tpu.vector_store %arg7[%c0_6, %c0_7], %8 {strides = array<i32>} : memref<2x256xf32, #tpu.memory_space<vmem>>, vector<2x256xf32>,
    %c3_i32 = arith.constant 3 : i32
    %10 = arith.cmpi eq, %arg2, %c3_i32 : i32
    %11 = arith.extui %10 : i1 to i32
    %c0_i32_8 = arith.constant 0 : i32
    %12 = arith.cmpi ne, %11, %c0_i32_8 : i32
    scf.if %12 {
      %c0_9 = arith.constant 0 : index
      %c0_10 = arith.constant 0 : index
      %13 = vector.load %arg7[%c0_9, %c0_10] : memref<2x256xf32, #tpu.memory_space<vmem>>, vector<2x256xf32>
      %c0_11 = arith.constant 0 : index
      %c0_12 = arith.constant 0 : index
      %14 = vector.load %arg5[%c0_11, %c0_12] : memref<1x256xf32, #tpu.memory_space<vmem>>, vector<1x256xf32>
      %15 = vector.broadcast %14 : vector<1x256xf32> to vector<2x256xf32>
      %16 = arith.addf %13, %15 : vector<2x256xf32>
      %cst_13 = arith.constant 0.000000e+00 : f32
      %17 = vector.broadcast %cst_13 : f32 to vector<2x256xf32>
      %18 = arith.maximumf %16, %17 : vector<2x256xf32>
      %c0_14 = arith.constant 0 : index
      %c0_15 = arith.constant 0 : index
      %19 = vector.load %arg6[%c0_14, %c0_15] : memref<2x256xf32, #tpu.memory_space<vmem>>, vector<2x256xf32>
      tpu.vector_store %arg6[%c0_14, %c0_15], %18 {strides = array<i32>} : memref<2x256xf32, #tpu.memory_space<vmem>>, vector<2x256xf32>,
    } else {
    }
    return
  }
  func.func @transform_0(%arg0: i32, %arg1: i32, %arg2: i32) -> (i32, i32) {
    %c0_i32 = arith.constant 0 : i32
    return %arg0, %arg2 : i32, i32
  }
  func.func @transform_1(%arg0: i32, %arg1: i32, %arg2: i32) -> (i32, i32) {
    %c0_i32 = arith.constant 0 : i32
    return %arg2, %arg1 : i32, i32
  }
  func.func @transform_2(%arg0: i32, %arg1: i32, %arg2: i32) -> (i32, i32) {
    %c0_i32 = arith.constant 0 : i32
    %c0_i32_0 = arith.constant 0 : i32
    return %c0_i32, %arg1 : i32, i32
  }
  func.func @transform_3(%arg0: i32, %arg1: i32, %arg2: i32) -> (i32, i32) {
    %c0_i32 = arith.constant 0 : i32
    return %arg0, %arg1 : i32, i32
  }
}

module attributes {stable_mosaic.version = 11 : i64} {
  func.func @_linear_kernel(%arg0: i32, %arg1: i32, %arg2: i32, %arg3: memref<2x512xf32, #tpu.memory_space<vmem>>, %arg4: memref<512x10xbf16, #tpu.memory_space<vmem>>, %arg5: memref<1x10xf32, #tpu.memory_space<vmem>>, %arg6: memref<2x10xf32, #tpu.memory_space<vmem>>, %arg7: memref<2x10xf32, #tpu.memory_space<vmem>>) attributes {dimension_semantics = [#tpu.dimension_semantics<parallel>, #tpu.dimension_semantics<parallel>, #tpu.dimension_semantics<arbitrary>], iteration_bounds = array<i64: 1, 1, 1>, scalar_prefetch = 0 : i64, scratch_operands = 1 : i64, tpu.core_type = #tpu.core_type<tc>, window_params = [{transform_indices = @transform_0, window_bounds = array<i64: 2, 512>}, {transform_indices = @transform_1, window_bounds = array<i64: 512, 10>}, {transform_indices = @transform_2, window_bounds = array<i64: 1, 10>}, {transform_indices = @transform_3, window_bounds = array<i64: 2, 10>}]} {
    %c0_i32 = arith.constant 0 : i32
    %0 = arith.cmpi eq, %arg2, %c0_i32 : i32
    %1 = arith.extui %0 : i1 to i32
    %c0_i32_0 = arith.constant 0 : i32
    %2 = arith.cmpi ne, %1, %c0_i32_0 : i32
    scf.if %2 {
      %cst_10 = arith.constant 0.000000e+00 : f32
      %13 = vector.broadcast %cst_10 : f32 to vector<2x10xf32>
      %c0_11 = arith.constant 0 : index
      %c0_12 = arith.constant 0 : index
      %14 = vector.load %arg7[%c0_11, %c0_12] : memref<2x10xf32, #tpu.memory_space<vmem>>, vector<2x10xf32>
      tpu.vector_store %arg7[%c0_11, %c0_12], %13 {strides = array<i32>} : memref<2x10xf32, #tpu.memory_space<vmem>>, vector<2x10xf32>,
    } else {
    }
    %c0 = arith.constant 0 : index
    %c0_1 = arith.constant 0 : index
    %3 = vector.load %arg7[%c0, %c0_1] : memref<2x10xf32, #tpu.memory_space<vmem>>, vector<2x10xf32>
    %c0_2 = arith.constant 0 : index
    %c0_3 = arith.constant 0 : index
    %4 = vector.load %arg3[%c0_2, %c0_3] : memref<2x512xf32, #tpu.memory_space<vmem>>, vector<2x512xf32>
    %5 = arith.truncf %4 : vector<2x512xf32> to vector<2x512xbf16>
    %c0_4 = arith.constant 0 : index
    %c0_5 = arith.constant 0 : index
    %6 = vector.load %arg4[%c0_4, %c0_5] : memref<512x10xbf16, #tpu.memory_space<vmem>>, vector<512x10xbf16>
    %cst = arith.constant dense<0.000000e+00> : vector<2x10xf32>
    %7 = tpu.matmul %5, %6, %cst {dimension_numbers = #tpu.dot_dimension_numbers<[1], [0], [0], [1], [0, 0, 1, 1], [], []>} : vector<2x512xbf16>, vector<512x10xbf16>, vector<2x10xf32> -> vector<2x10xf32>
    %8 = arith.addf %3, %7 : vector<2x10xf32>
    %c0_6 = arith.constant 0 : index
    %c0_7 = arith.constant 0 : index
    %9 = vector.load %arg7[%c0_6, %c0_7] : memref<2x10xf32, #tpu.memory_space<vmem>>, vector<2x10xf32>
    tpu.vector_store %arg7[%c0_6, %c0_7], %8 {strides = array<i32>} : memref<2x10xf32, #tpu.memory_space<vmem>>, vector<2x10xf32>,
    %c0_i32_8 = arith.constant 0 : i32
    %10 = arith.cmpi eq, %arg2, %c0_i32_8 : i32
    %11 = arith.extui %10 : i1 to i32
    %c0_i32_9 = arith.constant 0 : i32
    %12 = arith.cmpi ne, %11, %c0_i32_9 : i32
    scf.if %12 {
      %c0_10 = arith.constant 0 : index
      %c0_11 = arith.constant 0 : index
      %13 = vector.load %arg7[%c0_10, %c0_11] : memref<2x10xf32, #tpu.memory_space<vmem>>, vector<2x10xf32>
      %c0_12 = arith.constant 0 : index
      %c0_13 = arith.constant 0 : index
      %14 = vector.load %arg5[%c0_12, %c0_13] : memref<1x10xf32, #tpu.memory_space<vmem>>, vector<1x10xf32>
      %15 = vector.broadcast %14 : vector<1x10xf32> to vector<2x10xf32>
      %16 = arith.addf %13, %15 : vector<2x10xf32>
      %c0_14 = arith.constant 0 : index
      %c0_15 = arith.constant 0 : index
      %17 = vector.load %arg6[%c0_14, %c0_15] : memref<2x10xf32, #tpu.memory_space<vmem>>, vector<2x10xf32>
      tpu.vector_store %arg6[%c0_14, %c0_15], %16 {strides = array<i32>} : memref<2x10xf32, #tpu.memory_space<vmem>>, vector<2x10xf32>,
    } else {
    }
    return
  }
  func.func @transform_0(%arg0: i32, %arg1: i32, %arg2: i32) -> (i32, i32) {
    %c0_i32 = arith.constant 0 : i32
    return %arg0, %arg2 : i32, i32
  }
  func.func @transform_1(%arg0: i32, %arg1: i32, %arg2: i32) -> (i32, i32) {
    %c0_i32 = arith.constant 0 : i32
    return %arg2, %arg1 : i32, i32
  }
  func.func @transform_2(%arg0: i32, %arg1: i32, %arg2: i32) -> (i32, i32) {
    %c0_i32 = arith.constant 0 : i32
    %c0_i32_0 = arith.constant 0 : i32
    return %c0_i32, %arg1 : i32, i32
  }
  func.func @transform_3(%arg0: i32, %arg1: i32, %arg2: i32) -> (i32, i32) {
    %c0_i32 = arith.constant 0 : i32
    return %arg0, %arg1 : i32, i32
  }
}

</mosaic_0001>

<bundles_post_ra>
// kernel: squeeze.4
= control target key start
LH: loop header
LB: loop body
LE: loop exit
PB: predicated region body
PF: predicated region fallthrough
CT: control target
= control target key end

     0   :  { %vm7_vm0 = vcmask 23552   ;;  %s30_s8 = smov 3   ;;  %vm13_vm1 = vcmask 72752   ;;  %vm19_vm2 = vcmask 48152   ;;  %s47_s0 = inlined_call_operand.vmem [shape: f32[3,3], index: 0, kind: input, shape index: {}]   ;;  %s48_s1 = inlined_call_operand.vmem [shape: f32[9], index: 1, kind: output, shape index: {}]  }
   0x1   :  { %v4_v0 = vld [vmem:[%s47_s0] sm:$0xf]  ;;  %s29_s0 = smov 6  }
   0x2   :  { %5 = vst [vmem:[#allocation1] sm:$0xf] %v4_v0 }
   0x9   :  { %v10_v1 = vld [vmem:[#allocation1 + $0x2] sm:$0x1]   ;;  %v6_v2 = vld [vmem:[#allocation1] sm:$0x1]   ;;  %v16_v3 = vld [vmem:[#allocation1 + $0x1] sm:$0x1]  }
   0xa   :  { %11 = vrot.lane.b32.xlu0 %v10_v1, %s29_s0  ;;  %8 = vst.msk [vmem:[#allocation0] sm:$0x1] %vm7_vm0, %v6_v2  }
   0xe   :  { %17 = vrot.lane.b32.xlu0 %v16_v3, %s30_s8 }
  0x7c   :  { %v12_v4 = vpop.permute.xlu0 %11  }
  0x7d   :  { %14 = vst.msk [vmem:[#allocation0] sm:$0x1] %vm13_vm1, %v12_v4  }
  0x80   :  { %v18_v5 = vpop.permute.xlu0 %17  }
  0x81   :  { %20 = vst.msk [vmem:[#allocation0] sm:$0x1] %vm19_vm2, %v18_v5  }
  0x88   :  { %v24_v6 = vld [vmem:[#allocation0] sm:$0x1] }
  0x89   :  { %26 = vst [vmem:[%s48_s1] sm:$0x1] %v24_v6 }

// kernel: forward.16
= control target key start
LH: loop header
LB: loop body
LE: loop exit
PB: predicated region body
PF: predicated region fallthrough
CT: control target
= control target key end

     0   :  { %s389_s6 = smov 0   ;;  %s391_s7 = smov 0   ;;  %s434_s0 = inlined_call_operand.vmem [shape: f32[2,16,8,128], index: 0, kind: input, shape index: {}]   ;;  %s435_s1 = inlined_call_operand.vmem [shape: f32[2,8,8,64], index: 1, kind: output, shape index: {}]  }
   0x1   :  { %s393_s8 = smov 0  }
   0x2 LB: > { %s23_s9 = sadd.s32 1, %s372_s7  ;;  %p320_p0 = scmp.ge.s32.totalorder %s376_s8, 1  ;;  %s376_s8 = sphi %s393_s8, %s11_s8   ;;  %s372_s7 = sphi %s391_s7, %s437_s7   ;;  %s368_s6 = sphi %s389_s6, %s436_s6  }
   0x3   : > { %p25_p1 = scmp.ge.s32.totalorder %s23_s9, 2  ;;  %p108_p2 = scmp.lt.s32.totalorder %s376_s8, 3 }
   0x5   : > { %s439_s9 = smov (%p25_p1, %s23_s9), 0  ;;  %p109_p3 = pnand %p320_p0, %p108_p2 }
   0x6   : > { %p137_p4 = scmp.lt.s32.totalorder (!%p109_p3), %s368_s6, 1  ;;  %s378_s14 = smov (!%p109_p3), 64   ;;  %vm220_vm0 = vcmask (!%p109_p3), 523264  }
   0x7   : > { %112 = sbr.rel (%p109_p3) target bundleno = 151 (0x97), region = 24 }
   0xe   : > { %s441_s6 = smov (!%p137_p4, %s368_s6), 1 }
   0xf   : > { %s327_s10 = sshll.u32 %s441_s6, 7  ;;  %s328_s15 = sshll.u32 %s441_s6, 6 }
  0x10   : > { %s144_s13 = scalar_lea.vmem %s434_s0, %s327_s10  ;;  %s154_s18 = scalar_lea.vmem %s435_s1, %s328_s15 }
  0x11   : > { %v160_v0 = vld [vmem:[%s144_s13 + $0x20] sm:$0xff]  ;;  %v161_v1 = vld [vmem:[%s144_s13 + $0x28] sm:$0xff]  ;;  %v162_v5 = vld [vmem:[%s144_s13 + $0x30] sm:$0xff] }
  0x12   : > { %v156_v2 = vld [vmem:[%s144_s13] sm:$0xff]  ;;  %v174_v3 = vmax.f32 %v160_v0, %v161_v1  ;;  %v157_v4 = vld [vmem:[%s144_s13 + $0x8] sm:$0xff]  ;;  %v163_v6 = vld [vmem:[%s144_s13 + $0x38] sm:$0xff] }
  0x13   : > { %v172_v7 = vmax.f32 %v156_v2, %v157_v4  ;;  %v158_v8 = vld [vmem:[%s144_s13 + $0x10] sm:$0xff]  ;;  %v159_v9 = vld [vmem:[%s144_s13 + $0x18] sm:$0xff]  ;;  %v175_v10 = vmax.f32 %v162_v5, %v163_v6  ;;  %v164_v14 = vld [vmem:[%s144_s13 + $0x40] sm:$0xff] }
  0x14   : > { %192 = vrot.lane.b32.xlu1 %v174_v3, %s378_s14  ;;  %v173_v11 = vmax.f32 %v158_v8, %v159_v9  ;;  %v166_v12 = vld [vmem:[%s144_s13 + $0x50] sm:$0xff]  ;;  %v167_v13 = vld [vmem:[%s144_s13 + $0x58] sm:$0xff]  ;;  %v165_v15 = vld [vmem:[%s144_s13 + $0x48] sm:$0xff] }
  0x15   : > { %188 = vrot.lane.b32.xlu0 %v172_v7, %s378_s14  ;;  %v177_v16 = vmax.f32 %v166_v12, %v167_v13  ;;  %v176_v17 = vmax.f32 %v164_v14, %v165_v15  ;;  %v170_v18 = vld [vmem:[%s144_s13 + $0x70] sm:$0xff]  ;;  %v171_v19 = vld [vmem:[%s144_s13 + $0x78] sm:$0xff]  ;;  %v168_v20 = vld [vmem:[%s144_s13 + $0x60] sm:$0xff] }
  0x16   : > { %v169_v21 = vld [vmem:[%s144_s13 + $0x68] sm:$0xff]  ;;  %v179_v22 = vmax.f32 %v170_v18, %v171_v19 }
  0x17   : > { %v178_v23 = vmax.f32 %v168_v20, %v169_v21 }
  0x18   : > { %194 = vrot.lane.b32.xlu1 %v175_v10, %s378_s14 }
  0x19   : > { %190 = vrot.lane.b32.xlu0 %v173_v11, %s378_s14 }
  0x1c   : > { %198 = vrot.lane.b32.xlu1 %v177_v16, %s378_s14 }
  0x1d   : > { %196 = vrot.lane.b32.xlu0 %v176_v17, %s378_s14 }
  0x20   : > { %202 = vrot.lane.b32.xlu1 %v179_v22, %s378_s14 }
  0x21   : > { %200 = vrot.lane.b32.xlu0 %v178_v23, %s378_s14 }
  0x86   : > { %v193_v24 = vpop.permute.xlu1 %192 }
  0x87   : > { %v214_v25 = vmax.f32 %v174_v3, %v193_v24  ;;  %v189_v26 = vpop.permute.xlu0 %188 }
  0x88   : > { %v212_v27 = vmax.f32 %v172_v7, %v189_v26 }
  0x89   : > { %223 = vst.msk [vmem:[%s154_s18 + $0x10] sm:$0xff] %vm220_vm0, %v214_v25 }
  0x8a   : > { %221 = vst.msk [vmem:[%s154_s18] sm:$0xff] %vm220_vm0, %v212_v27  ;;  %v195_v28 = vpop.permute.xlu1 %194 }
  0x8b   : > { %v215_v29 = vmax.f32 %v175_v10, %v195_v28  ;;  %v191_v30 = vpop.permute.xlu0 %190 }
  0x8c   : > { %v213_v31 = vmax.f32 %v173_v11, %v191_v30 }
  0x8d   : > { %224 = vst.msk [vmem:[%s154_s18 + $0x18] sm:$0xff] %vm220_vm0, %v215_v29 }
  0x8e   : > { %222 = vst.msk [vmem:[%s154_s18 + $0x8] sm:$0xff] %vm220_vm0, %v213_v31  ;;  %v199_v32 = vpop.permute.xlu1 %198 }
  0x8f   : > { %v217_v33 = vmax.f32 %v177_v16, %v199_v32  ;;  %v197_v34 = vpop.permute.xlu0 %196 }
  0x90   : > { %v216_v35 = vmax.f32 %v176_v17, %v197_v34 }
  0x91   : > { %226 = vst.msk [vmem:[%s154_s18 + $0x28] sm:$0xff] %vm220_vm0, %v217_v33 }
  0x92   : > { %225 = vst.msk [vmem:[%s154_s18 + $0x20] sm:$0xff] %vm220_vm0, %v216_v35  ;;  %v203_v36 = vpop.permute.xlu1 %202 }
  0x93   : > { %v219_v37 = vmax.f32 %v179_v22, %v203_v36  ;;  %v201_v38 = vpop.permute.xlu0 %200 }
  0x94   : > { %v218_v39 = vmax.f32 %v178_v23, %v201_v38 }
  0x95   : > { %228 = vst.msk [vmem:[%s154_s18 + $0x38] sm:$0xff] %vm220_vm0, %v219_v37 }
  0x96   : > { %227 = vst.msk [vmem:[%s154_s18 + $0x30] sm:$0xff] %vm220_vm0, %v218_v39 }
  0x97 PF: > { %s11_s8 = sadd.s32 1, %s376_s8   ;;  %s436_s6 = smov %s372_s7 }
  0x98   : > { %p8_p5 = scmp.ge.s32.totalorder %s11_s8, 4   ;;  %s437_s7 = smov %s439_s9 }
  0x9a   :  { %10 = sbr.rel (!%p8_p5) target bundleno = 2 (0x2), region = 54 }

// kernel: forward.17
= control target key start
LH: loop header
LB: loop body
LE: loop exit
PB: predicated region body
PF: predicated region fallthrough
CT: control target
= control target key end

     0   :  { %s912_s0 = inlined_call_operand.vmem [shape: f32[2,8,8,64], index: 0, kind: input, shape index: {}]   ;;  %s913_s1 = inlined_call_operand.vmem [shape: f32[18], index: 1, kind: input, shape index: {}]   ;;  %s914_s2 = inlined_call_operand.<no memory space> [shape: f32[1], index: 2, kind: input, shape index: {}]   ;;  %s915_s3 = inlined_call_operand.vmem [shape: f32[2,8,8,64], index: 3, kind: output, shape index: {}]  }
   0x1   :  { %8 = sst [smem:[#allocation4]] %s914_s2 }
   0x2   :  { %9 = vsyncpa [#allocation6], 0  ;;  %s754_s14 = smov 0  }
   0x3 LB: > { %s641_s15 = sadd.s32 4294967295, %s725_s14   ;;  %p643_p0 = scmp.ge.s32.totalorder %s725_s14, 1  ;;  %s725_s14 = sphi %s754_s14, %s15_s14  }
   0x4   : > { %p114_p1 = scmp.lt.s32.totalorder %s725_s14, 3  ;;  %s127_s18 = sshll.u32 %s913_s1, 4  ;;  %s128_s18 = int_to_ptr.vmem [resolvable:$true] %s127_s18 }
   0x5   : > { %p682_p3 = scmp.eq.s32.totalorder %s641_s15, 0  ;;  %s700_s19 = scalar_lea.vmem %s128_s18, 16 }
   0x6   : > { %p765_p2 = pnand %p643_p0, %p114_p1  ;;  %p701_p6 = scmp.ne.s32.totalorder %s128_s18, %s700_s19 }
   0x7   : > { %p708_p10 = scmp.lt.s32.totalorder %s128_s18, %s128_s18  ;;  %p709_p11 = scmp.lt.s32.totalorder %s700_s19, %s700_s19 }
   0x8   : > { %p678_p4 = pneg %p765_p2 }
   0x9   : > { %p710_p12 = por %p709_p11, %p708_p10 }
   0xa   : > { %p679_p5 = pnand %p682_p3, %p678_p4 }
   0xc   : > { %p702_p7 = pneg %p679_p5 }
   0xe   : > { %p703_p8 = pnand %p702_p7, %p701_p6 }
  0x10   : > { %p704_p9 = pneg %p703_p8 }
  0x12   : > { %p711_p13 = pnand %p710_p12, %p704_p9 }
  0x14   : > { %714 = shalt.err (!%p711_p13)
}
  0x15   : > { %s727_s20 = smov [#allocation5]   ;;  %151 = sbr.rel (%p765_p2) target bundleno = 529 (0x211), region = 32 }
  0x16   : > { %681 = dma.vmem_to_smem (!%p679_p5), %s128_s18, 16, %s727_s20, [#allocation6]  }
  0x1c   : > { %720 = dma.done.wait (%p682_p3), [#allocation6], 16  }
  0x1d   : > { %722 = vsyncadd (%p682_p3), [#allocation6], 4294967280 }
  0x1e   : > { %157 = sfence }
  0x1f   : > { %p176_p0 = scmp.lt.s32.totalorder %s641_s15, 1  ;;  %vm200_vm0 = vcmask 523264   ;;  %vm194_vm1 = vcmask 80896   ;;  %vm196_vm2 = vcmask 74752   ;;  %v728_v24 = vmov 0.0   ;;  %s653_s25 = sld [smem:[#allocation5 + $0x1]] }
  0x20   : > { %195 = vst.msk [vmem:[#allocation2] sm:$0xff] %vm194_vm1, %v728_v24  ;;  %198 = vst.msk [vmem:[#allocation3] sm:$0xff] %vm194_vm1, %v728_v24  ;;  %v242_v25 = vlaneseq  ;;  %vm277_vm3 = vcmask 1041409   ;;  %vm279_vm4 = vcmask 1042434   ;;  %vm281_vm5 = vcmask 1043459   ;;  %s659_s26 = sld [smem:[#allocation5 + $0x4]] }
  0x21   : > { %s918_s15 = smov (!%p176_p0, %s641_s15), 1  ;;  %197 = vst.msk [vmem:[#allocation2 + $0x8] sm:$0x3] %vm196_vm2, %v728_v24  ;;  %199 = vst.msk [vmem:[#allocation3 + $0x8] sm:$0x3] %vm196_vm2, %v728_v24  ;;  %vm283_vm6 = vcmask 1044484  }
  0x22   : > { %s672_s21 = sshll.u32 %s918_s15, 6  ;;  %v243_v26 = vand.u32 127, %v242_v25  ;;  %v832_v30 = vshrl.u32 %v242_v25, 7  ;;  %vm285_vm7 = vcmask 1045509   ;;  %vm287_vm8 = vcmask 1046534   ;;  %s370_s27 = sld [smem:[#allocation5]] }
  0x23   : > { %s180_s24 = scalar_lea.vmem %s912_s0, %s672_s21  ;;  %vm289_vm9 = vcmask 1047559   ;;  %vm292_vm10 = vcmask 72712   ;;  %s654_s28 = sld [smem:[#allocation5 + $0xa]] }
  0x24   : > { %v784_v0 = vld [vmem:[%s180_s24 + $0x10] sm:$0xff]  ;;  %v786_v1 = vld [vmem:[%s180_s24] sm:$0xff]  ;;  %v788_v2 = vld [vmem:[%s180_s24 + $0x18] sm:$0xff]  ;;  %v244_v29 = vadd.s32 4294967295, %v243_v26  ;;  %s661_s29 = sld [smem:[#allocation5 + $0x5]]  ;;  %s367_s30 = sld [smem:[#allocation4]] }
  0x25   : > { %v207_v3 = vsel %vm200_vm0, %v784_v0, 0.0  ;;  %v201_v4 = vsel %vm200_vm0, %v786_v1, 0.0  ;;  %v794_v5 = vld [vmem:[%s180_s24 + $0x8] sm:$0xff]  ;;  %v210_v6 = vsel %vm200_vm0, %v788_v2, 0.0  ;;  %v802_v9 = vld [vmem:[%s180_s24 + $0x20] sm:$0xff]  ;;  %v294_v13 = vsel %vm200_vm0, %v786_v1, -inf  ;;  %s185_s23 = scalar_lea.vmem %s915_s3, %s672_s21 }
  0x26   : > { %208 = vadd.xlane.f32.xlu1 %v207_v3  ;;  %202 = vadd.xlane.f32.xlu0 %v201_v4  ;;  %v204_v7 = vsel %vm200_vm0, %v794_v5, 0.0  ;;  %v800_v8 = vld [vmem:[%s180_s24 + $0x28] sm:$0xff]  ;;  %v213_v11 = vsel %vm200_vm0, %v802_v9, 0.0  ;;  %v297_v12 = vsel %vm200_vm0, %v794_v5, -inf  ;;  %v812_v14 = vld [vmem:[%s180_s24 + $0x30] sm:$0xff]  ;;  %v300_v15 = vsel %vm200_vm0, %v784_v0, -inf }
  0x27   : > { %v216_v10 = vsel %vm200_vm0, %v800_v8, 0.0  ;;  %v219_v16 = vsel %vm200_vm0, %v812_v14, 0.0  ;;  %v818_v17 = vld [vmem:[%s180_s24 + $0x38] sm:$0xff]  ;;  %v303_v18 = vsel %vm200_vm0, %v788_v2, -inf  ;;  %v306_v20 = vsel %vm200_vm0, %v802_v9, -inf  ;;  %s652_s4 = sld [smem:[#allocation5 + $0x9]] }
  0x28   : > { %v222_v19 = vsel %vm200_vm0, %v818_v17, 0.0  ;;  %v309_v21 = vsel %vm200_vm0, %v800_v8, -inf  ;;  %v312_v22 = vsel %vm200_vm0, %v812_v14, -inf  ;;  %v315_v23 = vsel %vm200_vm0, %v818_v17, -inf  ;;  %s655_s5 = sld [smem:[#allocation5 + $0x2]]  ;;  %s665_s6 = sld [smem:[#allocation5 + $0x7]] }
  0x29   : > { %v835_v33 = vsub.s32 %v244_v29, %v832_v30  ;;  %s729_s7 = smov 127   ;;  %s656_s8 = sld [smem:[#allocation5 + $0xb]] }
  0x2a   : > { %211 = vadd.xlane.f32.xlu1 %v210_v6  ;;  %205 = vadd.xlane.f32.xlu0 %v204_v7  ;;  %s667_s9 = sld [smem:[#allocation5 + $0x8]]  ;;  %s660_s10 = sld [smem:[#allocation5 + $0xd]] }
  0x2b   : > { %s730_s11 = smov 126   ;;  %s662_s12 = sld [smem:[#allocation5 + $0xe]] }
  0x2c   : > { %s666_s13 = sld [smem:[#allocation5 + $0x10]]  ;;  %s668_s16 = sld [smem:[#allocation5 + $0x11]] }
  0x2d   : > { %s657_s17 = sld [smem:[#allocation5 + $0x3]]  ;;  %s658_s18 = sld [smem:[#allocation5 + $0xc]] }
  0x2e   : > { %217 = vadd.xlane.f32.xlu1 %v216_v10  ;;  %214 = vadd.xlane.f32.xlu0 %v213_v11  ;;  %s663_s2 = sld [smem:[#allocation5 + $0x6]]  ;;  %s664_s19 = sld [smem:[#allocation5 + $0xf]] }
  0x32   : > { %298 = vmax.xlane.f32.xlu1 %v297_v12  ;;  %295 = vmax.xlane.f32.xlu0 %v294_v13 }
  0x36   : > { %301 = vmax.xlane.f32.xlu1 %v300_v15  ;;  %220 = vadd.xlane.f32.xlu0 %v219_v16 }
  0x3a   : > { %304 = vmax.xlane.f32.xlu1 %v303_v18  ;;  %223 = vadd.xlane.f32.xlu0 %v222_v19 }
  0x3e   : > { %307 = vmax.xlane.f32.xlu0 %v306_v20  ;;  %310 = vmax.xlane.f32.xlu1 %v309_v21 }
  0x42   : > { %313 = vmax.xlane.f32.xlu0 %v312_v22  ;;  %316 = vmax.xlane.f32.xlu1 %v315_v23 }
  0xb3   : > { %v209_v27 = vpop.xlane.xlu1 %208  ;;  %v203_v28 = vpop.xlane.xlu0 %202 }
  0xb4   : > { %v226_v34 = vmul.f32 0.015625, %v203_v28  ;;  %v228_v37 = vmul.f32 0.015625, %v209_v27  ;;  %v381_v27 = vstv %s653_s25 }
  0xb6   : > { %v248_v40 = vrot.slane %v226_v34, %v835_v33  ;;  %v256_v43 = vrot.slane %v228_v37, %v835_v33  ;;  %v423_v34 = vstv %s659_s26 }
  0xb7   : > { %v212_v31 = vpop.xlane.xlu1 %211  ;;  %v206_v32 = vpop.xlane.xlu0 %205 }
  0xb8   : > { %v227_v35 = vmul.f32 0.015625, %v206_v32  ;;  %v229_v41 = vmul.f32 0.015625, %v212_v31 }
  0xba   : > { %v252_v36 = vrot.slane %v227_v35, %v835_v33  ;;  %v260_v47 = vrot.slane %v229_v41, %v835_v33 }
  0xbb   : > { %v218_v38 = vpop.xlane.xlu1 %217  ;;  %v215_v39 = vpop.xlane.xlu0 %214 }
  0xbc   : > { %v278_v42 = vsel %vm277_vm3, %v252_v36, %v248_v40  ;;  %v230_v44 = vmul.f32 0.015625, %v215_v39  ;;  %v231_v49 = vmul.f32 0.015625, %v218_v38  ;;  %v389_v36 = vstv %s654_s28 }
  0xbd   : > { %v280_v48 = vsel %vm279_vm4, %v256_v43, %v278_v42  ;;  %v439_v38 = vstv %s661_s29  ;;  %v368_v39 = vstv %s367_s30  ;;  %v377_v40 = vstv %s652_s4 }
  0xbe   : > { %v264_v50 = vrot.slane %v230_v44, %v835_v33  ;;  %v282_v53 = vsel %vm281_vm5, %v260_v47, %v280_v48  ;;  %v268_v55 = vrot.slane %v231_v49, %v835_v33  ;;  %v397_v44 = vstv %s655_s5 }
  0xbf   : > { %v299_v45 = vpop.xlane.xlu1 %298  ;;  %v296_v46 = vpop.xlane.xlu0 %295  ;;  %v465_v48 = vstv %s665_s6 }
  0xc0   : > { %v284_v56 = vsel %vm283_vm6, %v264_v50, %v282_v53  ;;  %v333_v57 = vrot.slane %v299_v45, %v835_v33  ;;  %v329_v58 = vrot.slane %v296_v46, %v835_v33  ;;  %v481_v53 = vstv %s667_s9 }
  0xc1   : > { %v286_v4 = vsel %vm285_vm7, %v268_v55, %v284_v56 }
  0xc2   : > { %v358_v7 = vsel %vm277_vm3, %v333_v57, %v329_v58  ;;  %v431_v57 = vstv %s660_s10 }
  0xc3   : > { %v302_v51 = vpop.xlane.xlu1 %301  ;;  %v221_v52 = vpop.xlane.xlu0 %220 }
  0xc4   : > { %v232_v54 = vmul.f32 0.015625, %v221_v52  ;;  %v337_v62 = vrot.slane %v302_v51, %v835_v33  ;;  %v405_v52 = vstv %s656_s8 }
  0xc6   : > { %v272_v59 = vrot.slane %v232_v54, %v835_v33  ;;  %v359_v13 = vsel %vm279_vm4, %v337_v62, %v358_v7  ;;  %v473_v62 = vstv %s666_s13 }
  0xc7   : > { %v305_v60 = vpop.xlane.xlu1 %304  ;;  %v224_v61 = vpop.xlane.xlu0 %223 }
  0xc8   : > { %v233_v63 = vmul.f32 0.015625, %v224_v61  ;;  %v341_v3 = vrot.slane %v305_v60, %v835_v33  ;;  %v288_v10 = vsel %vm287_vm8, %v272_v59, %v286_v4  ;;  %v447_v59 = vstv %s662_s12 }
  0xca   : > { %v276_v6 = vrot.slane %v233_v63, %v835_v33  ;;  %v360_v18 = vsel %vm281_vm5, %v341_v3, %v359_v13  ;;  %v489_v3 = vstv %s668_s16  ;;  %v414_v13 = vstv %s657_s17 }
  0xcb   : > { %v308_v11 = vpop.xlane.xlu0 %307  ;;  %v311_v12 = vpop.xlane.xlu1 %310 }
  0xcc   : > { %v290_v15 = vsel %vm289_vm9, %v276_v6, %v288_v10  ;;  %v345_v16 = vrot.slane %v308_v11, %v835_v33  ;;  %v349_v19 = vrot.slane %v311_v12, %v835_v33 }
  0xcd   : > { %293 = vst.msk [vmem:[#allocation2 + $0x1] sm:$0xff] %vm292_vm10, %v290_v15 }
  0xce   : > { %v361_v20 = vsel %vm283_vm6, %v345_v16, %v360_v18  ;;  %v419_v18 = vstv %s658_s18 }
  0xcf   : > { %v314_v21 = vpop.xlane.xlu0 %313  ;;  %v317_v22 = vpop.xlane.xlu1 %316  ;;  %v362_v25 = vsel %vm285_vm7, %v349_v19, %v361_v20 }
  0xd0   : > { %v353_v23 = vrot.slane %v314_v21, %v835_v33  ;;  %v357_v24 = vrot.slane %v317_v22, %v835_v33  ;;  %v372_v33 = vstv %s370_s27 }
  0xd2   : > { %v363_v26 = vsel %vm287_vm8, %v353_v23, %v362_v25 }
  0xd3   : > { %v364_v28 = vsel %vm289_vm9, %v357_v24, %v363_v26 }
  0xd4   : > { %366 = vst.msk [vmem:[#allocation3 + $0x1] sm:$0xff] %vm292_vm10, %v364_v28  ;;  %v371_v29 = vld [vmem:[#allocation2] sm:$0xff] }
  0xd5   : > { %v382_v31 = vmul.f32 %v381_v27, %v371_v29  ;;  %v869_v32 = vld [vmem:[#allocation2 + $0x1] sm:$0xff]  ;;  %v373_v37 = vmul.f32 %v372_v33, %v371_v29  ;;  %v398_v50 = vmul.f32 %v397_v44, %v371_v29  ;;  %v456_v29 = vstv %s663_s2 }
  0xd6   : > { %v424_v35 = vmul.f32 %v423_v34, %v869_v32  ;;  %v440_v43 = vmul.f32 %v439_v38, %v869_v32  ;;  %v455_v47 = vld [vmem:[#allocation2 + $0x2] sm:$0xff]  ;;  %v415_v19 = vmul.f32 %v414_v13, %v869_v32  ;;  %v461_v33 = vstv %s664_s19 }
  0xd7   : > { %384 = vrot.lane.b32.xlu0 %v382_v31, %s729_s7  ;;  %v374_v45 = vadd.f32 %v373_v37, %v368_v39  ;;  %v466_v51 = vmul.f32 %v465_v48, %v455_v47  ;;  %v482_v55 = vmul.f32 %v481_v53, %v455_v47 }
  0xdb   : > { %426 = vrot.lane.b32.xlu0 %v424_v35, %s729_s7  ;;  %v376_v41 = vld [vmem:[#allocation3] sm:$0xff]  ;;  %v457_v35 = vmul.f32 %v456_v29, %v455_v47  ;;  %v504_v47 = vsub.s32 0, %v832_v30 }
  0xdc   : > { %v390_v42 = vmul.f32 %v389_v36, %v376_v41  ;;  %v378_v46 = vmul.f32 %v377_v40, %v376_v41  ;;  %v406_v54 = vmul.f32 %v405_v52, %v376_v41  ;;  %v418_v56 = vld [vmem:[#allocation3 + $0x1] sm:$0xff] }
  0xdd   : > { %v432_v58 = vmul.f32 %v431_v57, %v418_v56  ;;  %v448_v60 = vmul.f32 %v447_v59, %v418_v56  ;;  %v460_v61 = vld [vmem:[#allocation3 + $0x2] sm:$0xff]  ;;  %v420_v22 = vmul.f32 %v419_v18, %v418_v56  ;;  %v518_v56 = vsub.s32 2, %v832_v30 }
  0xde   : > { %392 = vrot.lane.b32.xlu1 %v390_v42, %s729_s7  ;;  %v379_v49 = vadd.f32 %v378_v46, %v374_v45  ;;  %v474_v63 = vmul.f32 %v473_v62, %v460_v61  ;;  %v490_v4 = vmul.f32 %v489_v3, %v460_v61  ;;  %v462_v38 = vmul.f32 %v461_v33, %v460_v61 }
  0xdf   : > { %442 = vrot.lane.b32.xlu0 %v440_v43, %s730_s11  ;;  %v539_v59 = vsub.s32 5, %v832_v30  ;;  %v546_v3 = vsub.s32 6, %v832_v30 }
  0xe2   : > { %400 = vrot.lane.b32.xlu1 %v398_v50, %s730_s11 }
  0xe3   : > { %468 = vrot.lane.b32.xlu0 %v466_v51, %s729_s7  ;;  %v511_v51 = vsub.s32 1, %v832_v30 }
  0xe6   : > { %408 = vrot.lane.b32.xlu1 %v406_v54, %s730_s11 }
  0xe7   : > { %484 = vrot.lane.b32.xlu0 %v482_v55, %s730_s11  ;;  %v525_v55 = vsub.s32 3, %v832_v30 }
  0xea   : > { %434 = vrot.lane.b32.xlu1 %v432_v58, %s729_s7 }
  0xee   : > { %450 = vrot.lane.b32.xlu1 %v448_v60, %s730_s11  ;;  %v532_v60 = vsub.s32 4, %v832_v30 }
  0xf2   : > { %476 = vrot.lane.b32.xlu1 %v474_v63, %s729_s7  ;;  %v553_v63 = vsub.s32 7, %v832_v30 }
  0xf6   : > { %492 = vrot.lane.b32.xlu1 %v490_v4, %s730_s11 }
 0x149   : > { %v385_v6 = vpop.permute.xlu0 %384 }
 0x14a   : > { %v387_v10 = vadd.f32 %v385_v6, %v379_v49 }
 0x14d   : > { %v427_v23 = vpop.permute.xlu0 %426 }
 0x150   : > { %v393_v7 = vpop.permute.xlu1 %392 }
 0x151   : > { %v395_v12 = vadd.f32 %v393_v7, %v387_v10  ;;  %v443_v28 = vpop.permute.xlu0 %442 }
 0x154   : > { %v401_v11 = vpop.permute.xlu1 %400 }
 0x155   : > { %v403_v15 = vadd.f32 %v401_v11, %v395_v12  ;;  %v469_v32 = vpop.permute.xlu0 %468 }
 0x158   : > { %v409_v16 = vpop.permute.xlu1 %408 }
 0x159   : > { %v411_v20 = vadd.f32 %v409_v16, %v403_v15  ;;  %v485_v43 = vpop.permute.xlu0 %484 }
 0x15b   : > { %v416_v21 = vadd.f32 %v415_v19, %v411_v20 }
 0x15c   : > { %v435_v25 = vpop.permute.xlu1 %434 }
 0x15d   : > { %v421_v24 = vadd.f32 %v420_v22, %v416_v21 }
 0x15f   : > { %v429_v26 = vadd.f32 %v427_v23, %v421_v24 }
 0x160   : > { %v451_v34 = vpop.permute.xlu1 %450 }
 0x161   : > { %v437_v27 = vadd.f32 %v435_v25, %v429_v26 }
 0x163   : > { %v445_v31 = vadd.f32 %v443_v28, %v437_v27 }
 0x164   : > { %v477_v40 = vpop.permute.xlu1 %476 }
 0x165   : > { %v453_v36 = vadd.f32 %v451_v34, %v445_v31 }
 0x167   : > { %v458_v37 = vadd.f32 %v457_v35, %v453_v36 }
 0x168   : > { %v493_v45 = vpop.permute.xlu1 %492 }
 0x169   : > { %v463_v39 = vadd.f32 %v462_v38, %v458_v37 }
 0x16b   : > { %v471_v41 = vadd.f32 %v469_v32, %v463_v39 }
 0x16d   : > { %v479_v42 = vadd.f32 %v477_v40, %v471_v41 }
 0x16f   : > { %v487_v44 = vadd.f32 %v485_v43, %v479_v42 }
 0x171   : > { %v495_v46 = vadd.f32 %v493_v45, %v487_v44 }
 0x173   : > { %v669_v48 = vmul.f32 -1.442695, %v495_v46 }
 0x175   : > { %696 = vpow2.f32 %v669_v48 }
 0x17f   : > { %v697_v49 = vpop.eup %696 }
 0x180   : > { %v499_v50 = vadd.f32 1.0, %v697_v49 }
 0x182   : > { %698 = vrcp.f32 %v499_v50 }
 0x18c   : > { %v699_v52 = vpop.eup %698 }
 0x18d   : > { %v512_v53 = vrot.slane %v699_v52, %v511_v51  ;;  %v505_v54 = vrot.slane %v699_v52, %v504_v47  ;;  %v526_v57 = vrot.slane %v699_v52, %v525_v55  ;;  %v519_v58 = vrot.slane %v699_v52, %v518_v56 }
 0x18e   : > { %v540_v61 = vrot.slane %v699_v52, %v539_v59  ;;  %v533_v62 = vrot.slane %v699_v52, %v532_v60  ;;  %v554_v4 = vrot.slane %v699_v52, %v553_v63  ;;  %v547_v6 = vrot.slane %v699_v52, %v546_v3 }
 0x18f   : > { %514 = vbcast.lane.b32.xlu1 %v512_v53, 256  ;;  %507 = vbcast.lane.b32.xlu0 %v505_v54, 256 }
 0x193   : > { %528 = vbcast.lane.b32.xlu1 %v526_v57, 256  ;;  %521 = vbcast.lane.b32.xlu0 %v519_v58, 256 }
 0x197   : > { %542 = vbcast.lane.b32.xlu1 %v540_v61, 256  ;;  %535 = vbcast.lane.b32.xlu0 %v533_v62, 256 }
 0x19b   : > { %556 = vbcast.lane.b32.xlu1 %v554_v4, 256  ;;  %549 = vbcast.lane.b32.xlu0 %v547_v6, 256 }
 0x201   : > { %v515_v7 = vpop.permute.xlu1 %514  ;;  %v508_v10 = vpop.permute.xlu0 %507 }
 0x202   : > { %v559_v11 = vmul.f32 %v515_v7, %v794_v5  ;;  %v558_v12 = vmul.f32 %v508_v10, %v786_v1 }
 0x204   : > { %567 = vst.msk [vmem:[%s185_s23 + $0x8] sm:$0xff] %vm200_vm0, %v559_v11  ;;  %566 = vst.msk [vmem:[%s185_s23] sm:$0xff] %vm200_vm0, %v558_v12 }
 0x205   : > { %v529_v30 = vpop.permute.xlu1 %528  ;;  %v522_v13 = vpop.permute.xlu0 %521 }
 0x206   : > { %v561_v15 = vmul.f32 %v529_v30, %v788_v2  ;;  %v560_v16 = vmul.f32 %v522_v13, %v784_v0 }
 0x208   : > { %569 = vst.msk [vmem:[%s185_s23 + $0x18] sm:$0xff] %vm200_vm0, %v561_v15  ;;  %568 = vst.msk [vmem:[%s185_s23 + $0x10] sm:$0xff] %vm200_vm0, %v560_v16 }
 0x209   : > { %v543_v18 = vpop.permute.xlu1 %542  ;;  %v536_v19 = vpop.permute.xlu0 %535 }
 0x20a   : > { %v563_v5 = vmul.f32 %v543_v18, %v800_v8  ;;  %v562_v1 = vmul.f32 %v536_v19, %v802_v9 }
 0x20c   : > { %571 = vst.msk [vmem:[%s185_s23 + $0x28] sm:$0xff] %vm200_vm0, %v563_v5  ;;  %570 = vst.msk [vmem:[%s185_s23 + $0x20] sm:$0xff] %vm200_vm0, %v562_v1 }
 0x20d   : > { %v557_v20 = vpop.permute.xlu1 %556  ;;  %v550_v21 = vpop.permute.xlu0 %549 }
 0x20e   : > { %v565_v2 = vmul.f32 %v557_v20, %v818_v17  ;;  %v564_v0 = vmul.f32 %v550_v21, %v812_v14 }
 0x210   : > { %573 = vst.msk [vmem:[%s185_s23 + $0x38] sm:$0xff] %vm200_vm0, %v565_v2  ;;  %572 = vst.msk [vmem:[%s185_s23 + $0x30] sm:$0xff] %vm200_vm0, %v564_v0 }
 0x211 PF: > { %s15_s14 = sadd.s32 1, %s725_s14  }
 0x212   : > { %p12_p1 = scmp.ge.s32.totalorder %s15_s14, 4  }
 0x214   :  { %14 = sbr.rel (!%p12_p1) target bundleno = 3 (0x3), region = 67 }
 0x21b   :  { %595 = vsyncpa [#allocation6], 1 }
 0x21c   :  { %597 = vsyncpa [#allocation6 + $0x1], 1 }

// kernel: forward.18
= control target key start
LH: loop header
LB: loop body
LE: loop exit
PB: predicated region body
PF: predicated region fallthrough
CT: control target
= control target key end

     0   :  { %vm12_vm0 = vcmask 517120   ;;  %vm31_vm1 = vcmask 523264   ;;  %v132_v0 = vmov 0.0   ;;  %vm122_vm2 = vcmask 1040384   ;;  %s234_s0 = inlined_call_operand.vmem [shape: f32[128,64], index: 0, kind: input, shape index: {}]   ;;  %s235_s1 = inlined_call_operand.vmem [shape: f32[2,64], index: 1, kind: output, shape index: {}]  }
   0x1   :  { %13 = vst.msk [vmem:[%s235_s1] sm:$0x3] %vm12_vm0, %v132_v0  ;;  %v14_v1 = vld [vmem:[%s234_s0] sm:$0xff]  ;;  %v15_v2 = vld [vmem:[%s234_s0 + $0x8] sm:$0xff]  ;;  %v16_v3 = vld [vmem:[%s234_s0 + $0x10] sm:$0xff] }
   0x2   :  { %v32_v4 = vsel %vm31_vm1, %v14_v1, 0.0  ;;  %v33_v5 = vsel %vm31_vm1, %v15_v2, 0.0  ;;  %v35_v6 = vsel %vm31_vm1, %v16_v3, 0.0  ;;  %v17_v7 = vld [vmem:[%s234_s0 + $0x18] sm:$0xff]  ;;  %v18_v10 = vld [vmem:[%s234_s0 + $0x20] sm:$0xff]  ;;  %v19_v13 = vld [vmem:[%s234_s0 + $0x28] sm:$0xff]  ;;  %v69_v15 = vmul.f32 %v14_v1, %v14_v1 }
   0x3   :  { %v34_v8 = vadd.f32 %v33_v5, %v32_v4  ;;  %v37_v9 = vsel %vm31_vm1, %v17_v7, 0.0  ;;  %v39_v12 = vsel %vm31_vm1, %v18_v10, 0.0  ;;  %v70_v16 = vmul.f32 %v15_v2, %v15_v2  ;;  %v20_v19 = vld [vmem:[%s234_s0 + $0x30] sm:$0xff]  ;;  %v21_v24 = vld [vmem:[%s234_s0 + $0x38] sm:$0xff]  ;;  %v22_v31 = vld [vmem:[%s234_s0 + $0x40] sm:$0xff] }
   0x4   :  { %v71_v17 = vmul.f32 %v16_v3, %v16_v3  ;;  %v41_v18 = vsel %vm31_vm1, %v19_v13, 0.0  ;;  %v72_v21 = vmul.f32 %v17_v7, %v17_v7  ;;  %v43_v22 = vsel %vm31_vm1, %v20_v19, 0.0  ;;  %v23_v37 = vld [vmem:[%s234_s0 + $0x48] sm:$0xff]  ;;  %v24_v43 = vld [vmem:[%s234_s0 + $0x50] sm:$0xff]  ;;  %v25_v49 = vld [vmem:[%s234_s0 + $0x58] sm:$0xff] }
   0x5   :  { %v36_v11 = vadd.f32 %v35_v6, %v34_v8  ;;  %v73_v23 = vmul.f32 %v18_v10, %v18_v10  ;;  %v85_v26 = vsel %vm31_vm1, %v69_v15, 0.0  ;;  %v86_v27 = vsel %vm31_vm1, %v70_v16, 0.0  ;;  %v26_v55 = vld [vmem:[%s234_s0 + $0x60] sm:$0xff]  ;;  %v27_v61 = vld [vmem:[%s234_s0 + $0x68] sm:$0xff]  ;;  %v28_v3 = vld [vmem:[%s234_s0 + $0x70] sm:$0xff] }
   0x6   :  { %v88_v28 = vsel %vm31_vm1, %v71_v17, 0.0  ;;  %v45_v29 = vsel %vm31_vm1, %v21_v24, 0.0  ;;  %v87_v30 = vadd.f32 %v86_v27, %v85_v26  ;;  %v74_v33 = vmul.f32 %v19_v13, %v19_v13 }
   0x7   :  { %v38_v14 = vadd.f32 %v37_v9, %v36_v11  ;;  %v90_v34 = vsel %vm31_vm1, %v72_v21, 0.0  ;;  %v47_v35 = vsel %vm31_vm1, %v22_v31, 0.0  ;;  %v75_v39 = vmul.f32 %v20_v19, %v20_v19  ;;  %v29_v9 = vld [vmem:[%s234_s0 + $0x78] sm:$0xff] }
   0x8   :  { %v89_v36 = vadd.f32 %v88_v28, %v87_v30  ;;  %v92_v40 = vsel %vm31_vm1, %v73_v23, 0.0  ;;  %v49_v41 = vsel %vm31_vm1, %v23_v37, 0.0  ;;  %v76_v45 = vmul.f32 %v21_v24, %v21_v24 }
   0x9   :  { %v40_v20 = vadd.f32 %v39_v12, %v38_v14  ;;  %v94_v46 = vsel %vm31_vm1, %v74_v33, 0.0  ;;  %v51_v47 = vsel %vm31_vm1, %v24_v43, 0.0  ;;  %v77_v51 = vmul.f32 %v22_v31, %v22_v31 }
   0xa   :  { %v91_v42 = vadd.f32 %v90_v34, %v89_v36  ;;  %v96_v52 = vsel %vm31_vm1, %v75_v39, 0.0  ;;  %v53_v53 = vsel %vm31_vm1, %v25_v49, 0.0  ;;  %v78_v57 = vmul.f32 %v23_v37, %v23_v37 }
   0xb   :  { %v42_v25 = vadd.f32 %v41_v18, %v40_v20  ;;  %v98_v58 = vsel %vm31_vm1, %v76_v45, 0.0  ;;  %v55_v59 = vsel %vm31_vm1, %v26_v55, 0.0  ;;  %v79_v63 = vmul.f32 %v24_v43, %v24_v43 }
   0xc   :  { %v93_v48 = vadd.f32 %v92_v40, %v91_v42  ;;  %v100_v0 = vsel %vm31_vm1, %v77_v51, 0.0  ;;  %v57_v1 = vsel %vm31_vm1, %v27_v61, 0.0  ;;  %v80_v5 = vmul.f32 %v25_v49, %v25_v49  ;;  %v30_v42 = vld [vmem:[%s235_s1] sm:$0x3] }
   0xd   :  { %v44_v32 = vadd.f32 %v43_v22, %v42_v25  ;;  %v102_v6 = vsel %vm31_vm1, %v78_v57, 0.0  ;;  %v59_v7 = vsel %vm31_vm1, %v28_v3, 0.0  ;;  %v81_v11 = vmul.f32 %v26_v55, %v26_v55 }
   0xe   :  { %v95_v54 = vadd.f32 %v94_v46, %v93_v48  ;;  %v104_v12 = vsel %vm31_vm1, %v79_v63, 0.0  ;;  %v61_v13 = vsel %vm31_vm1, %v29_v9, 0.0  ;;  %v82_v16 = vmul.f32 %v27_v61, %v27_v61 }
   0xf   :  { %v46_v38 = vadd.f32 %v45_v29, %v44_v32  ;;  %v106_v17 = vsel %vm31_vm1, %v80_v5, 0.0  ;;  %v83_v20 = vmul.f32 %v28_v3, %v28_v3  ;;  %v108_v21 = vsel %vm31_vm1, %v81_v11, 0.0 }
  0x10   :  { %v97_v60 = vadd.f32 %v96_v52, %v95_v54  ;;  %v84_v24 = vmul.f32 %v29_v9, %v29_v9  ;;  %v110_v25 = vsel %vm31_vm1, %v82_v16, 0.0 }
  0x11   :  { %v48_v44 = vadd.f32 %v47_v35, %v46_v38  ;;  %v112_v28 = vsel %vm31_vm1, %v83_v20, 0.0 }
  0x12   :  { %v99_v2 = vadd.f32 %v98_v58, %v97_v60  ;;  %v114_v30 = vsel %vm31_vm1, %v84_v24, 0.0 }
  0x13   :  { %v50_v50 = vadd.f32 %v49_v41, %v48_v44 }
  0x14   :  { %v101_v8 = vadd.f32 %v100_v0, %v99_v2 }
  0x15   :  { %v52_v56 = vadd.f32 %v51_v47, %v50_v50 }
  0x16   :  { %v103_v14 = vadd.f32 %v102_v6, %v101_v8 }
  0x17   :  { %v54_v62 = vadd.f32 %v53_v53, %v52_v56 }
  0x18   :  { %v105_v18 = vadd.f32 %v104_v12, %v103_v14 }
  0x19   :  { %v56_v4 = vadd.f32 %v55_v59, %v54_v62 }
  0x1a   :  { %v107_v22 = vadd.f32 %v106_v17, %v105_v18 }
  0x1b   :  { %v58_v10 = vadd.f32 %v57_v1, %v56_v4 }
  0x1c   :  { %v109_v26 = vadd.f32 %v108_v21, %v107_v22 }
  0x1d   :  { %v60_v15 = vadd.f32 %v59_v7, %v58_v10 }
  0x1e   :  { %v111_v29 = vadd.f32 %v110_v25, %v109_v26 }
  0x1f   :  { %v62_v19 = vadd.f32 %v61_v13, %v60_v15 }
  0x20   :  { %v113_v32 = vadd.f32 %v112_v28, %v111_v29 }
  0x21   :  { %v63_v23 = vrot.slane %v62_v19, 4 }
  0x22   :  { %v115_v33 = vadd.f32 %v114_v30, %v113_v32 }
  0x23   :  { %v64_v27 = vadd.f32 %v63_v23, %v62_v19 }
  0x24   :  { %v116_v35 = vrot.slane %v115_v33, 4 }
  0x25   :  { %v65_v31 = vrot.slane %v64_v27, 2 }
  0x26   :  { %v117_v36 = vadd.f32 %v116_v35, %v115_v33 }
  0x27   :  { %v66_v34 = vadd.f32 %v65_v31, %v64_v27 }
  0x28   :  { %v118_v38 = vrot.slane %v117_v36, 2 }
  0x29   :  { %v67_v37 = vrot.slane %v66_v34, 1 }
  0x2a   :  { %v119_v39 = vadd.f32 %v118_v38, %v117_v36 }
  0x2b   :  { %v68_v40 = vadd.f32 %v67_v37, %v66_v34 }
  0x2c   :  { %v120_v41 = vrot.slane %v119_v39, 1 }
  0x2e   :  { %v121_v43 = vadd.f32 %v120_v41, %v119_v39 }
  0x30   :  { %v123_v44 = vsel %vm122_vm2, %v68_v40, %v121_v43 }
  0x31   :  { %v124_v45 = vadd.f32 %v123_v44, %v30_v42 }
  0x33   :  { %126 = vst.msk [vmem:[%s235_s1] sm:$0x3] %vm12_vm0, %v124_v45 }

// kernel: forward.19
= control target key start
LH: loop header
LB: loop body
LE: loop exit
PB: predicated region body
PF: predicated region fallthrough
CT: control target
= control target key end

     0   :  { %v41_v4 = vlaneseq  ;;  %vm127_vm0 = vcmask 523264   ;;  %s322_s1 = inlined_call_operand.vmem [shape: f32[2,64], index: 1, kind: input, shape index: {}]   ;;  %s323_s0 = inlined_call_operand.vmem [shape: f32[128,64], index: 0, kind: input, shape index: {}]   ;;  %s324_s2 = inlined_call_operand.vmem [shape: f32[1,64], index: 2, kind: input, shape index: {}]   ;;  %s325_s3 = inlined_call_operand.vmem [shape: f32[1,64], index: 3, kind: input, shape index: {}]   ;;  %s326_s4 = inlined_call_operand.vmem [shape: f32[128,64], index: 4, kind: output, shape index: {}]  }
   0x1   :  { %v33_v0 = vld [vmem:[%s322_s1] sm:$0x1]  ;;  %v35_v1 = vld [vmem:[%s322_s1 + $0x1] sm:$0x1]  ;;  %v18_v12 = vld [vmem:[%s323_s0 + $0x8] sm:$0xff] }
   0x2   :  { %v34_v2 = vmul.f32 0.0078125, %v33_v0  ;;  %v36_v3 = vmul.f32 0.0078125, %v35_v1  ;;  %v42_v7 = vshrl.u32 %v41_v4, 7  ;;  %v17_v10 = vld [vmem:[%s323_s0] sm:$0xff]  ;;  %v19_v13 = vld [vmem:[%s323_s0 + $0x10] sm:$0xff]  ;;  %v20_v14 = vld [vmem:[%s323_s0 + $0x18] sm:$0xff] }
   0x3   :  { %v21_v15 = vld [vmem:[%s323_s0 + $0x20] sm:$0xff]  ;;  %v22_v16 = vld [vmem:[%s323_s0 + $0x28] sm:$0xff]  ;;  %v23_v17 = vld [vmem:[%s323_s0 + $0x30] sm:$0xff] }
   0x4   :  { %v37_v5 = vmul.f32 %v34_v2, %v34_v2  ;;  %v43_v9 = vsub.s32 0, %v42_v7  ;;  %v24_v18 = vld [vmem:[%s323_s0 + $0x38] sm:$0xff]  ;;  %v25_v19 = vld [vmem:[%s323_s0 + $0x40] sm:$0xff]  ;;  %v26_v20 = vld [vmem:[%s323_s0 + $0x48] sm:$0xff] }
   0x5   :  { %v27_v22 = vld [vmem:[%s323_s0 + $0x50] sm:$0xff]  ;;  %v28_v23 = vld [vmem:[%s323_s0 + $0x58] sm:$0xff]  ;;  %v225_v24 = vld [vmem:[%s323_s0 + $0x60] sm:$0xff] }
   0x6   :  { %v38_v6 = vsub.f32 %v36_v3, %v37_v5  ;;  %v186_v11 = vrot.slane %v34_v2, %v43_v9  ;;  %v30_v29 = vld [vmem:[%s323_s0 + $0x68] sm:$0xff]  ;;  %v31_v30 = vld [vmem:[%s323_s0 + $0x70] sm:$0xff]  ;;  %v32_v31 = vld [vmem:[%s323_s0 + $0x78] sm:$0xff] }
   0x7   :  { %v148_v41 = vld [vmem:[%s324_s2] ss:$0 sm:$0xff] }
   0x8   :  { %v39_v8 = vadd.f32 1e-05, %v38_v6  ;;  %v45_v21 = vsub.f32 %v17_v10, %v186_v11  ;;  %v46_v25 = vsub.f32 %v18_v12, %v186_v11  ;;  %v47_v26 = vsub.f32 %v19_v13, %v186_v11  ;;  %v149_v50 = vld [vmem:[%s325_s3] ss:$0 sm:$0xff] }
   0x9   :  { %v48_v27 = vsub.f32 %v20_v14, %v186_v11  ;;  %v49_v28 = vsub.f32 %v21_v15, %v186_v11  ;;  %v50_v33 = vsub.f32 %v22_v16, %v186_v11  ;;  %v51_v34 = vsub.f32 %v23_v17, %v186_v11 }
   0xa   :  { %150 = vrsqrt.f32 %v39_v8  ;;  %v52_v35 = vsub.f32 %v24_v18, %v186_v11  ;;  %v53_v36 = vsub.f32 %v25_v19, %v186_v11  ;;  %v54_v38 = vsub.f32 %v26_v20, %v186_v11 }
   0xb   :  { %v55_v39 = vsub.f32 %v27_v22, %v186_v11  ;;  %v56_v40 = vsub.f32 %v28_v23, %v186_v11  ;;  %v57_v42 = vsub.f32 %v225_v24, %v186_v11  ;;  %v58_v43 = vsub.f32 %v30_v29, %v186_v11 }
   0xc   :  { %v59_v44 = vsub.f32 %v31_v30, %v186_v11  ;;  %v60_v45 = vsub.f32 %v32_v31, %v186_v11 }
  0x14   :  { %v151_v32 = vpop.eup %150 }
  0x15   :  { %v64_v37 = vrot.slane %v151_v32, %v43_v9 }
  0x17   :  { %v65_v46 = vmul.f32 %v64_v37, %v45_v21  ;;  %v66_v47 = vmul.f32 %v64_v37, %v46_v25  ;;  %v67_v48 = vmul.f32 %v64_v37, %v47_v26  ;;  %v68_v49 = vmul.f32 %v64_v37, %v48_v27 }
  0x18   :  { %v69_v51 = vmul.f32 %v64_v37, %v49_v28  ;;  %v70_v52 = vmul.f32 %v64_v37, %v50_v33  ;;  %v71_v53 = vmul.f32 %v64_v37, %v51_v34  ;;  %v72_v54 = vmul.f32 %v64_v37, %v52_v35 }
  0x19   :  { %v88_v55 = vmul.f32 %v148_v41, %v65_v46  ;;  %v89_v56 = vmul.f32 %v148_v41, %v66_v47  ;;  %v90_v57 = vmul.f32 %v148_v41, %v67_v48  ;;  %v91_v58 = vmul.f32 %v148_v41, %v68_v49 }
  0x1a   :  { %v92_v59 = vmul.f32 %v148_v41, %v69_v51  ;;  %v93_v60 = vmul.f32 %v148_v41, %v70_v52  ;;  %v94_v61 = vmul.f32 %v148_v41, %v71_v53  ;;  %v95_v62 = vmul.f32 %v148_v41, %v72_v54 }
  0x1b   :  { %v111_v63 = vadd.f32 %v149_v50, %v88_v55  ;;  %v112_v0 = vadd.f32 %v149_v50, %v89_v56  ;;  %v113_v1 = vadd.f32 %v149_v50, %v90_v57  ;;  %v114_v2 = vadd.f32 %v149_v50, %v91_v58 }
  0x1c   :  { %v115_v3 = vadd.f32 %v149_v50, %v92_v59  ;;  %v116_v4 = vadd.f32 %v149_v50, %v93_v60  ;;  %v117_v5 = vadd.f32 %v149_v50, %v94_v61  ;;  %v118_v6 = vadd.f32 %v149_v50, %v95_v62 }
  0x1d   :  { %128 = vst.msk [vmem:[%s326_s4] sm:$0xff] %vm127_vm0, %v111_v63  ;;  %129 = vst.msk [vmem:[%s326_s4 + $0x8] sm:$0xff] %vm127_vm0, %v112_v0  ;;  %v73_v7 = vmul.f32 %v64_v37, %v53_v36  ;;  %v74_v8 = vmul.f32 %v64_v37, %v54_v38  ;;  %v75_v9 = vmul.f32 %v64_v37, %v55_v39 }
  0x1e   :  { %130 = vst.msk [vmem:[%s326_s4 + $0x10] sm:$0xff] %vm127_vm0, %v113_v1  ;;  %131 = vst.msk [vmem:[%s326_s4 + $0x18] sm:$0xff] %vm127_vm0, %v114_v2  ;;  %v76_v10 = vmul.f32 %v64_v37, %v56_v40  ;;  %v77_v11 = vmul.f32 %v64_v37, %v57_v42  ;;  %v78_v12 = vmul.f32 %v64_v37, %v58_v43 }
  0x1f   :  { %132 = vst.msk [vmem:[%s326_s4 + $0x20] sm:$0xff] %vm127_vm0, %v115_v3  ;;  %133 = vst.msk [vmem:[%s326_s4 + $0x28] sm:$0xff] %vm127_vm0, %v116_v4  ;;  %v79_v13 = vmul.f32 %v64_v37, %v59_v44  ;;  %v80_v14 = vmul.f32 %v64_v37, %v60_v45  ;;  %v96_v15 = vmul.f32 %v148_v41, %v73_v7 }
  0x20   :  { %134 = vst.msk [vmem:[%s326_s4 + $0x30] sm:$0xff] %vm127_vm0, %v117_v5  ;;  %135 = vst.msk [vmem:[%s326_s4 + $0x38] sm:$0xff] %vm127_vm0, %v118_v6  ;;  %v97_v16 = vmul.f32 %v148_v41, %v74_v8  ;;  %v98_v17 = vmul.f32 %v148_v41, %v75_v9  ;;  %v99_v18 = vmul.f32 %v148_v41, %v76_v10 }
  0x21   :  { %v100_v19 = vmul.f32 %v148_v41, %v77_v11  ;;  %v101_v20 = vmul.f32 %v148_v41, %v78_v12  ;;  %v102_v21 = vmul.f32 %v148_v41, %v79_v13  ;;  %v103_v22 = vmul.f32 %v148_v41, %v80_v14 }
  0x22   :  { %v119_v23 = vadd.f32 %v149_v50, %v96_v15  ;;  %v120_v24 = vadd.f32 %v149_v50, %v97_v16  ;;  %v121_v25 = vadd.f32 %v149_v50, %v98_v17  ;;  %v122_v26 = vadd.f32 %v149_v50, %v99_v18 }
  0x23   :  { %v123_v27 = vadd.f32 %v149_v50, %v100_v19  ;;  %v124_v28 = vadd.f32 %v149_v50, %v101_v20  ;;  %v125_v29 = vadd.f32 %v149_v50, %v102_v21  ;;  %v126_v30 = vadd.f32 %v149_v50, %v103_v22 }
  0x24   :  { %136 = vst.msk [vmem:[%s326_s4 + $0x40] sm:$0xff] %vm127_vm0, %v119_v23  ;;  %137 = vst.msk [vmem:[%s326_s4 + $0x48] sm:$0xff] %vm127_vm0, %v120_v24 }
  0x25   :  { %138 = vst.msk [vmem:[%s326_s4 + $0x50] sm:$0xff] %vm127_vm0, %v121_v25  ;;  %139 = vst.msk [vmem:[%s326_s4 + $0x58] sm:$0xff] %vm127_vm0, %v122_v26 }
  0x26   :  { %140 = vst.msk [vmem:[%s326_s4 + $0x60] sm:$0xff] %vm127_vm0, %v123_v27  ;;  %141 = vst.msk [vmem:[%s326_s4 + $0x68] sm:$0xff] %vm127_vm0, %v124_v28 }
  0x27   :  { %142 = vst.msk [vmem:[%s326_s4 + $0x70] sm:$0xff] %vm127_vm0, %v125_v29  ;;  %143 = vst.msk [vmem:[%s326_s4 + $0x78] sm:$0xff] %vm127_vm0, %v126_v30 }

// kernel: forward.15
= control target key start
LH: loop header
LB: loop body
LE: loop exit
PB: predicated region body
PF: predicated region fallthrough
CT: control target
= control target key end

     0   :  { %8 = vsyncpa [#allocation3], 0  ;;  %s4293_s12 = smov 0   ;;  %s5023_s0 = inlined_call_operand.vmem [shape: f32[2,18,18,32], index: 0, kind: input, shape index: {}]   ;;  %s5024_s1 = inlined_call_operand.vmem [shape: bf16[9,32,64], index: 1, kind: input, shape index: {}]   ;;  %s5025_s2 = inlined_call_operand.hbm [shape: f32[1,64], index: 2, kind: input, shape index: {}]   ;;  %s5026_s3 = inlined_call_operand.vmem [shape: f32[2,16,16,64], index: 3, kind: output, shape index: {}]  }
   0x1 LB: > { %s4299_s13 = sadd.s32 4294967295, %s4270_s12   ;;  %p3050_p0 = scmp.ge.s32.totalorder %s4270_s12, 1  ;;  %s4270_s12 = sphi %s4293_s12, %s14_s12  }
   0x2   : > { %p113_p1 = scmp.lt.s32.totalorder %s4270_s12, 3  ;;  %p5027_p3 = scmp.eq.s32.totalorder %s4299_s13, 0 }
   0x3   : > { %s4272_s15 = smov [#allocation2]   ;;  %s4232_s20 = scalar_lea.hbm %s5025_s2, 16 }
   0x4   : > { %p4303_p2 = pnand %p3050_p0, %p113_p1  ;;  %s129_s16 = sshll.u32 %s4272_s15, 4  ;;  %s130_s16 = int_to_ptr.vmem [resolvable:$true] %s129_s16 }
   0x5   : > { %p4233_p6 = scmp.ne.s32.totalorder %s5025_s2, %s4232_s20  ;;  %p4239_p10 = scmp.lt.u32.totalorder %s4232_s20, %s5025_s2 }
   0x6   : > { %s5029_s14 = scalar_select %p4303_p2, 1, 0 }
   0x7   : > { %p4199_p4 = pneg %p4303_p2 }
   0x9   : > { %p4312_p5 = pnand %p5027_p3, %p4199_p4 }
   0xb   : > { %p4234_p7 = pneg %p4312_p5 }
   0xd   : > { %p4235_p8 = pnand %p4234_p7, %p4233_p6 }
   0xf   : > { %p4236_p9 = pneg %p4235_p8 }
  0x11   : > { %p4241_p11 = pnand %p4239_p10, %p4236_p9 }
  0x13   : > { %4244 = shalt.err (!%p4241_p11)
}
  0x14   : > { %s4245_s25 = scalar_lea.vmem %s130_s16, 16  ;;  %s4252_s26 = scalar_lea.vmem %s130_s16, 32 }
  0x15   : > { %p4246_p12 = scmp.ne.s32.totalorder %s130_s16, %s4245_s25  ;;  %p4253_p1 = scmp.lt.s32.totalorder %s130_s16, %s130_s16 }
  0x16   : > { %p4254_p4 = scmp.lt.s32.totalorder %s4252_s26, %s4245_s25 }
  0x17   : > { %p4248_p13 = pnand %p4246_p12, %p4234_p7 }
  0x18   : > { %p4255_p3 = por %p4254_p4, %p4253_p1 }
  0x19   : > { %p4249_p0 = pneg %p4248_p13 }
  0x1b   : > { %p4256_p2 = pnand %p4255_p3, %p4249_p0 }
  0x1d   : > { %4259 = shalt.err (!%p4256_p2)
}
  0x1e   : > { %4202 = dma.hbm_to_vmem [thread:$0]  (!%p4312_p5), %s5025_s2, 16, %s130_s16, [#allocation3]  }
  0x1f   : > { %p5031_p6 = scmp.ne.s32.totalorder %s5029_s14, 0 }
  0x20   : > { %p5032_p8 = scmp.eq.s32.totalorder (!%p5031_p6), %s4299_s13, 0 }
  0x21   : > { %150 = sbr.rel (%p5031_p6) target bundleno = 554 (0x22a), region = 32 }
  0x28   : > { %4265 = dma.done.wait (%p5032_p8), [#allocation3], 16   ;;  %p5033_p7 = pmov %p5032_p8 }
  0x29   : > { %p174_p9 = scmp.lt.s32.totalorder %s4299_s13, 1  ;;  %v4214_v0 = vld [vmem:[%s5024_s1 + $0x10] sm:$0xff]   ;;  %v4349_v1 = vld [vmem:[%s5024_s1 + $0x40] sm:$0xff]   ;;  %v4216_v2 = vld [vmem:[%s5024_s1 + $0x18] sm:$0xff]   ;;  %vm302_vm0 = vcmask 261120   ;;  %vm2948_vm1 = vcmask 523264  }
  0x2a   : > { %4267 = vsyncadd (%p5033_p7), [#allocation3], 4294967280  ;;  %3610 = vmatprep.subr.bf16.mxu1 %v4214_v0  ;;  %3754 = vmatprep.subr.bf16.mxu0 %v4349_v1  ;;  %v4363_v3 = vld [vmem:[%s5024_s1 + $0x48] sm:$0xff]   ;;  %v4218_v10 = vld [vmem:[%s5024_s1] sm:$0xff]  }
  0x2b   : > { %s5035_s13 = smov (!%p174_p9, %s4299_s13), 1  ;;  %3611 = vmatpush3.bf16.msra.mxu1 %v4214_v0  ;;  %3755 = vmatpush3.bf16.msra.mxu0 %v4349_v1  ;;  %v4219_v14 = vld [vmem:[%s5024_s1 + $0x50] sm:$0xff]   ;;  %v4220_v18 = vld [vmem:[%s5024_s1 + $0x58] sm:$0xff]   ;;  %v4221_v24 = vld [vmem:[%s5024_s1 + $0x8] sm:$0xff]  }
  0x2c   : > { %s4194_s29 = smul.u32 432, %s5035_s13  ;;  %3612 = vmatprep.subr.bf16.mxu1 %v4216_v2  ;;  %3756 = vmatprep.subr.bf16.mxu0 %v4363_v3  ;;  %v4222_v26 = vld [vmem:[%s5024_s1 + $0x60] sm:$0xff]   ;;  %v4224_v52 = vld [vmem:[%s5024_s1 + $0x68] sm:$0xff]   ;;  %v4496_v61 = vld [vmem:[%s5024_s1 + $0x70] sm:$0xff]  }
  0x2d   : > { %v4437_v33 = vld [vmem:[%s5024_s1 + $0x20] sm:$0xff]  }
  0x2e   : > { %s4354_s9 = scalar_lea.vmem %s5023_s0, %s4194_s29 }
  0x2f   : > { %v237_v4 = vld [vmem:[%s4354_s9 + $0x1] sm:$0xff]  ;;  %v238_v5 = vld [vmem:[%s4354_s9 + $0x9] sm:$0xff]  ;;  %v3174_v6 = vld [vmem:[%s4354_s9 + $0x19] sm:$0xff]  ;;  %3613 = vmatpush3.bf16.msra.mxu1 %v4216_v2  ;;  %3757 = vmatpush3.bf16.msra.mxu0 %v4363_v3 }
  0x30   : > { %v269_v7 = vpack.c.bf16 %v238_v5, %v237_v4  ;;  %v3175_v8 = vld [vmem:[%s4354_s9 + $0x21] sm:$0xff]  ;;  %v3176_v11 = vld [vmem:[%s4354_s9 + $0x31] sm:$0xff]  ;;  %v3177_v12 = vld [vmem:[%s4354_s9 + $0x39] sm:$0xff]  ;;  %3646 = vmatprep.subr.bf16.mxu1 %v4218_v10  ;;  %3790 = vmatprep.subr.bf16.mxu0 %v4219_v14 }
  0x31   : > { %v1378_v9 = vpack.c.bf16 %v3175_v8, %v3174_v6  ;;  %v4377_v13 = vpack.c.bf16 %v3177_v12, %v3176_v11  ;;  %v3178_v15 = vld [vmem:[%s4354_s9 + $0x49] sm:$0xff]  ;;  %v3179_v16 = vld [vmem:[%s4354_s9 + $0x51] sm:$0xff]  ;;  %v3180_v19 = vld [vmem:[%s4354_s9 + $0x61] sm:$0xff] }
  0x32   : > { %3614 = vmatprep.mubr.msk.bf16.mxu1 %vm302_vm0, %v269_v7  ;;  %v4386_v17 = vpack.c.bf16 %v3179_v16, %v3178_v15  ;;  %v3181_v20 = vld [vmem:[%s4354_s9 + $0x69] sm:$0xff]  ;;  %v3182_v21 = vld [vmem:[%s4354_s9 + $0x79] sm:$0xff]  ;;  %v3183_v22 = vld [vmem:[%s4354_s9 + $0x81] sm:$0xff] }
  0x33   : > { %3758 = vmatprep.mubr.msk.bf16.mxu0 %vm302_vm0, %v1378_v9  ;;  %3615 = vmatmul.mubr.msk.bf16.vlgmr.msra.gmra.mrb[0].mxu1 %vm302_vm0, %v1378_v9  ;;  %v4402_v23 = vpack.c.bf16 %v3181_v20, %v3180_v19  ;;  %v4407_v25 = vpack.c.bf16 %v3183_v22, %v3182_v21  ;;  %v3184_v27 = vld [vmem:[%s4354_s9 + $0x91] sm:$0xff]  ;;  %v3185_v28 = vld [vmem:[%s4354_s9 + $0x99] sm:$0xff]  ;;  %v3186_v29 = vld [vmem:[%s4354_s9 + $0xa9] sm:$0xff] }
  0x34   : > { %3759 = vmatmul.mubr.msk.bf16.vlgmr.msra.gmra.mrb[0].mxu0 %vm302_vm0, %v4377_v13  ;;  %3647 = vmatpush3.bf16.msra.mxu1 %v4218_v10  ;;  %v3187_v30 = vld [vmem:[%s4354_s9 + $0xb1] sm:$0xff]  ;;  %v4424_v31 = vpack.c.bf16 %v3185_v28, %v3184_v27  ;;  %v3188_v34 = vld [vmem:[%s4354_s9 + $0xc1] sm:$0xff]  ;;  %v3189_v35 = vld [vmem:[%s4354_s9 + $0xc9] sm:$0xff] }
  0x35   : > { %3791 = vmatpush3.bf16.msra.mxu0 %v4219_v14  ;;  %3618 = vmatprep.mubr.msk.bf16.mxu1 %vm302_vm0, %v4377_v13  ;;  %v4426_v32 = vpack.c.bf16 %v3187_v30, %v3186_v29  ;;  %v3228_v36 = vld [vmem:[%s4354_s9 + $0x1a] sm:$0xff]  ;;  %v3229_v37 = vld [vmem:[%s4354_s9 + $0x22] sm:$0xff]  ;;  %v4446_v38 = vpack.c.bf16 %v3189_v35, %v3188_v34  ;;  %v3230_v42 = vld [vmem:[%s4354_s9 + $0x32] sm:$0xff] }
  0x36   : > { %3762 = vmatprep.mubr.msk.bf16.mxu0 %vm302_vm0, %v4386_v17  ;;  %3792 = vmatprep.subr.bf16.mxu0 %v4220_v18  ;;  %v4448_v39 = vpack.c.bf16 %v3229_v37, %v3228_v36  ;;  %v255_v40 = vld [vmem:[%s4354_s9 + $0xd9] sm:$0xff]  ;;  %v256_v41 = vld [vmem:[%s4354_s9 + $0xe1] sm:$0xff]  ;;  %v257_v44 = vld [vmem:[%s4354_s9 + $0xf1] sm:$0xff] }
  0x37   : > { %3648 = vmatprep.subr.bf16.mxu1 %v4221_v24  ;;  %v3231_v43 = vld [vmem:[%s4354_s9 + $0x3a] sm:$0xff]  ;;  %v3232_v46 = vld [vmem:[%s4354_s9 + $0x4a] sm:$0xff]  ;;  %v3233_v47 = vld [vmem:[%s4354_s9 + $0x52] sm:$0xff]  ;;  %v4466_v48 = vpack.c.bf16 %v256_v41, %v255_v40 }
  0x38   : > { %3649 = vmatpush3.bf16.msra.mxu1 %v4221_v24  ;;  %v258_v45 = vld [vmem:[%s4354_s9 + $0xf9] sm:$0xff]  ;;  %v4468_v49 = vpack.c.bf16 %v3231_v43, %v3230_v42  ;;  %v4472_v51 = vpack.c.bf16 %v3233_v47, %v3232_v46  ;;  %v259_v53 = vld [vmem:[%s4354_s9 + $0x109] sm:$0xff]  ;;  %v260_v54 = vld [vmem:[%s4354_s9 + $0x111] sm:$0xff] }
  0x39   : > { %3793 = vmatpush3.bf16.msra.mxu0 %v4220_v18  ;;  %3682 = vmatprep.subr.bf16.mxu1 %v4437_v33  ;;  %v4470_v50 = vpack.c.bf16 %v258_v45, %v257_v44  ;;  %v3234_v55 = vld [vmem:[%s4354_s9 + $0x62] sm:$0xff]  ;;  %v3235_v56 = vld [vmem:[%s4354_s9 + $0x6a] sm:$0xff]  ;;  %v3236_v59 = vld [vmem:[%s4354_s9 + $0x7a] sm:$0xff]  ;;  %v4498_v62 = vpack.c.bf16 %v260_v54, %v259_v53 }
  0x3a   : > { %3826 = vmatprep.subr.bf16.mxu0 %v4222_v26  ;;  %v261_v57 = vld [vmem:[%s4354_s9 + $0x121] sm:$0xff]  ;;  %v262_v58 = vld [vmem:[%s4354_s9 + $0x129] sm:$0xff]  ;;  %v4500_v63 = vpack.c.bf16 %v3235_v56, %v3234_v55  ;;  %v263_v4 = vld [vmem:[%s4354_s9 + $0x139] sm:$0xff] }
  0x3b   : > { %3619 = vmatmul.mubr.msk.bf16.gmra.mrb[4].mxu1 %vm302_vm0, %v4386_v17  ;;  %v3237_v60 = vld [vmem:[%s4354_s9 + $0x82] sm:$0xff]  ;;  %v4502_v0 = vpack.c.bf16 %v262_v58, %v261_v57  ;;  %v3238_v6 = vld [vmem:[%s4354_s9 + $0x92] sm:$0xff]  ;;  %v3239_v7 = vld [vmem:[%s4354_s9 + $0x9a] sm:$0xff] }
  0x3c   : > { %3763 = vmatmul.mubr.msk.bf16.gmra.mrb[4].mxu0 %vm302_vm0, %v4402_v23  ;;  %3622 = vmatprep.mubr.msk.bf16.mxu1 %vm302_vm0, %v4402_v23  ;;  %v4504_v2 = vpack.c.bf16 %v3237_v60, %v3236_v59  ;;  %v264_v5 = vld [vmem:[%s4354_s9 + $0x141] sm:$0xff]  ;;  %v265_v8 = vld [vmem:[%s4354_s9 + $0x151] sm:$0xff]  ;;  %v266_v9 = vld [vmem:[%s4354_s9 + $0x159] sm:$0xff]  ;;  %v4525_v14 = vpack.c.bf16 %v3239_v7, %v3238_v6 }
  0x3d   : > { %3766 = vmatprep.mubr.msk.bf16.mxu0 %vm302_vm0, %v4407_v25  ;;  %v3240_v10 = vld [vmem:[%s4354_s9 + $0xaa] sm:$0xff]  ;;  %v3241_v11 = vld [vmem:[%s4354_s9 + $0xb2] sm:$0xff]  ;;  %v4523_v12 = vpack.c.bf16 %v264_v5, %v263_v4  ;;  %v4527_v15 = vpack.c.bf16 %v266_v9, %v265_v8  ;;  %v3242_v20 = vld [vmem:[%s4354_s9 + $0xc2] sm:$0xff] }
  0x3e   : > { %v4529_v16 = vpack.c.bf16 %v3241_v11, %v3240_v10  ;;  %v267_v18 = vld [vmem:[%s4354_s9 + $0x169] sm:$0xff]  ;;  %v268_v19 = vld [vmem:[%s4354_s9 + $0x171] sm:$0xff]  ;;  %v185_v22 = vld [vmem:[%s4354_s9] sm:$0xff] }
  0x3f   : > { %v3243_v21 = vld [vmem:[%s4354_s9 + $0xca] sm:$0xff]  ;;  %v3245_v27 = vld [vmem:[%s4354_s9 + $0xe2] sm:$0xff]  ;;  %v4547_v28 = vpack.c.bf16 %v268_v19, %v267_v18  ;;  %v187_v35 = vld [vmem:[%s4354_s9 + $0x18] sm:$0xff] }
  0x40   : > { %v186_v24 = vld [vmem:[%s4354_s9 + $0x8] sm:$0xff]  ;;  %v4549_v29 = vpack.c.bf16 %v3243_v21, %v3242_v20  ;;  %v188_v36 = vld [vmem:[%s4354_s9 + $0x20] sm:$0xff]  ;;  %v3246_v37 = vld [vmem:[%s4354_s9 + $0xf2] sm:$0xff] }
  0x41   : > { %v217_v30 = vpack.c.bf16 %v186_v24, %v185_v22  ;;  %v3247_v40 = vld [vmem:[%s4354_s9 + $0xfa] sm:$0xff]  ;;  %v189_v41 = vld [vmem:[%s4354_s9 + $0x30] sm:$0xff]  ;;  %v4568_v45 = vpack.c.bf16 %v188_v36, %v187_v35  ;;  %v4225_v53 = vld [vmem:[%s5024_s1 + $0x28] sm:$0xff]  }
  0x42   : > { %v190_v42 = vld [vmem:[%s4354_s9 + $0x38] sm:$0xff]  ;;  %v3248_v43 = vld [vmem:[%s4354_s9 + $0x10a] sm:$0xff]  ;;  %v4570_v46 = vpack.c.bf16 %v3247_v40, %v3246_v37  ;;  %v3250_v56 = vld [vmem:[%s4354_s9 + $0x122] sm:$0xff] }
  0x43   : > { %3623 = vmatmul.mubr.msk.bf16.gmra.mrb[8].mxu1 %vm302_vm0, %v4407_v25  ;;  %v3249_v44 = vld [vmem:[%s4354_s9 + $0x112] sm:$0xff]  ;;  %v4572_v47 = vpack.c.bf16 %v190_v42, %v189_v41  ;;  %v191_v54 = vld [vmem:[%s4354_s9 + $0x48] sm:$0xff]  ;;  %v193_v58 = vld [vmem:[%s4354_s9 + $0x60] sm:$0xff] }
  0x44   : > { %3767 = vmatmul.mubr.msk.bf16.gmra.mrb[8].mxu0 %vm302_vm0, %v4424_v31  ;;  %3626 = vmatprep.mubr.msk.bf16.mxu1 %vm302_vm0, %v4424_v31  ;;  %v192_v55 = vld [vmem:[%s4354_s9 + $0x50] sm:$0xff]  ;;  %v194_v59 = vld [vmem:[%s4354_s9 + $0x68] sm:$0xff]  ;;  %v195_v9 = vld [vmem:[%s4354_s9 + $0x78] sm:$0xff] }
  0x45   : > { %3770 = vmatprep.mubr.msk.bf16.mxu0 %vm302_vm0, %v4426_v32  ;;  %v3251_v57 = vld [vmem:[%s4354_s9 + $0x12a] sm:$0xff]  ;;  %v3253_v4 = vld [vmem:[%s4354_s9 + $0x142] sm:$0xff]  ;;  %v4601_v5 = vpack.c.bf16 %v192_v55, %v191_v54  ;;  %v4605_v7 = vpack.c.bf16 %v194_v59, %v193_v58  ;;  %v3254_v11 = vld [vmem:[%s4354_s9 + $0x152] sm:$0xff] }
  0x46   : > { %v4597_v60 = vld [vmem:[%s5024_s1 + $0x30] sm:$0xff]   ;;  %v4603_v6 = vpack.c.bf16 %v3251_v57, %v3250_v56  ;;  %v196_v10 = vld [vmem:[%s4354_s9 + $0x80] sm:$0xff]  ;;  %v198_v20 = vld [vmem:[%s4354_s9 + $0x98] sm:$0xff] }
  0x47   : > { %v3255_v18 = vld [vmem:[%s4354_s9 + $0x15a] sm:$0xff]  ;;  %v197_v19 = vld [vmem:[%s4354_s9 + $0x90] sm:$0xff]  ;;  %v4626_v24 = vpack.c.bf16 %v196_v10, %v195_v9  ;;  %v199_v35 = vld [vmem:[%s4354_s9 + $0xa8] sm:$0xff] }
  0x48   : > { %v3256_v21 = vld [vmem:[%s4354_s9 + $0x16a] sm:$0xff]  ;;  %v3257_v22 = vld [vmem:[%s4354_s9 + $0x172] sm:$0xff]  ;;  %v3258_v37 = vld [vmem:[%s4354_s9 + $0x182] sm:$0xff] }
  0x49   : > { %v200_v36 = vld [vmem:[%s4354_s9 + $0xb0] sm:$0xff]  ;;  %v201_v41 = vld [vmem:[%s4354_s9 + $0xc0] sm:$0xff]  ;;  %v202_v42 = vld [vmem:[%s4354_s9 + $0xc8] sm:$0xff] }
  0x4a   : > { %v3259_v40 = vld [vmem:[%s4354_s9 + $0x18a] sm:$0xff]  ;;  %v203_v54 = vld [vmem:[%s4354_s9 + $0xd8] sm:$0xff]  ;;  %v204_v55 = vld [vmem:[%s4354_s9 + $0xe0] sm:$0xff] }
  0x4b   : > { %3627 = vmatmul.mubr.msk.bf16.gmra.mrb[12].mxu1 %vm302_vm0, %v4426_v32  ;;  %v205_v56 = vld [vmem:[%s4354_s9 + $0xf0] sm:$0xff]  ;;  %v206_v57 = vld [vmem:[%s4354_s9 + $0xf8] sm:$0xff]  ;;  %v4666_v58 = vpack.c.bf16 %v204_v55, %v203_v54  ;;  %v209_v10 = vld [vmem:[%s4354_s9 + $0x120] sm:$0xff] }
  0x4c   : > { %3771 = vmatmul.mubr.msk.bf16.gmra.mrb[12].mxu0 %vm302_vm0, %v4446_v38  ;;  %3630 = vmatprep.mubr.msk.bf16.mxu1 %vm302_vm0, %v4446_v38  ;;  %v4668_v59 = vpack.c.bf16 %v206_v57, %v205_v56  ;;  %v208_v9 = vld [vmem:[%s4354_s9 + $0x110] sm:$0xff]  ;;  %v4229_v57 = vld [vmem:[%s5024_s1 + $0x38] sm:$0xff]  }
  0x4d   : > { %3794 = vmatprep.mubr.msk.bf16.mxu0 %vm302_vm0, %v4448_v39  ;;  %v734_v54 = vld [vmem:[%s4354_s9 + $0xa] sm:$0xff] }
  0x53   : > { %3631 = vmatmul.mubr.msk.bf16.gmra.mrb[16].mxu1 %vm302_vm0, %v4466_v48 }
  0x54   : > { %3795 = vmatmul.mubr.msk.bf16.vlgmr.msra.gmra.mrb[0].mxu0 %vm302_vm0, %v4468_v49  ;;  %3634 = vmatprep.mubr.msk.bf16.mxu1 %vm302_vm0, %v4470_v50 }
  0x55   : > { %3827 = vmatpush3.bf16.msra.mxu0 %v4222_v26  ;;  %3798 = vmatprep.mubr.msk.bf16.mxu0 %vm302_vm0, %v4472_v51  ;;  %v3244_v26 = vld [vmem:[%s4354_s9 + $0xda] sm:$0xff] }
  0x56   : > { %3828 = vmatprep.subr.bf16.mxu0 %v4224_v52  ;;  %v4551_v34 = vpack.c.bf16 %v3245_v27, %v3244_v26  ;;  %v4628_v26 = vpack.c.bf16 %v3255_v18, %v3254_v11  ;;  %v4630_v27 = vpack.c.bf16 %v198_v20, %v197_v19  ;;  %v210_v11 = vld [vmem:[%s4354_s9 + $0x128] sm:$0xff]  ;;  %v4230_v18 = vld [vmem:[%s5024_s1 + $0x80] sm:$0xff]  }
  0x57   : > { %v4691_v20 = vpack.c.bf16 %v210_v11, %v209_v10  ;;  %v4231_v11 = vld [vmem:[%s5024_s1 + $0x88] sm:$0xff]  }
  0x59   : > { %3829 = vmatpush3.bf16.msra.mxu0 %v4224_v52  ;;  %v4574_v52 = vpack.c.bf16 %v3249_v44, %v3248_v43  ;;  %v4648_v43 = vpack.c.bf16 %v200_v36, %v199_v35  ;;  %v4650_v44 = vpack.c.bf16 %v3259_v40, %v3258_v37  ;;  %v214_v35 = vld [vmem:[%s4354_s9 + $0x158] sm:$0xff]  ;;  %v215_v40 = vld [vmem:[%s4354_s9 + $0x168] sm:$0xff] }
  0x5a   : > { %3862 = vmatprep.subr.bf16.mxu0 %v4496_v61 }
  0x5b   : > { %3635 = vmatmul.mubr.msk.bf16.gmra.mrb[20].mxu1 %vm302_vm0, %v4498_v62 }
  0x5c   : > { %3799 = vmatmul.mubr.msk.bf16.gmra.mrb[4].mxu0 %vm302_vm0, %v4500_v63  ;;  %3638 = vmatprep.mubr.msk.bf16.mxu1 %vm302_vm0, %v4502_v0 }
  0x5d   : > { %3802 = vmatprep.mubr.msk.bf16.mxu0 %vm302_vm0, %v4504_v2 }
  0x63   : > { %3639 = vmatmul.mubr.msk.bf16.gmra.mrb[24].mxu1 %vm302_vm0, %v4523_v12 }
  0x64   : > { %3803 = vmatmul.mubr.msk.bf16.gmra.mrb[8].mxu0 %vm302_vm0, %v4525_v14  ;;  %3642 = vmatprep.mubr.msk.bf16.mxu1 %vm302_vm0, %v4527_v15 }
  0x65   : > { %3806 = vmatprep.mubr.msk.bf16.mxu0 %vm302_vm0, %v4529_v16 }
  0x6b   : > { %3643 = vmatmul.mubr.msk.bf16.gmra.mrb[28].mxu1 %vm302_vm0, %v4547_v28 }
  0x6c   : > { %3807 = vmatmul.mubr.msk.bf16.gmra.mrb[12].mxu0 %vm302_vm0, %v4549_v29  ;;  %3650 = vmatprep.mubr.msk.bf16.mxu1 %vm302_vm0, %v217_v30  ;;  %v4632_v30 = vpack.c.bf16 %v3257_v22, %v3256_v21  ;;  %v212_v21 = vld [vmem:[%s4354_s9 + $0x140] sm:$0xff]  ;;  %v213_v22 = vld [vmem:[%s4354_s9 + $0x150] sm:$0xff] }
  0x6d   : > { %3810 = vmatprep.mubr.msk.bf16.mxu0 %vm302_vm0, %v4551_v34  ;;  %v4707_v37 = vpack.c.bf16 %v214_v35, %v213_v22 }
  0x73   : > { %3651 = vmatmul.mubr.msk.bf16.vlgmr.msra.gmra.mrb[0].mxu1 %vm302_vm0, %v4568_v45 }
  0x74   : > { %3811 = vmatmul.mubr.msk.bf16.gmra.mrb[16].mxu0 %vm302_vm0, %v4570_v46  ;;  %3683 = vmatpush3.bf16.msra.mxu1 %v4437_v33  ;;  %v3252_v33 = vld [vmem:[%s4354_s9 + $0x13a] sm:$0xff] }
  0x75   : > { %3654 = vmatprep.mubr.msk.bf16.mxu1 %vm302_vm0, %v4572_v47  ;;  %3814 = vmatprep.mubr.msk.bf16.mxu0 %vm302_vm0, %v4574_v52  ;;  %v4607_v8 = vpack.c.bf16 %v3253_v4, %v3252_v33  ;;  %v4228_v33 = vld [vmem:[%s5024_s1 + $0x78] sm:$0xff]   ;;  %v207_v4 = vld [vmem:[%s4354_s9 + $0x108] sm:$0xff] }
  0x76   : > { %3684 = vmatprep.subr.bf16.mxu1 %v4225_v53  ;;  %v4689_v19 = vpack.c.bf16 %v208_v9, %v207_v4  ;;  %v3312_v4 = vld [vmem:[%s4354_s9 + $0x198] sm:$0xff]  ;;  %v3313_v9 = vld [vmem:[%s4354_s9 + $0x1a0] sm:$0xff] }
  0x77   : > { %v2006_v10 = vpack.c.bf16 %v3313_v9, %v3312_v4 }
  0x78   : > { %3685 = vmatpush3.bf16.msra.mxu1 %v4225_v53  ;;  %v4652_v53 = vpack.c.bf16 %v202_v42, %v201_v41  ;;  %v216_v41 = vld [vmem:[%s4354_s9 + $0x170] sm:$0xff]  ;;  %v733_v42 = vld [vmem:[%s4354_s9 + $0x2] sm:$0xff] }
  0x79   : > { %3718 = vmatprep.subr.bf16.mxu1 %v4597_v60  ;;  %v4721_v55 = vpack.c.bf16 %v216_v41, %v215_v40  ;;  %v765_v56 = vpack.c.bf16 %v734_v54, %v733_v42 }
  0x7b   : > { %3655 = vmatmul.mubr.msk.bf16.gmra.mrb[4].mxu1 %vm302_vm0, %v4601_v5 }
  0x7c   : > { %3815 = vmatmul.mubr.msk.bf16.gmra.mrb[20].mxu0 %vm302_vm0, %v4603_v6  ;;  %3658 = vmatprep.mubr.msk.bf16.mxu1 %vm302_vm0, %v4605_v7 }
  0x7d   : > { %3818 = vmatprep.mubr.msk.bf16.mxu0 %vm302_vm0, %v4607_v8 }
  0x83   : > { %3659 = vmatmul.mubr.msk.bf16.gmra.mrb[8].mxu1 %vm302_vm0, %v4626_v24 }
  0x84   : > { %3819 = vmatmul.mubr.msk.bf16.gmra.mrb[24].mxu0 %vm302_vm0, %v4628_v26  ;;  %3662 = vmatprep.mubr.msk.bf16.mxu1 %vm302_vm0, %v4630_v27 }
  0x85   : > { %3822 = vmatprep.mubr.msk.bf16.mxu0 %vm302_vm0, %v4632_v30 }
  0x8b   : > { %3663 = vmatmul.mubr.msk.bf16.gmra.mrb[12].mxu1 %vm302_vm0, %v4648_v43 }
  0x8c   : > { %3823 = vmatmul.mubr.msk.bf16.gmra.mrb[28].mxu0 %vm302_vm0, %v4650_v44  ;;  %3666 = vmatprep.mubr.msk.bf16.mxu1 %vm302_vm0, %v4652_v53 }
  0x8d   : > { %3830 = vmatprep.mubr.msk.bf16.mxu0 %vm302_vm0, %v4572_v47 }
  0x93   : > { %3667 = vmatmul.mubr.msk.bf16.gmra.mrb[16].mxu1 %vm302_vm0, %v4666_v58 }
  0x94   : > { %3831 = vmatmul.mubr.msk.bf16.vlgmr.msra.gmra.mrb[0].mxu0 %vm302_vm0, %v4601_v5  ;;  %3670 = vmatprep.mubr.msk.bf16.mxu1 %vm302_vm0, %v4668_v59 }
  0x95   : > { %3863 = vmatpush3.bf16.msra.mxu0 %v4496_v61  ;;  %3834 = vmatprep.mubr.msk.bf16.mxu0 %vm302_vm0, %v4605_v7  ;;  %v211_v61 = vld [vmem:[%s4354_s9 + $0x138] sm:$0xff] }
  0x96   : > { %3864 = vmatprep.subr.bf16.mxu0 %v4228_v33  ;;  %v4705_v36 = vpack.c.bf16 %v212_v21, %v211_v61 }
  0x99   : > { %3865 = vmatpush3.bf16.msra.mxu0 %v4228_v33 }
  0x9a   : > { %3898 = vmatprep.subr.bf16.mxu0 %v4230_v18 }
  0x9b   : > { %3671 = vmatmul.mubr.msk.bf16.gmra.mrb[20].mxu1 %vm302_vm0, %v4689_v19 }
  0x9c   : > { %3835 = vmatmul.mubr.msk.bf16.gmra.mrb[4].mxu0 %vm302_vm0, %v4626_v24  ;;  %3674 = vmatprep.mubr.msk.bf16.mxu1 %vm302_vm0, %v4691_v20 }
  0x9d   : > { %3838 = vmatprep.mubr.msk.bf16.mxu0 %vm302_vm0, %v4630_v27 }
  0xa3   : > { %3675 = vmatmul.mubr.msk.bf16.gmra.mrb[24].mxu1 %vm302_vm0, %v4705_v36 }
  0xa4   : > { %3839 = vmatmul.mubr.msk.bf16.gmra.mrb[8].mxu0 %vm302_vm0, %v4648_v43  ;;  %3678 = vmatprep.mubr.msk.bf16.mxu1 %vm302_vm0, %v4707_v37 }
  0xa5   : > { %3842 = vmatprep.mubr.msk.bf16.mxu0 %vm302_vm0, %v4652_v53 }
  0xab   : > { %3679 = vmatmul.mubr.msk.bf16.gmra.mrb[28].mxu1 %vm302_vm0, %v4721_v55 }
  0xac   : > { %3843 = vmatmul.mubr.msk.bf16.gmra.mrb[12].mxu0 %vm302_vm0, %v4666_v58  ;;  %3686 = vmatprep.mubr.msk.bf16.mxu1 %vm302_vm0, %v765_v56 }
  0xad   : > { %3846 = vmatprep.mubr.msk.bf16.mxu0 %vm302_vm0, %v4668_v59 }
  0xb3   : > { %3687 = vmatmul.mubr.msk.bf16.vlgmr.msra.gmra.mrb[0].mxu1 %vm302_vm0, %v4448_v39  ;;  %v3310_v39 = vld [vmem:[%s4354_s9 + $0x180] sm:$0xff] }
  0xb4   : > { %3847 = vmatmul.mubr.msk.bf16.gmra.mrb[16].mxu0 %vm302_vm0, %v4689_v19  ;;  %3719 = vmatpush3.bf16.msra.mxu1 %v4597_v60  ;;  %v3311_v60 = vld [vmem:[%s4354_s9 + $0x188] sm:$0xff] }
  0xb5   : > { %3690 = vmatprep.mubr.msk.bf16.mxu1 %vm302_vm0, %v4468_v49  ;;  %3850 = vmatprep.mubr.msk.bf16.mxu0 %vm302_vm0, %v4691_v20  ;;  %v4753_v33 = vpack.c.bf16 %v3311_v60, %v3310_v39 }
  0xb6   : > { %3720 = vmatprep.subr.bf16.mxu1 %v4229_v57 }
  0xb8   : > { %3721 = vmatpush3.bf16.msra.mxu1 %v4229_v57 }
  0xb9   : > { %3934 = vmatprep.subr.bf16.mxu1 %v4349_v1 }
  0xbb   : > { %3691 = vmatmul.mubr.msk.bf16.gmra.mrb[4].mxu1 %vm302_vm0, %v4472_v51 }
  0xbc   : > { %3851 = vmatmul.mubr.msk.bf16.gmra.mrb[20].mxu0 %vm302_vm0, %v4705_v36  ;;  %3694 = vmatprep.mubr.msk.bf16.mxu1 %vm302_vm0, %v4500_v63 }
  0xbd   : > { %3854 = vmatprep.mubr.msk.bf16.mxu0 %vm302_vm0, %v4707_v37 }
  0xc3   : > { %3695 = vmatmul.mubr.msk.bf16.gmra.mrb[8].mxu1 %vm302_vm0, %v4504_v2 }
  0xc4   : > { %3855 = vmatmul.mubr.msk.bf16.gmra.mrb[24].mxu0 %vm302_vm0, %v4721_v55  ;;  %3698 = vmatprep.mubr.msk.bf16.mxu1 %vm302_vm0, %v4525_v14 }
  0xc5   : > { %3858 = vmatprep.mubr.msk.bf16.mxu0 %vm302_vm0, %v4753_v33 }
  0xcb   : > { %3699 = vmatmul.mubr.msk.bf16.gmra.mrb[12].mxu1 %vm302_vm0, %v4529_v16 }
  0xcc   : > { %3859 = vmatmul.mubr.msk.bf16.gmra.mrb[28].mxu0 %vm302_vm0, %v2006_v10  ;;  %3702 = vmatprep.mubr.msk.bf16.mxu1 %vm302_vm0, %v4549_v29 }
  0xcd   : > { %3866 = vmatprep.mubr.msk.bf16.mxu0 %vm302_vm0, %v4377_v13  ;;  %v3365_v13 = vld [vmem:[%s4354_s9 + $0x189] sm:$0xff] }
  0xd3   : > { %3703 = vmatmul.mubr.msk.bf16.gmra.mrb[16].mxu1 %vm302_vm0, %v4551_v34 }
  0xd4   : > { %3867 = vmatmul.mubr.msk.bf16.vlgmr.msra.gmra.mrb[0].mxu0 %vm302_vm0, %v4386_v17  ;;  %3706 = vmatprep.mubr.msk.bf16.mxu1 %vm302_vm0, %v4570_v46 }
  0xd5   : > { %3899 = vmatpush3.bf16.msra.mxu0 %v4230_v18  ;;  %3870 = vmatprep.mubr.msk.bf16.mxu0 %vm302_vm0, %v4402_v23  ;;  %v3367_v23 = vld [vmem:[%s4354_s9 + $0x1a1] sm:$0xff] }
  0xd6   : > { %3900 = vmatprep.subr.bf16.mxu0 %v4231_v11 }
  0xd9   : > { %3901 = vmatpush3.bf16.msra.mxu0 %v4231_v11 }
  0xdb   : > { %3707 = vmatmul.mubr.msk.bf16.gmra.mrb[20].mxu1 %vm302_vm0, %v4574_v52 }
  0xdc   : > { %3871 = vmatmul.mubr.msk.bf16.gmra.mrb[4].mxu0 %vm302_vm0, %v4407_v25  ;;  %3710 = vmatprep.mubr.msk.bf16.mxu1 %vm302_vm0, %v4603_v6 }
  0xdd   : > { %3874 = vmatprep.mubr.msk.bf16.mxu0 %vm302_vm0, %v4424_v31  ;;  %v3420_v31 = vld [vmem:[%s4354_s9 + $0x19a] sm:$0xff] }
  0xe3   : > { %3711 = vmatmul.mubr.msk.bf16.gmra.mrb[24].mxu1 %vm302_vm0, %v4607_v8 }
  0xe4   : > { %3875 = vmatmul.mubr.msk.bf16.gmra.mrb[8].mxu0 %vm302_vm0, %v4426_v32  ;;  %3714 = vmatprep.mubr.msk.bf16.mxu1 %vm302_vm0, %v4628_v26  ;;  %v3421_v32 = vld [vmem:[%s4354_s9 + $0x1a2] sm:$0xff] }
  0xe5   : > { %3878 = vmatprep.mubr.msk.bf16.mxu0 %vm302_vm0, %v4446_v38  ;;  %v2618_v38 = vpack.c.bf16 %v3421_v32, %v3420_v31 }
  0xeb   : > { %3715 = vmatmul.mubr.msk.bf16.gmra.mrb[28].mxu1 %vm302_vm0, %v4632_v30 }
  0xec   : > { %3879 = vmatmul.mubr.msk.bf16.gmra.mrb[12].mxu0 %vm302_vm0, %v4466_v48  ;;  %3722 = vmatprep.mubr.msk.bf16.mxu1 %vm302_vm0, %v4568_v45 }
  0xed   : > { %3882 = vmatprep.mubr.msk.bf16.mxu0 %vm302_vm0, %v4470_v50 }
  0xf3   : > { %3723 = vmatmul.mubr.msk.bf16.vlgmr.msra.gmra.mrb[0].mxu1 %vm302_vm0, %v4572_v47  ;;  %v4912_v47 = vld [vmem:[#allocation2] ss:$0 sm:$0xff] }
  0xf4   : > { %3883 = vmatmul.mubr.msk.bf16.gmra.mrb[16].mxu0 %vm302_vm0, %v4498_v62  ;;  %3936 = vmatpush3.bf16.msra.mxu1 %v4349_v1  ;;  %v3364_v1 = vld [vmem:[%s4354_s9 + $0x181] sm:$0xff] }
  0xf5   : > { %3726 = vmatprep.mubr.msk.bf16.mxu1 %vm302_vm0, %v4601_v5  ;;  %3886 = vmatprep.mubr.msk.bf16.mxu0 %vm302_vm0, %v4502_v0  ;;  %v2311_v17 = vpack.c.bf16 %v3365_v13, %v3364_v1 }
  0xf6   : > { %3935 = vmatprep.subr.bf16.mxu1 %v4363_v3 }
  0xf8   : > { %3937 = vmatpush3.bf16.msra.mxu1 %v4363_v3  ;;  %v3366_v3 = vld [vmem:[%s4354_s9 + $0x199] sm:$0xff]  ;;  %s3447_s9 = sshll.u32 %s5035_s13, 8 }
  0xf9   : > { %v2312_v25 = vpack.c.bf16 %v3367_v23, %v3366_v3  ;;  %s4919_s22 = scalar_lea.vmem %s5026_s3, %s3447_s9 }
  0xfb   : > { %3727 = vmatmul.mubr.msk.bf16.gmra.mrb[4].mxu1 %vm302_vm0, %v4605_v7 }
  0xfc   : > { %3887 = vmatmul.mubr.msk.bf16.gmra.mrb[20].mxu0 %vm302_vm0, %v4523_v12  ;;  %3730 = vmatprep.mubr.msk.bf16.mxu1 %vm302_vm0, %v4626_v24 }
  0xfd   : > { %3890 = vmatprep.mubr.msk.bf16.mxu0 %vm302_vm0, %v4527_v15 }
 0x103   : > { %3731 = vmatmul.mubr.msk.bf16.gmra.mrb[8].mxu1 %vm302_vm0, %v4630_v27 }
 0x104   : > { %3891 = vmatmul.mubr.msk.bf16.gmra.mrb[24].mxu0 %vm302_vm0, %v4547_v28  ;;  %3734 = vmatprep.mubr.msk.bf16.mxu1 %vm302_vm0, %v4648_v43 }
 0x105   : > { %3894 = vmatprep.mubr.msk.bf16.mxu0 %vm302_vm0, %v2311_v17 }
 0x10b   : > { %3735 = vmatmul.mubr.msk.bf16.gmra.mrb[12].mxu1 %vm302_vm0, %v4652_v53 }
 0x10c   : > { %3895 = vmatmul.mubr.msk.bf16.gmra.mrb[28].mxu0 %vm302_vm0, %v2312_v25  ;;  %3738 = vmatprep.mubr.msk.bf16.mxu1 %vm302_vm0, %v4666_v58 }
 0x10d   : > { %3902 = vmatprep.mubr.msk.bf16.mxu0 %vm302_vm0, %v4468_v49 }
 0x113   : > { %3739 = vmatmul.mubr.msk.bf16.gmra.mrb[16].mxu1 %vm302_vm0, %v4668_v59 }
 0x114   : > { %3903 = vmatmul.mubr.msk.bf16.vlgmr.msra.gmra.mrb[0].mxu0 %vm302_vm0, %v4472_v51  ;;  %3742 = vmatprep.mubr.msk.bf16.mxu1 %vm302_vm0, %v4689_v19 }
 0x115   : > { %3906 = vmatprep.mubr.msk.bf16.mxu0 %vm302_vm0, %v4500_v63 }
 0x11b   : > { %3743 = vmatmul.mubr.msk.bf16.gmra.mrb[20].mxu1 %vm302_vm0, %v4691_v20 }
 0x11c   : > { %3907 = vmatmul.mubr.msk.bf16.gmra.mrb[4].mxu0 %vm302_vm0, %v4504_v2  ;;  %3746 = vmatprep.mubr.msk.bf16.mxu1 %vm302_vm0, %v4705_v36 }
 0x11d   : > { %3910 = vmatprep.mubr.msk.bf16.mxu0 %vm302_vm0, %v4525_v14 }
 0x123   : > { %3747 = vmatmul.mubr.msk.bf16.gmra.mrb[24].mxu1 %vm302_vm0, %v4707_v37 }
 0x124   : > { %3911 = vmatmul.mubr.msk.bf16.gmra.mrb[8].mxu0 %vm302_vm0, %v4529_v16  ;;  %3750 = vmatprep.mubr.msk.bf16.mxu1 %vm302_vm0, %v4721_v55 }
 0x125   : > { %3914 = vmatprep.mubr.msk.bf16.mxu0 %vm302_vm0, %v4549_v29 }
 0x12b   : > { %3751 = vmatmul.mubr.msk.bf16.gmra.mrb[28].mxu1 %vm302_vm0, %v4753_v33 }
 0x12c   : > { %3915 = vmatmul.mubr.msk.bf16.gmra.mrb[12].mxu0 %vm302_vm0, %v4551_v34  ;;  %3774 = vmatprep.mubr.msk.bf16.mxu1 %vm302_vm0, %v4466_v48 }
 0x12d   : > { %3918 = vmatprep.mubr.msk.bf16.mxu0 %vm302_vm0, %v4570_v46 }
 0x133   : > { %3775 = vmatmul.mubr.msk.bf16.vlgmr.msra.gmra.mrb[16].mxu1 %vm302_vm0, %v4470_v50 }
 0x134   : > { %3919 = vmatmul.mubr.msk.bf16.gmra.mrb[16].mxu0 %vm302_vm0, %v4574_v52  ;;  %3778 = vmatprep.mubr.msk.bf16.mxu1 %vm302_vm0, %v4498_v62 }
 0x135   : > { %3922 = vmatprep.mubr.msk.bf16.mxu0 %vm302_vm0, %v4603_v6 }
 0x13b   : > { %3779 = vmatmul.mubr.msk.bf16.gmra.mrb[20].mxu1 %vm302_vm0, %v4502_v0 }
 0x13c   : > { %3923 = vmatmul.mubr.msk.bf16.gmra.mrb[20].mxu0 %vm302_vm0, %v4607_v8  ;;  %3782 = vmatprep.mubr.msk.bf16.mxu1 %vm302_vm0, %v4523_v12 }
 0x13d   : > { %3926 = vmatprep.mubr.msk.bf16.mxu0 %vm302_vm0, %v4628_v26 }
 0x143   : > { %3783 = vmatmul.mubr.msk.bf16.gmra.mrb[24].mxu1 %vm302_vm0, %v4527_v15 }
 0x144   : > { %3927 = vmatmul.mubr.msk.bf16.gmra.mrb[24].mxu0 %vm302_vm0, %v4632_v30  ;;  %3786 = vmatprep.mubr.msk.bf16.mxu1 %vm302_vm0, %v4547_v28 }
 0x145   : > { %3930 = vmatprep.mubr.msk.bf16.mxu0 %vm302_vm0, %v4650_v44 }
 0x14b   : > { %3787 = vmatmul.mubr.msk.bf16.gmra.mrb[28].mxu1 %vm302_vm0, %v2311_v17 }
 0x14c   : > { %3931 = vmatmul.mubr.msk.bf16.gmra.mrb[28].mxu0 %vm302_vm0, %v2618_v38 }
 0x1c6   : > { %v3724_v48 = vpop.f32.mrb[0].mxu1 }
 0x1c7   : > { %v1187_v49 = vpop.f32.mrb[1].mxu1 }
 0x1c8   : > { %v3725_v50 = vpop.f32.mrb[2].mxu1 }
 0x1c9   : > { %v1190_v51 = vpop.f32.mrb[3].mxu1 }
 0x1ce   : > { %v3728_v62 = vpop.f32.mrb[4].mxu1 }
 0x1cf   : > { %v1203_v63 = vpop.f32.mrb[5].mxu1 }
 0x1d0   : > { %v3729_v0 = vpop.f32.mrb[6].mxu1 }
 0x1d1   : > { %v1206_v2 = vpop.f32.mrb[7].mxu1 }
 0x1d6   : > { %v3732_v12 = vpop.f32.mrb[8].mxu1 }
 0x1d7   : > { %v1219_v14 = vpop.f32.mrb[9].mxu1 }
 0x1d8   : > { %v3733_v15 = vpop.f32.mrb[10].mxu1 }
 0x1d9   : > { %v1222_v16 = vpop.f32.mrb[11].mxu1 }
 0x1de   : > { %v4904_v28 = vpop.f32.mrb[12].mxu1 }
 0x1df   : > { %v4906_v29 = vpop.f32.mrb[13].mxu1 }
 0x1e0   : > { %v4908_v34 = vpop.f32.mrb[14].mxu1 }
 0x1e1   : > { %v4910_v45 = vpop.f32.mrb[15].mxu1 }
 0x1e7   : > { %v3904_v46 = vpop.f32.mrb[0].mxu0 }
 0x1e8   : > { %v3938_v52 = vadd.f32 %v3904_v46, %v3724_v48  ;;  %v2718_v5 = vpop.f32.mrb[1].mxu0 }
 0x1e9   : > { %v3939_v6 = vadd.f32 %v2718_v5, %v1187_v49  ;;  %v3905_v7 = vpop.f32.mrb[2].mxu0 }
 0x1ea   : > { %v2886_v8 = vadd.f32 %v3938_v52, %v4912_v47  ;;  %v3940_v24 = vadd.f32 %v3905_v7, %v3725_v50  ;;  %v2721_v26 = vpop.f32.mrb[3].mxu0 }
 0x1eb   : > { %v2884_v27 = vadd.f32 %v3939_v6, %v4912_v47  ;;  %v3941_v30 = vadd.f32 %v2721_v26, %v1190_v51 }
 0x1ec   : > { %v2918_v43 = vmax.f32 %v2886_v8, 0.0  ;;  %v2887_v44 = vadd.f32 %v3940_v24, %v4912_v47 }
 0x1ed   : > { %v2916_v53 = vmax.f32 %v2884_v27, 0.0  ;;  %v2885_v58 = vadd.f32 %v3941_v30, %v4912_v47 }
 0x1ee   : > { %2951 = vst.msk [vmem:[%s4919_s22 + $0x10] sm:$0xff] %vm2948_vm1, %v2918_v43  ;;  %v2919_v59 = vmax.f32 %v2887_v44, 0.0 }
 0x1ef   : > { %2949 = vst.msk [vmem:[%s4919_s22] sm:$0xff] %vm2948_vm1, %v2916_v53  ;;  %v2917_v18 = vmax.f32 %v2885_v58, 0.0  ;;  %v3908_v19 = vpop.f32.mrb[4].mxu0 }
 0x1f0   : > { %2952 = vst.msk [vmem:[%s4919_s22 + $0x18] sm:$0xff] %vm2948_vm1, %v2919_v59  ;;  %v3942_v20 = vadd.f32 %v3908_v19, %v3728_v62  ;;  %v2734_v61 = vpop.f32.mrb[5].mxu0 }
 0x1f1   : > { %2950 = vst.msk [vmem:[%s4919_s22 + $0x8] sm:$0xff] %vm2948_vm1, %v2917_v18  ;;  %v3943_v21 = vadd.f32 %v2734_v61, %v1203_v63  ;;  %v3909_v22 = vpop.f32.mrb[6].mxu0 }
 0x1f2   : > { %v2890_v35 = vadd.f32 %v3942_v20, %v4912_v47  ;;  %v3944_v36 = vadd.f32 %v3909_v22, %v3729_v0  ;;  %v2737_v37 = vpop.f32.mrb[7].mxu0 }
 0x1f3   : > { %v2888_v40 = vadd.f32 %v3943_v21, %v4912_v47  ;;  %v3945_v41 = vadd.f32 %v2737_v37, %v1206_v2 }
 0x1f4   : > { %v2922_v42 = vmax.f32 %v2890_v35, 0.0  ;;  %v2891_v54 = vadd.f32 %v3944_v36, %v4912_v47 }
 0x1f5   : > { %v2920_v55 = vmax.f32 %v2888_v40, 0.0  ;;  %v2889_v56 = vadd.f32 %v3945_v41, %v4912_v47 }
 0x1f6   : > { %2955 = vst.msk [vmem:[%s4919_s22 + $0x30] sm:$0xff] %vm2948_vm1, %v2922_v42  ;;  %v2923_v57 = vmax.f32 %v2891_v54, 0.0 }
 0x1f7   : > { %2953 = vst.msk [vmem:[%s4919_s22 + $0x20] sm:$0xff] %vm2948_vm1, %v2920_v55  ;;  %v2921_v39 = vmax.f32 %v2889_v56, 0.0  ;;  %v3912_v60 = vpop.f32.mrb[8].mxu0 }
 0x1f8   : > { %2956 = vst.msk [vmem:[%s4919_s22 + $0x38] sm:$0xff] %vm2948_vm1, %v2923_v57  ;;  %v3946_v33 = vadd.f32 %v3912_v60, %v3732_v12  ;;  %v2750_v4 = vpop.f32.mrb[9].mxu0 }
 0x1f9   : > { %2954 = vst.msk [vmem:[%s4919_s22 + $0x28] sm:$0xff] %vm2948_vm1, %v2921_v39  ;;  %v3947_v9 = vadd.f32 %v2750_v4, %v1219_v14  ;;  %v3913_v10 = vpop.f32.mrb[10].mxu0 }
 0x1fa   : > { %v2894_v11 = vadd.f32 %v3946_v33, %v4912_v47  ;;  %v3948_v1 = vadd.f32 %v3913_v10, %v3733_v15  ;;  %v2753_v13 = vpop.f32.mrb[11].mxu0 }
 0x1fb   : > { %v2892_v17 = vadd.f32 %v3947_v9, %v4912_v47  ;;  %v3949_v3 = vadd.f32 %v2753_v13, %v1222_v16 }
 0x1fc   : > { %v2926_v23 = vmax.f32 %v2894_v11, 0.0  ;;  %v2895_v25 = vadd.f32 %v3948_v1, %v4912_v47 }
 0x1fd   : > { %v2924_v31 = vmax.f32 %v2892_v17, 0.0  ;;  %v2893_v32 = vadd.f32 %v3949_v3, %v4912_v47 }
 0x1fe   : > { %2959 = vst.msk [vmem:[%s4919_s22 + $0x50] sm:$0xff] %vm2948_vm1, %v2926_v23  ;;  %v2927_v38 = vmax.f32 %v2895_v25, 0.0 }
 0x1ff   : > { %2957 = vst.msk [vmem:[%s4919_s22 + $0x40] sm:$0xff] %vm2948_vm1, %v2924_v31  ;;  %v2925_v48 = vmax.f32 %v2893_v32, 0.0  ;;  %v3916_v49 = vpop.f32.mrb[12].mxu0 }
 0x200   : > { %2960 = vst.msk [vmem:[%s4919_s22 + $0x58] sm:$0xff] %vm2948_vm1, %v2927_v38  ;;  %v3950_v50 = vadd.f32 %v3916_v49, %v4904_v28  ;;  %v2766_v51 = vpop.f32.mrb[13].mxu0 }
 0x201   : > { %2958 = vst.msk [vmem:[%s4919_s22 + $0x48] sm:$0xff] %vm2948_vm1, %v2925_v48  ;;  %v3951_v62 = vadd.f32 %v2766_v51, %v4906_v29  ;;  %v3917_v63 = vpop.f32.mrb[14].mxu0 }
 0x202   : > { %v2898_v0 = vadd.f32 %v3950_v50, %v4912_v47  ;;  %v3952_v2 = vadd.f32 %v3917_v63, %v4908_v34  ;;  %v2769_v12 = vpop.f32.mrb[15].mxu0 }
 0x203   : > { %v2896_v14 = vadd.f32 %v3951_v62, %v4912_v47  ;;  %v3953_v15 = vadd.f32 %v2769_v12, %v4910_v45 }
 0x204   : > { %v2930_v16 = vmax.f32 %v2898_v0, 0.0  ;;  %v2899_v28 = vadd.f32 %v3952_v2, %v4912_v47 }
 0x205   : > { %v2928_v46 = vmax.f32 %v2896_v14, 0.0  ;;  %v2897_v52 = vadd.f32 %v3953_v15, %v4912_v47 }
 0x206   : > { %2963 = vst.msk [vmem:[%s4919_s22 + $0x70] sm:$0xff] %vm2948_vm1, %v2930_v16  ;;  %v2931_v29 = vmax.f32 %v2899_v28, 0.0  ;;  %v3776_v5 = vpop.f32.mrb[16].mxu1 }
 0x207   : > { %2961 = vst.msk [vmem:[%s4919_s22 + $0x60] sm:$0xff] %vm2948_vm1, %v2928_v46  ;;  %v2929_v6 = vmax.f32 %v2897_v52, 0.0  ;;  %v3920_v34 = vpop.f32.mrb[16].mxu0  ;;  %v1557_v7 = vpop.f32.mrb[17].mxu1 }
 0x208   : > { %2964 = vst.msk [vmem:[%s4919_s22 + $0x78] sm:$0xff] %vm2948_vm1, %v2931_v29  ;;  %v3954_v8 = vadd.f32 %v3920_v34, %v3776_v5  ;;  %v2782_v45 = vpop.f32.mrb[17].mxu0  ;;  %v3777_v24 = vpop.f32.mrb[18].mxu1 }
 0x209   : > { %2962 = vst.msk [vmem:[%s4919_s22 + $0x68] sm:$0xff] %vm2948_vm1, %v2929_v6  ;;  %v3955_v26 = vadd.f32 %v2782_v45, %v1557_v7  ;;  %v3921_v27 = vpop.f32.mrb[18].mxu0  ;;  %v1560_v30 = vpop.f32.mrb[19].mxu1 }
 0x20a   : > { %v2902_v43 = vadd.f32 %v3954_v8, %v4912_v47  ;;  %v3956_v44 = vadd.f32 %v3921_v27, %v3777_v24  ;;  %v2785_v53 = vpop.f32.mrb[19].mxu0 }
 0x20b   : > { %v2900_v58 = vadd.f32 %v3955_v26, %v4912_v47  ;;  %v3957_v59 = vadd.f32 %v2785_v53, %v1560_v30 }
 0x20c   : > { %v2934_v18 = vmax.f32 %v2902_v43, 0.0  ;;  %v2903_v19 = vadd.f32 %v3956_v44, %v4912_v47 }
 0x20d   : > { %v2932_v20 = vmax.f32 %v2900_v58, 0.0  ;;  %v2901_v61 = vadd.f32 %v3957_v59, %v4912_v47 }
 0x20e   : > { %2967 = vst.msk [vmem:[%s4919_s22 + $0x90] sm:$0xff] %vm2948_vm1, %v2934_v18  ;;  %v2935_v21 = vmax.f32 %v2903_v19, 0.0  ;;  %v3780_v22 = vpop.f32.mrb[20].mxu1 }
 0x20f   : > { %2965 = vst.msk [vmem:[%s4919_s22 + $0x80] sm:$0xff] %vm2948_vm1, %v2932_v20  ;;  %v2933_v35 = vmax.f32 %v2901_v61, 0.0  ;;  %v3924_v36 = vpop.f32.mrb[20].mxu0  ;;  %v1573_v37 = vpop.f32.mrb[21].mxu1 }
 0x210   : > { %2968 = vst.msk [vmem:[%s4919_s22 + $0x98] sm:$0xff] %vm2948_vm1, %v2935_v21  ;;  %v3958_v40 = vadd.f32 %v3924_v36, %v3780_v22  ;;  %v2798_v41 = vpop.f32.mrb[21].mxu0  ;;  %v3781_v42 = vpop.f32.mrb[22].mxu1 }
 0x211   : > { %2966 = vst.msk [vmem:[%s4919_s22 + $0x88] sm:$0xff] %vm2948_vm1, %v2933_v35  ;;  %v3959_v54 = vadd.f32 %v2798_v41, %v1573_v37  ;;  %v3925_v55 = vpop.f32.mrb[22].mxu0  ;;  %v1576_v56 = vpop.f32.mrb[23].mxu1 }
 0x212   : > { %v2906_v57 = vadd.f32 %v3958_v40, %v4912_v47  ;;  %v3960_v39 = vadd.f32 %v3925_v55, %v3781_v42  ;;  %v2801_v60 = vpop.f32.mrb[23].mxu0 }
 0x213   : > { %v2904_v33 = vadd.f32 %v3959_v54, %v4912_v47  ;;  %v3961_v4 = vadd.f32 %v2801_v60, %v1576_v56 }
 0x214   : > { %v2938_v9 = vmax.f32 %v2906_v57, 0.0  ;;  %v2907_v10 = vadd.f32 %v3960_v39, %v4912_v47 }
 0x215   : > { %v2936_v11 = vmax.f32 %v2904_v33, 0.0  ;;  %v2905_v1 = vadd.f32 %v3961_v4, %v4912_v47 }
 0x216   : > { %2971 = vst.msk [vmem:[%s4919_s22 + $0xb0] sm:$0xff] %vm2948_vm1, %v2938_v9  ;;  %v2939_v13 = vmax.f32 %v2907_v10, 0.0  ;;  %v3784_v17 = vpop.f32.mrb[24].mxu1 }
 0x217   : > { %2969 = vst.msk [vmem:[%s4919_s22 + $0xa0] sm:$0xff] %vm2948_vm1, %v2936_v11  ;;  %v2937_v3 = vmax.f32 %v2905_v1, 0.0  ;;  %v3928_v23 = vpop.f32.mrb[24].mxu0  ;;  %v1589_v25 = vpop.f32.mrb[25].mxu1 }
 0x218   : > { %2972 = vst.msk [vmem:[%s4919_s22 + $0xb8] sm:$0xff] %vm2948_vm1, %v2939_v13  ;;  %v3962_v31 = vadd.f32 %v3928_v23, %v3784_v17  ;;  %v2814_v32 = vpop.f32.mrb[25].mxu0  ;;  %v3785_v38 = vpop.f32.mrb[26].mxu1 }
 0x219   : > { %2970 = vst.msk [vmem:[%s4919_s22 + $0xa8] sm:$0xff] %vm2948_vm1, %v2937_v3  ;;  %v3963_v48 = vadd.f32 %v2814_v32, %v1589_v25  ;;  %v3929_v49 = vpop.f32.mrb[26].mxu0  ;;  %v1592_v50 = vpop.f32.mrb[27].mxu1 }
 0x21a   : > { %v2910_v51 = vadd.f32 %v3962_v31, %v4912_v47  ;;  %v3964_v62 = vadd.f32 %v3929_v49, %v3785_v38  ;;  %v2817_v63 = vpop.f32.mrb[27].mxu0 }
 0x21b   : > { %v2908_v0 = vadd.f32 %v3963_v48, %v4912_v47  ;;  %v3965_v2 = vadd.f32 %v2817_v63, %v1592_v50 }
 0x21c   : > { %v2942_v12 = vmax.f32 %v2910_v51, 0.0  ;;  %v2911_v14 = vadd.f32 %v3964_v62, %v4912_v47 }
 0x21d   : > { %v2940_v15 = vmax.f32 %v2908_v0, 0.0  ;;  %v2909_v16 = vadd.f32 %v3965_v2, %v4912_v47 }
 0x21e   : > { %2975 = vst.msk [vmem:[%s4919_s22 + $0xd0] sm:$0xff] %vm2948_vm1, %v2942_v12  ;;  %v2943_v28 = vmax.f32 %v2911_v14, 0.0  ;;  %v3788_v46 = vpop.f32.mrb[28].mxu1 }
 0x21f   : > { %2973 = vst.msk [vmem:[%s4919_s22 + $0xc0] sm:$0xff] %vm2948_vm1, %v2940_v15  ;;  %v2941_v52 = vmax.f32 %v2909_v16, 0.0  ;;  %v3932_v29 = vpop.f32.mrb[28].mxu0  ;;  %v1605_v5 = vpop.f32.mrb[29].mxu1 }
 0x220   : > { %2976 = vst.msk [vmem:[%s4919_s22 + $0xd8] sm:$0xff] %vm2948_vm1, %v2943_v28  ;;  %v3966_v6 = vadd.f32 %v3932_v29, %v3788_v46  ;;  %v2830_v34 = vpop.f32.mrb[29].mxu0  ;;  %v3789_v7 = vpop.f32.mrb[30].mxu1 }
 0x221   : > { %2974 = vst.msk [vmem:[%s4919_s22 + $0xc8] sm:$0xff] %vm2948_vm1, %v2941_v52  ;;  %v3967_v8 = vadd.f32 %v2830_v34, %v1605_v5  ;;  %v3933_v45 = vpop.f32.mrb[30].mxu0  ;;  %v1608_v24 = vpop.f32.mrb[31].mxu1 }
 0x222   : > { %v2914_v26 = vadd.f32 %v3966_v6, %v4912_v47  ;;  %v3968_v27 = vadd.f32 %v3933_v45, %v3789_v7  ;;  %v2833_v30 = vpop.f32.mrb[31].mxu0 }
 0x223   : > { %v2912_v43 = vadd.f32 %v3967_v8, %v4912_v47  ;;  %v3969_v44 = vadd.f32 %v2833_v30, %v1608_v24 }
 0x224   : > { %v2946_v53 = vmax.f32 %v2914_v26, 0.0  ;;  %v2915_v58 = vadd.f32 %v3968_v27, %v4912_v47 }
 0x225   : > { %v2944_v59 = vmax.f32 %v2912_v43, 0.0  ;;  %v2913_v18 = vadd.f32 %v3969_v44, %v4912_v47 }
 0x226   : > { %2979 = vst.msk [vmem:[%s4919_s22 + $0xf0] sm:$0xff] %vm2948_vm1, %v2946_v53  ;;  %v2947_v19 = vmax.f32 %v2915_v58, 0.0 }
 0x227   : > { %2977 = vst.msk [vmem:[%s4919_s22 + $0xe0] sm:$0xff] %vm2948_vm1, %v2944_v59  ;;  %v2945_v20 = vmax.f32 %v2913_v18, 0.0 }
 0x228   : > { %2980 = vst.msk [vmem:[%s4919_s22 + $0xf8] sm:$0xff] %vm2948_vm1, %v2947_v19 }
 0x229   : > { %2978 = vst.msk [vmem:[%s4919_s22 + $0xe8] sm:$0xff] %vm2948_vm1, %v2945_v20 }
 0x22a PF: > { %s14_s12 = sadd.s32 1, %s4270_s12  }
 0x22b   : > { %p11_p2 = scmp.ge.s32.totalorder %s14_s12, 4  }
 0x22d   :  { %13 = sbr.rel (!%p11_p2) target bundleno = 1 (0x1), region = 77 }
 0x234   :  { %3002 = vsyncpa [#allocation3], 1 }
 0x235   :  { %3004 = vsyncpa [#allocation3 + $0x1], 1 }

// kernel: forward.14
= control target key start
LH: loop header
LB: loop body
LE: loop exit
PB: predicated region body
PF: predicated region fallthrough
CT: control target
= control target key end

     0   :  { %8 = vsyncpa [#allocation3], 0  ;;  %s5445_s0 = inlined_call_operand.vmem [shape: f32[2,18,18,1], index: 0, kind: input, shape index: {}]   ;;  %s5446_s1 = inlined_call_operand.hbm [shape: f32[9,1,32], index: 1, kind: input, shape index: {}]   ;;  %s5447_s2 = inlined_call_operand.hbm [shape: f32[1,32], index: 2, kind: input, shape index: {}]   ;;  %s5448_s3 = inlined_call_operand.vmem [shape: f32[2,16,16,32], index: 3, kind: output, shape index: {}]  }
   0x1   :  { %9 = vsyncpa [#allocation5], 0  ;;  %s3107_s12 = smov 0  }
   0x2 LB: > { %s3113_s13 = sadd.s32 4294967295, %s3080_s12   ;;  %p2759_p0 = scmp.ge.s32.totalorder %s3080_s12, 1  ;;  %s3080_s12 = sphi %s3107_s12, %s15_s12  }
   0x3   : > { %p114_p1 = scmp.lt.s32.totalorder %s3080_s12, 3  ;;  %s3082_s14 = smov [#allocation2]  }
   0x4   : > { %s126_s15 = sshll.u32 %s3082_s14, 4  ;;  %p5449_p3 = scmp.eq.s32.totalorder %s3113_s13, 0  ;;  %s127_s15 = int_to_ptr.vmem [resolvable:$true] %s126_s15 }
   0x5   : > { %p3117_p2 = pnand %p2759_p0, %p114_p1  ;;  %s3083_s17 = smov [#allocation4]  }
   0x6   : > { %s140_s18 = sshll.u32 %s3083_s17, 4  ;;  %s3010_s22 = scalar_lea.hbm %s5446_s1, 144  ;;  %s3130_s18 = int_to_ptr.vmem [resolvable:$true] %s140_s18 }
   0x7   : > { %s5483_s16 = scalar_select %p3117_p2, 1, 0 }
   0x8   : > { %p2983_p4 = pneg %p3117_p2  ;;  %p3011_p6 = scmp.ne.s32.totalorder %s5446_s1, %s3010_s22 }
   0x9   : > { %p3017_p10 = scmp.lt.u32.totalorder %s3010_s22, %s5446_s1 }
   0xa   : > { %p3126_p5 = pnand %p5449_p3, %p2983_p4 }
   0xc   : > { %p3012_p7 = pneg %p3126_p5 }
   0xe   : > { %p3013_p8 = pnand %p3012_p7, %p3011_p6 }
  0x10   : > { %p3014_p9 = pneg %p3013_p8 }
  0x12   : > { %p3019_p11 = pnand %p3017_p10, %p3014_p9 }
  0x14   : > { %3022 = shalt.err (!%p3019_p11)
}
  0x15   : > { %s3023_s27 = scalar_lea.vmem %s127_s15, 144  ;;  %s3030_s28 = scalar_lea.vmem %s127_s15, 160 }
  0x16   : > { %p3024_p12 = scmp.ne.s32.totalorder %s127_s15, %s3023_s27  ;;  %p3031_p1 = scmp.lt.s32.totalorder %s127_s15, %s127_s15 }
  0x17   : > { %p3032_p4 = scmp.lt.s32.totalorder %s3030_s28, %s3023_s27 }
  0x18   : > { %p3026_p13 = pnand %p3024_p12, %p3012_p7 }
  0x19   : > { %p3033_p3 = por %p3032_p4, %p3031_p1 }
  0x1a   : > { %p3027_p0 = pneg %p3026_p13 }
  0x1c   : > { %p3034_p2 = pnand %p3033_p3, %p3027_p0 }
  0x1e   : > { %3037 = shalt.err (!%p3034_p2)
}
  0x1f   : > { %s3084_s29 = smov 16   ;;  %s3085_s30 = smov 1  }
  0x20   : > { %2986 = dma.hbm_to_vmem [thread:$0]  (!%p3126_p5), %s5446_s1, 144, %s127_s15, [#allocation3], %s3084_s29, %s3084_s29, %s3085_s30  }
  0x21   : > { %s3038_s8 = scalar_lea.hbm %s5447_s2, 16 }
  0x22   : > { %p3039_p6 = scmp.ne.s32.totalorder %s5447_s2, %s3038_s8  ;;  %p3045_p8 = scmp.lt.u32.totalorder %s3038_s8, %s5447_s2 }
  0x24   : > { %p3041_p2 = pnand %p3039_p6, %p3012_p7 }
  0x26   : > { %p3042_p3 = pneg %p3041_p2 }
  0x28   : > { %p3047_p9 = pnand %p3045_p8, %p3042_p3 }
  0x2a   : > { %3050 = shalt.err (!%p3047_p9)
}
  0x2b   : > { %s3051_s15 = scalar_lea.vmem %s3130_s18, 16  ;;  %s3058_s17 = scalar_lea.vmem %s3130_s18, 32 }
  0x2c   : > { %p3052_p10 = scmp.ne.s32.totalorder %s3130_s18, %s3051_s15  ;;  %p3059_p13 = scmp.lt.s32.totalorder %s3130_s18, %s3130_s18 }
  0x2d   : > { %p3060_p0 = scmp.lt.s32.totalorder %s3058_s17, %s3051_s15 }
  0x2e   : > { %p3054_p11 = pnand %p3052_p10, %p3012_p7 }
  0x2f   : > { %p3061_p1 = por %p3060_p0, %p3059_p13 }
  0x30   : > { %p3055_p12 = pneg %p3054_p11 }
  0x32   : > { %p3062_p4 = pnand %p3061_p1, %p3055_p12 }
  0x34   : > { %3065 = shalt.err (!%p3062_p4)
}
  0x35   : > { %2989 = dma.hbm_to_vmem [thread:$0]  (!%p3126_p5), %s5447_s2, 16, %s3130_s18, [#allocation5]  }
  0x36   : > { %p5485_p6 = scmp.ne.s32.totalorder %s5483_s16, 0 }
  0x38   : > { %161 = sbr.rel (%p5485_p6) target bundleno = 787 (0x313), region = 32 }
  0x3f   : > { %p5486_p7 = scmp.eq.s32.totalorder %s3113_s13, 0 }
  0x41   : > { %3071 = dma.done.wait (%p5486_p7), [#allocation3], 144   ;;  %p5487_p2 = pmov %p5486_p7 }
  0x43   : > { %3073 = vsyncadd (%p5487_p2), [#allocation3], 4294967152  ;;  %p5488_p3 = pmov %p5487_p2 }
  0x44   : > { %p5489_p8 = pmov %p5487_p2 }
  0x45   : > { %3075 = dma.done.wait (%p5488_p3), [#allocation5], 16  }
  0x46   : > { %3077 = vsyncadd (%p5489_p8), [#allocation5], 4294967280  ;;  %p189_p9 = scmp.lt.s32.totalorder %s3113_s13, 1  ;;  %v3086_v0 = vmov 0   ;;  %vm2647_vm0 = vcmask 261120  }
  0x47   : > { %3008 = vset.pattern.permute.xlu1 %v3086_v0  ;;  %3007 = vset.pattern.permute.xlu0 %v3086_v0 }
  0x48   : > { %s6007_s13 = smov (!%p189_p9, %s3113_s13), 1 }
  0x49   : > { %s2974_s16 = smul.u32 432, %s6007_s13  ;;  %s2973_s23 = sshll.u32 %s6007_s13, 8 }
  0x4a   : > { %s5202_s25 = scalar_lea.vmem %s5448_s3, %s2973_s23 }
  0x4b   : > { %s3198_s22 = scalar_lea.vmem %s5445_s0, %s2974_s16 }
  0x4c   : > { %v3201_v1 = vld [vmem:[%s3198_s22 + $0x18] sm:$0xff]  ;;  %v199_v2 = vld [vmem:[%s3198_s22] sm:$0xff]  ;;  %v200_v4 = vld [vmem:[%s3198_s22 + $0x8] sm:$0xff] }
  0x4d   : > { %244 = vperm.xlu1 %3008, %v3201_v1   ;;  %234 = vperm.xlu0 %3007, %v199_v2   ;;  %v3206_v3 = vld [vmem:[%s3198_s22 + $0x20] sm:$0xff]  ;;  %v3211_v5 = vld [vmem:[%s3198_s22 + $0x38] sm:$0xff]  ;;  %v3214_v6 = vld [vmem:[%s3198_s22 + $0x30] sm:$0xff] }
  0x4e   : > { %v3219_v7 = vld [vmem:[%s3198_s22 + $0x50] sm:$0xff]  ;;  %v3222_v8 = vld [vmem:[%s3198_s22 + $0x48] sm:$0xff]  ;;  %v3230_v10 = vld [vmem:[%s3198_s22 + $0x60] sm:$0xff] }
  0x4f   : > { %v3227_v9 = vld [vmem:[%s3198_s22 + $0x68] sm:$0xff]  ;;  %v3235_v11 = vld [vmem:[%s3198_s22 + $0x80] sm:$0xff]  ;;  %v3238_v12 = vld [vmem:[%s3198_s22 + $0x78] sm:$0xff] }
  0x50   : > { %v3243_v13 = vld [vmem:[%s3198_s22 + $0x98] sm:$0xff]  ;;  %v3246_v14 = vld [vmem:[%s3198_s22 + $0x90] sm:$0xff]  ;;  %v3254_v16 = vld [vmem:[%s3198_s22 + $0xa8] sm:$0xff] }
  0x51   : > { %249 = vperm.xlu1 %3008, %v3206_v3   ;;  %239 = vperm.xlu0 %3007, %v200_v4   ;;  %v3251_v15 = vld [vmem:[%s3198_s22 + $0xb0] sm:$0xff]  ;;  %v3259_v17 = vld [vmem:[%s3198_s22 + $0xc8] sm:$0xff]  ;;  %v3262_v18 = vld [vmem:[%s3198_s22 + $0xc0] sm:$0xff] }
  0x52   : > { %v3267_v19 = vld [vmem:[%s3198_s22 + $0xe0] sm:$0xff]  ;;  %v3270_v20 = vld [vmem:[%s3198_s22 + $0xd8] sm:$0xff]  ;;  %v3278_v22 = vld [vmem:[%s3198_s22 + $0xf0] sm:$0xff] }
  0x53   : > { %v3275_v21 = vld [vmem:[%s3198_s22 + $0xf8] sm:$0xff]  ;;  %v3283_v23 = vld [vmem:[%s3198_s22 + $0x110] sm:$0xff]  ;;  %v3286_v24 = vld [vmem:[%s3198_s22 + $0x108] sm:$0xff] }
  0x54   : > { %v3291_v25 = vld [vmem:[%s3198_s22 + $0x128] sm:$0xff]  ;;  %v3294_v26 = vld [vmem:[%s3198_s22 + $0x120] sm:$0xff]  ;;  %v3302_v28 = vld [vmem:[%s3198_s22 + $0x138] sm:$0xff] }
  0x55   : > { %259 = vperm.xlu1 %3008, %v3211_v5   ;;  %254 = vperm.xlu0 %3007, %v3214_v6   ;;  %v3299_v27 = vld [vmem:[%s3198_s22 + $0x140] sm:$0xff]  ;;  %v3307_v29 = vld [vmem:[%s3198_s22 + $0x158] sm:$0xff]  ;;  %v3310_v30 = vld [vmem:[%s3198_s22 + $0x150] sm:$0xff] }
  0x56   : > { %v3315_v31 = vld [vmem:[%s3198_s22 + $0x170] sm:$0xff]  ;;  %v3318_v32 = vld [vmem:[%s3198_s22 + $0x168] sm:$0xff]  ;;  %v3328_v36 = vld [vmem:[%s3198_s22 + $0x19] sm:$0xff] }
  0x57   : > { %v463_v33 = vld [vmem:[%s3198_s22 + $0x9] sm:$0xff]  ;;  %v462_v34 = vld [vmem:[%s3198_s22 + $0x1] sm:$0xff]  ;;  %v3333_v37 = vld [vmem:[%s3198_s22 + $0x39] sm:$0xff] }
  0x58   : > { %v3325_v35 = vld [vmem:[%s3198_s22 + $0x21] sm:$0xff]  ;;  %v3336_v38 = vld [vmem:[%s3198_s22 + $0x31] sm:$0xff]  ;;  %v3344_v40 = vld [vmem:[%s3198_s22 + $0x49] sm:$0xff] }
  0x59   : > { %269 = vperm.xlu1 %3008, %v3219_v7   ;;  %264 = vperm.xlu0 %3007, %v3222_v8   ;;  %v3341_v39 = vld [vmem:[%s3198_s22 + $0x51] sm:$0xff]  ;;  %v3349_v41 = vld [vmem:[%s3198_s22 + $0x69] sm:$0xff]  ;;  %v3352_v42 = vld [vmem:[%s3198_s22 + $0x61] sm:$0xff] }
  0x5a   : > { %v3357_v43 = vld [vmem:[%s3198_s22 + $0x81] sm:$0xff]  ;;  %v3360_v44 = vld [vmem:[%s3198_s22 + $0x79] sm:$0xff]  ;;  %v3368_v46 = vld [vmem:[%s3198_s22 + $0x91] sm:$0xff] }
  0x5b   : > { %v3365_v45 = vld [vmem:[%s3198_s22 + $0x99] sm:$0xff]  ;;  %v3373_v47 = vld [vmem:[%s3198_s22 + $0xb1] sm:$0xff]  ;;  %v3376_v48 = vld [vmem:[%s3198_s22 + $0xa9] sm:$0xff] }
  0x5c   : > { %v3381_v49 = vld [vmem:[%s3198_s22 + $0xc9] sm:$0xff]  ;;  %v3384_v50 = vld [vmem:[%s3198_s22 + $0xc1] sm:$0xff]  ;;  %v3392_v52 = vld [vmem:[%s3198_s22 + $0xd9] sm:$0xff] }
  0x5d   : > { %279 = vperm.xlu1 %3008, %v3227_v9   ;;  %274 = vperm.xlu0 %3007, %v3230_v10   ;;  %v3389_v51 = vld [vmem:[%s3198_s22 + $0xe1] sm:$0xff]  ;;  %v3397_v53 = vld [vmem:[%s3198_s22 + $0xf9] sm:$0xff]  ;;  %v3400_v54 = vld [vmem:[%s3198_s22 + $0xf1] sm:$0xff] }
  0x5e   : > { %v3405_v55 = vld [vmem:[%s3198_s22 + $0x111] sm:$0xff]  ;;  %v3408_v56 = vld [vmem:[%s3198_s22 + $0x109] sm:$0xff]  ;;  %v3416_v58 = vld [vmem:[%s3198_s22 + $0x121] sm:$0xff] }
  0x5f   : > { %v3413_v57 = vld [vmem:[%s3198_s22 + $0x129] sm:$0xff]  ;;  %v3421_v59 = vld [vmem:[%s3198_s22 + $0x141] sm:$0xff]  ;;  %v3424_v60 = vld [vmem:[%s3198_s22 + $0x139] sm:$0xff] }
  0x60   : > { %5490 = vst [vmem:[#allocation8_spill] sm:$0xff] %v3424_v60  ;;  %v3429_v61 = vld [vmem:[%s3198_s22 + $0x159] sm:$0xff]  ;;  %v3432_v62 = vld [vmem:[%s3198_s22 + $0x151] sm:$0xff]  ;;  %v3440_v0 = vld [vmem:[%s3198_s22 + $0x169] sm:$0xff] }
  0x61   : > { %289 = vperm.xlu1 %3008, %v3235_v11   ;;  %284 = vperm.xlu0 %3007, %v3238_v12   ;;  %5491 = vst [vmem:[#allocation9_spill] sm:$0xff] %v3429_v61  ;;  %5492 = vst [vmem:[#allocation10_spill] sm:$0xff] %v3432_v62  ;;  %v3437_v63 = vld [vmem:[%s3198_s22 + $0x171] sm:$0xff]  ;;  %v726_v4 = vld [vmem:[%s3198_s22 + $0x2] sm:$0xff] }
  0x62   : > { %5493 = vst [vmem:[#allocation11_spill] sm:$0xff] %v3437_v63  ;;  %5494 = vst [vmem:[#allocation12_spill] sm:$0xff] %v3440_v0  ;;  %v727_v2 = vld [vmem:[%s3198_s22 + $0xa] sm:$0xff] }
  0x65   : > { %299 = vperm.xlu1 %3008, %v3243_v13   ;;  %294 = vperm.xlu0 %3007, %v3246_v14  }
  0x69   : > { %309 = vperm.xlu1 %3008, %v3251_v15   ;;  %304 = vperm.xlu0 %3007, %v3254_v16  }
  0x6d   : > { %319 = vperm.xlu1 %3008, %v3259_v17   ;;  %314 = vperm.xlu0 %3007, %v3262_v18  }
  0x71   : > { %329 = vperm.xlu1 %3008, %v3267_v19   ;;  %324 = vperm.xlu0 %3007, %v3270_v20  }
  0x75   : > { %339 = vperm.xlu1 %3008, %v3275_v21   ;;  %334 = vperm.xlu0 %3007, %v3278_v22  }
  0x79   : > { %349 = vperm.xlu1 %3008, %v3283_v23   ;;  %344 = vperm.xlu0 %3007, %v3286_v24  }
  0x7d   : > { %359 = vperm.xlu1 %3008, %v3291_v25   ;;  %354 = vperm.xlu0 %3007, %v3294_v26  }
  0x81   : > { %369 = vperm.xlu1 %3008, %v3299_v27   ;;  %364 = vperm.xlu0 %3007, %v3302_v28  }
  0x85   : > { %379 = vperm.xlu1 %3008, %v3307_v29   ;;  %374 = vperm.xlu0 %3007, %v3310_v30  }
  0x89   : > { %389 = vperm.xlu1 %3008, %v3315_v31   ;;  %384 = vperm.xlu0 %3007, %v3318_v32  }
  0x8d   : > { %503 = vperm.xlu1 %3008, %v463_v33   ;;  %498 = vperm.xlu0 %3007, %v462_v34  }
  0x91   : > { %513 = vperm.xlu1 %3008, %v3325_v35   ;;  %508 = vperm.xlu0 %3007, %v3328_v36  }
  0x95   : > { %523 = vperm.xlu1 %3008, %v3333_v37   ;;  %518 = vperm.xlu0 %3007, %v3336_v38  }
  0x99   : > { %533 = vperm.xlu1 %3008, %v3341_v39   ;;  %528 = vperm.xlu0 %3007, %v3344_v40  }
  0x9d   : > { %543 = vperm.xlu1 %3008, %v3349_v41   ;;  %538 = vperm.xlu0 %3007, %v3352_v42  }
  0xa1   : > { %553 = vperm.xlu1 %3008, %v3357_v43   ;;  %548 = vperm.xlu0 %3007, %v3360_v44  }
  0xa5   : > { %563 = vperm.xlu1 %3008, %v3365_v45   ;;  %558 = vperm.xlu0 %3007, %v3368_v46  }
  0xa9   : > { %573 = vperm.xlu1 %3008, %v3373_v47   ;;  %568 = vperm.xlu0 %3007, %v3376_v48  }
  0xad   : > { %583 = vperm.xlu1 %3008, %v3381_v49   ;;  %578 = vperm.xlu0 %3007, %v3384_v50  }
  0xb1   : > { %593 = vperm.xlu1 %3008, %v3389_v51   ;;  %588 = vperm.xlu0 %3007, %v3392_v52  }
  0xb5   : > { %603 = vperm.xlu1 %3008, %v3397_v53   ;;  %598 = vperm.xlu0 %3007, %v3400_v54  }
  0xb9   : > { %613 = vperm.xlu1 %3008, %v3405_v55   ;;  %608 = vperm.xlu0 %3007, %v3408_v56  }
  0xbd   : > { %623 = vperm.xlu1 %3008, %v3413_v57   ;;  %618 = vperm.xlu0 %3007, %v3416_v58  }
  0xc1   : > { %633 = vperm.xlu1 %3008, %v3421_v59   ;;  %628 = vperm.xlu0 %3007, %v3424_v60  }
  0xc5   : > { %643 = vperm.xlu1 %3008, %v3429_v61   ;;  %638 = vperm.xlu0 %3007, %v3432_v62   ;;  %v3451_v62 = vld [vmem:[%s3198_s22 + $0x22] sm:$0xff]  ;;  %v3454_v61 = vld [vmem:[%s3198_s22 + $0x1a] sm:$0xff] }
  0xc6   : > { %5497 = vst [vmem:[#allocation15_spill] sm:$0xff] %v3451_v62  ;;  %5498 = vst [vmem:[#allocation16_spill] sm:$0xff] %v3454_v61 }
  0xc9   : > { %653 = vperm.xlu1 %3008, %v3437_v63   ;;  %648 = vperm.xlu0 %3007, %v3440_v0  }
  0xcc   : > { %v3446_v33 = vpop.permute.xlu1 %244  ;;  %v3448_v34 = vpop.permute.xlu0 %234 }
  0xcd   : > { %5495 = vst [vmem:[#allocation13_spill] sm:$0xff] %v3446_v33  ;;  %5496 = vst [vmem:[#allocation14_spill] sm:$0xff] %v3448_v34  ;;  %767 = vperm.xlu1 %3008, %v727_v2   ;;  %762 = vperm.xlu0 %3007, %v726_v4   ;;  %v3463_v33 = vld [vmem:[%s3198_s22 + $0x3a] sm:$0xff]  ;;  %v3466_v34 = vld [vmem:[%s3198_s22 + $0x32] sm:$0xff] }
  0xce   : > { %5501 = vst [vmem:[#allocation19_spill] sm:$0xff] %v3463_v33  ;;  %5502 = vst [vmem:[#allocation20_spill] sm:$0xff] %v3466_v34 }
  0xd0   : > { %v3456_v60 = vpop.permute.xlu1 %249  ;;  %v3458_v63 = vpop.permute.xlu0 %239 }
  0xd1   : > { %5499 = vst [vmem:[#allocation17_spill] sm:$0xff] %v3456_v60  ;;  %5500 = vst [vmem:[#allocation18_spill] sm:$0xff] %v3458_v63  ;;  %777 = vperm.xlu1 %3008, %v3451_v62   ;;  %772 = vperm.xlu0 %3007, %v3454_v61   ;;  %v3475_v63 = vld [vmem:[%s3198_s22 + $0x52] sm:$0xff]  ;;  %v3478_v60 = vld [vmem:[%s3198_s22 + $0x4a] sm:$0xff] }
  0xd2   : > { %5505 = vst [vmem:[#allocation23_spill] sm:$0xff] %v3475_v63  ;;  %5506 = vst [vmem:[#allocation24_spill] sm:$0xff] %v3478_v60 }
  0xd4   : > { %v3468_v2 = vpop.permute.xlu1 %259  ;;  %v3470_v4 = vpop.permute.xlu0 %254 }
  0xd5   : > { %5503 = vst [vmem:[#allocation21_spill] sm:$0xff] %v3468_v2  ;;  %5504 = vst [vmem:[#allocation22_spill] sm:$0xff] %v3470_v4  ;;  %787 = vperm.xlu1 %3008, %v3463_v33   ;;  %782 = vperm.xlu0 %3007, %v3466_v34   ;;  %v3487_v4 = vld [vmem:[%s3198_s22 + $0x6a] sm:$0xff]  ;;  %v3490_v2 = vld [vmem:[%s3198_s22 + $0x62] sm:$0xff] }
  0xd6   : > { %5509 = vst [vmem:[#allocation27_spill] sm:$0xff] %v3487_v4  ;;  %5510 = vst [vmem:[#allocation28_spill] sm:$0xff] %v3490_v2 }
  0xd8   : > { %v3480_v62 = vpop.permute.xlu1 %269  ;;  %v3482_v61 = vpop.permute.xlu0 %264 }
  0xd9   : > { %5507 = vst [vmem:[#allocation25_spill] sm:$0xff] %v3480_v62  ;;  %5508 = vst [vmem:[#allocation26_spill] sm:$0xff] %v3482_v61  ;;  %797 = vperm.xlu1 %3008, %v3475_v63   ;;  %792 = vperm.xlu0 %3007, %v3478_v60   ;;  %v3499_v61 = vld [vmem:[%s3198_s22 + $0x82] sm:$0xff]  ;;  %v3502_v62 = vld [vmem:[%s3198_s22 + $0x7a] sm:$0xff] }
  0xda   : > { %5513 = vst [vmem:[#allocation31_spill] sm:$0xff] %v3499_v61  ;;  %5514 = vst [vmem:[#allocation32_spill] sm:$0xff] %v3502_v62 }
  0xdc   : > { %v3492_v33 = vpop.permute.xlu1 %279  ;;  %v3494_v34 = vpop.permute.xlu0 %274 }
  0xdd   : > { %5511 = vst [vmem:[#allocation29_spill] sm:$0xff] %v3492_v33  ;;  %5512 = vst [vmem:[#allocation30_spill] sm:$0xff] %v3494_v34  ;;  %807 = vperm.xlu1 %3008, %v3487_v4   ;;  %802 = vperm.xlu0 %3007, %v3490_v2   ;;  %v3511_v34 = vld [vmem:[%s3198_s22 + $0x9a] sm:$0xff]  ;;  %v3514_v33 = vld [vmem:[%s3198_s22 + $0x92] sm:$0xff] }
  0xde   : > { %5517 = vst [vmem:[#allocation35_spill] sm:$0xff] %v3511_v34  ;;  %5518 = vst [vmem:[#allocation36_spill] sm:$0xff] %v3514_v33 }
  0xe0   : > { %v3504_v63 = vpop.permute.xlu1 %289  ;;  %v3506_v60 = vpop.permute.xlu0 %284 }
  0xe1   : > { %5515 = vst [vmem:[#allocation33_spill] sm:$0xff] %v3504_v63  ;;  %5516 = vst [vmem:[#allocation34_spill] sm:$0xff] %v3506_v60  ;;  %817 = vperm.xlu1 %3008, %v3499_v61   ;;  %812 = vperm.xlu0 %3007, %v3502_v62   ;;  %v3523_v60 = vld [vmem:[%s3198_s22 + $0xb2] sm:$0xff]  ;;  %v3526_v63 = vld [vmem:[%s3198_s22 + $0xaa] sm:$0xff] }
  0xe2   : > { %5521 = vst [vmem:[#allocation39_spill] sm:$0xff] %v3523_v60  ;;  %5522 = vst [vmem:[#allocation40_spill] sm:$0xff] %v3526_v63 }
  0xe4   : > { %v3516_v4 = vpop.permute.xlu1 %299  ;;  %v3518_v2 = vpop.permute.xlu0 %294 }
  0xe5   : > { %5519 = vst [vmem:[#allocation37_spill] sm:$0xff] %v3516_v4  ;;  %5520 = vst [vmem:[#allocation38_spill] sm:$0xff] %v3518_v2  ;;  %827 = vperm.xlu1 %3008, %v3511_v34   ;;  %822 = vperm.xlu0 %3007, %v3514_v33   ;;  %v3535_v2 = vld [vmem:[%s3198_s22 + $0xca] sm:$0xff]  ;;  %v3538_v4 = vld [vmem:[%s3198_s22 + $0xc2] sm:$0xff] }
  0xe6   : > { %5525 = vst [vmem:[#allocation43_spill] sm:$0xff] %v3535_v2  ;;  %5526 = vst [vmem:[#allocation44_spill] sm:$0xff] %v3538_v4 }
  0xe8   : > { %v3528_v61 = vpop.permute.xlu1 %309  ;;  %v3530_v62 = vpop.permute.xlu0 %304 }
  0xe9   : > { %5523 = vst [vmem:[#allocation41_spill] sm:$0xff] %v3528_v61  ;;  %5524 = vst [vmem:[#allocation42_spill] sm:$0xff] %v3530_v62  ;;  %837 = vperm.xlu1 %3008, %v3523_v60   ;;  %832 = vperm.xlu0 %3007, %v3526_v63   ;;  %v3547_v62 = vld [vmem:[%s3198_s22 + $0xe2] sm:$0xff]  ;;  %v3550_v61 = vld [vmem:[%s3198_s22 + $0xda] sm:$0xff] }
  0xea   : > { %5529 = vst [vmem:[#allocation47_spill] sm:$0xff] %v3547_v62  ;;  %5530 = vst [vmem:[#allocation48_spill] sm:$0xff] %v3550_v61 }
  0xec   : > { %v3540_v34 = vpop.permute.xlu1 %319  ;;  %v3542_v33 = vpop.permute.xlu0 %314 }
  0xed   : > { %5527 = vst [vmem:[#allocation45_spill] sm:$0xff] %v3540_v34  ;;  %5528 = vst [vmem:[#allocation46_spill] sm:$0xff] %v3542_v33  ;;  %847 = vperm.xlu1 %3008, %v3535_v2   ;;  %842 = vperm.xlu0 %3007, %v3538_v4   ;;  %v3559_v33 = vld [vmem:[%s3198_s22 + $0xfa] sm:$0xff]  ;;  %v3562_v34 = vld [vmem:[%s3198_s22 + $0xf2] sm:$0xff] }
  0xee   : > { %5533 = vst [vmem:[#allocation51_spill] sm:$0xff] %v3559_v33  ;;  %5534 = vst [vmem:[#allocation52_spill] sm:$0xff] %v3562_v34 }
  0xf0   : > { %v3552_v60 = vpop.permute.xlu1 %329  ;;  %v3554_v63 = vpop.permute.xlu0 %324 }
  0xf1   : > { %5531 = vst [vmem:[#allocation49_spill] sm:$0xff] %v3552_v60  ;;  %5532 = vst [vmem:[#allocation50_spill] sm:$0xff] %v3554_v63  ;;  %857 = vperm.xlu1 %3008, %v3547_v62   ;;  %852 = vperm.xlu0 %3007, %v3550_v61   ;;  %v3571_v63 = vld [vmem:[%s3198_s22 + $0x112] sm:$0xff]  ;;  %v3574_v60 = vld [vmem:[%s3198_s22 + $0x10a] sm:$0xff] }
  0xf2   : > { %5537 = vst [vmem:[#allocation55_spill] sm:$0xff] %v3571_v63  ;;  %5538 = vst [vmem:[#allocation56_spill] sm:$0xff] %v3574_v60 }
  0xf4   : > { %v3564_v2 = vpop.permute.xlu1 %339  ;;  %v3566_v4 = vpop.permute.xlu0 %334 }
  0xf5   : > { %5535 = vst [vmem:[#allocation53_spill] sm:$0xff] %v3564_v2  ;;  %5536 = vst [vmem:[#allocation54_spill] sm:$0xff] %v3566_v4  ;;  %867 = vperm.xlu1 %3008, %v3559_v33   ;;  %862 = vperm.xlu0 %3007, %v3562_v34   ;;  %v3583_v4 = vld [vmem:[%s3198_s22 + $0x12a] sm:$0xff]  ;;  %v3586_v2 = vld [vmem:[%s3198_s22 + $0x122] sm:$0xff] }
  0xf6   : > { %5541 = vst [vmem:[#allocation59_spill] sm:$0xff] %v3583_v4  ;;  %5542 = vst [vmem:[#allocation60_spill] sm:$0xff] %v3586_v2 }
  0xf8   : > { %v3576_v62 = vpop.permute.xlu1 %349  ;;  %v3578_v61 = vpop.permute.xlu0 %344 }
  0xf9   : > { %5539 = vst [vmem:[#allocation57_spill] sm:$0xff] %v3576_v62  ;;  %5540 = vst [vmem:[#allocation58_spill] sm:$0xff] %v3578_v61  ;;  %877 = vperm.xlu1 %3008, %v3571_v63   ;;  %872 = vperm.xlu0 %3007, %v3574_v60   ;;  %v3595_v61 = vld [vmem:[%s3198_s22 + $0x142] sm:$0xff]  ;;  %v3598_v62 = vld [vmem:[%s3198_s22 + $0x13a] sm:$0xff] }
  0xfa   : > { %5545 = vst [vmem:[#allocation63_spill] sm:$0xff] %v3595_v61  ;;  %5546 = vst [vmem:[#allocation64_spill] sm:$0xff] %v3598_v62 }
  0xfc   : > { %v3588_v33 = vpop.permute.xlu1 %359  ;;  %v3590_v34 = vpop.permute.xlu0 %354 }
  0xfd   : > { %5543 = vst [vmem:[#allocation61_spill] sm:$0xff] %v3588_v33  ;;  %5544 = vst [vmem:[#allocation62_spill] sm:$0xff] %v3590_v34  ;;  %887 = vperm.xlu1 %3008, %v3583_v4   ;;  %882 = vperm.xlu0 %3007, %v3586_v2   ;;  %v3607_v33 = vld [vmem:[%s3198_s22 + $0x15a] sm:$0xff]  ;;  %v3610_v34 = vld [vmem:[%s3198_s22 + $0x152] sm:$0xff] }
  0xfe   : > { %5549 = vst [vmem:[#allocation67_spill] sm:$0xff] %v3610_v34  ;;  %v3619_v2 = vld [vmem:[%s3198_s22 + $0x172] sm:$0xff] }
 0x100   : > { %v3600_v63 = vpop.permute.xlu1 %369  ;;  %v3602_v60 = vpop.permute.xlu0 %364 }
 0x101   : > { %5547 = vst [vmem:[#allocation65_spill] sm:$0xff] %v3600_v63  ;;  %5548 = vst [vmem:[#allocation66_spill] sm:$0xff] %v3602_v60  ;;  %897 = vperm.xlu1 %3008, %v3595_v61   ;;  %892 = vperm.xlu0 %3007, %v3598_v62   ;;  %v3622_v63 = vld [vmem:[%s3198_s22 + $0x16a] sm:$0xff] }
 0x104   : > { %v3612_v0 = vpop.permute.xlu1 %379  ;;  %v3614_v4 = vpop.permute.xlu0 %374 }
 0x105   : > { %5550 = vst [vmem:[#allocation68_spill] sm:$0xff] %v3612_v0  ;;  %5551 = vst [vmem:[#allocation69_spill] sm:$0xff] %v3614_v4  ;;  %907 = vperm.xlu1 %3008, %v3607_v33   ;;  %902 = vperm.xlu0 %3007, %v3610_v34  }
 0x108   : > { %v3624_v60 = vpop.permute.xlu1 %389  ;;  %v3626_v61 = vpop.permute.xlu0 %384 }
 0x109   : > { %5552 = vst [vmem:[#allocation70_spill] sm:$0xff] %v3624_v60  ;;  %5553 = vst [vmem:[#allocation71_spill] sm:$0xff] %v3626_v61  ;;  %917 = vperm.xlu1 %3008, %v3619_v2   ;;  %912 = vperm.xlu0 %3007, %v3622_v63  }
 0x10c   : > { %v3630_v62 = vpop.permute.xlu1 %503  ;;  %v3632_v0 = vpop.permute.xlu0 %498 }
 0x10d   : > { %5554 = vst [vmem:[#allocation72_spill] sm:$0xff] %v3632_v0  ;;  %1032 = vperm.xlu1 %3008, %v3206_v3   ;;  %1027 = vperm.xlu0 %3007, %v3201_v1  }
 0x110   : > { %v3636_v4 = vpop.permute.xlu1 %513  ;;  %v3638_v34 = vpop.permute.xlu0 %508 }
 0x111   : > { %1042 = vperm.xlu1 %3008, %v3211_v5   ;;  %1037 = vperm.xlu0 %3007, %v3214_v6  }
 0x114   : > { %v3642_v61 = vpop.permute.xlu1 %523  ;;  %v3644_v60 = vpop.permute.xlu0 %518 }
 0x115   : > { %1052 = vperm.xlu1 %3008, %v3219_v7   ;;  %1047 = vperm.xlu0 %3007, %v3222_v8  }
 0x118   : > { %v3648_v0 = vpop.permute.xlu1 %533  ;;  %v3650_v3 = vpop.permute.xlu0 %528 }
 0x119   : > { %1062 = vperm.xlu1 %3008, %v3227_v9   ;;  %1057 = vperm.xlu0 %3007, %v3230_v10  }
 0x11c   : > { %v3654_v1 = vpop.permute.xlu1 %543  ;;  %v3656_v5 = vpop.permute.xlu0 %538 }
 0x11d   : > { %1072 = vperm.xlu1 %3008, %v3235_v11   ;;  %1067 = vperm.xlu0 %3007, %v3238_v12  }
 0x120   : > { %v3660_v6 = vpop.permute.xlu1 %553  ;;  %v3662_v7 = vpop.permute.xlu0 %548 }
 0x121   : > { %1082 = vperm.xlu1 %3008, %v3243_v13   ;;  %1077 = vperm.xlu0 %3007, %v3246_v14  }
 0x124   : > { %v3666_v8 = vpop.permute.xlu1 %563  ;;  %v3668_v9 = vpop.permute.xlu0 %558 }
 0x125   : > { %1092 = vperm.xlu1 %3008, %v3251_v15   ;;  %1087 = vperm.xlu0 %3007, %v3254_v16  }
 0x128   : > { %v3672_v10 = vpop.permute.xlu1 %573  ;;  %v3674_v11 = vpop.permute.xlu0 %568 }
 0x129   : > { %1102 = vperm.xlu1 %3008, %v3259_v17   ;;  %1097 = vperm.xlu0 %3007, %v3262_v18  }
 0x12c   : > { %v3678_v12 = vpop.permute.xlu1 %583  ;;  %v3680_v13 = vpop.permute.xlu0 %578 }
 0x12d   : > { %1112 = vperm.xlu1 %3008, %v3267_v19   ;;  %1107 = vperm.xlu0 %3007, %v3270_v20  }
 0x130   : > { %v3684_v14 = vpop.permute.xlu1 %593  ;;  %v3686_v15 = vpop.permute.xlu0 %588 }
 0x131   : > { %5555 = vst [vmem:[#allocation73_spill] sm:$0xff] %v3684_v14  ;;  %5556 = vst [vmem:[#allocation74_spill] sm:$0xff] %v3686_v15  ;;  %1122 = vperm.xlu1 %3008, %v3275_v21   ;;  %1117 = vperm.xlu0 %3007, %v3278_v22  }
 0x134   : > { %v3690_v16 = vpop.permute.xlu1 %603  ;;  %v3692_v17 = vpop.permute.xlu0 %598 }
 0x135   : > { %5557 = vst [vmem:[#allocation75_spill] sm:$0xff] %v3690_v16  ;;  %5558 = vst [vmem:[#allocation76_spill] sm:$0xff] %v3692_v17  ;;  %1132 = vperm.xlu1 %3008, %v3283_v23   ;;  %1127 = vperm.xlu0 %3007, %v3286_v24  }
 0x138   : > { %v3696_v18 = vpop.permute.xlu1 %613  ;;  %v3698_v19 = vpop.permute.xlu0 %608 }
 0x139   : > { %5559 = vst [vmem:[#allocation77_spill] sm:$0xff] %v3696_v18  ;;  %5560 = vst [vmem:[#allocation78_spill] sm:$0xff] %v3698_v19  ;;  %1142 = vperm.xlu1 %3008, %v3291_v25   ;;  %1137 = vperm.xlu0 %3007, %v3294_v26   ;;  %v3721_v26 = vld [vmem:[%s3198_s22 + $0x188] sm:$0xff]  ;;  %v5762_v19 = vld [vmem:[#allocation50_spill] sm:$0xff] }
 0x13a   : > { %v5764_v18 = vld [vmem:[#allocation53_spill] sm:$0xff] }
 0x13c   : > { %v3702_v20 = vpop.permute.xlu1 %623  ;;  %v3704_v21 = vpop.permute.xlu0 %618 }
 0x13d   : > { %5561 = vst [vmem:[#allocation79_spill] sm:$0xff] %v3702_v20  ;;  %5562 = vst [vmem:[#allocation80_spill] sm:$0xff] %v3704_v21  ;;  %1152 = vperm.xlu1 %3008, %v3299_v27   ;;  %1147 = vperm.xlu0 %3007, %v3302_v28   ;;  %v3724_v27 = vld [vmem:[%s3198_s22 + $0x180] sm:$0xff]  ;;  %v5758_v21 = vld [vmem:[#allocation49_spill] sm:$0xff] }
 0x13e   : > { %v4239_v20 = vld [vmem:[#allocation2 + $0x1] ss:$0 sm:$0xff] }
 0x140   : > { %v3708_v22 = vpop.permute.xlu1 %633  ;;  %v3710_v23 = vpop.permute.xlu0 %628 }
 0x141   : > { %5563 = vst [vmem:[#allocation81_spill] sm:$0xff] %v3708_v22  ;;  %5564 = vst [vmem:[#allocation82_spill] sm:$0xff] %v3710_v23  ;;  %1162 = vperm.xlu1 %3008, %v3307_v29   ;;  %1157 = vperm.xlu0 %3007, %v3310_v30   ;;  %v5756_v23 = vld [vmem:[#allocation46_spill] sm:$0xff] }
 0x144   : > { %v3714_v24 = vpop.permute.xlu1 %643  ;;  %v3716_v25 = vpop.permute.xlu0 %638 }
 0x145   : > { %5565 = vst [vmem:[#allocation83_spill] sm:$0xff] %v3714_v24  ;;  %5566 = vst [vmem:[#allocation84_spill] sm:$0xff] %v3716_v25  ;;  %1172 = vperm.xlu1 %3008, %v3315_v31   ;;  %1167 = vperm.xlu0 %3007, %v3318_v32  }
 0x148   : > { %v3726_v28 = vpop.permute.xlu1 %653  ;;  %v3728_v22 = vpop.permute.xlu0 %648 }
 0x149   : > { %1182 = vperm.xlu1 %3008, %v3721_v26   ;;  %1177 = vperm.xlu0 %3007, %v3724_v27  }
 0x14c   : > { %v3732_v29 = vpop.permute.xlu1 %767  ;;  %v3734_v30 = vpop.permute.xlu0 %762 }
 0x14d   : > { %5567 = vst [vmem:[#allocation85_spill] sm:$0xff] %v3732_v29  ;;  %5568 = vst [vmem:[#allocation86_spill] sm:$0xff] %v3734_v30  ;;  %1296 = vperm.xlu1 %3008, %v3325_v35   ;;  %1291 = vperm.xlu0 %3007, %v3328_v36   ;;  %v5755_v29 = vld [vmem:[#allocation45_spill] sm:$0xff] }
 0x150   : > { %v3738_v31 = vpop.permute.xlu1 %777  ;;  %v3740_v32 = vpop.permute.xlu0 %772 }
 0x151   : > { %5569 = vst [vmem:[#allocation87_spill] sm:$0xff] %v3738_v31  ;;  %5570 = vst [vmem:[#allocation88_spill] sm:$0xff] %v3740_v32  ;;  %1306 = vperm.xlu1 %3008, %v3333_v37   ;;  %1301 = vperm.xlu0 %3007, %v3336_v38   ;;  %v5753_v32 = vld [vmem:[#allocation41_spill] sm:$0xff]  ;;  %v5754_v31 = vld [vmem:[#allocation42_spill] sm:$0xff] }
 0x154   : > { %v3744_v25 = vpop.permute.xlu1 %787  ;;  %v3746_v24 = vpop.permute.xlu0 %782 }
 0x155   : > { %5571 = vst [vmem:[#allocation89_spill] sm:$0xff] %v3744_v25  ;;  %5572 = vst [vmem:[#allocation90_spill] sm:$0xff] %v3746_v24  ;;  %1316 = vperm.xlu1 %3008, %v3341_v39   ;;  %1311 = vperm.xlu0 %3007, %v3344_v40   ;;  %v5750_v24 = vld [vmem:[#allocation34_spill] sm:$0xff] }
 0x158   : > { %v3750_v30 = vpop.permute.xlu1 %797  ;;  %v3752_v35 = vpop.permute.xlu0 %792 }
 0x159   : > { %5573 = vst [vmem:[#allocation91_spill] sm:$0xff] %v3750_v30  ;;  %5574 = vst [vmem:[#allocation92_spill] sm:$0xff] %v3752_v35  ;;  %1326 = vperm.xlu1 %3008, %v3349_v41   ;;  %1321 = vperm.xlu0 %3007, %v3352_v42  }
 0x15c   : > { %v3756_v36 = vpop.permute.xlu1 %807  ;;  %v3758_v37 = vpop.permute.xlu0 %802 }
 0x15d   : > { %5575 = vst [vmem:[#allocation93_spill] sm:$0xff] %v3756_v36  ;;  %5576 = vst [vmem:[#allocation94_spill] sm:$0xff] %v3758_v37  ;;  %1336 = vperm.xlu1 %3008, %v3357_v43   ;;  %1331 = vperm.xlu0 %3007, %v3360_v44   ;;  %v5745_v37 = vld [vmem:[#allocation25_spill] sm:$0xff] }
 0x160   : > { %v3762_v38 = vpop.permute.xlu1 %817  ;;  %v3764_v39 = vpop.permute.xlu0 %812 }
 0x161   : > { %5577 = vst [vmem:[#allocation95_spill] sm:$0xff] %v3762_v38  ;;  %5578 = vst [vmem:[#allocation96_spill] sm:$0xff] %v3764_v39  ;;  %1346 = vperm.xlu1 %3008, %v3365_v45   ;;  %1341 = vperm.xlu0 %3007, %v3368_v46  }
 0x164   : > { %v3768_v40 = vpop.permute.xlu1 %827  ;;  %v3770_v41 = vpop.permute.xlu0 %822 }
 0x165   : > { %5579 = vst [vmem:[#allocation97_spill] sm:$0xff] %v3768_v40  ;;  %5580 = vst [vmem:[#allocation98_spill] sm:$0xff] %v3770_v41  ;;  %1356 = vperm.xlu1 %3008, %v3373_v47   ;;  %1351 = vperm.xlu0 %3007, %v3376_v48   ;;  %v5740_v41 = vld [vmem:[#allocation18_spill] sm:$0xff] }
 0x168   : > { %v3774_v42 = vpop.permute.xlu1 %837  ;;  %v3776_v43 = vpop.permute.xlu0 %832 }
 0x169   : > { %5581 = vst [vmem:[#allocation99_spill] sm:$0xff] %v3774_v42  ;;  %5582 = vst [vmem:[#allocation100_spill] sm:$0xff] %v3776_v43  ;;  %1366 = vperm.xlu1 %3008, %v3381_v49   ;;  %1361 = vperm.xlu0 %3007, %v3384_v50  }
 0x16c   : > { %v3780_v44 = vpop.permute.xlu1 %847  ;;  %v3782_v45 = vpop.permute.xlu0 %842 }
 0x16d   : > { %5583 = vst [vmem:[#allocation101_spill] sm:$0xff] %v3780_v44  ;;  %5584 = vst [vmem:[#allocation102_spill] sm:$0xff] %v3782_v45  ;;  %1376 = vperm.xlu1 %3008, %v3389_v51   ;;  %1371 = vperm.xlu0 %3007, %v3392_v52   ;;  %v5612_v45 = vld [vmem:[#allocation23_spill] sm:$0xff] }
 0x170   : > { %v3786_v46 = vpop.permute.xlu1 %857  ;;  %v3788_v47 = vpop.permute.xlu0 %852 }
 0x171   : > { %5585 = vst [vmem:[#allocation103_spill] sm:$0xff] %v3786_v46  ;;  %5586 = vst [vmem:[#allocation104_spill] sm:$0xff] %v3788_v47  ;;  %1386 = vperm.xlu1 %3008, %v3397_v53   ;;  %1381 = vperm.xlu0 %3007, %v3400_v54   ;;  %v5593_v54 = vld [vmem:[#allocation8_spill] sm:$0xff] }
 0x174   : > { %v3792_v48 = vpop.permute.xlu1 %867  ;;  %v3794_v49 = vpop.permute.xlu0 %862 }
 0x175   : > { %5587 = vst [vmem:[#allocation105_spill] sm:$0xff] %v3792_v48  ;;  %5588 = vst [vmem:[#allocation106_spill] sm:$0xff] %v3794_v49  ;;  %1396 = vperm.xlu1 %3008, %v3405_v55   ;;  %1391 = vperm.xlu0 %3007, %v3408_v56   ;;  %v5609_v48 = vld [vmem:[#allocation20_spill] sm:$0xff] }
 0x178   : > { %v3798_v50 = vpop.permute.xlu1 %877  ;;  %v3800_v51 = vpop.permute.xlu0 %872 }
 0x179   : > { %5589 = vst [vmem:[#allocation107_spill] sm:$0xff] %v3798_v50  ;;  %5590 = vst [vmem:[#allocation108_spill] sm:$0xff] %v3800_v51  ;;  %1406 = vperm.xlu1 %3008, %v3413_v57   ;;  %1401 = vperm.xlu0 %3007, %v3416_v58   ;;  %v5596_v50 = vld [vmem:[#allocation9_spill] sm:$0xff]  ;;  %v5597_v51 = vld [vmem:[#allocation10_spill] sm:$0xff] }
 0x17a   : > { %v5600_v58 = vld [vmem:[#allocation11_spill] sm:$0xff] }
 0x17c   : > { %v3804_v52 = vpop.permute.xlu1 %887  ;;  %v3806_v53 = vpop.permute.xlu0 %882 }
 0x17d   : > { %5591 = vst [vmem:[#allocation109_spill] sm:$0xff] %v3804_v52  ;;  %5592 = vst [vmem:[#allocation110_spill] sm:$0xff] %v3806_v53  ;;  %1416 = vperm.xlu1 %3008, %v3421_v59   ;;  %1411 = vperm.xlu0 %3007, %v5593_v54   ;;  %v5601_v52 = vld [vmem:[#allocation12_spill] sm:$0xff]  ;;  %v3826_v59 = vld [vmem:[%s3198_s22 + $0x181] sm:$0xff] }
 0x17e   : > { %v3823_v53 = vld [vmem:[%s3198_s22 + $0x189] sm:$0xff] }
 0x180   : > { %v3810_v55 = vpop.permute.xlu1 %897  ;;  %v3812_v56 = vpop.permute.xlu0 %892 }
 0x181   : > { %5594 = vst [vmem:[#allocation8_spill] sm:$0xff] %v3810_v55  ;;  %5595 = vst [vmem:[#allocation111_spill] sm:$0xff] %v3812_v56  ;;  %1426 = vperm.xlu1 %3008, %v5596_v50   ;;  %1421 = vperm.xlu0 %3007, %v5597_v51   ;;  %v5608_v56 = vld [vmem:[#allocation19_spill] sm:$0xff] }
 0x184   : > { %v3816_v49 = vpop.permute.xlu1 %907  ;;  %v3818_v57 = vpop.permute.xlu0 %902 }
 0x185   : > { %5598 = vst [vmem:[#allocation9_spill] sm:$0xff] %v3816_v49  ;;  %5599 = vst [vmem:[#allocation10_spill] sm:$0xff] %v3818_v57  ;;  %1436 = vperm.xlu1 %3008, %v5600_v58   ;;  %1431 = vperm.xlu0 %3007, %v5601_v52   ;;  %v5604_v57 = vld [vmem:[#allocation15_spill] sm:$0xff]  ;;  %v5605_v58 = vld [vmem:[#allocation16_spill] sm:$0xff] }
 0x188   : > { %v3828_v54 = vpop.permute.xlu1 %917  ;;  %v3830_v55 = vpop.permute.xlu0 %912 }
 0x189   : > { %1446 = vperm.xlu1 %3008, %v3823_v53   ;;  %1441 = vperm.xlu0 %3007, %v3826_v59  }
 0x18c   : > { %v3834_v50 = vpop.permute.xlu1 %1032  ;;  %v3836_v51 = vpop.permute.xlu0 %1027 }
 0x18d   : > { %5602 = vst [vmem:[#allocation11_spill] sm:$0xff] %v3834_v50  ;;  %5603 = vst [vmem:[#allocation12_spill] sm:$0xff] %v3836_v51  ;;  %1560 = vperm.xlu1 %3008, %v5604_v57   ;;  %1555 = vperm.xlu0 %3007, %v5605_v58   ;;  %v5613_v50 = vld [vmem:[#allocation24_spill] sm:$0xff]  ;;  %v5616_v58 = vld [vmem:[#allocation27_spill] sm:$0xff] }
 0x190   : > { %v3840_v52 = vpop.permute.xlu1 %1042  ;;  %v3842_v49 = vpop.permute.xlu0 %1037 }
 0x191   : > { %5606 = vst [vmem:[#allocation15_spill] sm:$0xff] %v3840_v52  ;;  %5607 = vst [vmem:[#allocation16_spill] sm:$0xff] %v3842_v49  ;;  %1570 = vperm.xlu1 %3008, %v5608_v56   ;;  %1565 = vperm.xlu0 %3007, %v5609_v48   ;;  %v5617_v52 = vld [vmem:[#allocation28_spill] sm:$0xff]  ;;  %v5620_v48 = vld [vmem:[#allocation31_spill] sm:$0xff] }
 0x194   : > { %v3846_v47 = vpop.permute.xlu1 %1052  ;;  %v3848_v46 = vpop.permute.xlu0 %1047 }
 0x195   : > { %5610 = vst [vmem:[#allocation19_spill] sm:$0xff] %v3846_v47  ;;  %5611 = vst [vmem:[#allocation20_spill] sm:$0xff] %v3848_v46  ;;  %1580 = vperm.xlu1 %3008, %v5612_v45   ;;  %1575 = vperm.xlu0 %3007, %v5613_v50   ;;  %v5621_v47 = vld [vmem:[#allocation32_spill] sm:$0xff]  ;;  %v5624_v50 = vld [vmem:[#allocation35_spill] sm:$0xff] }
 0x198   : > { %v3852_v51 = vpop.permute.xlu1 %1062  ;;  %v3854_v57 = vpop.permute.xlu0 %1057 }
 0x199   : > { %5614 = vst [vmem:[#allocation23_spill] sm:$0xff] %v3852_v51  ;;  %5615 = vst [vmem:[#allocation24_spill] sm:$0xff] %v3854_v57  ;;  %1590 = vperm.xlu1 %3008, %v5616_v58   ;;  %1585 = vperm.xlu0 %3007, %v5617_v52   ;;  %v5625_v51 = vld [vmem:[#allocation36_spill] sm:$0xff]  ;;  %v5628_v52 = vld [vmem:[#allocation39_spill] sm:$0xff] }
 0x19c   : > { %v3858_v49 = vpop.permute.xlu1 %1072  ;;  %v3860_v56 = vpop.permute.xlu0 %1067 }
 0x19d   : > { %5618 = vst [vmem:[#allocation27_spill] sm:$0xff] %v3858_v49  ;;  %5619 = vst [vmem:[#allocation28_spill] sm:$0xff] %v3860_v56  ;;  %1600 = vperm.xlu1 %3008, %v5620_v48   ;;  %1595 = vperm.xlu0 %3007, %v5621_v47   ;;  %v5629_v49 = vld [vmem:[#allocation40_spill] sm:$0xff]  ;;  %v5632_v47 = vld [vmem:[#allocation43_spill] sm:$0xff] }
 0x1a0   : > { %v3864_v46 = vpop.permute.xlu1 %1082  ;;  %v3866_v45 = vpop.permute.xlu0 %1077 }
 0x1a1   : > { %5622 = vst [vmem:[#allocation31_spill] sm:$0xff] %v3864_v46  ;;  %5623 = vst [vmem:[#allocation32_spill] sm:$0xff] %v3866_v45  ;;  %1610 = vperm.xlu1 %3008, %v5624_v50   ;;  %1605 = vperm.xlu0 %3007, %v5625_v51   ;;  %v5633_v46 = vld [vmem:[#allocation44_spill] sm:$0xff]  ;;  %v5636_v51 = vld [vmem:[#allocation47_spill] sm:$0xff] }
 0x1a4   : > { %v3870_v57 = vpop.permute.xlu1 %1092  ;;  %v3872_v58 = vpop.permute.xlu0 %1087 }
 0x1a5   : > { %5626 = vst [vmem:[#allocation35_spill] sm:$0xff] %v3870_v57  ;;  %5627 = vst [vmem:[#allocation36_spill] sm:$0xff] %v3872_v58  ;;  %1620 = vperm.xlu1 %3008, %v5628_v52   ;;  %1615 = vperm.xlu0 %3007, %v5629_v49   ;;  %v5637_v57 = vld [vmem:[#allocation48_spill] sm:$0xff]  ;;  %v5640_v49 = vld [vmem:[#allocation51_spill] sm:$0xff] }
 0x1a8   : > { %v3876_v56 = vpop.permute.xlu1 %1102  ;;  %v3878_v48 = vpop.permute.xlu0 %1097 }
 0x1a9   : > { %5630 = vst [vmem:[#allocation39_spill] sm:$0xff] %v3876_v56  ;;  %5631 = vst [vmem:[#allocation40_spill] sm:$0xff] %v3878_v48  ;;  %1630 = vperm.xlu1 %3008, %v5632_v47   ;;  %1625 = vperm.xlu0 %3007, %v5633_v46   ;;  %v5641_v56 = vld [vmem:[#allocation52_spill] sm:$0xff]  ;;  %v5644_v46 = vld [vmem:[#allocation55_spill] sm:$0xff] }
 0x1ac   : > { %v3882_v45 = vpop.permute.xlu1 %1112  ;;  %v3884_v50 = vpop.permute.xlu0 %1107 }
 0x1ad   : > { %5634 = vst [vmem:[#allocation43_spill] sm:$0xff] %v3882_v45  ;;  %5635 = vst [vmem:[#allocation44_spill] sm:$0xff] %v3884_v50  ;;  %1640 = vperm.xlu1 %3008, %v5636_v51   ;;  %1635 = vperm.xlu0 %3007, %v5637_v57   ;;  %v5645_v45 = vld [vmem:[#allocation56_spill] sm:$0xff]  ;;  %v5648_v51 = vld [vmem:[#allocation59_spill] sm:$0xff] }
 0x1b0   : > { %v3888_v58 = vpop.permute.xlu1 %1122  ;;  %v3890_v52 = vpop.permute.xlu0 %1117 }
 0x1b1   : > { %5638 = vst [vmem:[#allocation47_spill] sm:$0xff] %v3888_v58  ;;  %5639 = vst [vmem:[#allocation48_spill] sm:$0xff] %v3890_v52  ;;  %1650 = vperm.xlu1 %3008, %v5640_v49   ;;  %1645 = vperm.xlu0 %3007, %v5641_v56   ;;  %v5649_v52 = vld [vmem:[#allocation60_spill] sm:$0xff]  ;;  %v2875_v58 = vld [vmem:[%s3198_s22 + $0x60] sm:$0xff] }
 0x1b4   : > { %v3894_v48 = vpop.permute.xlu1 %1132  ;;  %v3896_v47 = vpop.permute.xlu0 %1127 }
 0x1b5   : > { %5642 = vst [vmem:[#allocation51_spill] sm:$0xff] %v3894_v48  ;;  %5643 = vst [vmem:[#allocation52_spill] sm:$0xff] %v3896_v47  ;;  %1660 = vperm.xlu1 %3008, %v5644_v46   ;;  %1655 = vperm.xlu0 %3007, %v5645_v45   ;;  %v5652_v48 = vld [vmem:[#allocation63_spill] sm:$0xff]  ;;  %v5653_v47 = vld [vmem:[#allocation64_spill] sm:$0xff] }
 0x1b8   : > { %v3900_v50 = vpop.permute.xlu1 %1142  ;;  %v3902_v57 = vpop.permute.xlu0 %1137 }
 0x1b9   : > { %5646 = vst [vmem:[#allocation55_spill] sm:$0xff] %v3900_v50  ;;  %5647 = vst [vmem:[#allocation56_spill] sm:$0xff] %v3902_v57  ;;  %1670 = vperm.xlu1 %3008, %v5648_v51   ;;  %1665 = vperm.xlu0 %3007, %v5649_v52   ;;  %v5656_v57 = vld [vmem:[#allocation67_spill] sm:$0xff] }
 0x1ba   : > { %v2876_v50 = vld [vmem:[%s3198_s22 + $0x68] sm:$0xff] }
 0x1bc   : > { %v3906_v49 = vpop.permute.xlu1 %1152  ;;  %v3908_v56 = vpop.permute.xlu0 %1147 }
 0x1bd   : > { %5650 = vst [vmem:[#allocation59_spill] sm:$0xff] %v3906_v49  ;;  %5651 = vst [vmem:[#allocation60_spill] sm:$0xff] %v3908_v56  ;;  %1680 = vperm.xlu1 %3008, %v5652_v48   ;;  %1675 = vperm.xlu0 %3007, %v5653_v47   ;;  %v3925_v48 = vld [vmem:[%s3198_s22 + $0x18a] sm:$0xff]  ;;  %v3928_v47 = vld [vmem:[%s3198_s22 + $0x182] sm:$0xff] }
 0x1c0   : > { %v3912_v45 = vpop.permute.xlu1 %1162  ;;  %v3914_v46 = vpop.permute.xlu0 %1157 }
 0x1c1   : > { %5654 = vst [vmem:[#allocation63_spill] sm:$0xff] %v3912_v45  ;;  %5655 = vst [vmem:[#allocation64_spill] sm:$0xff] %v3914_v46  ;;  %1690 = vperm.xlu1 %3008, %v3607_v33   ;;  %1685 = vperm.xlu0 %3007, %v5656_v57   ;;  %v2872_v57 = vld [vmem:[%s3198_s22 + $0x38] sm:$0xff]  ;;  %v2873_v46 = vld [vmem:[%s3198_s22 + $0x48] sm:$0xff] }
 0x1c4   : > { %v3918_v51 = vpop.permute.xlu1 %1172  ;;  %v3920_v52 = vpop.permute.xlu0 %1167 }
 0x1c5   : > { %5657 = vst [vmem:[#allocation67_spill] sm:$0xff] %v3918_v51  ;;  %5658 = vst [vmem:[#allocation112_spill] sm:$0xff] %v3920_v52  ;;  %1700 = vperm.xlu1 %3008, %v3619_v2   ;;  %1695 = vperm.xlu0 %3007, %v3622_v63   ;;  %v2871_v52 = vld [vmem:[%s3198_s22 + $0x30] sm:$0xff] }
 0x1c6   : > { %v2874_v2 = vld [vmem:[%s3198_s22 + $0x50] sm:$0xff] }
 0x1c8   : > { %v3930_v45 = vpop.permute.xlu1 %1182  ;;  %v3932_v33 = vpop.permute.xlu0 %1177 }
 0x1c9   : > { %1710 = vperm.xlu1 %3008, %v3925_v48   ;;  %1705 = vperm.xlu0 %3007, %v3928_v47  }
 0x1cc   : > { %v3938_v51 = vpop.permute.xlu1 %1296  ;;  %v3940_v63 = vpop.permute.xlu0 %1291 }
 0x1cd   : > { %5659 = vst [vmem:[#allocation113_spill] sm:$0xff] %v3938_v51  ;;  %5660 = vst [vmem:[#allocation114_spill] sm:$0xff] %v3940_v63  ;;  %1825 = vperm.xlu1 %3008, %v2872_v57   ;;  %1820 = vperm.xlu0 %3007, %v2871_v52   ;;  %v2878_v52 = vld [vmem:[%s3198_s22 + $0x80] sm:$0xff]  ;;  %v2877_v57 = vld [vmem:[%s3198_s22 + $0x78] sm:$0xff] }
 0x1d0   : > { %v3944_v56 = vpop.permute.xlu1 %1306  ;;  %v3946_v49 = vpop.permute.xlu0 %1301 }
 0x1d1   : > { %5661 = vst [vmem:[#allocation115_spill] sm:$0xff] %v3944_v56  ;;  %5662 = vst [vmem:[#allocation116_spill] sm:$0xff] %v3946_v49  ;;  %1835 = vperm.xlu1 %3008, %v2874_v2   ;;  %1830 = vperm.xlu0 %3007, %v2873_v46   ;;  %v2880_v46 = vld [vmem:[%s3198_s22 + $0x98] sm:$0xff]  ;;  %v2879_v2 = vld [vmem:[%s3198_s22 + $0x90] sm:$0xff] }
 0x1d4   : > { %v3950_v44 = vpop.permute.xlu1 %1316  ;;  %v3952_v51 = vpop.permute.xlu0 %1311 }
 0x1d5   : > { %5663 = vst [vmem:[#allocation117_spill] sm:$0xff] %v3950_v44  ;;  %5664 = vst [vmem:[#allocation118_spill] sm:$0xff] %v3952_v51  ;;  %1845 = vperm.xlu1 %3008, %v2876_v50   ;;  %1840 = vperm.xlu0 %3007, %v2875_v58   ;;  %v2882_v58 = vld [vmem:[%s3198_s22 + $0xb0] sm:$0xff]  ;;  %v2881_v50 = vld [vmem:[%s3198_s22 + $0xa8] sm:$0xff] }
 0x1d8   : > { %v3956_v63 = vpop.permute.xlu1 %1326  ;;  %v3958_v56 = vpop.permute.xlu0 %1321 }
 0x1d9   : > { %5665 = vst [vmem:[#allocation119_spill] sm:$0xff] %v3956_v63  ;;  %5666 = vst [vmem:[#allocation120_spill] sm:$0xff] %v3958_v56  ;;  %1855 = vperm.xlu1 %3008, %v2878_v52   ;;  %1850 = vperm.xlu0 %3007, %v2877_v57   ;;  %v2884_v52 = vld [vmem:[%s3198_s22 + $0xc8] sm:$0xff]  ;;  %v2883_v57 = vld [vmem:[%s3198_s22 + $0xc0] sm:$0xff] }
 0x1dc   : > { %v3962_v49 = vpop.permute.xlu1 %1336  ;;  %v3964_v44 = vpop.permute.xlu0 %1331 }
 0x1dd   : > { %5667 = vst [vmem:[#allocation121_spill] sm:$0xff] %v3962_v49  ;;  %5668 = vst [vmem:[#allocation122_spill] sm:$0xff] %v3964_v44  ;;  %1865 = vperm.xlu1 %3008, %v2880_v46   ;;  %1860 = vperm.xlu0 %3007, %v2879_v2   ;;  %v2886_v46 = vld [vmem:[%s3198_s22 + $0xe0] sm:$0xff]  ;;  %v2885_v2 = vld [vmem:[%s3198_s22 + $0xd8] sm:$0xff] }
 0x1e0   : > { %v3968_v51 = vpop.permute.xlu1 %1346  ;;  %v3970_v63 = vpop.permute.xlu0 %1341 }
 0x1e1   : > { %5669 = vst [vmem:[#allocation123_spill] sm:$0xff] %v3968_v51  ;;  %5670 = vst [vmem:[#allocation124_spill] sm:$0xff] %v3970_v63  ;;  %1875 = vperm.xlu1 %3008, %v2882_v58   ;;  %1870 = vperm.xlu0 %3007, %v2881_v50   ;;  %v2888_v58 = vld [vmem:[%s3198_s22 + $0xf8] sm:$0xff]  ;;  %v2887_v50 = vld [vmem:[%s3198_s22 + $0xf0] sm:$0xff] }
 0x1e4   : > { %v3974_v56 = vpop.permute.xlu1 %1356  ;;  %v3976_v49 = vpop.permute.xlu0 %1351 }
 0x1e5   : > { %5671 = vst [vmem:[#allocation125_spill] sm:$0xff] %v3974_v56  ;;  %5672 = vst [vmem:[#allocation126_spill] sm:$0xff] %v3976_v49  ;;  %1885 = vperm.xlu1 %3008, %v2884_v52   ;;  %1880 = vperm.xlu0 %3007, %v2883_v57   ;;  %v2890_v52 = vld [vmem:[%s3198_s22 + $0x110] sm:$0xff]  ;;  %v2889_v57 = vld [vmem:[%s3198_s22 + $0x108] sm:$0xff] }
 0x1e8   : > { %v3980_v44 = vpop.permute.xlu1 %1366  ;;  %v3982_v51 = vpop.permute.xlu0 %1361 }
 0x1e9   : > { %5673 = vst [vmem:[#allocation127_spill] sm:$0xff] %v3980_v44  ;;  %5674 = vst [vmem:[#allocation128_spill] sm:$0xff] %v3982_v51  ;;  %1895 = vperm.xlu1 %3008, %v2886_v46   ;;  %1890 = vperm.xlu0 %3007, %v2885_v2   ;;  %v2892_v46 = vld [vmem:[%s3198_s22 + $0x128] sm:$0xff]  ;;  %v2891_v2 = vld [vmem:[%s3198_s22 + $0x120] sm:$0xff] }
 0x1ec   : > { %v3986_v63 = vpop.permute.xlu1 %1376  ;;  %v3988_v56 = vpop.permute.xlu0 %1371 }
 0x1ed   : > { %5675 = vst [vmem:[#allocation129_spill] sm:$0xff] %v3986_v63  ;;  %5676 = vst [vmem:[#allocation130_spill] sm:$0xff] %v3988_v56  ;;  %1905 = vperm.xlu1 %3008, %v2888_v58   ;;  %1900 = vperm.xlu0 %3007, %v2887_v50   ;;  %v2894_v58 = vld [vmem:[%s3198_s22 + $0x140] sm:$0xff]  ;;  %v2893_v50 = vld [vmem:[%s3198_s22 + $0x138] sm:$0xff] }
 0x1f0   : > { %v3992_v49 = vpop.permute.xlu1 %1386  ;;  %v3994_v44 = vpop.permute.xlu0 %1381 }
 0x1f1   : > { %5677 = vst [vmem:[#allocation131_spill] sm:$0xff] %v3992_v49  ;;  %5678 = vst [vmem:[#allocation132_spill] sm:$0xff] %v3994_v44  ;;  %1915 = vperm.xlu1 %3008, %v2890_v52   ;;  %1910 = vperm.xlu0 %3007, %v2889_v57   ;;  %v2896_v52 = vld [vmem:[%s3198_s22 + $0x158] sm:$0xff]  ;;  %v2895_v57 = vld [vmem:[%s3198_s22 + $0x150] sm:$0xff] }
 0x1f4   : > { %v3998_v51 = vpop.permute.xlu1 %1396  ;;  %v4000_v63 = vpop.permute.xlu0 %1391 }
 0x1f5   : > { %5679 = vst [vmem:[#allocation133_spill] sm:$0xff] %v3998_v51  ;;  %5680 = vst [vmem:[#allocation134_spill] sm:$0xff] %v4000_v63  ;;  %1925 = vperm.xlu1 %3008, %v2892_v46   ;;  %1920 = vperm.xlu0 %3007, %v2891_v2   ;;  %v2898_v46 = vld [vmem:[%s3198_s22 + $0x170] sm:$0xff]  ;;  %v2897_v2 = vld [vmem:[%s3198_s22 + $0x168] sm:$0xff] }
 0x1f8   : > { %v4004_v56 = vpop.permute.xlu1 %1406  ;;  %v4006_v49 = vpop.permute.xlu0 %1401 }
 0x1f9   : > { %5681 = vst [vmem:[#allocation135_spill] sm:$0xff] %v4004_v56  ;;  %5682 = vst [vmem:[#allocation136_spill] sm:$0xff] %v4006_v49  ;;  %1935 = vperm.xlu1 %3008, %v2894_v58   ;;  %1930 = vperm.xlu0 %3007, %v2893_v50  }
 0x1fc   : > { %v4010_v44 = vpop.permute.xlu1 %1416  ;;  %v4012_v51 = vpop.permute.xlu0 %1411 }
 0x1fd   : > { %5683 = vst [vmem:[#allocation137_spill] sm:$0xff] %v4010_v44  ;;  %5684 = vst [vmem:[#allocation138_spill] sm:$0xff] %v4012_v51  ;;  %1945 = vperm.xlu1 %3008, %v2896_v52   ;;  %1940 = vperm.xlu0 %3007, %v2895_v57   ;;  %v2902_v52 = vld [vmem:[%s3198_s22 + $0x1a0] sm:$0xff]  ;;  %v2901_v57 = vld [vmem:[%s3198_s22 + $0x198] sm:$0xff] }
 0x200   : > { %v4016_v63 = vpop.permute.xlu1 %1426  ;;  %v4018_v56 = vpop.permute.xlu0 %1421 }
 0x201   : > { %5685 = vst [vmem:[#allocation139_spill] sm:$0xff] %v4016_v63  ;;  %5686 = vst [vmem:[#allocation140_spill] sm:$0xff] %v4018_v56  ;;  %1955 = vperm.xlu1 %3008, %v2898_v46   ;;  %1950 = vperm.xlu0 %3007, %v2897_v2   ;;  %v2905_v46 = vld [vmem:[%s3198_s22 + $0x39] sm:$0xff]  ;;  %v2904_v2 = vld [vmem:[%s3198_s22 + $0x31] sm:$0xff] }
 0x204   : > { %v4020_v58 = vpop.permute.xlu1 %1436  ;;  %v4022_v50 = vpop.permute.xlu0 %1431 }
 0x205   : > { %5687 = vst [vmem:[#allocation141_spill] sm:$0xff] %v4020_v58  ;;  %5688 = vst [vmem:[#allocation142_spill] sm:$0xff] %v4022_v50  ;;  %1965 = vperm.xlu1 %3008, %v3721_v26   ;;  %1960 = vperm.xlu0 %3007, %v3724_v27   ;;  %v2907_v26 = vld [vmem:[%s3198_s22 + $0x51] sm:$0xff]  ;;  %v2906_v27 = vld [vmem:[%s3198_s22 + $0x49] sm:$0xff] }
 0x208   : > { %v4028_v51 = vpop.permute.xlu1 %1446  ;;  %v4030_v63 = vpop.permute.xlu0 %1441 }
 0x209   : > { %1975 = vperm.xlu1 %3008, %v2902_v52   ;;  %1970 = vperm.xlu0 %3007, %v2901_v57   ;;  %v2909_v52 = vld [vmem:[%s3198_s22 + $0x69] sm:$0xff]  ;;  %v2908_v57 = vld [vmem:[%s3198_s22 + $0x61] sm:$0xff] }
 0x20c   : > { %v4034_v58 = vpop.permute.xlu1 %1560  ;;  %v4036_v50 = vpop.permute.xlu0 %1555 }
 0x20d   : > { %5689 = vst [vmem:[#allocation143_spill] sm:$0xff] %v4034_v58  ;;  %5690 = vst [vmem:[#allocation144_spill] sm:$0xff] %v4036_v50  ;;  %2089 = vperm.xlu1 %3008, %v2905_v46   ;;  %2084 = vperm.xlu0 %3007, %v2904_v2   ;;  %v2911_v46 = vld [vmem:[%s3198_s22 + $0x81] sm:$0xff]  ;;  %v2910_v2 = vld [vmem:[%s3198_s22 + $0x79] sm:$0xff] }
 0x210   : > { %v4040_v56 = vpop.permute.xlu1 %1570  ;;  %v4042_v44 = vpop.permute.xlu0 %1565 }
 0x211   : > { %5691 = vst [vmem:[#allocation145_spill] sm:$0xff] %v4040_v56  ;;  %5692 = vst [vmem:[#allocation146_spill] sm:$0xff] %v4042_v44  ;;  %2099 = vperm.xlu1 %3008, %v2907_v26   ;;  %2094 = vperm.xlu0 %3007, %v2906_v27   ;;  %v2913_v26 = vld [vmem:[%s3198_s22 + $0x99] sm:$0xff]  ;;  %v2912_v27 = vld [vmem:[%s3198_s22 + $0x91] sm:$0xff] }
 0x214   : > { %v4046_v49 = vpop.permute.xlu1 %1580  ;;  %v4048_v58 = vpop.permute.xlu0 %1575 }
 0x215   : > { %5693 = vst [vmem:[#allocation147_spill] sm:$0xff] %v4046_v49  ;;  %5694 = vst [vmem:[#allocation148_spill] sm:$0xff] %v4048_v58  ;;  %2109 = vperm.xlu1 %3008, %v2909_v52   ;;  %2104 = vperm.xlu0 %3007, %v2908_v57   ;;  %v2915_v52 = vld [vmem:[%s3198_s22 + $0xb1] sm:$0xff]  ;;  %v2914_v57 = vld [vmem:[%s3198_s22 + $0xa9] sm:$0xff] }
 0x218   : > { %v4052_v50 = vpop.permute.xlu1 %1590  ;;  %v4054_v56 = vpop.permute.xlu0 %1585 }
 0x219   : > { %5695 = vst [vmem:[#allocation149_spill] sm:$0xff] %v4052_v50  ;;  %5696 = vst [vmem:[#allocation150_spill] sm:$0xff] %v4054_v56  ;;  %2119 = vperm.xlu1 %3008, %v2911_v46   ;;  %2114 = vperm.xlu0 %3007, %v2910_v2   ;;  %v2917_v46 = vld [vmem:[%s3198_s22 + $0xc9] sm:$0xff]  ;;  %v2916_v2 = vld [vmem:[%s3198_s22 + $0xc1] sm:$0xff] }
 0x21c   : > { %v4058_v44 = vpop.permute.xlu1 %1600  ;;  %v4060_v49 = vpop.permute.xlu0 %1595 }
 0x21d   : > { %5697 = vst [vmem:[#allocation151_spill] sm:$0xff] %v4058_v44  ;;  %5698 = vst [vmem:[#allocation152_spill] sm:$0xff] %v4060_v49  ;;  %2129 = vperm.xlu1 %3008, %v2913_v26   ;;  %2124 = vperm.xlu0 %3007, %v2912_v27   ;;  %v2919_v26 = vld [vmem:[%s3198_s22 + $0xe1] sm:$0xff]  ;;  %v2918_v27 = vld [vmem:[%s3198_s22 + $0xd9] sm:$0xff] }
 0x220   : > { %v4064_v58 = vpop.permute.xlu1 %1610  ;;  %v4066_v50 = vpop.permute.xlu0 %1605 }
 0x221   : > { %5699 = vst [vmem:[#allocation153_spill] sm:$0xff] %v4064_v58  ;;  %5700 = vst [vmem:[#allocation154_spill] sm:$0xff] %v4066_v50  ;;  %2139 = vperm.xlu1 %3008, %v2915_v52   ;;  %2134 = vperm.xlu0 %3007, %v2914_v57   ;;  %v2921_v52 = vld [vmem:[%s3198_s22 + $0xf9] sm:$0xff]  ;;  %v2920_v57 = vld [vmem:[%s3198_s22 + $0xf1] sm:$0xff] }
 0x224   : > { %v4070_v56 = vpop.permute.xlu1 %1620  ;;  %v4072_v44 = vpop.permute.xlu0 %1615 }
 0x225   : > { %5701 = vst [vmem:[#allocation155_spill] sm:$0xff] %v4070_v56  ;;  %5702 = vst [vmem:[#allocation156_spill] sm:$0xff] %v4072_v44  ;;  %2149 = vperm.xlu1 %3008, %v2917_v46   ;;  %2144 = vperm.xlu0 %3007, %v2916_v2   ;;  %v2923_v46 = vld [vmem:[%s3198_s22 + $0x111] sm:$0xff]  ;;  %v2922_v2 = vld [vmem:[%s3198_s22 + $0x109] sm:$0xff] }
 0x228   : > { %v4076_v49 = vpop.permute.xlu1 %1630  ;;  %v4078_v58 = vpop.permute.xlu0 %1625 }
 0x229   : > { %5703 = vst [vmem:[#allocation157_spill] sm:$0xff] %v4076_v49  ;;  %5704 = vst [vmem:[#allocation158_spill] sm:$0xff] %v4078_v58  ;;  %2159 = vperm.xlu1 %3008, %v2919_v26   ;;  %2154 = vperm.xlu0 %3007, %v2918_v27   ;;  %v2925_v26 = vld [vmem:[%s3198_s22 + $0x129] sm:$0xff]  ;;  %v2924_v27 = vld [vmem:[%s3198_s22 + $0x121] sm:$0xff] }
 0x22c   : > { %v4082_v50 = vpop.permute.xlu1 %1640  ;;  %v4084_v56 = vpop.permute.xlu0 %1635 }
 0x22d   : > { %5705 = vst [vmem:[#allocation159_spill] sm:$0xff] %v4082_v50  ;;  %5706 = vst [vmem:[#allocation160_spill] sm:$0xff] %v4084_v56  ;;  %2169 = vperm.xlu1 %3008, %v2921_v52   ;;  %2164 = vperm.xlu0 %3007, %v2920_v57   ;;  %v2927_v52 = vld [vmem:[%s3198_s22 + $0x141] sm:$0xff]  ;;  %v2926_v57 = vld [vmem:[%s3198_s22 + $0x139] sm:$0xff] }
 0x230   : > { %v4088_v44 = vpop.permute.xlu1 %1650  ;;  %v4090_v49 = vpop.permute.xlu0 %1645 }
 0x231   : > { %5707 = vst [vmem:[#allocation161_spill] sm:$0xff] %v4088_v44  ;;  %5708 = vst [vmem:[#allocation162_spill] sm:$0xff] %v4090_v49  ;;  %2179 = vperm.xlu1 %3008, %v2923_v46   ;;  %2174 = vperm.xlu0 %3007, %v2922_v2   ;;  %v2929_v46 = vld [vmem:[%s3198_s22 + $0x159] sm:$0xff]  ;;  %v2928_v2 = vld [vmem:[%s3198_s22 + $0x151] sm:$0xff] }
 0x234   : > { %v4094_v58 = vpop.permute.xlu1 %1660  ;;  %v4096_v50 = vpop.permute.xlu0 %1655 }
 0x235   : > { %5709 = vst [vmem:[#allocation163_spill] sm:$0xff] %v4094_v58  ;;  %5710 = vst [vmem:[#allocation164_spill] sm:$0xff] %v4096_v50  ;;  %2189 = vperm.xlu1 %3008, %v2925_v26   ;;  %2184 = vperm.xlu0 %3007, %v2924_v27   ;;  %v2931_v26 = vld [vmem:[%s3198_s22 + $0x171] sm:$0xff]  ;;  %v2930_v27 = vld [vmem:[%s3198_s22 + $0x169] sm:$0xff] }
 0x238   : > { %v4100_v56 = vpop.permute.xlu1 %1670  ;;  %v4102_v44 = vpop.permute.xlu0 %1665 }
 0x239   : > { %5711 = vst [vmem:[#allocation165_spill] sm:$0xff] %v4100_v56  ;;  %5712 = vst [vmem:[#allocation166_spill] sm:$0xff] %v4102_v44  ;;  %2199 = vperm.xlu1 %3008, %v2927_v52   ;;  %2194 = vperm.xlu0 %3007, %v2926_v57  }
 0x23c   : > { %v4106_v49 = vpop.permute.xlu1 %1680  ;;  %v4108_v58 = vpop.permute.xlu0 %1675 }
 0x23d   : > { %5713 = vst [vmem:[#allocation167_spill] sm:$0xff] %v4106_v49  ;;  %5714 = vst [vmem:[#allocation168_spill] sm:$0xff] %v4108_v58  ;;  %2209 = vperm.xlu1 %3008, %v2929_v46   ;;  %2204 = vperm.xlu0 %3007, %v2928_v2   ;;  %v2935_v46 = vld [vmem:[%s3198_s22 + $0x1a1] sm:$0xff]  ;;  %v2934_v2 = vld [vmem:[%s3198_s22 + $0x199] sm:$0xff] }
 0x240   : > { %v4112_v50 = vpop.permute.xlu1 %1690  ;;  %v4114_v56 = vpop.permute.xlu0 %1685 }
 0x241   : > { %5715 = vst [vmem:[#allocation169_spill] sm:$0xff] %v4112_v50  ;;  %5716 = vst [vmem:[#allocation170_spill] sm:$0xff] %v4114_v56  ;;  %2219 = vperm.xlu1 %3008, %v2931_v26   ;;  %2214 = vperm.xlu0 %3007, %v2930_v27   ;;  %v2938_v26 = vld [vmem:[%s3198_s22 + $0x3a] sm:$0xff]  ;;  %v2937_v27 = vld [vmem:[%s3198_s22 + $0x32] sm:$0xff] }
 0x244   : > { %v4116_v52 = vpop.permute.xlu1 %1700  ;;  %v4118_v57 = vpop.permute.xlu0 %1695 }
 0x245   : > { %5717 = vst [vmem:[#allocation171_spill] sm:$0xff] %v4116_v52  ;;  %5718 = vst [vmem:[#allocation172_spill] sm:$0xff] %v4118_v57  ;;  %2229 = vperm.xlu1 %3008, %v3823_v53   ;;  %2224 = vperm.xlu0 %3007, %v3826_v59   ;;  %v2940_v53 = vld [vmem:[%s3198_s22 + $0x52] sm:$0xff]  ;;  %v2939_v59 = vld [vmem:[%s3198_s22 + $0x4a] sm:$0xff] }
 0x248   : > { %v4124_v58 = vpop.permute.xlu1 %1710  ;;  %v4126_v50 = vpop.permute.xlu0 %1705 }
 0x249   : > { %2239 = vperm.xlu1 %3008, %v2935_v46   ;;  %2234 = vperm.xlu0 %3007, %v2934_v2   ;;  %v2942_v46 = vld [vmem:[%s3198_s22 + $0x6a] sm:$0xff]  ;;  %v2941_v2 = vld [vmem:[%s3198_s22 + $0x62] sm:$0xff] }
 0x24c   : > { %v4130_v52 = vpop.permute.xlu1 %1825  ;;  %v4132_v57 = vpop.permute.xlu0 %1820 }
 0x24d   : > { %5719 = vst [vmem:[#allocation173_spill] sm:$0xff] %v4130_v52  ;;  %5720 = vst [vmem:[#allocation174_spill] sm:$0xff] %v4132_v57  ;;  %2353 = vperm.xlu1 %3008, %v2938_v26   ;;  %2348 = vperm.xlu0 %3007, %v2937_v27   ;;  %v2944_v26 = vld [vmem:[%s3198_s22 + $0x82] sm:$0xff]  ;;  %v2943_v27 = vld [vmem:[%s3198_s22 + $0x7a] sm:$0xff] }
 0x250   : > { %v4136_v56 = vpop.permute.xlu1 %1835  ;;  %v4138_v49 = vpop.permute.xlu0 %1830 }
 0x251   : > { %5721 = vst [vmem:[#allocation175_spill] sm:$0xff] %v4136_v56  ;;  %5722 = vst [vmem:[#allocation176_spill] sm:$0xff] %v4138_v49  ;;  %2363 = vperm.xlu1 %3008, %v2940_v53   ;;  %2358 = vperm.xlu0 %3007, %v2939_v59   ;;  %v2946_v53 = vld [vmem:[%s3198_s22 + $0x9a] sm:$0xff]  ;;  %v2945_v59 = vld [vmem:[%s3198_s22 + $0x92] sm:$0xff] }
 0x254   : > { %v4142_v44 = vpop.permute.xlu1 %1845  ;;  %v4144_v52 = vpop.permute.xlu0 %1840 }
 0x255   : > { %5723 = vst [vmem:[#allocation177_spill] sm:$0xff] %v4142_v44  ;;  %5724 = vst [vmem:[#allocation178_spill] sm:$0xff] %v4144_v52  ;;  %2373 = vperm.xlu1 %3008, %v2942_v46   ;;  %2368 = vperm.xlu0 %3007, %v2941_v2   ;;  %v2948_v46 = vld [vmem:[%s3198_s22 + $0xb2] sm:$0xff]  ;;  %v2947_v2 = vld [vmem:[%s3198_s22 + $0xaa] sm:$0xff] }
 0x258   : > { %v4148_v57 = vpop.permute.xlu1 %1855  ;;  %v4150_v56 = vpop.permute.xlu0 %1850 }
 0x259   : > { %5725 = vst [vmem:[#allocation179_spill] sm:$0xff] %v4148_v57  ;;  %5726 = vst [vmem:[#allocation180_spill] sm:$0xff] %v4150_v56  ;;  %2383 = vperm.xlu1 %3008, %v2944_v26   ;;  %2378 = vperm.xlu0 %3007, %v2943_v27   ;;  %v2950_v26 = vld [vmem:[%s3198_s22 + $0xca] sm:$0xff]  ;;  %v2949_v27 = vld [vmem:[%s3198_s22 + $0xc2] sm:$0xff] }
 0x25c   : > { %v4154_v49 = vpop.permute.xlu1 %1865  ;;  %v4156_v44 = vpop.permute.xlu0 %1860 }
 0x25d   : > { %5727 = vst [vmem:[#allocation181_spill] sm:$0xff] %v4154_v49  ;;  %5728 = vst [vmem:[#allocation182_spill] sm:$0xff] %v4156_v44  ;;  %2393 = vperm.xlu1 %3008, %v2946_v53   ;;  %2388 = vperm.xlu0 %3007, %v2945_v59   ;;  %v2952_v53 = vld [vmem:[%s3198_s22 + $0xe2] sm:$0xff]  ;;  %v2951_v59 = vld [vmem:[%s3198_s22 + $0xda] sm:$0xff] }
 0x260   : > { %v4160_v52 = vpop.permute.xlu1 %1875  ;;  %v4162_v57 = vpop.permute.xlu0 %1870 }
 0x261   : > { %5729 = vst [vmem:[#allocation183_spill] sm:$0xff] %v4160_v52  ;;  %5730 = vst [vmem:[#allocation184_spill] sm:$0xff] %v4162_v57  ;;  %2403 = vperm.xlu1 %3008, %v2948_v46   ;;  %2398 = vperm.xlu0 %3007, %v2947_v2   ;;  %v2954_v46 = vld [vmem:[%s3198_s22 + $0xfa] sm:$0xff]  ;;  %v2953_v2 = vld [vmem:[%s3198_s22 + $0xf2] sm:$0xff] }
 0x264   : > { %v4166_v56 = vpop.permute.xlu1 %1885  ;;  %v4168_v49 = vpop.permute.xlu0 %1880 }
 0x265   : > { %5731 = vst [vmem:[#allocation185_spill] sm:$0xff] %v4166_v56  ;;  %5732 = vst [vmem:[#allocation186_spill] sm:$0xff] %v4168_v49  ;;  %2413 = vperm.xlu1 %3008, %v2950_v26   ;;  %2408 = vperm.xlu0 %3007, %v2949_v27   ;;  %v2769_v56 = vld [vmem:[#allocation2] ss:$0 sm:$0xff]  ;;  %v2956_v26 = vld [vmem:[%s3198_s22 + $0x112] sm:$0xff] }
 0x266   : > { %v2955_v49 = vld [vmem:[%s3198_s22 + $0x10a] sm:$0xff]  ;;  %v5737_v27 = vld [vmem:[#allocation13_spill] sm:$0xff]  ;;  %v399_v40 = vmul.f32 %v2769_v56, %v5740_v41  ;;  %v4199_v36 = vmul.f32 %v2769_v56, %v5745_v37  ;;  %v5748_v41 = vld [vmem:[#allocation30_spill] sm:$0xff]  ;;  %v4216_v25 = vmul.f32 %v2769_v56, %v5750_v24  ;;  %v4234_v24 = vmul.f32 %v2769_v56, %v5756_v23 }
 0x267   : > { %v4185_v42 = vmul.f32 %v2769_v56, %v5737_v27  ;;  %v5746_v27 = vld [vmem:[#allocation26_spill] sm:$0xff]  ;;  %v5751_v37 = vld [vmem:[#allocation37_spill] sm:$0xff]  ;;  %v4249_v17 = vmul.f32 %v2769_v56, %v5764_v18 }
 0x268   : > { %v4172_v44 = vpop.permute.xlu1 %1895  ;;  %v4174_v52 = vpop.permute.xlu0 %1890  ;;  %v5767_v23 = vld [vmem:[#allocation57_spill] sm:$0xff] }
 0x269   : > { %5733 = vst [vmem:[#allocation187_spill] sm:$0xff] %v4172_v44  ;;  %5734 = vst [vmem:[#allocation188_spill] sm:$0xff] %v4174_v52  ;;  %2423 = vperm.xlu1 %3008, %v2952_v53   ;;  %2418 = vperm.xlu0 %3007, %v2951_v59   ;;  %v5738_v44 = vld [vmem:[#allocation14_spill] sm:$0xff]  ;;  %v5739_v53 = vld [vmem:[#allocation17_spill] sm:$0xff] }
 0x26a   : > { %v398_v52 = vmul.f32 %v2769_v56, %v5738_v44  ;;  %v401_v59 = vmul.f32 %v2769_v56, %v5739_v53  ;;  %v4202_v44 = vmul.f32 %v2769_v56, %v5746_v27  ;;  %v5747_v53 = vld [vmem:[#allocation29_spill] sm:$0xff]  ;;  %5757 = vst [vmem:[#allocation17_spill] sm:$0xff] %v4234_v24  ;;  %5765 = vst [vmem:[#allocation26_spill] sm:$0xff] %v4249_v17 }
 0x26b   : > { %v4205_v35 = vmul.f32 %v2769_v56, %v5747_v53  ;;  %v4225_v53 = vmul.f32 %v2769_v56, %v5753_v32  ;;  %v2959_v18 = vld [vmem:[%s3198_s22 + $0x13a] sm:$0xff] }
 0x26c   : > { %v4178_v57 = vpop.permute.xlu1 %1905  ;;  %v4180_v43 = vpop.permute.xlu0 %1900  ;;  %v5774_v17 = vld [vmem:[#allocation65_spill] sm:$0xff] }
 0x26d   : > { %5735 = vst [vmem:[#allocation189_spill] sm:$0xff] %v4178_v57  ;;  %5736 = vst [vmem:[#allocation190_spill] sm:$0xff] %v4180_v43  ;;  %2433 = vperm.xlu1 %3008, %v2954_v46   ;;  %2428 = vperm.xlu0 %3007, %v2953_v2   ;;  %v5743_v43 = vld [vmem:[#allocation21_spill] sm:$0xff]  ;;  %v5744_v2 = vld [vmem:[#allocation22_spill] sm:$0xff]  ;;  %v4269_v14 = vmul.f32 %v2769_v56, %v5774_v17  ;;  %v664_v17 = vmul.f32 %v4239_v20, %v3638_v34 }
 0x26e   : > { %v403_v46 = vmul.f32 %v2769_v56, %v5743_v43  ;;  %v4196_v38 = vmul.f32 %v2769_v56, %v5744_v2  ;;  %v2958_v43 = vld [vmem:[%s3198_s22 + $0x12a] sm:$0xff]  ;;  %v2957_v2 = vld [vmem:[%s3198_s22 + $0x122] sm:$0xff] }
 0x26f   : > { %5775 = vst [vmem:[#allocation34_spill] sm:$0xff] %v4269_v14  ;;  %v5783_v14 = vld [vmem:[#allocation69_spill] sm:$0xff] }
 0x270   : > { %v4190_v39 = vpop.permute.xlu1 %1915  ;;  %v4192_v57 = vpop.permute.xlu0 %1910 }
 0x271   : > { %5741 = vst [vmem:[#allocation13_spill] sm:$0xff] %v4190_v39  ;;  %5742 = vst [vmem:[#allocation14_spill] sm:$0xff] %v4192_v57  ;;  %2443 = vperm.xlu1 %3008, %v2956_v26   ;;  %2438 = vperm.xlu0 %3007, %v2955_v49   ;;  %v4208_v39 = vmul.f32 %v2769_v56, %v5748_v41  ;;  %v5749_v57 = vld [vmem:[#allocation33_spill] sm:$0xff]  ;;  %v4219_v26 = vmul.f32 %v2769_v56, %v5751_v37  ;;  %v5752_v49 = vld [vmem:[#allocation38_spill] sm:$0xff] }
 0x272   : > { %v4211_v30 = vmul.f32 %v2769_v56, %v5749_v57  ;;  %v4222_v27 = vmul.f32 %v2769_v56, %v5752_v49  ;;  %v4228_v41 = vmul.f32 %v2769_v56, %v5754_v31  ;;  %v4231_v57 = vmul.f32 %v2769_v56, %v5755_v29  ;;  %v5766_v29 = vld [vmem:[#allocation54_spill] sm:$0xff] }
 0x273   : > { %v4237_v37 = vmul.f32 %v2769_v56, %v5758_v21  ;;  %v4246_v31 = vmul.f32 %v2769_v56, %v5762_v19  ;;  %v4252_v16 = vmul.f32 %v2769_v56, %v5766_v29  ;;  %v4255_v21 = vmul.f32 %v2769_v56, %v5767_v23  ;;  %v5776_v29 = vld [vmem:[#allocation66_spill] sm:$0xff]  ;;  %v5778_v23 = vld [vmem:[#allocation72_spill] sm:$0xff] }
 0x274   : > { %v4241_v49 = vpop.permute.xlu1 %1925  ;;  %v4243_v32 = vpop.permute.xlu0 %1920 }
 0x275   : > { %5759 = vst [vmem:[#allocation18_spill] sm:$0xff] %v4237_v37  ;;  %5760 = vst [vmem:[#allocation21_spill] sm:$0xff] %v4241_v49  ;;  %2453 = vperm.xlu1 %3008, %v2958_v43   ;;  %2448 = vperm.xlu0 %3007, %v2957_v2   ;;  %v5768_v37 = vld [vmem:[#allocation58_spill] sm:$0xff]  ;;  %v5770_v49 = vld [vmem:[#allocation61_spill] sm:$0xff]  ;;  %v4272_v43 = vmul.f32 %v2769_v56, %v5776_v29  ;;  %v663_v2 = vmul.f32 %v4239_v20, %v3630_v62 }
 0x276   : > { %5761 = vst [vmem:[#allocation22_spill] sm:$0xff] %v4243_v32  ;;  %5763 = vst [vmem:[#allocation25_spill] sm:$0xff] %v4246_v31  ;;  %v4258_v24 = vmul.f32 %v2769_v56, %v5768_v37  ;;  %v4261_v15 = vmul.f32 %v2769_v56, %v5770_v49  ;;  %v5772_v32 = vld [vmem:[#allocation62_spill] sm:$0xff]  ;;  %v662_v37 = vmul.f32 %v4239_v20, %v5778_v23 }
 0x277   : > { %v4264_v19 = vmul.f32 %v2769_v56, %v5772_v32  ;;  %v2960_v31 = vld [vmem:[%s3198_s22 + $0x142] sm:$0xff]  ;;  %5777 = vst [vmem:[#allocation37_spill] sm:$0xff] %v4272_v43  ;;  %v665_v32 = vmul.f32 %v4239_v20, %v3636_v4  ;;  %v667_v29 = vmul.f32 %v4239_v20, %v3642_v61  ;;  %v4292_v23 = vmul.f32 %v2769_v56, %v5783_v14  ;;  %v2962_v14 = vld [vmem:[%s3198_s22 + $0x15a] sm:$0xff] }
 0x278   : > { %5769 = vst [vmem:[#allocation29_spill] sm:$0xff] %v4258_v24  ;;  %5771 = vst [vmem:[#allocation30_spill] sm:$0xff] %v4261_v15  ;;  %v5779_v24 = vld [vmem:[#allocation68_spill] sm:$0xff]  ;;  %v4287_v43 = vpop.permute.xlu1 %1935  ;;  %v4289_v62 = vpop.permute.xlu0 %1930  ;;  %v5785_v4 = vld [vmem:[#allocation70_spill] sm:$0xff]  ;;  %v668_v61 = vmul.f32 %v4239_v20, %v3650_v3  ;;  %v4317_v3 = vadd.f32 %v664_v17, %v4185_v42  ;;  %v692_v42 = vmul.f32 %v4239_v20, %v3728_v22 }
 0x279   : > { %5773 = vst [vmem:[#allocation33_spill] sm:$0xff] %v4264_v19  ;;  %v4279_v49 = vmul.f32 %v2769_v56, %v5779_v24  ;;  %5781 = vst [vmem:[#allocation41_spill] sm:$0xff] %v4287_v43  ;;  %v666_v24 = vmul.f32 %v4239_v20, %v3644_v60  ;;  %2463 = vperm.xlu1 %3008, %v2960_v31   ;;  %2458 = vperm.xlu0 %3007, %v2959_v18   ;;  %v5786_v19 = vld [vmem:[#allocation71_spill] sm:$0xff]  ;;  %v2961_v43 = vld [vmem:[%s3198_s22 + $0x152] sm:$0xff] }
 0x27a   : > { %5782 = vst [vmem:[#allocation42_spill] sm:$0xff] %v4289_v62  ;;  %5784 = vst [vmem:[#allocation45_spill] sm:$0xff] %v4292_v23  ;;  %v429_v34 = vmul.f32 %v2769_v56, %v5785_v4  ;;  %v428_v15 = vmul.f32 %v2769_v56, %v5786_v19  ;;  %v671_v62 = vmul.f32 %v4239_v20, %v3654_v1  ;;  %v2964_v19 = vld [vmem:[%s3198_s22 + $0x172] sm:$0xff]  ;;  %v4391_v4 = vld [vmem:[#allocation2 + $0x5] ss:$0 sm:$0xff] }
 0x27b   : > { %5780 = vst [vmem:[#allocation38_spill] sm:$0xff] %v4279_v49  ;;  %v669_v49 = vmul.f32 %v4239_v20, %v3648_v0  ;;  %v4306_v23 = vadd.f32 %v663_v2, %v399_v40  ;;  %v4308_v60 = vadd.f32 %v662_v37, %v398_v52  ;;  %v670_v0 = vmul.f32 %v4239_v20, %v3656_v5  ;;  %v2963_v2 = vld [vmem:[%s3198_s22 + $0x16a] sm:$0xff] }
 0x27c   : > { %v673_v31 = vmul.f32 %v4239_v20, %v3660_v6  ;;  %v4314_v18 = vadd.f32 %v665_v32, %v401_v59  ;;  %v4319_v1 = vadd.f32 %v667_v29, %v403_v46  ;;  %v693_v40 = vmul.f32 %v4239_v20, %v3726_v28  ;;  %v4323_v56 = vpop.permute.xlu1 %1945  ;;  %v4325_v52 = vpop.permute.xlu0 %1940  ;;  %v4335_v59 = vld [vmem:[#allocation2 + $0x2] ss:$0 sm:$0xff]  ;;  %v4375_v29 = vld [vmem:[#allocation2 + $0x4] ss:$0 sm:$0xff] }
 0x27d   : > { %5787 = vst [vmem:[#allocation46_spill] sm:$0xff] %v4323_v56  ;;  %5788 = vst [vmem:[#allocation49_spill] sm:$0xff] %v4325_v52  ;;  %v4328_v5 = vadd.f32 %v666_v24, %v4196_v38  ;;  %v4331_v6 = vadd.f32 %v669_v49, %v4199_v36  ;;  %2473 = vperm.xlu1 %3008, %v2962_v14   ;;  %2468 = vperm.xlu0 %3007, %v2961_v43   ;;  %v4359_v43 = vld [vmem:[#allocation2 + $0x3] ss:$0 sm:$0xff]  ;;  %v5793_v14 = vld [vmem:[#allocation73_spill] sm:$0xff] }
 0x27e   : > { %v4338_v46 = vadd.f32 %v668_v61, %v4202_v44  ;;  %v4341_v28 = vadd.f32 %v671_v62, %v4205_v35  ;;  %v672_v38 = vmul.f32 %v4239_v20, %v3662_v7  ;;  %v957_v36 = vmul.f32 %v4335_v59, %v3828_v54  ;;  %v5862_v56 = vld [vmem:[#allocation36_spill] sm:$0xff] }
 0x27f   : > { %v4350_v22 = vadd.f32 %v670_v0, %v4208_v39  ;;  %v4353_v37 = vadd.f32 %v673_v31, %v4211_v30  ;;  %v675_v44 = vmul.f32 %v4239_v20, %v3666_v8  ;;  %v956_v35 = vmul.f32 %v4335_v59, %v3830_v55  ;;  %v5794_v0 = vld [vmem:[#allocation74_spill] sm:$0xff] }
 0x280   : > { %v674_v7 = vmul.f32 %v4239_v20, %v3668_v9  ;;  %v677_v54 = vmul.f32 %v4239_v20, %v3672_v10  ;;  %v725_v49 = vadd.f32 %v693_v40, %v429_v34  ;;  %v1222_v39 = vmul.f32 %v4359_v43, %v3930_v45  ;;  %v4367_v30 = vpop.permute.xlu1 %1955  ;;  %v4369_v32 = vpop.permute.xlu0 %1950 }
 0x281   : > { %5789 = vst [vmem:[#allocation50_spill] sm:$0xff] %v4367_v30  ;;  %5790 = vst [vmem:[#allocation53_spill] sm:$0xff] %v4369_v32  ;;  %v676_v8 = vmul.f32 %v4239_v20, %v3674_v11  ;;  %v724_v55 = vadd.f32 %v692_v42, %v428_v15  ;;  %v1221_v17 = vmul.f32 %v4359_v43, %v3932_v33  ;;  %2483 = vperm.xlu1 %3008, %v2964_v19   ;;  %v2967_v42 = vld [vmem:[%s3198_s22 + $0x19a] sm:$0xff]  ;;  %v5797_v19 = vld [vmem:[#allocation76_spill] sm:$0xff] }
 0x282   : > { %2478 = vperm.xlu0 %3007, %v2963_v2   ;;  %v4378_v9 = vadd.f32 %v672_v38, %v4216_v25  ;;  %v679_v10 = vmul.f32 %v4239_v20, %v3678_v12  ;;  %v989_v45 = vadd.f32 %v957_v36, %v725_v49  ;;  %v1486_v62 = vmul.f32 %v4375_v29, %v4028_v51  ;;  %v5795_v38 = vld [vmem:[#allocation17_spill] sm:$0xff]  ;;  %v5845_v32 = vld [vmem:[#allocation111_spill] sm:$0xff] }
 0x283   : > { %v4385_v11 = vadd.f32 %v675_v44, %v4219_v26  ;;  %v678_v15 = vmul.f32 %v4239_v20, %v3680_v13  ;;  %v988_v33 = vadd.f32 %v956_v35, %v724_v55  ;;  %v1485_v24 = vmul.f32 %v4375_v29, %v4030_v63  ;;  %v5798_v2 = vld [vmem:[#allocation77_spill] sm:$0xff]  ;;  %v5799_v35 = vld [vmem:[#allocation78_spill] sm:$0xff] }
 0x284   : > { %v4394_v25 = vadd.f32 %v674_v7, %v4222_v27  ;;  %v4397_v12 = vadd.f32 %v677_v54, %v4225_v53  ;;  %v1254_v51 = vadd.f32 %v1222_v39, %v989_v45  ;;  %v1750_v26 = vmul.f32 %v4391_v4, %v4124_v58  ;;  %v4401_v34 = vpop.permute.xlu1 %1965  ;;  %v4403_v13 = vpop.permute.xlu0 %1960  ;;  %v5800_v54 = vld [vmem:[#allocation79_spill] sm:$0xff] }
 0x285   : > { %5791 = vst [vmem:[#allocation54_spill] sm:$0xff] %v4401_v34  ;;  %5792 = vst [vmem:[#allocation57_spill] sm:$0xff] %v4403_v13  ;;  %v4406_v63 = vadd.f32 %v676_v8, %v4228_v41  ;;  %v1253_v61 = vadd.f32 %v1221_v17, %v988_v33  ;;  %v1749_v27 = vmul.f32 %v4391_v4, %v4126_v50  ;;  %2493 = vperm.xlu1 %3008, %v3925_v48   ;;  %v2968_v41 = vld [vmem:[%s3198_s22 + $0x1a2] sm:$0xff] }
 0x286   : > { %2488 = vperm.xlu0 %3007, %v3928_v47   ;;  %v4413_v53 = vadd.f32 %v679_v10, %v4231_v57  ;;  %v681_v58 = vmul.f32 %v4239_v20, %v5793_v14  ;;  %v680_v31 = vmul.f32 %v4239_v20, %v5794_v0  ;;  %v1518_v40 = vadd.f32 %v1486_v62, %v1254_v51  ;;  %v5796_v50 = vld [vmem:[#allocation75_spill] sm:$0xff]  ;;  %v5804_v14 = vld [vmem:[#allocation81_spill] sm:$0xff]  ;;  %v5839_v13 = vld [vmem:[#allocation106_spill] sm:$0xff] }
 0x287   : > { %v4422_v36 = vadd.f32 %v678_v15, %v5795_v38  ;;  %v683_v48 = vmul.f32 %v4239_v20, %v5796_v50  ;;  %v682_v47 = vmul.f32 %v4239_v20, %v5797_v19  ;;  %v1517_v57 = vadd.f32 %v1485_v24, %v1253_v61  ;;  %v4434_v8 = vld [vmem:[#allocation2 + $0x6] ss:$0 sm:$0xff]  ;;  %v5801_v15 = vld [vmem:[#allocation18_spill] sm:$0xff]  ;;  %v5802_v24 = vld [vmem:[#allocation25_spill] sm:$0xff] }
 0x288   : > { %v685_v44 = vmul.f32 %v4239_v20, %v5798_v2  ;;  %v684_v7 = vmul.f32 %v4239_v20, %v5799_v35  ;;  %v687_v49 = vmul.f32 %v4239_v20, %v5800_v54  ;;  %v1782_v39 = vadd.f32 %v1750_v26, %v1518_v40  ;;  %v1976_v55 = vpop.permute.xlu1 %1975  ;;  %v1971_v17 = vpop.permute.xlu0 %1970  ;;  %v5803_v61 = vld [vmem:[#allocation80_spill] sm:$0xff]  ;;  %v5805_v40 = vld [vmem:[#allocation26_spill] sm:$0xff]  ;;  %v5809_v19 = vld [vmem:[#allocation83_spill] sm:$0xff] }
 0x289   : > { %v1781_v10 = vadd.f32 %v1749_v27, %v1517_v57  ;;  %v2015_v45 = vmul.f32 %v4434_v8, %v1976_v55  ;;  %v2014_v62 = vmul.f32 %v4434_v8, %v1971_v17  ;;  %2503 = vperm.xlu1 %3008, %v2968_v41   ;;  %v4439_v33 = vadd.f32 %v681_v58, %v5801_v15  ;;  %v5806_v38 = vld [vmem:[#allocation82_spill] sm:$0xff]  ;;  %v5810_v2 = vld [vmem:[#allocation84_spill] sm:$0xff] }
 0x28a   : > { %2498 = vperm.xlu0 %3007, %v2967_v42   ;;  %v4442_v51 = vadd.f32 %v680_v31, %v5802_v24  ;;  %v686_v26 = vmul.f32 %v4239_v20, %v5803_v61  ;;  %v689_v0 = vmul.f32 %v4239_v20, %v5804_v14  ;;  %v4449_v27 = vadd.f32 %v683_v48, %v5805_v40  ;;  %v5812_v17 = vld [vmem:[#allocation30_spill] sm:$0xff]  ;;  %v5817_v24 = vld [vmem:[#allocation87_spill] sm:$0xff] }
 0x28b   : > { %v688_v50 = vmul.f32 %v4239_v20, %v5806_v38  ;;  %v4453_v41 = vadd.f32 %v2015_v45, %v1782_v39  ;;  %v4455_v42 = vadd.f32 %v2014_v62, %v1781_v10  ;;  %v4458_v58 = vadd.f32 %v682_v47, %v4252_v16  ;;  %v5811_v39 = vld [vmem:[#allocation29_spill] sm:$0xff]  ;;  %v5814_v47 = vld [vmem:[#allocation86_spill] sm:$0xff] }
 0x28c   : > { %v4461_v31 = vadd.f32 %v685_v44, %v4255_v21  ;;  %v691_v57 = vmul.f32 %v4239_v20, %v5809_v19  ;;  %v690_v48 = vmul.f32 %v4239_v20, %v5810_v2  ;;  %v4467_v35 = vpop.permute.xlu1 %2089  ;;  %v4469_v54 = vpop.permute.xlu0 %2084  ;;  %v4472_v55 = vadd.f32 %v684_v7, %v5811_v39  ;;  %v5813_v16 = vld [vmem:[#allocation85_spill] sm:$0xff]  ;;  %v5816_v20 = vld [vmem:[#allocation34_spill] sm:$0xff]  ;;  %v5818_v7 = vld [vmem:[#allocation88_spill] sm:$0xff] }
 0x28d   : > { %5807 = vst [vmem:[#allocation58_spill] sm:$0xff] %v4453_v41  ;;  %5808 = vst [vmem:[#allocation61_spill] sm:$0xff] %v4455_v42  ;;  %v4475_v10 = vadd.f32 %v687_v49, %v5812_v17  ;;  %v927_v21 = vmul.f32 %v4335_v59, %v5813_v16  ;;  %v926_v44 = vmul.f32 %v4335_v59, %v5814_v47  ;;  %v5815_v45 = vld [vmem:[#allocation33_spill] sm:$0xff]  ;;  %v5821_v2 = vld [vmem:[#allocation90_spill] sm:$0xff] }
 0x28e   : > { %v4482_v62 = vadd.f32 %v686_v26, %v5815_v45  ;;  %v4485_v15 = vadd.f32 %v689_v0, %v5816_v20  ;;  %v929_v61 = vmul.f32 %v4335_v59, %v5817_v24  ;;  %v928_v14 = vmul.f32 %v4335_v59, %v5818_v7  ;;  %v5819_v49 = vld [vmem:[#allocation37_spill] sm:$0xff]  ;;  %v5822_v26 = vld [vmem:[#allocation91_spill] sm:$0xff]  ;;  %v5823_v0 = vld [vmem:[#allocation38_spill] sm:$0xff] }
 0x28f   : > { %v4492_v40 = vadd.f32 %v688_v50, %v5819_v49  ;;  %v5820_v38 = vld [vmem:[#allocation89_spill] sm:$0xff]  ;;  %v930_v39 = vmul.f32 %v4335_v59, %v5821_v2  ;;  %v933_v17 = vmul.f32 %v4335_v59, %v5822_v26  ;;  %v4501_v16 = vadd.f32 %v691_v57, %v5823_v0  ;;  %v5825_v20 = vld [vmem:[#allocation92_spill] sm:$0xff]  ;;  %v5827_v57 = vld [vmem:[#allocation94_spill] sm:$0xff] }
 0x290   : > { %v931_v19 = vmul.f32 %v4335_v59, %v5820_v38  ;;  %v5824_v47 = vld [vmem:[#allocation45_spill] sm:$0xff]  ;;  %v932_v24 = vmul.f32 %v4335_v59, %v5825_v20  ;;  %v4510_v49 = vpop.permute.xlu1 %2099  ;;  %v4512_v38 = vpop.permute.xlu0 %2094  ;;  %v4515_v2 = vadd.f32 %v927_v21, %v4306_v23  ;;  %v4518_v26 = vadd.f32 %v926_v44, %v4308_v60  ;;  %v5828_v0 = vld [vmem:[#allocation95_spill] sm:$0xff]  ;;  %v5829_v42 = vld [vmem:[#allocation96_spill] sm:$0xff] }
 0x291   : > { %v4504_v45 = vadd.f32 %v690_v48, %v5824_v47  ;;  %v5826_v50 = vld [vmem:[#allocation93_spill] sm:$0xff]  ;;  %v934_v48 = vmul.f32 %v4335_v59, %v5827_v57  ;;  %v937_v47 = vmul.f32 %v4335_v59, %v5828_v0  ;;  %v4525_v20 = vadd.f32 %v929_v61, %v4314_v18  ;;  %v5831_v18 = vld [vmem:[#allocation98_spill] sm:$0xff] }
 0x292   : > { %v935_v7 = vmul.f32 %v4335_v59, %v5826_v50  ;;  %v4528_v50 = vadd.f32 %v928_v14, %v4317_v3  ;;  %v936_v41 = vmul.f32 %v4335_v59, %v5829_v42  ;;  %v5830_v23 = vld [vmem:[#allocation97_spill] sm:$0xff]  ;;  %v4535_v60 = vadd.f32 %v931_v19, %v4319_v1  ;;  %v5832_v14 = vld [vmem:[#allocation99_spill] sm:$0xff]  ;;  %v5833_v1 = vld [vmem:[#allocation100_spill] sm:$0xff] }
 0x293   : > { %v939_v21 = vmul.f32 %v4335_v59, %v5830_v23  ;;  %v4538_v44 = vadd.f32 %v930_v39, %v4328_v5  ;;  %v4541_v57 = vadd.f32 %v933_v17, %v4331_v6  ;;  %v938_v61 = vmul.f32 %v4335_v59, %v5831_v18 }
 0x294   : > { %v4546_v3 = vadd.f32 %v932_v24, %v4338_v46  ;;  %v4549_v42 = vadd.f32 %v935_v7, %v4341_v28  ;;  %v941_v0 = vmul.f32 %v4335_v59, %v5832_v14  ;;  %v940_v19 = vmul.f32 %v4335_v59, %v5833_v1  ;;  %v4555_v5 = vpop.permute.xlu1 %2109  ;;  %v4557_v39 = vpop.permute.xlu0 %2104  ;;  %v5834_v46 = vld [vmem:[#allocation101_spill] sm:$0xff]  ;;  %v5835_v24 = vld [vmem:[#allocation102_spill] sm:$0xff]  ;;  %v5836_v14 = vld [vmem:[#allocation103_spill] sm:$0xff] }
 0x295   : > { %v4560_v6 = vadd.f32 %v934_v48, %v4350_v22  ;;  %v4563_v17 = vadd.f32 %v937_v47, %v4353_v37  ;;  %v943_v28 = vmul.f32 %v4335_v59, %v5834_v46  ;;  %v942_v7 = vmul.f32 %v4335_v59, %v5835_v24  ;;  %v5837_v22 = vld [vmem:[#allocation104_spill] sm:$0xff]  ;;  %v5838_v47 = vld [vmem:[#allocation105_spill] sm:$0xff] }
 0x296   : > { %v4570_v23 = vadd.f32 %v936_v41, %v4378_v9  ;;  %v4573_v18 = vadd.f32 %v939_v21, %v4385_v11  ;;  %v945_v1 = vmul.f32 %v4335_v59, %v5836_v14  ;;  %v944_v48 = vmul.f32 %v4335_v59, %v5837_v22  ;;  %v5840_v9 = vld [vmem:[#allocation107_spill] sm:$0xff]  ;;  %v5841_v14 = vld [vmem:[#allocation108_spill] sm:$0xff] }
 0x297   : > { %v4580_v37 = vadd.f32 %v938_v61, %v4394_v25  ;;  %v947_v46 = vmul.f32 %v4335_v59, %v5838_v47  ;;  %v946_v24 = vmul.f32 %v4335_v59, %v5839_v13  ;;  %v949_v41 = vmul.f32 %v4335_v59, %v5840_v9  ;;  %v5842_v25 = vld [vmem:[#allocation109_spill] sm:$0xff] }
 0x298   : > { %v4589_v11 = vadd.f32 %v941_v0, %v4397_v12  ;;  %v4592_v21 = vadd.f32 %v940_v19, %v4406_v63  ;;  %v948_v22 = vmul.f32 %v4335_v59, %v5841_v14  ;;  %v951_v61 = vmul.f32 %v4335_v59, %v5842_v25  ;;  %v4598_v34 = vpop.permute.xlu1 %2119  ;;  %v4600_v47 = vpop.permute.xlu0 %2114  ;;  %v5843_v12 = vld [vmem:[#allocation110_spill] sm:$0xff]  ;;  %v5844_v0 = vld [vmem:[#allocation8_spill] sm:$0xff] }
 0x299   : > { %v4603_v13 = vadd.f32 %v943_v28, %v4413_v53  ;;  %v4606_v9 = vadd.f32 %v942_v7, %v4422_v36  ;;  %v950_v63 = vmul.f32 %v4335_v59, %v5843_v12  ;;  %v953_v19 = vmul.f32 %v4335_v59, %v5844_v0  ;;  %v5846_v53 = vld [vmem:[#allocation9_spill] sm:$0xff] }
 0x29a   : > { %v4613_v14 = vadd.f32 %v945_v1, %v4439_v33  ;;  %v4616_v25 = vadd.f32 %v944_v48, %v4442_v51  ;;  %v952_v30 = vmul.f32 %v4335_v59, %v5845_v32  ;;  %v955_v28 = vmul.f32 %v4335_v59, %v5846_v53  ;;  %v5847_v33 = vld [vmem:[#allocation10_spill] sm:$0xff]  ;;  %v5848_v48 = vld [vmem:[#allocation11_spill] sm:$0xff] }
 0x29b   : > { %v4623_v36 = vadd.f32 %v947_v46, %v4449_v27  ;;  %v4626_v7 = vadd.f32 %v946_v24, %v4458_v58  ;;  %v4629_v12 = vadd.f32 %v949_v41, %v4461_v31  ;;  %v954_v1 = vmul.f32 %v4335_v59, %v5847_v33  ;;  %v5849_v27 = vld [vmem:[#allocation12_spill] sm:$0xff]  ;;  %v5852_v33 = vld [vmem:[#allocation19_spill] sm:$0xff] }
 0x29c   : > { %v4634_v51 = vadd.f32 %v948_v22, %v4472_v55  ;;  %v4637_v32 = vadd.f32 %v951_v61, %v4475_v10  ;;  %v1192_v0 = vmul.f32 %v4359_v43, %v5848_v48  ;;  %v1191_v46 = vmul.f32 %v4359_v43, %v5849_v27  ;;  %v4643_v58 = vpop.permute.xlu1 %2129  ;;  %v4645_v24 = vpop.permute.xlu0 %2124  ;;  %v5850_v55 = vld [vmem:[#allocation15_spill] sm:$0xff]  ;;  %v5851_v41 = vld [vmem:[#allocation16_spill] sm:$0xff] }
 0x29d   : > { %v4648_v31 = vadd.f32 %v950_v63, %v4482_v62  ;;  %v4651_v59 = vadd.f32 %v953_v19, %v4485_v15  ;;  %v1194_v10 = vmul.f32 %v4359_v43, %v5850_v55  ;;  %v1193_v22 = vmul.f32 %v4359_v43, %v5851_v41  ;;  %v5853_v62 = vld [vmem:[#allocation20_spill] sm:$0xff]  ;;  %v5854_v19 = vld [vmem:[#allocation23_spill] sm:$0xff] }
 0x29e   : > { %v4658_v61 = vadd.f32 %v952_v30, %v4492_v40  ;;  %v4661_v53 = vadd.f32 %v955_v28, %v4501_v16  ;;  %v1196_v48 = vmul.f32 %v4359_v43, %v5852_v33  ;;  %v1195_v63 = vmul.f32 %v4359_v43, %v5853_v62  ;;  %v5855_v55 = vld [vmem:[#allocation24_spill] sm:$0xff]  ;;  %v5856_v30 = vld [vmem:[#allocation27_spill] sm:$0xff] }
 0x29f   : > { %v4668_v15 = vadd.f32 %v954_v1, %v4504_v45  ;;  %v1198_v27 = vmul.f32 %v4359_v43, %v5854_v19  ;;  %v1197_v41 = vmul.f32 %v4359_v43, %v5855_v55  ;;  %v1200_v40 = vmul.f32 %v4359_v43, %v5856_v30  ;;  %v5857_v33 = vld [vmem:[#allocation28_spill] sm:$0xff]  ;;  %v5858_v45 = vld [vmem:[#allocation31_spill] sm:$0xff] }
 0x2a0   : > { %v4677_v16 = vadd.f32 %v1192_v0, %v4515_v2  ;;  %v4680_v28 = vadd.f32 %v1191_v46, %v4518_v26  ;;  %v1199_v62 = vmul.f32 %v4359_v43, %v5857_v33  ;;  %v1202_v1 = vmul.f32 %v4359_v43, %v5858_v45  ;;  %v4686_v52 = vpop.permute.xlu1 %2139  ;;  %v4688_v19 = vpop.permute.xlu0 %2134  ;;  %v5860_v2 = vld [vmem:[#allocation32_spill] sm:$0xff]  ;;  %v5861_v0 = vld [vmem:[#allocation35_spill] sm:$0xff] }
 0x2a1   : > { %5859 = vst [vmem:[#allocation62_spill] sm:$0xff] %v4688_v19  ;;  %v4691_v55 = vadd.f32 %v1194_v10, %v4525_v20  ;;  %v4694_v30 = vadd.f32 %v1193_v22, %v4528_v50  ;;  %v1201_v26 = vmul.f32 %v4359_v43, %v5860_v2  ;;  %v1204_v46 = vmul.f32 %v4359_v43, %v5861_v0  ;;  %v5863_v20 = vld [vmem:[#allocation39_spill] sm:$0xff] }
 0x2a2   : > { %v4701_v33 = vadd.f32 %v1196_v48, %v4535_v60  ;;  %v4704_v45 = vadd.f32 %v1195_v63, %v4538_v44  ;;  %v1203_v19 = vmul.f32 %v4359_v43, %v5862_v56  ;;  %v1206_v10 = vmul.f32 %v4359_v43, %v5863_v20  ;;  %v5864_v60 = vld [vmem:[#allocation40_spill] sm:$0xff]  ;;  %v5865_v63 = vld [vmem:[#allocation43_spill] sm:$0xff] }
 0x2a3   : > { %v4711_v50 = vadd.f32 %v1198_v27, %v4541_v57  ;;  %v4714_v22 = vadd.f32 %v1197_v41, %v4546_v3  ;;  %v4717_v2 = vadd.f32 %v1200_v40, %v4549_v42  ;;  %v1205_v48 = vmul.f32 %v4359_v43, %v5864_v60  ;;  %v5866_v57 = vld [vmem:[#allocation44_spill] sm:$0xff] }
 0x2a4   : > { %v4722_v44 = vadd.f32 %v1199_v62, %v4560_v6  ;;  %v4725_v56 = vadd.f32 %v1202_v1, %v4563_v17  ;;  %v1208_v0 = vmul.f32 %v4359_v43, %v5865_v63  ;;  %v1207_v27 = vmul.f32 %v4359_v43, %v5866_v57  ;;  %v4731_v3 = vpop.permute.xlu1 %2149  ;;  %v4733_v41 = vpop.permute.xlu0 %2144  ;;  %v5869_v6 = vld [vmem:[#allocation47_spill] sm:$0xff]  ;;  %v5870_v62 = vld [vmem:[#allocation48_spill] sm:$0xff] }
 0x2a5   : > { %5867 = vst [vmem:[#allocation65_spill] sm:$0xff] %v4731_v3  ;;  %5868 = vst [vmem:[#allocation66_spill] sm:$0xff] %v4733_v41  ;;  %v4736_v42 = vadd.f32 %v1201_v26, %v4570_v23  ;;  %v4739_v40 = vadd.f32 %v1204_v46, %v4573_v18  ;;  %v1210_v17 = vmul.f32 %v4359_v43, %v5869_v6  ;;  %v5871_v63 = vld [vmem:[#allocation51_spill] sm:$0xff]  ;;  %v5872_v23 = vld [vmem:[#allocation52_spill] sm:$0xff] }
 0x2a6   : > { %v1209_v1 = vmul.f32 %v4359_v43, %v5870_v62  ;;  %v4746_v20 = vadd.f32 %v1203_v19, %v4580_v37  ;;  %v4749_v60 = vadd.f32 %v1206_v10, %v4589_v11  ;;  %v1212_v57 = vmul.f32 %v4359_v43, %v5871_v63  ;;  %v5873_v46 = vld [vmem:[#allocation55_spill] sm:$0xff]  ;;  %v5874_v41 = vld [vmem:[#allocation56_spill] sm:$0xff] }
 0x2a7   : > { %v1211_v26 = vmul.f32 %v4359_v43, %v5872_v23  ;;  %v4756_v18 = vadd.f32 %v1205_v48, %v4592_v21  ;;  %v1214_v6 = vmul.f32 %v4359_v43, %v5873_v46  ;;  %v1213_v62 = vmul.f32 %v4359_v43, %v5874_v41  ;;  %v5875_v37 = vld [vmem:[#allocation59_spill] sm:$0xff]  ;;  %v5876_v63 = vld [vmem:[#allocation60_spill] sm:$0xff] }
 0x2a8   : > { %v1216_v19 = vmul.f32 %v4359_v43, %v5875_v37  ;;  %v4765_v11 = vadd.f32 %v1208_v0, %v4603_v13  ;;  %v4768_v10 = vadd.f32 %v1207_v27, %v4606_v9  ;;  %v1215_v23 = vmul.f32 %v4359_v43, %v5876_v63  ;;  %v5877_v21 = vld [vmem:[#allocation63_spill] sm:$0xff]  ;;  %v4774_v3 = vpop.permute.xlu1 %2159  ;;  %v4776_v46 = vpop.permute.xlu0 %2154  ;;  %v5880_v13 = vld [vmem:[#allocation64_spill] sm:$0xff] }
 0x2a9   : > { %v1218_v48 = vmul.f32 %v4359_v43, %v5877_v21  ;;  %5878 = vst [vmem:[#allocation72_spill] sm:$0xff] %v4774_v3  ;;  %5879 = vst [vmem:[#allocation68_spill] sm:$0xff] %v4776_v46  ;;  %v4779_v41 = vadd.f32 %v1210_v17, %v4613_v14  ;;  %v4782_v37 = vadd.f32 %v1209_v1, %v4616_v25  ;;  %v5881_v0 = vld [vmem:[#allocation67_spill] sm:$0xff]  ;;  %v5882_v3 = vld [vmem:[#allocation112_spill] sm:$0xff] }
 0x2aa   : > { %v1217_v9 = vmul.f32 %v4359_v43, %v5880_v13  ;;  %v1220_v27 = vmul.f32 %v4359_v43, %v5881_v0  ;;  %v4789_v63 = vadd.f32 %v1212_v57, %v4623_v36  ;;  %v4792_v21 = vadd.f32 %v1211_v26, %v4626_v7  ;;  %v5883_v14 = vld [vmem:[#allocation113_spill] sm:$0xff]  ;;  %v5884_v36 = vld [vmem:[#allocation114_spill] sm:$0xff] }
 0x2ab   : > { %v1219_v46 = vmul.f32 %v4359_v43, %v5882_v3  ;;  %v1456_v17 = vmul.f32 %v4375_v29, %v5883_v14  ;;  %v4799_v25 = vadd.f32 %v1214_v6, %v4629_v12  ;;  %v4802_v1 = vadd.f32 %v1213_v62, %v4634_v51  ;;  %v5885_v3 = vld [vmem:[#allocation115_spill] sm:$0xff]  ;;  %v5886_v12 = vld [vmem:[#allocation116_spill] sm:$0xff] }
 0x2ac   : > { %v4805_v13 = vadd.f32 %v1216_v19, %v4637_v32  ;;  %v1455_v57 = vmul.f32 %v4375_v29, %v5884_v36  ;;  %v4810_v7 = vadd.f32 %v1215_v23, %v4648_v31  ;;  %v4813_v43 = vadd.f32 %v1218_v48, %v4651_v59  ;;  %v4819_v51 = vpop.permute.xlu1 %2169  ;;  %v4821_v62 = vpop.permute.xlu0 %2164  ;;  %v5888_v31 = vld [vmem:[#allocation117_spill] sm:$0xff]  ;;  %v5889_v23 = vld [vmem:[#allocation118_spill] sm:$0xff]  ;;  %v5890_v36 = vld [vmem:[#allocation119_spill] sm:$0xff] }
 0x2ad   : > { %v1458_v26 = vmul.f32 %v4375_v29, %v5885_v3  ;;  %v1457_v6 = vmul.f32 %v4375_v29, %v5886_v12  ;;  %5887 = vst [vmem:[#allocation69_spill] sm:$0xff] %v4821_v62  ;;  %v4824_v32 = vadd.f32 %v1217_v9, %v4658_v61  ;;  %v4827_v19 = vadd.f32 %v1220_v27, %v4661_v53  ;;  %v5891_v61 = vld [vmem:[#allocation120_spill] sm:$0xff]  ;;  %v5892_v27 = vld [vmem:[#allocation121_spill] sm:$0xff] }
 0x2ae   : > { %v1460_v59 = vmul.f32 %v4375_v29, %v5888_v31  ;;  %v1459_v48 = vmul.f32 %v4375_v29, %v5889_v23  ;;  %v4834_v0 = vadd.f32 %v1219_v46, %v4668_v15  ;;  %v4837_v14 = vadd.f32 %v1456_v17, %v4677_v16  ;;  %v5893_v31 = vld [vmem:[#allocation122_spill] sm:$0xff]  ;;  %v5894_v15 = vld [vmem:[#allocation123_spill] sm:$0xff] }
 0x2af   : > { %v1462_v3 = vmul.f32 %v4375_v29, %v5890_v36  ;;  %v1461_v9 = vmul.f32 %v4375_v29, %v5891_v61  ;;  %v4844_v53 = vadd.f32 %v1455_v57, %v4680_v28  ;;  %v1464_v12 = vmul.f32 %v4375_v29, %v5892_v27  ;;  %v5895_v36 = vld [vmem:[#allocation124_spill] sm:$0xff]  ;;  %v5896_v28 = vld [vmem:[#allocation125_spill] sm:$0xff] }
 0x2b0   : > { %v1463_v23 = vmul.f32 %v4375_v29, %v5893_v31  ;;  %v1466_v46 = vmul.f32 %v4375_v29, %v5894_v15  ;;  %v4853_v16 = vadd.f32 %v1458_v26, %v4691_v55  ;;  %v4856_v17 = vadd.f32 %v1457_v6, %v4694_v30  ;;  %v4862_v62 = vpop.permute.xlu1 %2179  ;;  %v4864_v27 = vpop.permute.xlu0 %2174  ;;  %v5899_v55 = vld [vmem:[#allocation126_spill] sm:$0xff]  ;;  %v5900_v26 = vld [vmem:[#allocation127_spill] sm:$0xff] }
 0x2b1   : > { %v1465_v61 = vmul.f32 %v4375_v29, %v5895_v36  ;;  %v1468_v57 = vmul.f32 %v4375_v29, %v5896_v28  ;;  %5897 = vst [vmem:[#allocation70_spill] sm:$0xff] %v4862_v62  ;;  %5898 = vst [vmem:[#allocation71_spill] sm:$0xff] %v4864_v27  ;;  %v4867_v31 = vadd.f32 %v1460_v59, %v4701_v33  ;;  %v5901_v62 = vld [vmem:[#allocation128_spill] sm:$0xff]  ;;  %v5902_v33 = vld [vmem:[#allocation129_spill] sm:$0xff] }
 0x2b2   : > { %v4870_v15 = vadd.f32 %v1459_v48, %v4704_v45  ;;  %v1467_v30 = vmul.f32 %v4375_v29, %v5899_v55  ;;  %v1470_v6 = vmul.f32 %v4375_v29, %v5900_v26  ;;  %v4877_v36 = vadd.f32 %v1462_v3, %v4711_v50  ;;  %v5903_v50 = vld [vmem:[#allocation130_spill] sm:$0xff] }
 0x2b3   : > { %v4880_v28 = vadd.f32 %v1461_v9, %v4714_v22  ;;  %v1469_v27 = vmul.f32 %v4375_v29, %v5901_v62  ;;  %v1472_v59 = vmul.f32 %v4375_v29, %v5902_v33  ;;  %v4887_v45 = vadd.f32 %v1464_v12, %v4717_v2  ;;  %v5904_v9 = vld [vmem:[#allocation131_spill] sm:$0xff]  ;;  %v5905_v2 = vld [vmem:[#allocation132_spill] sm:$0xff] }
 0x2b4   : > { %v4890_v48 = vadd.f32 %v1463_v23, %v4722_v44  ;;  %v4893_v55 = vadd.f32 %v1466_v46, %v4725_v56  ;;  %v1471_v3 = vmul.f32 %v4375_v29, %v5903_v50  ;;  %v4898_v22 = vadd.f32 %v1465_v61, %v4736_v42  ;;  %v4907_v44 = vpop.permute.xlu1 %2189  ;;  %v4909_v23 = vpop.permute.xlu0 %2184  ;;  %v5908_v42 = vld [vmem:[#allocation133_spill] sm:$0xff]  ;;  %v5909_v61 = vld [vmem:[#allocation134_spill] sm:$0xff] }
 0x2b5   : > { %v4901_v62 = vadd.f32 %v1468_v57, %v4739_v40  ;;  %v1474_v26 = vmul.f32 %v4375_v29, %v5904_v9  ;;  %v1473_v12 = vmul.f32 %v4375_v29, %v5905_v2  ;;  %5906 = vst [vmem:[#allocation73_spill] sm:$0xff] %v4907_v44  ;;  %5907 = vst [vmem:[#allocation74_spill] sm:$0xff] %v4909_v23  ;;  %v5910_v9 = vld [vmem:[#allocation135_spill] sm:$0xff]  ;;  %v5913_v23 = vld [vmem:[#allocation138_spill] sm:$0xff] }
 0x2b6   : > { %v4912_v56 = vadd.f32 %v1467_v30, %v4746_v20  ;;  %v4915_v46 = vadd.f32 %v1470_v6, %v4749_v60  ;;  %v1476_v40 = vmul.f32 %v4375_v29, %v5908_v42  ;;  %v1475_v57 = vmul.f32 %v4375_v29, %v5909_v61  ;;  %v5911_v20 = vld [vmem:[#allocation136_spill] sm:$0xff]  ;;  %v5912_v6 = vld [vmem:[#allocation137_spill] sm:$0xff] }
 0x2b7   : > { %v4922_v33 = vadd.f32 %v1469_v27, %v4756_v18  ;;  %v4925_v50 = vadd.f32 %v1472_v59, %v4765_v11  ;;  %v1478_v2 = vmul.f32 %v4375_v29, %v5910_v9  ;;  %v1477_v30 = vmul.f32 %v4375_v29, %v5911_v20  ;;  %v5914_v18 = vld [vmem:[#allocation139_spill] sm:$0xff]  ;;  %v5915_v9 = vld [vmem:[#allocation140_spill] sm:$0xff] }
 0x2b8   : > { %v4932_v60 = vadd.f32 %v1471_v3, %v4768_v10  ;;  %v1480_v42 = vmul.f32 %v4375_v29, %v5912_v6  ;;  %v1479_v61 = vmul.f32 %v4375_v29, %v5913_v23  ;;  %v1482_v27 = vmul.f32 %v4375_v29, %v5914_v18  ;;  %v5916_v10 = vld [vmem:[#allocation141_spill] sm:$0xff]  ;;  %v4950_v44 = vpop.permute.xlu1 %2199  ;;  %v4952_v6 = vpop.permute.xlu0 %2194 }
 0x2b9   : > { %v4941_v11 = vadd.f32 %v1474_v26, %v4779_v41  ;;  %v4944_v59 = vadd.f32 %v1473_v12, %v4782_v37  ;;  %v1481_v20 = vmul.f32 %v4375_v29, %v5915_v9  ;;  %v1484_v3 = vmul.f32 %v4375_v29, %v5916_v10  ;;  %5917 = vst [vmem:[#allocation17_spill] sm:$0xff] %v4950_v44  ;;  %v5919_v41 = vld [vmem:[#allocation142_spill] sm:$0xff]  ;;  %v5920_v26 = vld [vmem:[#allocation143_spill] sm:$0xff]  ;;  %v5921_v44 = vld [vmem:[#allocation144_spill] sm:$0xff] }
 0x2ba   : > { %5918 = vst [vmem:[#allocation75_spill] sm:$0xff] %v4952_v6  ;;  %v4955_v23 = vadd.f32 %v1476_v40, %v4789_v63  ;;  %v4958_v18 = vadd.f32 %v1475_v57, %v4792_v21  ;;  %v1483_v37 = vmul.f32 %v4375_v29, %v5919_v41  ;;  %v1720_v12 = vmul.f32 %v4391_v4, %v5920_v26  ;;  %v5922_v63 = vld [vmem:[#allocation145_spill] sm:$0xff] }
 0x2bb   : > { %v4965_v9 = vadd.f32 %v1478_v2, %v4799_v25  ;;  %v4968_v10 = vadd.f32 %v1477_v30, %v4802_v1  ;;  %v1719_v6 = vmul.f32 %v4391_v4, %v5921_v44  ;;  %v1722_v40 = vmul.f32 %v4391_v4, %v5922_v63  ;;  %v5923_v25 = vld [vmem:[#allocation146_spill] sm:$0xff]  ;;  %v5924_v30 = vld [vmem:[#allocation147_spill] sm:$0xff] }
 0x2bc   : > { %v4975_v21 = vadd.f32 %v1480_v42, %v4805_v13  ;;  %v4978_v29 = vadd.f32 %v1479_v61, %v4810_v7  ;;  %v4981_v57 = vadd.f32 %v1482_v27, %v4813_v43  ;;  %v1721_v2 = vmul.f32 %v4391_v4, %v5923_v25  ;;  %v5925_v13 = vld [vmem:[#allocation148_spill] sm:$0xff]  ;;  %v4995_v7 = vpop.permute.xlu1 %2209  ;;  %v4997_v61 = vpop.permute.xlu0 %2204  ;;  %v5930_v25 = vld [vmem:[#allocation151_spill] sm:$0xff] }
 0x2bd   : > { %v4986_v1 = vadd.f32 %v1481_v20, %v4824_v32  ;;  %v4989_v44 = vadd.f32 %v1484_v3, %v4827_v19  ;;  %v1724_v41 = vmul.f32 %v4391_v4, %v5924_v30  ;;  %v1723_v42 = vmul.f32 %v4391_v4, %v5925_v13  ;;  %5926 = vst [vmem:[#allocation76_spill] sm:$0xff] %v4995_v7  ;;  %v5928_v32 = vld [vmem:[#allocation149_spill] sm:$0xff]  ;;  %v5929_v20 = vld [vmem:[#allocation150_spill] sm:$0xff] }
 0x2be   : > { %5927 = vst [vmem:[#allocation77_spill] sm:$0xff] %v4997_v61  ;;  %v5000_v43 = vadd.f32 %v1483_v37, %v4834_v0  ;;  %v5003_v27 = vadd.f32 %v1720_v12, %v4837_v14  ;;  %v1726_v19 = vmul.f32 %v4391_v4, %v5928_v32  ;;  %v1725_v3 = vmul.f32 %v4391_v4, %v5929_v20  ;;  %v5931_v0 = vld [vmem:[#allocation152_spill] sm:$0xff]  ;;  %v5932_v12 = vld [vmem:[#allocation153_spill] sm:$0xff]  ;;  %v5933_v32 = vld [vmem:[#allocation154_spill] sm:$0xff] }
 0x2bf   : > { %v5010_v26 = vadd.f32 %v1719_v6, %v4844_v53  ;;  %v5013_v63 = vadd.f32 %v1722_v40, %v4853_v16  ;;  %v1728_v30 = vmul.f32 %v4391_v4, %v5930_v25  ;;  %v1727_v37 = vmul.f32 %v4391_v4, %v5931_v0  ;;  %v5934_v53 = vld [vmem:[#allocation155_spill] sm:$0xff]  ;;  %v5935_v25 = vld [vmem:[#allocation156_spill] sm:$0xff] }
 0x2c0   : > { %v5020_v14 = vadd.f32 %v1721_v2, %v4856_v17  ;;  %v1730_v13 = vmul.f32 %v4391_v4, %v5932_v12  ;;  %v1729_v20 = vmul.f32 %v4391_v4, %v5933_v32  ;;  %v1732_v6 = vmul.f32 %v4391_v4, %v5934_v53  ;;  %v5936_v17 = vld [vmem:[#allocation157_spill] sm:$0xff]  ;;  %v5038_v61 = vpop.permute.xlu1 %2219  ;;  %v5040_v12 = vpop.permute.xlu0 %2214 }
 0x2c1   : > { %v5029_v16 = vadd.f32 %v1724_v41, %v4867_v31  ;;  %v5032_v40 = vadd.f32 %v1723_v42, %v4870_v15  ;;  %v1731_v0 = vmul.f32 %v4391_v4, %v5935_v25  ;;  %v1734_v2 = vmul.f32 %v4391_v4, %v5936_v17  ;;  %5937 = vst [vmem:[#allocation78_spill] sm:$0xff] %v5038_v61  ;;  %v5939_v31 = vld [vmem:[#allocation158_spill] sm:$0xff]  ;;  %v5940_v41 = vld [vmem:[#allocation159_spill] sm:$0xff]  ;;  %v5941_v61 = vld [vmem:[#allocation160_spill] sm:$0xff] }
 0x2c2   : > { %5938 = vst [vmem:[#allocation79_spill] sm:$0xff] %v5040_v12  ;;  %v5043_v32 = vadd.f32 %v1726_v19, %v4877_v36  ;;  %v5046_v53 = vadd.f32 %v1725_v3, %v4880_v28  ;;  %v1733_v15 = vmul.f32 %v4391_v4, %v5939_v31  ;;  %v1736_v42 = vmul.f32 %v4391_v4, %v5940_v41  ;;  %v5942_v36 = vld [vmem:[#allocation161_spill] sm:$0xff] }
 0x2c3   : > { %v5053_v25 = vadd.f32 %v1728_v30, %v4887_v45  ;;  %v5056_v17 = vadd.f32 %v1727_v37, %v4890_v48  ;;  %v1735_v12 = vmul.f32 %v4391_v4, %v5941_v61  ;;  %v1738_v19 = vmul.f32 %v4391_v4, %v5942_v36  ;;  %v5943_v45 = vld [vmem:[#allocation162_spill] sm:$0xff]  ;;  %v5944_v37 = vld [vmem:[#allocation163_spill] sm:$0xff] }
 0x2c4   : > { %v5063_v28 = vadd.f32 %v1730_v13, %v4893_v55  ;;  %v5066_v3 = vadd.f32 %v1729_v20, %v4898_v22  ;;  %v5069_v31 = vadd.f32 %v1732_v6, %v4901_v62  ;;  %v1737_v30 = vmul.f32 %v4391_v4, %v5943_v45  ;;  %v5945_v55 = vld [vmem:[#allocation164_spill] sm:$0xff]  ;;  %v5083_v22 = vpop.permute.xlu1 %2229  ;;  %v5085_v20 = vpop.permute.xlu0 %2224 }
 0x2c5   : > { %v5074_v48 = vadd.f32 %v1731_v0, %v4912_v56  ;;  %v5077_v61 = vadd.f32 %v1734_v2, %v4915_v46  ;;  %v1740_v41 = vmul.f32 %v4391_v4, %v5944_v37  ;;  %v1739_v13 = vmul.f32 %v4391_v4, %v5945_v55  ;;  %5946 = vst [vmem:[#allocation18_spill] sm:$0xff] %v5083_v22  ;;  %v5948_v56 = vld [vmem:[#allocation165_spill] sm:$0xff]  ;;  %v5949_v0 = vld [vmem:[#allocation166_spill] sm:$0xff]  ;;  %v5950_v37 = vld [vmem:[#allocation167_spill] sm:$0xff] }
 0x2c6   : > { %5947 = vst [vmem:[#allocation25_spill] sm:$0xff] %v5085_v20  ;;  %v5088_v62 = vadd.f32 %v1733_v15, %v4922_v33  ;;  %v5091_v6 = vadd.f32 %v1736_v42, %v4925_v50  ;;  %v1742_v46 = vmul.f32 %v4391_v4, %v5948_v56  ;;  %v1741_v2 = vmul.f32 %v4391_v4, %v5949_v0  ;;  %v5951_v33 = vld [vmem:[#allocation168_spill] sm:$0xff]  ;;  %v5107_v50 = vld [vmem:[#allocation2 + $0x7] ss:$0 sm:$0xff]  ;;  %v5952_v56 = vld [vmem:[#allocation169_spill] sm:$0xff] }
 0x2c7   : > { %v5098_v36 = vadd.f32 %v1735_v12, %v4932_v60  ;;  %v5101_v45 = vadd.f32 %v1738_v19, %v4941_v11  ;;  %v1744_v55 = vmul.f32 %v4391_v4, %v5950_v37  ;;  %v1743_v15 = vmul.f32 %v4391_v4, %v5951_v33  ;;  %v5953_v20 = vld [vmem:[#allocation173_spill] sm:$0xff]  ;;  %v5954_v12 = vld [vmem:[#allocation174_spill] sm:$0xff] }
 0x2c8   : > { %v5110_v42 = vadd.f32 %v1737_v30, %v4944_v59  ;;  %v1746_v0 = vmul.f32 %v4391_v4, %v5952_v56  ;;  %v1985_v60 = vmul.f32 %v4434_v8, %v5953_v20  ;;  %v1984_v11 = vmul.f32 %v4434_v8, %v5954_v12  ;;  %v5955_v33 = vld [vmem:[#allocation170_spill] sm:$0xff]  ;;  %v5956_v59 = vld [vmem:[#allocation171_spill] sm:$0xff]  ;;  %v5128_v7 = vpop.permute.xlu1 %2239  ;;  %v5130_v56 = vpop.permute.xlu0 %2234 }
 0x2c9   : > { %v5119_v19 = vadd.f32 %v1740_v41, %v4955_v23  ;;  %v5122_v37 = vadd.f32 %v1739_v13, %v4958_v18  ;;  %v1745_v22 = vmul.f32 %v4391_v4, %v5955_v33  ;;  %v1748_v30 = vmul.f32 %v4391_v4, %v5956_v59  ;;  %v5957_v33 = vld [vmem:[#allocation175_spill] sm:$0xff] }
 0x2ca   : > { %v5133_v20 = vadd.f32 %v1742_v46, %v4965_v9  ;;  %v5136_v12 = vadd.f32 %v1741_v2, %v4968_v10  ;;  %v2249_v23 = vmul.f32 %v5107_v50, %v4467_v35  ;;  %v2248_v18 = vmul.f32 %v5107_v50, %v4469_v54  ;;  %v5958_v9 = vld [vmem:[#allocation176_spill] sm:$0xff]  ;;  %v5152_v10 = vld [vmem:[#allocation2 + $0x8] ss:$0 sm:$0xff] }
 0x2cb   : > { %v5143_v41 = vadd.f32 %v1744_v55, %v4975_v21  ;;  %v5146_v13 = vadd.f32 %v1743_v15, %v4978_v29  ;;  %v1987_v59 = vmul.f32 %v4434_v8, %v5957_v33  ;;  %v1986_v46 = vmul.f32 %v4434_v8, %v5958_v9  ;;  %v5959_v35 = vld [vmem:[#allocation172_spill] sm:$0xff] }
 0x2cc   : > { %v5155_v2 = vadd.f32 %v1746_v0, %v4981_v57  ;;  %v1747_v54 = vmul.f32 %v4391_v4, %v5959_v35  ;;  %v2017_v21 = vadd.f32 %v1985_v60, %v5003_v27  ;;  %v2016_v55 = vadd.f32 %v1984_v11, %v5010_v26  ;;  %v2354_v0 = vpop.permute.xlu1 %2353  ;;  %v2349_v9 = vpop.permute.xlu0 %2348  ;;  %v5961_v11 = vld [vmem:[#allocation178_spill] sm:$0xff] }
 0x2cd   : > { %v5162_v29 = vadd.f32 %v1745_v22, %v4986_v1  ;;  %v5165_v15 = vadd.f32 %v1748_v30, %v4989_v44  ;;  %v2251_v33 = vmul.f32 %v5107_v50, %v4510_v49  ;;  %v2250_v57 = vmul.f32 %v5107_v50, %v4512_v38  ;;  %v5960_v44 = vld [vmem:[#allocation177_spill] sm:$0xff]  ;;  %v5179_v30 = vld [vmem:[#allocation4] ss:$0 sm:$0xff] }
 0x2ce   : > { %v2281_v4 = vadd.f32 %v2249_v23, %v2017_v21  ;;  %v2280_v35 = vadd.f32 %v2248_v18, %v2016_v55  ;;  %v2513_v27 = vmul.f32 %v5152_v10, %v2354_v0  ;;  %v2512_v26 = vmul.f32 %v5152_v10, %v2349_v9 }
 0x2cf   : > { %v2019_v1 = vadd.f32 %v1987_v59, %v5013_v63  ;;  %v2018_v22 = vadd.f32 %v1986_v46, %v5020_v14  ;;  %v1989_v60 = vmul.f32 %v4434_v8, %v5960_v44  ;;  %v1988_v49 = vmul.f32 %v4434_v8, %v5961_v11 }
 0x2d0   : > { %v5182_v38 = vadd.f32 %v1747_v54, %v5000_v43  ;;  %v2545_v23 = vadd.f32 %v2513_v27, %v2281_v4  ;;  %v2544_v18 = vadd.f32 %v2512_v26, %v2280_v35  ;;  %v2253_v63 = vmul.f32 %v5107_v50, %v4555_v5  ;;  %v2364_v59 = vpop.permute.xlu1 %2363  ;;  %v2359_v46 = vpop.permute.xlu0 %2358  ;;  %v5963_v35 = vld [vmem:[#allocation180_spill] sm:$0xff] }
 0x2d1   : > { %v2283_v21 = vadd.f32 %v2251_v33, %v2019_v1  ;;  %v2282_v55 = vadd.f32 %v2250_v57, %v2018_v22  ;;  %v2252_v14 = vmul.f32 %v5107_v50, %v4557_v39  ;;  %v2515_v43 = vmul.f32 %v5152_v10, %v2364_v59  ;;  %v5962_v57 = vld [vmem:[#allocation179_spill] sm:$0xff]  ;;  %v5965_v59 = vld [vmem:[#allocation182_spill] sm:$0xff] }
 0x2d2   : > { %v2584_v0 = vadd.f32 %v5179_v30, %v2545_v23  ;;  %v2583_v9 = vadd.f32 %v5179_v30, %v2544_v18  ;;  %v2514_v54 = vmul.f32 %v5152_v10, %v2359_v46  ;;  %v2021_v4 = vadd.f32 %v1989_v60, %v5029_v16 }
 0x2d3   : > { %v2020_v33 = vadd.f32 %v1988_v49, %v5032_v40  ;;  %v1991_v5 = vmul.f32 %v4434_v8, %v5962_v57  ;;  %v1990_v39 = vmul.f32 %v4434_v8, %v5963_v35  ;;  %v2547_v1 = vadd.f32 %v2515_v43, %v2283_v21 }
 0x2d4   : > { %v2616_v27 = vmax.f32 %v2584_v0, 0.0  ;;  %v2615_v26 = vmax.f32 %v2583_v9, 0.0  ;;  %v2546_v22 = vadd.f32 %v2514_v54, %v2282_v55  ;;  %v2285_v16 = vadd.f32 %v2253_v63, %v2021_v4  ;;  %v2374_v11 = vpop.permute.xlu1 %2373  ;;  %v2369_v49 = vpop.permute.xlu0 %2368  ;;  %v5964_v63 = vld [vmem:[#allocation181_spill] sm:$0xff] }
 0x2d5   : > { %v2284_v44 = vadd.f32 %v2252_v14, %v2020_v33  ;;  %v2255_v40 = vmul.f32 %v5107_v50, %v4598_v34  ;;  %v2254_v60 = vmul.f32 %v5107_v50, %v4600_v47  ;;  %v2586_v23 = vadd.f32 %v5179_v30, %v2547_v1  ;;  %v5966_v1 = vld [vmem:[#allocation183_spill] sm:$0xff] }
 0x2d6   : > { %2649 = vst.msk [vmem:[%s5202_s25 + $0x8] sm:$0xff] %vm2647_vm0, %v2616_v27  ;;  %2648 = vst.msk [vmem:[%s5202_s25] sm:$0xff] %vm2647_vm0, %v2615_v26  ;;  %v2585_v18 = vadd.f32 %v5179_v30, %v2546_v22  ;;  %v2517_v21 = vmul.f32 %v5152_v10, %v2374_v11  ;;  %v2516_v55 = vmul.f32 %v5152_v10, %v2369_v49 }
 0x2d7   : > { %v2023_v34 = vadd.f32 %v1991_v5, %v5043_v32  ;;  %v2022_v47 = vadd.f32 %v1990_v39, %v5046_v53  ;;  %v1993_v14 = vmul.f32 %v4434_v8, %v5964_v63  ;;  %v1992_v46 = vmul.f32 %v4434_v8, %v5965_v59 }
 0x2d8   : > { %v2618_v0 = vmax.f32 %v2586_v23, 0.0  ;;  %v2617_v9 = vmax.f32 %v2585_v18, 0.0  ;;  %v2549_v43 = vadd.f32 %v2517_v21, %v2285_v16  ;;  %v2548_v54 = vadd.f32 %v2516_v55, %v2284_v44  ;;  %v2384_v5 = vpop.permute.xlu1 %2383  ;;  %v2379_v53 = vpop.permute.xlu0 %2378  ;;  %v5967_v16 = vld [vmem:[#allocation184_spill] sm:$0xff]  ;;  %v5968_v55 = vld [vmem:[#allocation62_spill] sm:$0xff] }
 0x2d9   : > { %v2287_v4 = vadd.f32 %v2255_v40, %v2023_v34  ;;  %v2286_v33 = vadd.f32 %v2254_v60, %v2022_v47  ;;  %v2257_v57 = vmul.f32 %v5107_v50, %v4643_v58  ;;  %v2256_v32 = vmul.f32 %v5107_v50, %v4645_v24 }
 0x2da   : > { %2651 = vst.msk [vmem:[%s5202_s25 + $0x18] sm:$0xff] %vm2647_vm0, %v2618_v0  ;;  %2650 = vst.msk [vmem:[%s5202_s25 + $0x10] sm:$0xff] %vm2647_vm0, %v2617_v9  ;;  %v2588_v35 = vadd.f32 %v5179_v30, %v2549_v43  ;;  %v2587_v39 = vadd.f32 %v5179_v30, %v2548_v54  ;;  %v2519_v27 = vmul.f32 %v5152_v10, %v2384_v5  ;;  %v5969_v0 = vld [vmem:[#allocation185_spill] sm:$0xff]  ;;  %v5970_v43 = vld [vmem:[#allocation186_spill] sm:$0xff] }
 0x2db   : > { %v2518_v26 = vmul.f32 %v5152_v10, %v2379_v53  ;;  %v2025_v58 = vadd.f32 %v1993_v14, %v5053_v25  ;;  %v2024_v24 = vadd.f32 %v1992_v46, %v5056_v17  ;;  %v1995_v22 = vmul.f32 %v4434_v8, %v5966_v1 }
 0x2dc   : > { %v1994_v44 = vmul.f32 %v4434_v8, %v5967_v16  ;;  %v2620_v40 = vmax.f32 %v2588_v35, 0.0  ;;  %v2619_v60 = vmax.f32 %v2587_v39, 0.0  ;;  %v2551_v11 = vadd.f32 %v2519_v27, %v2287_v4  ;;  %v2394_v34 = vpop.permute.xlu1 %2393  ;;  %v2389_v17 = vpop.permute.xlu0 %2388  ;;  %v5971_v35 = vld [vmem:[#allocation65_spill] sm:$0xff]  ;;  %v5972_v27 = vld [vmem:[#allocation66_spill] sm:$0xff] }
 0x2dd   : > { %v2550_v49 = vadd.f32 %v2518_v26, %v2286_v33  ;;  %v2289_v23 = vadd.f32 %v2257_v57, %v2025_v58  ;;  %v2288_v18 = vadd.f32 %v2256_v32, %v2024_v24  ;;  %v2259_v21 = vmul.f32 %v5107_v50, %v4686_v52 }
 0x2de   : > { %v2258_v25 = vmul.f32 %v5107_v50, %v5968_v55  ;;  %2653 = vst.msk [vmem:[%s5202_s25 + $0x28] sm:$0xff] %vm2647_vm0, %v2620_v40  ;;  %2652 = vst.msk [vmem:[%s5202_s25 + $0x20] sm:$0xff] %vm2647_vm0, %v2619_v60  ;;  %v2590_v47 = vadd.f32 %v5179_v30, %v2551_v11  ;;  %v2521_v14 = vmul.f32 %v5152_v10, %v2394_v34  ;;  %v5973_v40 = vld [vmem:[#allocation187_spill] sm:$0xff]  ;;  %v5974_v11 = vld [vmem:[#allocation188_spill] sm:$0xff] }
 0x2df   : > { %v2589_v63 = vadd.f32 %v5179_v30, %v2550_v49  ;;  %v2520_v59 = vmul.f32 %v5152_v10, %v2389_v17  ;;  %v2027_v52 = vadd.f32 %v1995_v22, %v5063_v28  ;;  %v2026_v46 = vadd.f32 %v1994_v44, %v5066_v3  ;;  %v5975_v17 = vld [vmem:[#allocation72_spill] sm:$0xff] }
 0x2e0   : > { %v1997_v9 = vmul.f32 %v4434_v8, %v5969_v0  ;;  %v1996_v54 = vmul.f32 %v4434_v8, %v5970_v43  ;;  %v2622_v4 = vmax.f32 %v2590_v47, 0.0  ;;  %v2553_v57 = vadd.f32 %v2521_v14, %v2289_v23  ;;  %v2404_v26 = vpop.permute.xlu1 %2403  ;;  %v2399_v3 = vpop.permute.xlu0 %2398 }
 0x2e1   : > { %v2621_v33 = vmax.f32 %v2589_v63, 0.0  ;;  %v2552_v32 = vadd.f32 %v2520_v59, %v2288_v18  ;;  %v2291_v5 = vadd.f32 %v2259_v21, %v2027_v52  ;;  %v2290_v53 = vadd.f32 %v2258_v25, %v2026_v46  ;;  %v5976_v63 = vld [vmem:[#allocation68_spill] sm:$0xff] }
 0x2e2   : > { %v2261_v39 = vmul.f32 %v5107_v50, %v5971_v35  ;;  %v2260_v28 = vmul.f32 %v5107_v50, %v5972_v27  ;;  %2655 = vst.msk [vmem:[%s5202_s25 + $0x38] sm:$0xff] %vm2647_vm0, %v2622_v4  ;;  %v2592_v58 = vadd.f32 %v5179_v30, %v2553_v57  ;;  %v2523_v1 = vmul.f32 %v5152_v10, %v2404_v26  ;;  %v5979_v26 = vld [vmem:[#allocation69_spill] sm:$0xff] }
 0x2e3   : > { %2654 = vst.msk [vmem:[%s5202_s25 + $0x30] sm:$0xff] %vm2647_vm0, %v2621_v33  ;;  %v2591_v24 = vadd.f32 %v5179_v30, %v2552_v32  ;;  %v2522_v22 = vmul.f32 %v5152_v10, %v2399_v3  ;;  %v2029_v16 = vadd.f32 %v1997_v9, %v5069_v31  ;;  %v2028_v44 = vadd.f32 %v1996_v54, %v5074_v48  ;;  %v5977_v54 = vld [vmem:[#allocation189_spill] sm:$0xff]  ;;  %v5978_v33 = vld [vmem:[#allocation190_spill] sm:$0xff] }
 0x2e4   : > { %v1999_v60 = vmul.f32 %v4434_v8, %v5973_v40  ;;  %v1998_v49 = vmul.f32 %v4434_v8, %v5974_v11  ;;  %v2624_v23 = vmax.f32 %v2592_v58, 0.0  ;;  %v2555_v21 = vadd.f32 %v2523_v1, %v2291_v5  ;;  %v2414_v14 = vpop.permute.xlu1 %2413  ;;  %v2409_v48 = vpop.permute.xlu0 %2408 }
 0x2e5   : > { %v2623_v18 = vmax.f32 %v2591_v24, 0.0  ;;  %v2554_v55 = vadd.f32 %v2522_v22, %v2290_v53  ;;  %v2293_v25 = vadd.f32 %v2261_v39, %v2029_v16  ;;  %v2292_v34 = vadd.f32 %v2260_v28, %v2028_v44  ;;  %v5980_v44 = vld [vmem:[#allocation13_spill] sm:$0xff] }
 0x2e6   : > { %v2263_v47 = vmul.f32 %v5107_v50, %v5975_v17  ;;  %v2262_v31 = vmul.f32 %v5107_v50, %v5976_v63  ;;  %2657 = vst.msk [vmem:[%s5202_s25 + $0x48] sm:$0xff] %vm2647_vm0, %v2624_v23  ;;  %v2594_v59 = vadd.f32 %v5179_v30, %v2555_v21  ;;  %v2525_v46 = vmul.f32 %v5152_v10, %v2414_v14 }
 0x2e7   : > { %2656 = vst.msk [vmem:[%s5202_s25 + $0x40] sm:$0xff] %vm2647_vm0, %v2623_v18  ;;  %v2593_v52 = vadd.f32 %v5179_v30, %v2554_v55  ;;  %v2524_v0 = vmul.f32 %v5152_v10, %v2409_v48  ;;  %v2031_v9 = vadd.f32 %v1999_v60, %v5077_v61  ;;  %v2030_v43 = vadd.f32 %v1998_v49, %v5088_v62  ;;  %v5981_v60 = vld [vmem:[#allocation14_spill] sm:$0xff] }
 0x2e8   : > { %v2001_v4 = vmul.f32 %v4434_v8, %v5977_v54  ;;  %v2000_v57 = vmul.f32 %v4434_v8, %v5978_v33  ;;  %v2626_v32 = vmax.f32 %v2594_v59, 0.0  ;;  %v2557_v53 = vadd.f32 %v2525_v46, %v2293_v25  ;;  %v2424_v3 = vpop.permute.xlu1 %2423  ;;  %v2419_v62 = vpop.permute.xlu0 %2418 }
 0x2e9   : > { %v2625_v5 = vmax.f32 %v2593_v52, 0.0  ;;  %v2556_v35 = vadd.f32 %v2524_v0, %v2292_v34  ;;  %v2295_v39 = vadd.f32 %v2263_v47, %v2031_v9  ;;  %v2294_v27 = vadd.f32 %v2262_v31, %v2030_v43  ;;  %v5982_v34 = vld [vmem:[#allocation70_spill] sm:$0xff]  ;;  %v5983_v47 = vld [vmem:[#allocation71_spill] sm:$0xff]  ;;  %v5984_v0 = vld [vmem:[#allocation21_spill] sm:$0xff] }
 0x2ea   : > { %v2265_v28 = vmul.f32 %v5107_v50, %v4819_v51  ;;  %v2264_v61 = vmul.f32 %v5107_v50, %v5979_v26  ;;  %2659 = vst.msk [vmem:[%s5202_s25 + $0x58] sm:$0xff] %vm2647_vm0, %v2626_v32  ;;  %v2596_v58 = vadd.f32 %v5179_v30, %v2557_v53  ;;  %v2527_v1 = vmul.f32 %v5152_v10, %v2424_v3  ;;  %v5985_v43 = vld [vmem:[#allocation22_spill] sm:$0xff] }
 0x2eb   : > { %2658 = vst.msk [vmem:[%s5202_s25 + $0x50] sm:$0xff] %vm2647_vm0, %v2625_v5  ;;  %v2595_v24 = vadd.f32 %v5179_v30, %v2556_v35  ;;  %v2526_v22 = vmul.f32 %v5152_v10, %v2419_v62  ;;  %v2033_v51 = vadd.f32 %v2001_v4, %v5091_v6  ;;  %v2032_v16 = vadd.f32 %v2000_v57, %v5098_v36  ;;  %v5986_v35 = vld [vmem:[#allocation73_spill] sm:$0xff] }
 0x2ec   : > { %v2003_v40 = vmul.f32 %v4434_v8, %v5980_v44  ;;  %v2002_v11 = vmul.f32 %v4434_v8, %v5981_v60  ;;  %v2628_v49 = vmax.f32 %v2596_v58, 0.0  ;;  %v2559_v18 = vadd.f32 %v2527_v1, %v2295_v39  ;;  %v2434_v63 = vpop.permute.xlu1 %2433  ;;  %v2429_v36 = vpop.permute.xlu0 %2428  ;;  %v5988_v1 = vld [vmem:[#allocation41_spill] sm:$0xff] }
 0x2ed   : > { %v2627_v23 = vmax.f32 %v2595_v24, 0.0  ;;  %v2558_v21 = vadd.f32 %v2526_v22, %v2294_v27  ;;  %v2297_v55 = vadd.f32 %v2265_v28, %v2033_v51  ;;  %v2296_v25 = vadd.f32 %v2264_v61, %v2032_v16  ;;  %v5987_v27 = vld [vmem:[#allocation74_spill] sm:$0xff] }
 0x2ee   : > { %v2267_v17 = vmul.f32 %v5107_v50, %v5982_v34  ;;  %v2266_v6 = vmul.f32 %v5107_v50, %v5983_v47  ;;  %2661 = vst.msk [vmem:[%s5202_s25 + $0x68] sm:$0xff] %vm2647_vm0, %v2628_v49  ;;  %v2598_v31 = vadd.f32 %v5179_v30, %v2559_v18  ;;  %v2529_v48 = vmul.f32 %v5152_v10, %v2434_v63  ;;  %v5989_v51 = vld [vmem:[#allocation42_spill] sm:$0xff]  ;;  %v5990_v18 = vld [vmem:[#allocation17_spill] sm:$0xff] }
 0x2ef   : > { %2660 = vst.msk [vmem:[%s5202_s25 + $0x60] sm:$0xff] %vm2647_vm0, %v2627_v23  ;;  %v2597_v14 = vadd.f32 %v5179_v30, %v2558_v21  ;;  %v2528_v59 = vmul.f32 %v5152_v10, %v2429_v36  ;;  %v2035_v52 = vadd.f32 %v2003_v40, %v5101_v45  ;;  %v2034_v46 = vadd.f32 %v2002_v11, %v5110_v42  ;;  %v3009_v36 = vld [vmem:[#allocation2 + $0x6] ss:$0 sm:$0xff] }
 0x2f0   : > { %v2005_v9 = vmul.f32 %v4434_v8, %v5984_v0  ;;  %v2004_v54 = vmul.f32 %v4434_v8, %v5985_v43  ;;  %v2630_v4 = vmax.f32 %v2598_v31, 0.0  ;;  %v2561_v57 = vadd.f32 %v2529_v48, %v2297_v55  ;;  %v2444_v28 = vpop.permute.xlu1 %2443  ;;  %v2439_v42 = vpop.permute.xlu0 %2438  ;;  %v5991_v55 = vld [vmem:[#allocation75_spill] sm:$0xff]  ;;  %v5992_v31 = vld [vmem:[#allocation46_spill] sm:$0xff]  ;;  %v5993_v48 = vld [vmem:[#allocation49_spill] sm:$0xff] }
 0x2f1   : > { %v2629_v33 = vmax.f32 %v2597_v14, 0.0  ;;  %v2560_v32 = vadd.f32 %v2528_v59, %v2296_v25  ;;  %v2299_v5 = vadd.f32 %v2267_v17, %v2035_v52  ;;  %v2298_v53 = vadd.f32 %v2266_v6, %v2034_v46 }
 0x2f2   : > { %v2269_v39 = vmul.f32 %v5107_v50, %v5986_v35  ;;  %v2268_v45 = vmul.f32 %v5107_v50, %v5987_v27  ;;  %2663 = vst.msk [vmem:[%s5202_s25 + $0x78] sm:$0xff] %vm2647_vm0, %v2630_v4  ;;  %v2600_v26 = vadd.f32 %v5179_v30, %v2561_v57  ;;  %v2531_v3 = vmul.f32 %v5152_v10, %v2444_v28  ;;  %v5994_v4 = vld [vmem:[#allocation76_spill] sm:$0xff]  ;;  %v5995_v57 = vld [vmem:[#allocation77_spill] sm:$0xff]  ;;  %v5996_v28 = vld [vmem:[#allocation50_spill] sm:$0xff] }
 0x2f3   : > { %2662 = vst.msk [vmem:[%s5202_s25 + $0x70] sm:$0xff] %vm2647_vm0, %v2629_v33  ;;  %v2599_v61 = vadd.f32 %v5179_v30, %v2560_v32  ;;  %v2530_v62 = vmul.f32 %v5152_v10, %v2439_v42  ;;  %v2037_v58 = vadd.f32 %v2005_v9, %v5119_v19  ;;  %v2036_v24 = vadd.f32 %v2004_v54, %v5122_v37 }
 0x2f4   : > { %v2007_v22 = vmul.f32 %v4434_v8, %v5988_v1  ;;  %v2006_v16 = vmul.f32 %v4434_v8, %v5989_v51  ;;  %v2632_v44 = vmax.f32 %v2600_v26, 0.0  ;;  %v2563_v60 = vadd.f32 %v2531_v3, %v2299_v5  ;;  %v2454_v25 = vpop.permute.xlu1 %2453  ;;  %v2449_v37 = vpop.permute.xlu0 %2448  ;;  %v5997_v26 = vld [vmem:[#allocation53_spill] sm:$0xff]  ;;  %v5998_v51 = vld [vmem:[#allocation78_spill] sm:$0xff] }
 0x2f5   : > { %v2631_v40 = vmax.f32 %v2599_v61, 0.0  ;;  %v2562_v11 = vadd.f32 %v2530_v62, %v2298_v53  ;;  %v2301_v49 = vadd.f32 %v2269_v39, %v2037_v58  ;;  %v2300_v23 = vadd.f32 %v2268_v45, %v2036_v24 }
 0x2f6   : > { %v2271_v21 = vmul.f32 %v5107_v50, %v5990_v18  ;;  %v2270_v19 = vmul.f32 %v5107_v50, %v5991_v55  ;;  %2665 = vst.msk [vmem:[%s5202_s25 + $0x88] sm:$0xff] %vm2647_vm0, %v2632_v44  ;;  %v2602_v8 = vadd.f32 %v5179_v30, %v2563_v60  ;;  %v2533_v17 = vmul.f32 %v5152_v10, %v2454_v25  ;;  %v5999_v44 = vld [vmem:[#allocation79_spill] sm:$0xff]  ;;  %v6000_v55 = vld [vmem:[#allocation54_spill] sm:$0xff]  ;;  %v6001_v25 = vld [vmem:[#allocation57_spill] sm:$0xff] }
 0x2f7   : > { %2664 = vst.msk [vmem:[%s5202_s25 + $0x80] sm:$0xff] %vm2647_vm0, %v2631_v40  ;;  %v2601_v34 = vadd.f32 %v5179_v30, %v2562_v11  ;;  %v2532_v47 = vmul.f32 %v5152_v10, %v2449_v37  ;;  %v2039_v6 = vadd.f32 %v2007_v22, %v5133_v20  ;;  %v2038_v63 = vadd.f32 %v2006_v16, %v5136_v12 }
 0x2f8   : > { %v2009_v14 = vmul.f32 %v3009_v36, %v5992_v31  ;;  %v2008_v59 = vmul.f32 %v3009_v36, %v5993_v48  ;;  %v2634_v52 = vmax.f32 %v2602_v8, 0.0  ;;  %v2565_v0 = vadd.f32 %v2533_v17, %v2301_v49  ;;  %v2464_v32 = vpop.permute.xlu1 %2463  ;;  %v2459_v5 = vpop.permute.xlu0 %2458  ;;  %v6002_v31 = vld [vmem:[#allocation18_spill] sm:$0xff]  ;;  %v6003_v48 = vld [vmem:[#allocation25_spill] sm:$0xff] }
 0x2f9   : > { %v2633_v46 = vmax.f32 %v2601_v34, 0.0  ;;  %v2564_v9 = vadd.f32 %v2532_v47, %v2300_v23  ;;  %v2303_v43 = vadd.f32 %v2271_v21, %v2039_v6  ;;  %v2302_v54 = vadd.f32 %v2270_v19, %v2038_v63 }
 0x2fa   : > { %v2273_v33 = vmul.f32 %v5107_v50, %v5994_v4  ;;  %v2272_v20 = vmul.f32 %v5107_v50, %v5995_v57  ;;  %2667 = vst.msk [vmem:[%s5202_s25 + $0x98] sm:$0xff] %vm2647_vm0, %v2634_v52  ;;  %v2604_v12 = vadd.f32 %v5179_v30, %v2565_v0  ;;  %v2535_v35 = vmul.f32 %v5152_v10, %v2464_v32 }
 0x2fb   : > { %2666 = vst.msk [vmem:[%s5202_s25 + $0x90] sm:$0xff] %vm2647_vm0, %v2633_v46  ;;  %v2603_v53 = vadd.f32 %v5179_v30, %v2564_v9  ;;  %v2534_v39 = vmul.f32 %v5152_v10, %v2459_v5  ;;  %v2041_v27 = vadd.f32 %v2009_v14, %v5143_v41  ;;  %v2040_v45 = vadd.f32 %v2008_v59, %v5146_v13 }
 0x2fc   : > { %v2011_v42 = vmul.f32 %v3009_v36, %v5996_v28  ;;  %v2010_v61 = vmul.f32 %v3009_v36, %v5997_v26  ;;  %v2636_v3 = vmax.f32 %v2604_v12, 0.0  ;;  %v2567_v58 = vadd.f32 %v2535_v35, %v2303_v43  ;;  %v2474_v60 = vpop.permute.xlu1 %2473  ;;  %v2469_v41 = vpop.permute.xlu0 %2468  ;;  %v6005_v26 = vld [vmem:[#allocation61_spill] sm:$0xff] }
 0x2fd   : > { %v2635_v62 = vmax.f32 %v2603_v53, 0.0  ;;  %v2566_v24 = vadd.f32 %v2534_v39, %v2302_v54  ;;  %v2305_v1 = vadd.f32 %v2273_v33, %v2041_v27  ;;  %v2304_v22 = vadd.f32 %v2272_v20, %v2040_v45 }
 0x2fe   : > { %v2275_v16 = vmul.f32 %v5107_v50, %v5998_v51  ;;  %v2274_v40 = vmul.f32 %v5107_v50, %v5999_v44  ;;  %2669 = vst.msk [vmem:[%s5202_s25 + $0xa8] sm:$0xff] %vm2647_vm0, %v2636_v3  ;;  %v2606_v13 = vadd.f32 %v5179_v30, %v2567_v58  ;;  %v2537_v49 = vmul.f32 %v5152_v10, %v2474_v60 }
 0x2ff   : > { %2668 = vst.msk [vmem:[%s5202_s25 + $0xa0] sm:$0xff] %vm2647_vm0, %v2635_v62  ;;  %v2605_v11 = vadd.f32 %v5179_v30, %v2566_v24  ;;  %v2536_v23 = vmul.f32 %v5152_v10, %v2469_v41  ;;  %v2043_v18 = vadd.f32 %v2011_v42, %v5155_v2  ;;  %v2042_v21 = vadd.f32 %v2010_v61, %v5162_v29 }
 0x300   : > { %v2013_v19 = vmul.f32 %v3009_v36, %v6000_v55  ;;  %v2012_v37 = vmul.f32 %v3009_v36, %v6001_v25  ;;  %v2638_v8 = vmax.f32 %v2606_v13, 0.0  ;;  %v2569_v17 = vadd.f32 %v2537_v49, %v2305_v1  ;;  %v2484_v52 = vpop.permute.xlu1 %2483 }
 0x301   : > { %v2637_v34 = vmax.f32 %v2605_v11, 0.0  ;;  %v2568_v47 = vadd.f32 %v2536_v23, %v2304_v22  ;;  %v2307_v6 = vadd.f32 %v2275_v16, %v2043_v18  ;;  %v2306_v63 = vadd.f32 %v2274_v40, %v2042_v21  ;;  %v2479_v2 = vpop.permute.xlu0 %2478 }
 0x302   : > { %v2277_v14 = vmul.f32 %v5107_v50, %v6002_v31  ;;  %v2276_v59 = vmul.f32 %v5107_v50, %v6003_v48  ;;  %2671 = vst.msk [vmem:[%s5202_s25 + $0xb8] sm:$0xff] %vm2647_vm0, %v2638_v8  ;;  %v2608_v29 = vadd.f32 %v5179_v30, %v2569_v17  ;;  %v2539_v46 = vmul.f32 %v5152_v10, %v2484_v52 }
 0x303   : > { %2670 = vst.msk [vmem:[%s5202_s25 + $0xb0] sm:$0xff] %vm2647_vm0, %v2637_v34  ;;  %v2607_v36 = vadd.f32 %v5179_v30, %v2568_v47  ;;  %v2538_v0 = vmul.f32 %v5152_v10, %v2479_v2  ;;  %v2045_v9 = vadd.f32 %v2013_v19, %v5165_v15  ;;  %v2044_v43 = vadd.f32 %v2012_v37, %v5182_v38 }
 0x304   : > { %v2640_v54 = vmax.f32 %v2608_v29, 0.0  ;;  %v2571_v33 = vadd.f32 %v2539_v46, %v2307_v6  ;;  %v2279_v5 = vmul.f32 %v5107_v50, %v5128_v7  ;;  %v2278_v12 = vmul.f32 %v5107_v50, %v5130_v56  ;;  %v2494_v53 = vpop.permute.xlu1 %2493  ;;  %v6004_v56 = vld [vmem:[#allocation58_spill] sm:$0xff] }
 0x305   : > { %v2639_v4 = vmax.f32 %v2607_v36, 0.0  ;;  %v2570_v57 = vadd.f32 %v2538_v0, %v2306_v63  ;;  %v2309_v20 = vadd.f32 %v2277_v14, %v2045_v9  ;;  %v2308_v32 = vadd.f32 %v2276_v59, %v2044_v43  ;;  %v2489_v35 = vpop.permute.xlu0 %2488 }
 0x306   : > { %2673 = vst.msk [vmem:[%s5202_s25 + $0xc8] sm:$0xff] %vm2647_vm0, %v2640_v54  ;;  %v2610_v15 = vadd.f32 %v5179_v30, %v2571_v33  ;;  %v2541_v39 = vmul.f32 %v5152_v10, %v2494_v53  ;;  %v2540_v27 = vmul.f32 %v5152_v10, %v2489_v35  ;;  %v2311_v42 = vadd.f32 %v2279_v5, %v6004_v56 }
 0x307   : > { %2672 = vst.msk [vmem:[%s5202_s25 + $0xc0] sm:$0xff] %vm2647_vm0, %v2639_v4  ;;  %v2609_v38 = vadd.f32 %v5179_v30, %v2570_v57  ;;  %v2310_v61 = vadd.f32 %v2278_v12, %v6005_v26 }
 0x308   : > { %v2642_v7 = vmax.f32 %v2610_v15, 0.0  ;;  %v2573_v28 = vadd.f32 %v2541_v39, %v2309_v20  ;;  %v2572_v50 = vadd.f32 %v2540_v27, %v2308_v32  ;;  %v2504_v3 = vpop.permute.xlu1 %2503 }
 0x309   : > { %v2641_v45 = vmax.f32 %v2609_v38, 0.0  ;;  %v2499_v62 = vpop.permute.xlu0 %2498  ;;  %v2543_v1 = vmul.f32 %v5152_v10, %v2504_v3 }
 0x30a   : > { %2675 = vst.msk [vmem:[%s5202_s25 + $0xd8] sm:$0xff] %vm2647_vm0, %v2642_v7  ;;  %v2612_v58 = vadd.f32 %v5179_v30, %v2573_v28  ;;  %v2611_v24 = vadd.f32 %v5179_v30, %v2572_v50  ;;  %v2542_v22 = vmul.f32 %v5152_v10, %v2499_v62 }
 0x30b   : > { %2674 = vst.msk [vmem:[%s5202_s25 + $0xd0] sm:$0xff] %vm2647_vm0, %v2641_v45  ;;  %v2575_v44 = vadd.f32 %v2543_v1, %v2311_v42 }
 0x30c   : > { %v2644_v51 = vmax.f32 %v2612_v58, 0.0  ;;  %v2643_v16 = vmax.f32 %v2611_v24, 0.0  ;;  %v2574_v40 = vadd.f32 %v2542_v22, %v2310_v61 }
 0x30d   : > { %v2614_v60 = vadd.f32 %v5179_v30, %v2575_v44 }
 0x30e   : > { %2677 = vst.msk [vmem:[%s5202_s25 + $0xe8] sm:$0xff] %vm2647_vm0, %v2644_v51  ;;  %2676 = vst.msk [vmem:[%s5202_s25 + $0xe0] sm:$0xff] %vm2647_vm0, %v2643_v16  ;;  %v2613_v41 = vadd.f32 %v5179_v30, %v2574_v40 }
 0x30f   : > { %v2646_v13 = vmax.f32 %v2614_v60, 0.0 }
 0x310   : > { %v2645_v11 = vmax.f32 %v2613_v41, 0.0 }
 0x311   : > { %2679 = vst.msk [vmem:[%s5202_s25 + $0xf8] sm:$0xff] %vm2647_vm0, %v2646_v13 }
 0x312   : > { %2678 = vst.msk [vmem:[%s5202_s25 + $0xf0] sm:$0xff] %vm2647_vm0, %v2645_v11 }
 0x313 PF: > { %s15_s12 = sadd.s32 1, %s3080_s12  }
 0x314   : > { %p12_p5 = scmp.ge.s32.totalorder %s15_s12, 4  }
 0x316   :  { %14 = sbr.rel (!%p12_p5) target bundleno = 2 (0x2), region = 81 }
 0x31d   :  { %2701 = vsyncpa [#allocation3], 1 }
 0x31e   :  { %2703 = vsyncpa [#allocation3 + $0x1], 1 }
 0x31f   :  { %2704 = vsyncpa [#allocation5], 1 }

// kernel: forward.22
= control target key start
LH: loop header
LB: loop body
LE: loop exit
PB: predicated region body
PF: predicated region fallthrough
CT: control target
= control target key end

     0   :  { %s352_s6 = smov 0   ;;  %s354_s7 = smov 0   ;;  %s385_s0 = inlined_call_operand.vmem [shape: f32[2,8,4,256], index: 0, kind: input, shape index: {}]   ;;  %s386_s1 = inlined_call_operand.vmem [shape: f32[2,4,4,128], index: 1, kind: output, shape index: {}]  }
   0x1   :  { %s356_s8 = smov 0  }
   0x2 LB: > { %s23_s9 = sadd.s32 1, %s336_s7  ;;  %p285_p0 = scmp.ge.s32.totalorder %s340_s8, 1  ;;  %s340_s8 = sphi %s356_s8, %s11_s8   ;;  %s336_s7 = sphi %s354_s7, %s388_s7   ;;  %s332_s6 = sphi %s352_s6, %s387_s6  }
   0x3   : > { %p25_p1 = scmp.ge.s32.totalorder %s23_s9, 2  ;;  %p109_p2 = scmp.lt.s32.totalorder %s340_s8, 3 }
   0x5   : > { %s390_s9 = smov (%p25_p1, %s23_s9), 0  ;;  %p110_p3 = pnand %p285_p0, %p109_p2 }
   0x6   : > { %p139_p4 = scmp.lt.s32.totalorder (!%p110_p3), %s332_s6, 1 }
   0x7   : > { %113 = sbr.rel (%p110_p3) target bundleno = 27 (0x1b), region = 24 }
   0xe   : > { %s392_s6 = smov (!%p139_p4, %s332_s6), 1 }
   0xf   : > { %s292_s10 = sshll.u32 %s392_s6, 6  ;;  %s293_s14 = sshll.u32 %s392_s6, 4 }
  0x10   : > { %s147_s13 = scalar_lea.vmem %s385_s0, %s292_s10  ;;  %s157_s17 = scalar_lea.vmem %s386_s1, %s293_s14 }
  0x11   : > { %v159_v0 = vld [vmem:[%s147_s13] sm:$0xff]  ;;  %v160_v1 = vld [vmem:[%s147_s13 + $0x8] sm:$0xff]  ;;  %v161_v2 = vld [vmem:[%s147_s13 + $0x10] sm:$0xff] }
  0x12   : > { %v167_v3 = vmax.f32 %v159_v0, %v160_v1  ;;  %v162_v4 = vld [vmem:[%s147_s13 + $0x18] sm:$0xff]  ;;  %v163_v5 = vld [vmem:[%s147_s13 + $0x20] sm:$0xff]  ;;  %v164_v6 = vld [vmem:[%s147_s13 + $0x28] sm:$0xff] }
  0x13   : > { %v168_v7 = vmax.f32 %v161_v2, %v162_v4  ;;  %v169_v8 = vmax.f32 %v163_v5, %v164_v6  ;;  %v165_v9 = vld [vmem:[%s147_s13 + $0x30] sm:$0xff]  ;;  %v166_v10 = vld [vmem:[%s147_s13 + $0x38] sm:$0xff] }
  0x14   : > { %v175_v11 = vrot.slane %v167_v3, 4  ;;  %v170_v12 = vmax.f32 %v165_v9, %v166_v10 }
  0x15   : > { %v176_v13 = vrot.slane %v168_v7, 4  ;;  %v177_v14 = vrot.slane %v169_v8, 4 }
  0x16   : > { %v183_v15 = vmax.f32 %v167_v3, %v175_v11  ;;  %v178_v16 = vrot.slane %v170_v12, 4 }
  0x17   : > { %v184_v17 = vmax.f32 %v168_v7, %v176_v13  ;;  %v185_v18 = vmax.f32 %v169_v8, %v177_v14 }
  0x18   : > { %187 = vst [vmem:[%s157_s17] sm:$0xf] %v183_v15  ;;  %v186_v19 = vmax.f32 %v170_v12, %v178_v16 }
  0x19   : > { %188 = vst [vmem:[%s157_s17 + $0x4] sm:$0xf] %v184_v17  ;;  %189 = vst [vmem:[%s157_s17 + $0x8] sm:$0xf] %v185_v18 }
  0x1a   : > { %190 = vst [vmem:[%s157_s17 + $0xc] sm:$0xf] %v186_v19 }
  0x1b PF: > { %s11_s8 = sadd.s32 1, %s340_s8   ;;  %s387_s6 = smov %s336_s7 }
  0x1c   : > { %p8_p5 = scmp.ge.s32.totalorder %s11_s8, 4   ;;  %s388_s7 = smov %s390_s9 }
  0x1e   :  { %10 = sbr.rel (!%p8_p5) target bundleno = 2 (0x2), region = 54 }

// kernel: forward.20
= control target key start
LH: loop header
LB: loop body
LE: loop exit
PB: predicated region body
PF: predicated region fallthrough
CT: control target
= control target key end

     0   :  { %s1971_s12 = smov 0   ;;  %s2235_s0 = inlined_call_operand.vmem [shape: f32[2,10,10,64], index: 0, kind: input, shape index: {}]   ;;  %s2236_s1 = inlined_call_operand.vmem [shape: bf16[9,64,128], index: 1, kind: input, shape index: {}]   ;;  %s2237_s2 = inlined_call_operand.vmem [shape: f32[1,128], index: 2, kind: input, shape index: {}]   ;;  %s2238_s3 = inlined_call_operand.vmem [shape: f32[2,8,8,128], index: 3, kind: output, shape index: {}]  }
   0x1 LB: > { %s1414_s13 = sadd.s32 4294967295, %s1949_s12   ;;  %p1418_p0 = scmp.ge.s32.totalorder %s1949_s12, 1  ;;  %s1949_s12 = sphi %s1971_s12, %s13_s12  }
   0x2   : > { %p137_p1 = scmp.lt.s32.totalorder %s1949_s12, 3 }
   0x4   : > { %p138_p2 = pnand %p1418_p0, %p137_p1 }
   0x5   : > { %v1907_v0 = vld [vmem:[%s2236_s1 + $0x20] sm:$0xff] (!%p138_p2)   ;;  %p161_p3 = scmp.lt.s32.totalorder (!%p138_p2), %s1414_s13, 1  ;;  %v1909_v2 = vld [vmem:[%s2236_s1 + $0x28] sm:$0xff] (!%p138_p2)   ;;  %v1911_v4 = vld [vmem:[%s2236_s1 + $0x30] sm:$0xff] (!%p138_p2)   ;;  %vm237_vm0 = vcmask (!%p138_p2), 523264  }
   0x6   : > { %141 = sbr.rel (%p138_p2) target bundleno = 309 (0x135), region = 32  ;;  %v1908_v1 = vld [vmem:[%s2236_s1 + $0x80] sm:$0xff] (!%p138_p2)   ;;  %1682 = vmatprep.subr.bf16.mxu1 (!%p138_p2), %v1907_v0  ;;  %v1910_v3 = vld [vmem:[%s2236_s1 + $0x88] sm:$0xff] (!%p138_p2)   ;;  %v1912_v5 = vld [vmem:[%s2236_s1 + $0x90] sm:$0xff] (!%p138_p2)  }
   0x7   : > { %1746 = vmatprep.subr.bf16.mxu0 (!%p138_p2), %v1908_v1  ;;  %1683 = vmatpush3.bf16.msra.mxu1 (!%p138_p2), %v1907_v0  ;;  %v1913_v6 = vld [vmem:[%s2236_s1 + $0x38] sm:$0xff] (!%p138_p2)   ;;  %v1915_v14 = vld [vmem:[%s2236_s1] sm:$0xff] (!%p138_p2)   ;;  %v1917_v21 = vld [vmem:[%s2236_s1 + $0x8] sm:$0xff] (!%p138_p2)  }
   0x8   : > { %1747 = vmatpush3.bf16.msra.mxu0 (!%p138_p2), %v1908_v1  ;;  %1684 = vmatprep.subr.bf16.mxu1 (!%p138_p2), %v1909_v2  ;;  %v1914_v10 = vld [vmem:[%s2236_s1 + $0x98] sm:$0xff] (!%p138_p2)   ;;  %v1916_v16 = vld [vmem:[%s2236_s1 + $0xa0] sm:$0xff] (!%p138_p2)   ;;  %v1918_v22 = vld [vmem:[%s2236_s1 + $0xa8] sm:$0xff] (!%p138_p2)  }
   0x9   : > { %1748 = vmatprep.subr.bf16.mxu0 (!%p138_p2), %v1910_v3  ;;  %v1919_v26 = vld [vmem:[%s2236_s1 + $0x10] sm:$0xff] (!%p138_p2)   ;;  %v1921_v35 = vld [vmem:[%s2236_s1 + $0x18] sm:$0xff] (!%p138_p2)   ;;  %v1923_v41 = vld [vmem:[%s2236_s1 + $0x40] sm:$0xff] (!%p138_p2)  }
   0xa   : > { %v1920_v28 = vld [vmem:[%s2236_s1 + $0xb0] sm:$0xff] (!%p138_p2)   ;;  %v1922_v36 = vld [vmem:[%s2236_s1 + $0xb8] sm:$0xff] (!%p138_p2)   ;;  %v1924_v44 = vld [vmem:[%s2236_s1 + $0xc0] sm:$0xff] (!%p138_p2)  }
   0xb   : > { %1685 = vmatpush3.bf16.msra.mxu1 (!%p138_p2), %v1909_v2  ;;  %v1925_v51 = vld [vmem:[%s2236_s1 + $0x48] sm:$0xff] (!%p138_p2)   ;;  %v1927_v57 = vld [vmem:[%s2236_s1 + $0x50] sm:$0xff] (!%p138_p2)   ;;  %v1929_v0 = vld [vmem:[%s2236_s1 + $0x58] sm:$0xff] (!%p138_p2)  }
   0xc   : > { %1749 = vmatpush3.bf16.msra.mxu0 (!%p138_p2), %v1910_v3  ;;  %1686 = vmatprep.subr.bf16.mxu1 (!%p138_p2), %v1911_v4  ;;  %v1926_v52 = vld [vmem:[%s2236_s1 + $0xc8] sm:$0xff] (!%p138_p2)   ;;  %v1928_v60 = vld [vmem:[%s2236_s1 + $0xd0] sm:$0xff] (!%p138_p2)   ;;  %v1930_v1 = vld [vmem:[%s2236_s1 + $0xd8] sm:$0xff] (!%p138_p2)  }
   0xd   : > { %s2240_s13 = smov (!%p161_p3, %s1414_s13), 1  ;;  %1750 = vmatprep.subr.bf16.mxu0 %v1912_v5  ;;  %v1931_v3 = vld [vmem:[%s2236_s1 + $0x60] sm:$0xff]  }
   0xe   : > { %s1898_s24 = smul.u32 160, %s2240_s13  ;;  %s1609_s18 = sshll.u32 %s2240_s13, 6 }
   0xf   : > { %1687 = vmatpush3.bf16.msra.mxu1 %v1911_v4  ;;  %v1932_v4 = vld [vmem:[%s2236_s1 + $0xe0] sm:$0xff]   ;;  %s170_s21 = scalar_lea.vmem %s2238_s3, %s1609_s18 }
  0x10   : > { %s2003_s29 = scalar_lea.vmem %s2235_s0, %s1898_s24  ;;  %1751 = vmatpush3.bf16.msra.mxu0 %v1912_v5  ;;  %1688 = vmatprep.subr.bf16.mxu1 %v1913_v6 }
  0x11   : > { %v192_v7 = vld [vmem:[%s2003_s29 + $0x1] sm:$0xff]  ;;  %v193_v8 = vld [vmem:[%s2003_s29 + $0x11] sm:$0xff]  ;;  %1752 = vmatprep.subr.bf16.mxu0 %v1914_v10 }
  0x12   : > { %v1487_v9 = vld [vmem:[%s2003_s29 + $0x21] sm:$0xff]  ;;  %v200_v11 = vpack.c.bf16 %v193_v8, %v192_v7  ;;  %v195_v13 = vld [vmem:[%s2003_s29 + $0x31] sm:$0xff] }
  0x13   : > { %v685_v12 = vpack.c.bf16 %v1487_v9, %v193_v8  ;;  %v1489_v15 = vld [vmem:[%s2003_s29 + $0x41] sm:$0xff]  ;;  %v2024_v17 = vpack.c.bf16 %v195_v13, %v1487_v9  ;;  %v197_v18 = vld [vmem:[%s2003_s29 + $0x51] sm:$0xff]  ;;  %1689 = vmatpush3.bf16.msra.mxu1 %v1913_v6 }
  0x14   : > { %1690 = vmatprep.mubr.msk.bf16.mxu1 %vm237_vm0, %v200_v11  ;;  %v686_v19 = vpack.c.bf16 %v1489_v15, %v195_v13  ;;  %v1491_v20 = vld [vmem:[%s2003_s29 + $0x61] sm:$0xff]  ;;  %1753 = vmatpush3.bf16.msra.mxu0 %v1914_v10  ;;  %v2034_v23 = vpack.c.bf16 %v197_v18, %v1489_v15  ;;  %v199_v25 = vld [vmem:[%s2003_s29 + $0x71] sm:$0xff] }
  0x15   : > { %1754 = vmatprep.mubr.msk.bf16.mxu0 %vm237_vm0, %v685_v12  ;;  %1698 = vmatprep.subr.bf16.mxu1 %v1915_v14  ;;  %v687_v24 = vpack.c.bf16 %v1491_v20, %v197_v18  ;;  %v2044_v27 = vld [vmem:[%s2003_s29 + $0x81] sm:$0xff]  ;;  %v2053_v30 = vpack.c.bf16 %v199_v25, %v1491_v20  ;;  %v2056_v31 = vld [vmem:[%s2003_s29 + $0x10] sm:$0xff]  ;;  %v1937_v15 = vld [vmem:[%s2236_s1 + $0x78] sm:$0xff]  }
  0x16   : > { %1762 = vmatprep.subr.bf16.mxu0 %v1916_v16  ;;  %1691 = vmatmul.mubr.msk.bf16.vlgmr.msra.gmra.mrb[0].mxu1 %vm237_vm0, %v2024_v17  ;;  %v172_v29 = vld [vmem:[%s2003_s29] sm:$0xff]  ;;  %v2059_v32 = vld [vmem:[%s2003_s29 + $0x12] sm:$0xff]  ;;  %v688_v33 = vpack.c.bf16 %v2044_v27, %v199_v25  ;;  %v1933_v6 = vld [vmem:[%s2236_s1 + $0x68] sm:$0xff]  }
  0x17   : > { %1755 = vmatmul.mubr.msk.bf16.vlgmr.msra.gmra.mrb[0].mxu0 %vm237_vm0, %v686_v19  ;;  %1699 = vmatpush3.bf16.msra.mxu1 %v1915_v14  ;;  %v2063_v34 = vld [vmem:[%s2003_s29 + $0x22] sm:$0xff]  ;;  %v180_v37 = vpack.c.bf16 %v2056_v31, %v172_v29  ;;  %v2080_v40 = vld [vmem:[%s2003_s29 + $0x30] sm:$0xff] }
  0x18   : > { %1763 = vmatpush3.bf16.msra.mxu0 %v1916_v16  ;;  %1700 = vmatprep.subr.bf16.mxu1 %v1917_v21  ;;  %v815_v38 = vpack.c.bf16 %v2063_v34, %v2059_v32  ;;  %v2077_v39 = vld [vmem:[%s2003_s29 + $0x20] sm:$0xff]  ;;  %v1512_v42 = vld [vmem:[%s2003_s29 + $0x32] sm:$0xff]  ;;  %v1934_v7 = vld [vmem:[%s2236_s1 + $0xe8] sm:$0xff]  }
  0x19   : > { %1764 = vmatprep.subr.bf16.mxu0 %v1918_v22  ;;  %1694 = vmatprep.mubr.msk.bf16.mxu1 %vm237_vm0, %v2034_v23  ;;  %v1513_v43 = vld [vmem:[%s2003_s29 + $0x42] sm:$0xff]  ;;  %v2096_v46 = vld [vmem:[%s2003_s29 + $0x50] sm:$0xff]  ;;  %v181_v47 = vpack.c.bf16 %v2080_v40, %v2077_v39  ;;  %v2153_v5 = vpack.c.bf16 %v1512_v42, %v2063_v34  ;;  %v1938_v16 = vld [vmem:[%s2236_s1 + $0xf8] sm:$0xff]   ;;  %v555_v18 = vpack.c.bf16 %v2077_v39, %v2056_v31 }
  0x1a   : > { %1758 = vmatprep.mubr.msk.bf16.mxu0 %vm237_vm0, %v687_v24  ;;  %v2092_v45 = vld [vmem:[%s2003_s29 + $0x40] sm:$0xff]  ;;  %v1514_v48 = vld [vmem:[%s2003_s29 + $0x52] sm:$0xff]  ;;  %v816_v49 = vpack.c.bf16 %v1513_v43, %v1512_v42 }
  0x1b   : > { %1701 = vmatpush3.bf16.msra.mxu1 %v1917_v21  ;;  %v1515_v50 = vld [vmem:[%s2003_s29 + $0x62] sm:$0xff]  ;;  %v182_v53 = vpack.c.bf16 %v2096_v46, %v2092_v45  ;;  %v2115_v55 = vld [vmem:[%s2003_s29 + $0x70] sm:$0xff]  ;;  %v2161_v8 = vpack.c.bf16 %v1514_v48, %v1513_v43  ;;  %v556_v20 = vpack.c.bf16 %v2092_v45, %v2080_v40  ;;  %v1606_v45 = vld [vmem:[%s2237_s2] ss:$0 sm:$0xff] }
  0x1c   : > { %1765 = vmatpush3.bf16.msra.mxu0 %v1918_v22  ;;  %1702 = vmatprep.subr.bf16.mxu1 %v1919_v26  ;;  %v2112_v54 = vld [vmem:[%s2003_s29 + $0x60] sm:$0xff]  ;;  %v817_v56 = vpack.c.bf16 %v1515_v50, %v1514_v48  ;;  %v1516_v58 = vld [vmem:[%s2003_s29 + $0x72] sm:$0xff]  ;;  %v1940_v21 = vld [vmem:[%s2236_s1 + $0x108] sm:$0xff]  }
  0x1d   : > { %1766 = vmatprep.subr.bf16.mxu0 %v1920_v28  ;;  %v2124_v59 = vld [vmem:[%s2003_s29 + $0x82] sm:$0xff]  ;;  %v183_v61 = vpack.c.bf16 %v2115_v55, %v2112_v54  ;;  %v1935_v9 = vld [vmem:[%s2236_s1 + $0x70] sm:$0xff]   ;;  %v427_v13 = vpack.c.bf16 %v1516_v58, %v1515_v50  ;;  %v557_v22 = vpack.c.bf16 %v2112_v54, %v2096_v46 }
  0x1e   : > { %1695 = vmatmul.mubr.msk.bf16.gmra.mrb[4].mxu1 %vm237_vm0, %v2053_v30  ;;  %v416_v62 = vld [vmem:[%s2003_s29 + $0x2] sm:$0xff]  ;;  %v818_v63 = vpack.c.bf16 %v2124_v59, %v1516_v58  ;;  %v1541_v11 = vld [vmem:[%s2003_s29 + $0x90] sm:$0xff] }
  0x1f   : > { %1759 = vmatmul.mubr.msk.bf16.gmra.mrb[4].mxu0 %vm237_vm0, %v688_v33  ;;  %1703 = vmatpush3.bf16.msra.mxu1 %v1919_v26  ;;  %v424_v2 = vpack.c.bf16 %v2059_v32, %v416_v62  ;;  %v1540_v10 = vld [vmem:[%s2003_s29 + $0x80] sm:$0xff]  ;;  %v1936_v12 = vld [vmem:[%s2236_s1 + $0xf0] sm:$0xff]   ;;  %v1942_v26 = vld [vmem:[%s2236_s1 + $0x118] sm:$0xff]  }
  0x20   : > { %1767 = vmatpush3.bf16.msra.mxu0 %v1920_v28  ;;  %1704 = vmatprep.subr.bf16.mxu1 %v1921_v35  ;;  %v949_v14 = vpack.c.bf16 %v1541_v11, %v1540_v10  ;;  %v1939_v19 = vld [vmem:[%s2236_s1 + $0x100] sm:$0xff]   ;;  %v1941_v24 = vld [vmem:[%s2236_s1 + $0x110] sm:$0xff]   ;;  %v558_v25 = vpack.c.bf16 %v1540_v10, %v2115_v55 }
  0x21   : > { %1768 = vmatprep.subr.bf16.mxu0 %v1922_v36  ;;  %1706 = vmatprep.mubr.msk.bf16.mxu1 %vm237_vm0, %v180_v37  ;;  %v1589_v28 = vld [vmem:[%s2003_s29 + $0x92] sm:$0xff] }
  0x22   : > { %1770 = vmatprep.mubr.msk.bf16.mxu0 %vm237_vm0, %v815_v38 }
  0x23   : > { %1705 = vmatpush3.bf16.msra.mxu1 %v1921_v35 }
  0x24   : > { %1769 = vmatpush3.bf16.msra.mxu0 %v1922_v36  ;;  %1714 = vmatprep.subr.bf16.mxu1 %v1923_v41 }
  0x25   : > { %1778 = vmatprep.subr.bf16.mxu0 %v1924_v44 }
  0x26   : > { %1707 = vmatmul.mubr.msk.bf16.vlgmr.msra.gmra.mrb[0].mxu1 %vm237_vm0, %v181_v47 }
  0x27   : > { %1771 = vmatmul.mubr.msk.bf16.vlgmr.msra.gmra.mrb[0].mxu0 %vm237_vm0, %v816_v49  ;;  %1715 = vmatpush3.bf16.msra.mxu1 %v1923_v41 }
  0x28   : > { %1779 = vmatpush3.bf16.msra.mxu0 %v1924_v44  ;;  %1716 = vmatprep.subr.bf16.mxu1 %v1925_v51 }
  0x29   : > { %1780 = vmatprep.subr.bf16.mxu0 %v1926_v52  ;;  %1710 = vmatprep.mubr.msk.bf16.mxu1 %vm237_vm0, %v182_v53 }
  0x2a   : > { %1774 = vmatprep.mubr.msk.bf16.mxu0 %vm237_vm0, %v817_v56 }
  0x2b   : > { %1717 = vmatpush3.bf16.msra.mxu1 %v1925_v51 }
  0x2c   : > { %1781 = vmatpush3.bf16.msra.mxu0 %v1926_v52  ;;  %1718 = vmatprep.subr.bf16.mxu1 %v1927_v57 }
  0x2d   : > { %1782 = vmatprep.subr.bf16.mxu0 %v1928_v60 }
  0x2e   : > { %1711 = vmatmul.mubr.msk.bf16.gmra.mrb[4].mxu1 %vm237_vm0, %v183_v61 }
  0x2f   : > { %1775 = vmatmul.mubr.msk.bf16.gmra.mrb[4].mxu0 %vm237_vm0, %v818_v63  ;;  %1719 = vmatpush3.bf16.msra.mxu1 %v1927_v57 }
  0x30   : > { %1783 = vmatpush3.bf16.msra.mxu0 %v1928_v60  ;;  %1720 = vmatprep.subr.bf16.mxu1 %v1929_v0 }
  0x31   : > { %1784 = vmatprep.subr.bf16.mxu0 %v1930_v1  ;;  %1722 = vmatprep.mubr.msk.bf16.mxu1 %vm237_vm0, %v424_v2 }
  0x32   : > { %1786 = vmatprep.mubr.msk.bf16.mxu0 %vm237_vm0, %v181_v47 }
  0x33   : > { %1721 = vmatpush3.bf16.msra.mxu1 %v1929_v0 }
  0x34   : > { %1785 = vmatpush3.bf16.msra.mxu0 %v1930_v1  ;;  %1730 = vmatprep.subr.bf16.mxu1 %v1931_v3 }
  0x35   : > { %1794 = vmatprep.subr.bf16.mxu0 %v1932_v4 }
  0x36   : > { %1723 = vmatmul.mubr.msk.bf16.vlgmr.msra.gmra.mrb[0].mxu1 %vm237_vm0, %v2153_v5 }
  0x37   : > { %1787 = vmatmul.mubr.msk.bf16.vlgmr.msra.gmra.mrb[0].mxu0 %vm237_vm0, %v182_v53  ;;  %1731 = vmatpush3.bf16.msra.mxu1 %v1931_v3 }
  0x38   : > { %1795 = vmatpush3.bf16.msra.mxu0 %v1932_v4  ;;  %1732 = vmatprep.subr.bf16.mxu1 %v1933_v6 }
  0x39   : > { %1796 = vmatprep.subr.bf16.mxu0 %v1934_v7  ;;  %1726 = vmatprep.mubr.msk.bf16.mxu1 %vm237_vm0, %v2161_v8 }
  0x3a   : > { %1790 = vmatprep.mubr.msk.bf16.mxu0 %vm237_vm0, %v183_v61 }
  0x3b   : > { %1733 = vmatpush3.bf16.msra.mxu1 %v1933_v6 }
  0x3c   : > { %1797 = vmatpush3.bf16.msra.mxu0 %v1934_v7  ;;  %1734 = vmatprep.subr.bf16.mxu1 %v1935_v9 }
  0x3d   : > { %1798 = vmatprep.subr.bf16.mxu0 %v1936_v12 }
  0x3e   : > { %1727 = vmatmul.mubr.msk.bf16.gmra.mrb[4].mxu1 %vm237_vm0, %v427_v13 }
  0x3f   : > { %1791 = vmatmul.mubr.msk.bf16.gmra.mrb[4].mxu0 %vm237_vm0, %v949_v14  ;;  %1735 = vmatpush3.bf16.msra.mxu1 %v1935_v9 }
  0x40   : > { %1799 = vmatpush3.bf16.msra.mxu0 %v1936_v12  ;;  %1736 = vmatprep.subr.bf16.mxu1 %v1937_v15 }
  0x41   : > { %1800 = vmatprep.subr.bf16.mxu0 %v1938_v16  ;;  %1738 = vmatprep.mubr.msk.bf16.mxu1 %vm237_vm0, %v555_v18 }
  0x42   : > { %1802 = vmatprep.mubr.msk.bf16.mxu0 %vm237_vm0, %v2024_v17  ;;  %v1565_v17 = vld [vmem:[%s2003_s29 + $0x91] sm:$0xff] }
  0x43   : > { %1737 = vmatpush3.bf16.msra.mxu1 %v1937_v15 }
  0x44   : > { %1801 = vmatpush3.bf16.msra.mxu0 %v1938_v16  ;;  %1826 = vmatprep.subr.bf16.mxu1 %v1939_v19 }
  0x45   : > { %1810 = vmatprep.subr.bf16.mxu0 %v1939_v19 }
  0x46   : > { %1739 = vmatmul.mubr.msk.bf16.vlgmr.msra.gmra.mrb[0].mxu1 %vm237_vm0, %v556_v20 }
  0x47   : > { %1803 = vmatmul.mubr.msk.bf16.vlgmr.msra.gmra.mrb[0].mxu0 %vm237_vm0, %v2034_v23  ;;  %1830 = vmatpush3.bf16.msra.mxu1 %v1939_v19  ;;  %v1079_v23 = vpack.c.bf16 %v1565_v17, %v2044_v27  ;;  %v1209_v27 = vpack.c.bf16 %v1589_v28, %v2124_v59 }
  0x48   : > { %1811 = vmatpush3.bf16.msra.mxu0 %v1939_v19  ;;  %1827 = vmatprep.subr.bf16.mxu1 %v1940_v21 }
  0x49   : > { %1812 = vmatprep.subr.bf16.mxu0 %v1940_v21  ;;  %1742 = vmatprep.mubr.msk.bf16.mxu1 %vm237_vm0, %v557_v22 }
  0x4a   : > { %1806 = vmatprep.mubr.msk.bf16.mxu0 %vm237_vm0, %v2053_v30 }
  0x4b   : > { %1831 = vmatpush3.bf16.msra.mxu1 %v1940_v21 }
  0x4c   : > { %1813 = vmatpush3.bf16.msra.mxu0 %v1940_v21  ;;  %1828 = vmatprep.subr.bf16.mxu1 %v1941_v24 }
  0x4d   : > { %1814 = vmatprep.subr.bf16.mxu0 %v1941_v24 }
  0x4e   : > { %1743 = vmatmul.mubr.msk.bf16.gmra.mrb[4].mxu1 %vm237_vm0, %v558_v25 }
  0x4f   : > { %1807 = vmatmul.mubr.msk.bf16.gmra.mrb[4].mxu0 %vm237_vm0, %v1079_v23  ;;  %1832 = vmatpush3.bf16.msra.mxu1 %v1941_v24 }
  0x50   : > { %1815 = vmatpush3.bf16.msra.mxu0 %v1941_v24  ;;  %1829 = vmatprep.subr.bf16.mxu1 %v1942_v26 }
  0x51   : > { %1816 = vmatprep.subr.bf16.mxu0 %v1942_v26  ;;  %1818 = vmatprep.mubr.msk.bf16.mxu0 %vm237_vm0, %v2153_v5 }
  0x52   : > { %1822 = vmatprep.mubr.msk.bf16.mxu1 %vm237_vm0, %v427_v13 }
  0x53   : > { %1833 = vmatpush3.bf16.msra.mxu1 %v1942_v26 }
  0x54   : > { %1817 = vmatpush3.bf16.msra.mxu0 %v1942_v26 }
  0x56   : > { %1823 = vmatmul.mubr.msk.bf16.vlgmr.msra.gmra.mrb[8].mxu1 %vm237_vm0, %v1209_v27 }
  0x57   : > { %1819 = vmatmul.mubr.msk.bf16.vlgmr.msra.gmra.mrb[0].mxu0 %vm237_vm0, %v2161_v8 }
 0x119   : > { %v1740_v29 = vpop.f32.mrb[0].mxu1 }
 0x11a   : > { %v638_v30 = vpop.f32.mrb[1].mxu1 }
 0x11b   : > { %v1741_v31 = vpop.f32.mrb[2].mxu1 }
 0x11c   : > { %v641_v32 = vpop.f32.mrb[3].mxu1 }
 0x121   : > { %v1744_v33 = vpop.f32.mrb[4].mxu1 }
 0x122   : > { %v1808_v34 = vpop.f32.mrb[4].mxu0  ;;  %v654_v35 = vpop.f32.mrb[5].mxu1 }
 0x123   : > { %v1838_v36 = vadd.f32 %v1808_v34, %v1744_v33  ;;  %v1175_v37 = vpop.f32.mrb[5].mxu0  ;;  %v1745_v38 = vpop.f32.mrb[6].mxu1 }
 0x124   : > { %v1840_v39 = vadd.f32 %v1175_v37, %v654_v35  ;;  %v1809_v40 = vpop.f32.mrb[6].mxu0  ;;  %v657_v41 = vpop.f32.mrb[7].mxu1 }
 0x125   : > { %v1842_v42 = vadd.f32 %v1809_v40, %v1745_v38  ;;  %v1178_v43 = vpop.f32.mrb[7].mxu0 }
 0x126   : > { %v1844_v44 = vadd.f32 %v1178_v43, %v657_v41 }
 0x129   : > { %v1824_v46 = vpop.f32.mrb[8].mxu1 }
 0x12a   : > { %v1820_v47 = vpop.f32.mrb[0].mxu0  ;;  %v1839_v48 = vadd.f32 %v1838_v36, %v1824_v46  ;;  %v1305_v49 = vpop.f32.mrb[9].mxu1 }
 0x12b   : > { %v1834_v50 = vadd.f32 %v1820_v47, %v1740_v29  ;;  %v1289_v51 = vpop.f32.mrb[1].mxu0  ;;  %v1841_v52 = vadd.f32 %v1840_v39, %v1305_v49  ;;  %v1825_v53 = vpop.f32.mrb[10].mxu1 }
 0x12c   : > { %v1341_v54 = vadd.f32 %v1839_v48, %v1606_v45  ;;  %v1835_v55 = vadd.f32 %v1289_v51, %v638_v30  ;;  %v1821_v56 = vpop.f32.mrb[2].mxu0  ;;  %v1843_v57 = vadd.f32 %v1842_v42, %v1825_v53  ;;  %v1308_v58 = vpop.f32.mrb[11].mxu1 }
 0x12d   : > { %v1337_v59 = vadd.f32 %v1834_v50, %v1606_v45  ;;  %v1339_v60 = vadd.f32 %v1841_v52, %v1606_v45  ;;  %v1836_v61 = vadd.f32 %v1821_v56, %v1741_v31  ;;  %v1292_v62 = vpop.f32.mrb[3].mxu0  ;;  %v1845_v63 = vadd.f32 %v1844_v44, %v1308_v58 }
 0x12e   : > { %v1349_v0 = vmax.f32 %v1341_v54, 0.0  ;;  %v1335_v1 = vadd.f32 %v1835_v55, %v1606_v45  ;;  %v1342_v2 = vadd.f32 %v1843_v57, %v1606_v45  ;;  %v1837_v3 = vadd.f32 %v1292_v62, %v641_v32 }
 0x12f   : > { %v1345_v4 = vmax.f32 %v1337_v59, 0.0  ;;  %v1347_v5 = vmax.f32 %v1339_v60, 0.0  ;;  %v1338_v6 = vadd.f32 %v1836_v61, %v1606_v45  ;;  %v1340_v7 = vadd.f32 %v1845_v63, %v1606_v45 }
 0x130   : > { %1357 = vst [vmem:[%s170_s21 + $0x30] sm:$0xff] %v1349_v0  ;;  %v1343_v8 = vmax.f32 %v1335_v1, 0.0  ;;  %v1350_v9 = vmax.f32 %v1342_v2, 0.0  ;;  %v1336_v10 = vadd.f32 %v1837_v3, %v1606_v45 }
 0x131   : > { %1353 = vst [vmem:[%s170_s21 + $0x10] sm:$0xff] %v1345_v4  ;;  %1355 = vst [vmem:[%s170_s21 + $0x20] sm:$0xff] %v1347_v5  ;;  %v1346_v11 = vmax.f32 %v1338_v6, 0.0  ;;  %v1348_v12 = vmax.f32 %v1340_v7, 0.0 }
 0x132   : > { %1351 = vst [vmem:[%s170_s21] sm:$0xff] %v1343_v8  ;;  %1358 = vst [vmem:[%s170_s21 + $0x38] sm:$0xff] %v1350_v9  ;;  %v1344_v13 = vmax.f32 %v1336_v10, 0.0 }
 0x133   : > { %1354 = vst [vmem:[%s170_s21 + $0x18] sm:$0xff] %v1346_v11  ;;  %1356 = vst [vmem:[%s170_s21 + $0x28] sm:$0xff] %v1348_v12 }
 0x134   : > { %1352 = vst [vmem:[%s170_s21 + $0x8] sm:$0xff] %v1344_v13 }
 0x135 PF: > { %s13_s12 = sadd.s32 1, %s1949_s12  }
 0x136   : > { %p10_p4 = scmp.ge.s32.totalorder %s13_s12, 4  }
 0x138   :  { %12 = sbr.rel (!%p10_p4) target bundleno = 1 (0x1), region = 72 }

// kernel: forward.23
= control target key start
LH: loop header
LB: loop body
LE: loop exit
PB: predicated region body
PF: predicated region fallthrough
CT: control target
= control target key end

     0   :  { %s723_s0 = inlined_call_operand.vmem [shape: f32[2,4,4,128], index: 0, kind: input, shape index: {}]   ;;  %s724_s1 = inlined_call_operand.vmem [shape: f32[18], index: 1, kind: input, shape index: {}]   ;;  %s725_s2 = inlined_call_operand.<no memory space> [shape: f32[1], index: 2, kind: input, shape index: {}]   ;;  %s726_s3 = inlined_call_operand.vmem [shape: f32[2,4,4,128], index: 3, kind: output, shape index: {}]  }
   0x1   :  { %8 = sst [smem:[#allocation4]] %s725_s2 }
   0x2   :  { %9 = vsyncpa [#allocation6], 0  ;;  %s631_s14 = smov 0  }
   0x3 LB: > { %s518_s15 = sadd.s32 4294967295, %s602_s14   ;;  %p520_p0 = scmp.ge.s32.totalorder %s602_s14, 1  ;;  %s602_s14 = sphi %s631_s14, %s15_s14  }
   0x4   : > { %p114_p1 = scmp.lt.s32.totalorder %s602_s14, 3  ;;  %s127_s18 = sshll.u32 %s724_s1, 4  ;;  %s128_s18 = int_to_ptr.vmem [resolvable:$true] %s127_s18 }
   0x5   : > { %p559_p3 = scmp.eq.s32.totalorder %s518_s15, 0  ;;  %s577_s19 = scalar_lea.vmem %s128_s18, 16 }
   0x6   : > { %p642_p2 = pnand %p520_p0, %p114_p1  ;;  %p578_p6 = scmp.ne.s32.totalorder %s128_s18, %s577_s19 }
   0x7   : > { %p585_p10 = scmp.lt.s32.totalorder %s128_s18, %s128_s18  ;;  %p586_p11 = scmp.lt.s32.totalorder %s577_s19, %s577_s19 }
   0x8   : > { %p555_p4 = pneg %p642_p2 }
   0x9   : > { %p587_p12 = por %p586_p11, %p585_p10 }
   0xa   : > { %p556_p5 = pnand %p559_p3, %p555_p4 }
   0xc   : > { %p579_p7 = pneg %p556_p5 }
   0xe   : > { %p580_p8 = pnand %p579_p7, %p578_p6 }
  0x10   : > { %p581_p9 = pneg %p580_p8 }
  0x12   : > { %p588_p13 = pnand %p587_p12, %p581_p9 }
  0x14   : > { %591 = shalt.err (!%p588_p13)
}
  0x15   : > { %s604_s20 = smov [#allocation5]   ;;  %151 = sbr.rel (%p642_p2) target bundleno = 505 (0x1f9), region = 32 }
  0x16   : > { %558 = dma.vmem_to_smem (!%p556_p5), %s128_s18, 16, %s604_s20, [#allocation6]  }
  0x1c   : > { %597 = dma.done.wait (%p559_p3), [#allocation6], 16  }
  0x1d   : > { %599 = vsyncadd (%p559_p3), [#allocation6], 4294967280 }
  0x1e   : > { %157 = sfence }
  0x1f   : > { %p176_p0 = scmp.lt.s32.totalorder %s518_s15, 1  ;;  %vm193_vm0 = vcmask 1043456   ;;  %vm190_vm1 = vcmask 46080   ;;  %v605_v12 = vmov 0.0   ;;  %v215_v13 = vlaneseq  ;;  %s530_s25 = sld [smem:[#allocation5 + $0x1]] }
  0x20   : > { %191 = vst.msk [vmem:[#allocation2] sm:$0x3f] %vm190_vm1, %v605_v12  ;;  %192 = vst.msk [vmem:[#allocation3] sm:$0x3f] %vm190_vm1, %v605_v12  ;;  %vm234_vm2 = vcmask 1041409   ;;  %vm236_vm3 = vcmask 1042434  }
  0x21   : > { %s729_s15 = smov (!%p176_p0, %s518_s15), 1  ;;  %v216_v14 = vand.u32 127, %v215_v13  ;;  %v685_v16 = vshrl.u32 %v215_v13, 7  ;;  %vm238_vm4 = vcmask 1043459   ;;  %vm241_vm5 = vcmask 35848   ;;  %s283_s26 = sld [smem:[#allocation5]] }
  0x22   : > { %s549_s21 = sshll.u32 %s729_s15, 4  ;;  %s536_s27 = sld [smem:[#allocation5 + $0x4]] }
  0x23   : > { %s180_s24 = scalar_lea.vmem %s723_s0, %s549_s21  ;;  %v217_v15 = vadd.s32 4294967295, %v216_v14  ;;  %s531_s28 = sld [smem:[#allocation5 + $0xa]] }
  0x24   : > { %v661_v0 = vld [vmem:[%s180_s24 + $0x8] sm:$0xf]  ;;  %v663_v1 = vld [vmem:[%s180_s24] sm:$0xf]  ;;  %v665_v2 = vld [vmem:[%s180_s24 + $0xc] sm:$0xf]  ;;  %s185_s23 = scalar_lea.vmem %s726_s3, %s549_s21 }
  0x25   : > { %v200_v3 = vsel %vm193_vm0, %v661_v0, 0.0  ;;  %v194_v4 = vsel %vm193_vm0, %v663_v1, 0.0  ;;  %v671_v5 = vld [vmem:[%s180_s24 + $0x4] sm:$0xf]  ;;  %v203_v6 = vsel %vm193_vm0, %v665_v2, 0.0  ;;  %v243_v9 = vsel %vm193_vm0, %v663_v1, -inf }
  0x26   : > { %201 = vadd.xlane.f32.xlu1 %v200_v3  ;;  %195 = vadd.xlane.f32.xlu0 %v194_v4  ;;  %v197_v7 = vsel %vm193_vm0, %v671_v5, 0.0  ;;  %v246_v8 = vsel %vm193_vm0, %v671_v5, -inf  ;;  %v249_v10 = vsel %vm193_vm0, %v661_v0, -inf  ;;  %v252_v11 = vsel %vm193_vm0, %v665_v2, -inf  ;;  %s280_s29 = sld [smem:[#allocation4]]  ;;  %s529_s30 = sld [smem:[#allocation5 + $0x9]] }
  0x27   : > { %v220_v19 = vsub.s32 %v217_v15, %v685_v16  ;;  %v294_v44 = vstv %s530_s25  ;;  %s538_s4 = sld [smem:[#allocation5 + $0x5]]  ;;  %s532_s5 = sld [smem:[#allocation5 + $0x2]]  ;;  %v285_v46 = vstv %s283_s26 }
  0x28   : > { %v336_v49 = vstv %s536_s27  ;;  %s542_s6 = sld [smem:[#allocation5 + $0x7]]  ;;  %s606_s7 = smov 127  }
  0x29   : > { %v302_v50 = vstv %s531_s28  ;;  %s533_s8 = sld [smem:[#allocation5 + $0xb]]  ;;  %s544_s9 = sld [smem:[#allocation5 + $0x8]] }
  0x2a   : > { %204 = vadd.xlane.f32.xlu1 %v203_v6  ;;  %198 = vadd.xlane.f32.xlu0 %v197_v7  ;;  %s537_s10 = sld [smem:[#allocation5 + $0xd]]  ;;  %s607_s11 = smov 126  }
  0x2b   : > { %s539_s12 = sld [smem:[#allocation5 + $0xe]]  ;;  %s543_s13 = sld [smem:[#allocation5 + $0x10]] }
  0x2c   : > { %v281_v52 = vstv %s280_s29  ;;  %v290_v53 = vstv %s529_s30  ;;  %s545_s16 = sld [smem:[#allocation5 + $0x11]]  ;;  %s534_s17 = sld [smem:[#allocation5 + $0x3]] }
  0x2d   : > { %v352_v57 = vstv %s538_s4  ;;  %v310_v58 = vstv %s532_s5  ;;  %s535_s18 = sld [smem:[#allocation5 + $0xc]]  ;;  %s540_s2 = sld [smem:[#allocation5 + $0x6]] }
  0x2e   : > { %247 = vmax.xlane.f32.xlu1 %v246_v8  ;;  %244 = vmax.xlane.f32.xlu0 %v243_v9  ;;  %v378_v4 = vstv %s542_s6  ;;  %s541_s19 = sld [smem:[#allocation5 + $0xf]] }
  0x2f   : > { %v318_v6 = vstv %s533_s8  ;;  %v394_v9 = vstv %s544_s9 }
  0x31   : > { %v360_v14 = vstv %s539_s12 }
  0x32   : > { %250 = vmax.xlane.f32.xlu0 %v249_v10  ;;  %253 = vmax.xlane.f32.xlu1 %v252_v11  ;;  %v344_v11 = vstv %s537_s10 }
  0xb3   : > { %v202_v17 = vpop.xlane.xlu1 %201  ;;  %v196_v18 = vpop.xlane.xlu0 %195 }
  0xb4   : > { %v207_v20 = vmul.f32 0.0078125, %v196_v18  ;;  %v209_v21 = vmul.f32 0.0078125, %v202_v17  ;;  %v386_v18 = vstv %s543_s13 }
  0xb6   : > { %v221_v26 = vrot.slane %v207_v20, %v220_v19  ;;  %v229_v29 = vrot.slane %v209_v21, %v220_v19  ;;  %v402_v20 = vstv %s545_s16 }
  0xb7   : > { %v205_v22 = vpop.xlane.xlu1 %204  ;;  %v199_v23 = vpop.xlane.xlu0 %198 }
  0xb8   : > { %v210_v24 = vmul.f32 0.0078125, %v205_v22  ;;  %v208_v25 = vmul.f32 0.0078125, %v199_v23 }
  0xba   : > { %v233_v27 = vrot.slane %v210_v24, %v220_v19  ;;  %v225_v28 = vrot.slane %v208_v25, %v220_v19 }
  0xbb   : > { %v248_v30 = vpop.xlane.xlu1 %247  ;;  %v245_v31 = vpop.xlane.xlu0 %244 }
  0xbc   : > { %v235_v32 = vsel %vm234_vm2, %v225_v28, %v221_v26  ;;  %v266_v33 = vrot.slane %v248_v30, %v220_v19  ;;  %v262_v34 = vrot.slane %v245_v31, %v220_v19  ;;  %v332_v30 = vstv %s535_s18 }
  0xbd   : > { %v237_v35 = vsel %vm236_vm3, %v229_v29, %v235_v32 }
  0xbe   : > { %v239_v36 = vsel %vm238_vm4, %v233_v27, %v237_v35  ;;  %v275_v41 = vsel %vm234_vm2, %v266_v33, %v262_v34  ;;  %v327_v27 = vstv %s534_s17 }
  0xbf   : > { %v251_v37 = vpop.xlane.xlu0 %250  ;;  %v254_v38 = vpop.xlane.xlu1 %253  ;;  %242 = vst.msk [vmem:[#allocation2 + $0x1] sm:$0xf] %vm241_vm5, %v239_v36 }
  0xc0   : > { %v270_v39 = vrot.slane %v251_v37, %v220_v19  ;;  %v274_v40 = vrot.slane %v254_v38, %v220_v19 }
  0xc2   : > { %v276_v42 = vsel %vm236_vm3, %v270_v39, %v275_v41  ;;  %v369_v41 = vstv %s540_s2 }
  0xc3   : > { %v277_v43 = vsel %vm238_vm4, %v274_v40, %v276_v42 }
  0xc4   : > { %279 = vst.msk [vmem:[#allocation3 + $0x1] sm:$0xf] %vm241_vm5, %v277_v43 }
  0xc6   : > { %v284_v45 = vld [vmem:[#allocation2] sm:$0xf] }
  0xc7   : > { %v295_v47 = vmul.f32 %v294_v44, %v284_v45  ;;  %v696_v48 = vld [vmem:[#allocation2 + $0x1] sm:$0xf]  ;;  %v286_v51 = vmul.f32 %v285_v46, %v284_v45  ;;  %v311_v63 = vmul.f32 %v310_v58, %v284_v45  ;;  %v374_v44 = vstv %s541_s19 }
  0xc8   : > { %v337_v54 = vmul.f32 %v336_v49, %v696_v48  ;;  %v353_v61 = vmul.f32 %v352_v57, %v696_v48  ;;  %v368_v3 = vld [vmem:[#allocation2 + $0x2] sm:$0xf]  ;;  %v328_v31 = vmul.f32 %v327_v27, %v696_v48 }
  0xc9   : > { %297 = vrot.lane.b32.xlu0 %v295_v47, %s606_s7  ;;  %v287_v59 = vadd.f32 %v286_v51, %v281_v52  ;;  %v379_v7 = vmul.f32 %v378_v4, %v368_v3  ;;  %v395_v12 = vmul.f32 %v394_v9, %v368_v3  ;;  %v370_v45 = vmul.f32 %v369_v41, %v368_v3 }
  0xcb   : > { %v289_v55 = vld [vmem:[#allocation3] sm:$0xf] }
  0xcc   : > { %v303_v56 = vmul.f32 %v302_v50, %v289_v55  ;;  %v291_v60 = vmul.f32 %v290_v53, %v289_v55  ;;  %v319_v8 = vmul.f32 %v318_v6, %v289_v55  ;;  %v331_v10 = vld [vmem:[#allocation3 + $0x1] sm:$0xf]  ;;  %v438_v6 = vsub.s32 3, %v685_v16 }
  0xcd   : > { %339 = vrot.lane.b32.xlu0 %v337_v54, %s606_s7  ;;  %v345_v13 = vmul.f32 %v344_v11, %v331_v10  ;;  %v361_v15 = vmul.f32 %v360_v14, %v331_v10  ;;  %v373_v17 = vld [vmem:[#allocation3 + $0x2] sm:$0xf]  ;;  %v333_v34 = vmul.f32 %v332_v30, %v331_v10 }
  0xce   : > { %305 = vrot.lane.b32.xlu1 %v303_v56, %s606_s7  ;;  %v292_v62 = vadd.f32 %v291_v60, %v287_v59  ;;  %v387_v19 = vmul.f32 %v386_v18, %v373_v17  ;;  %v403_v21 = vmul.f32 %v402_v20, %v373_v17  ;;  %v375_v49 = vmul.f32 %v374_v44, %v373_v17 }
  0xd1   : > { %355 = vrot.lane.b32.xlu0 %v353_v61, %s607_s11  ;;  %v424_v61 = vsub.s32 1, %v685_v16 }
  0xd2   : > { %313 = vrot.lane.b32.xlu1 %v311_v63, %s607_s11 }
  0xd5   : > { %381 = vrot.lane.b32.xlu0 %v379_v7, %s606_s7  ;;  %v431_v7 = vsub.s32 2, %v685_v16 }
  0xd6   : > { %321 = vrot.lane.b32.xlu1 %v319_v8, %s607_s11 }
  0xd9   : > { %397 = vrot.lane.b32.xlu0 %v395_v12, %s607_s11 }
  0xda   : > { %347 = vrot.lane.b32.xlu1 %v345_v13, %s606_s7 }
  0xde   : > { %363 = vrot.lane.b32.xlu1 %v361_v15, %s607_s11 }
  0xe2   : > { %389 = vrot.lane.b32.xlu1 %v387_v19, %s606_s7 }
  0xe6   : > { %405 = vrot.lane.b32.xlu1 %v403_v21, %s607_s11 }
 0x13b   : > { %v298_v22 = vpop.permute.xlu0 %297 }
 0x13c   : > { %v300_v24 = vadd.f32 %v298_v22, %v292_v62  ;;  %v417_v62 = vsub.s32 0, %v685_v16 }
 0x13f   : > { %v340_v35 = vpop.permute.xlu0 %339 }
 0x140   : > { %v306_v23 = vpop.permute.xlu1 %305 }
 0x141   : > { %v308_v26 = vadd.f32 %v306_v23, %v300_v24 }
 0x143   : > { %v356_v40 = vpop.permute.xlu0 %355 }
 0x144   : > { %v314_v25 = vpop.permute.xlu1 %313 }
 0x145   : > { %v316_v28 = vadd.f32 %v314_v25, %v308_v26 }
 0x147   : > { %v382_v48 = vpop.permute.xlu0 %381 }
 0x148   : > { %v322_v29 = vpop.permute.xlu1 %321 }
 0x149   : > { %v324_v32 = vadd.f32 %v322_v29, %v316_v28 }
 0x14b   : > { %v329_v33 = vadd.f32 %v328_v31, %v324_v32  ;;  %v398_v54 = vpop.permute.xlu0 %397 }
 0x14c   : > { %v348_v37 = vpop.permute.xlu1 %347 }
 0x14d   : > { %v334_v36 = vadd.f32 %v333_v34, %v329_v33 }
 0x14f   : > { %v342_v38 = vadd.f32 %v340_v35, %v334_v36 }
 0x150   : > { %v364_v43 = vpop.permute.xlu1 %363 }
 0x151   : > { %v350_v39 = vadd.f32 %v348_v37, %v342_v38 }
 0x153   : > { %v358_v42 = vadd.f32 %v356_v40, %v350_v39 }
 0x154   : > { %v390_v51 = vpop.permute.xlu1 %389 }
 0x155   : > { %v366_v46 = vadd.f32 %v364_v43, %v358_v42 }
 0x157   : > { %v371_v47 = vadd.f32 %v370_v45, %v366_v46 }
 0x158   : > { %v406_v56 = vpop.permute.xlu1 %405 }
 0x159   : > { %v376_v50 = vadd.f32 %v375_v49, %v371_v47 }
 0x15b   : > { %v384_v52 = vadd.f32 %v382_v48, %v376_v50 }
 0x15d   : > { %v392_v53 = vadd.f32 %v390_v51, %v384_v52 }
 0x15f   : > { %v400_v55 = vadd.f32 %v398_v54, %v392_v53 }
 0x161   : > { %v408_v57 = vadd.f32 %v406_v56, %v400_v55 }
 0x163   : > { %v546_v58 = vmul.f32 -1.442695, %v408_v57 }
 0x165   : > { %573 = vpow2.f32 %v546_v58 }
 0x16f   : > { %v574_v59 = vpop.eup %573 }
 0x170   : > { %v412_v60 = vadd.f32 1.0, %v574_v59 }
 0x172   : > { %575 = vrcp.f32 %v412_v60 }
 0x17c   : > { %v576_v63 = vpop.eup %575 }
 0x17d   : > { %v425_v3 = vrot.slane %v576_v63, %v424_v61  ;;  %v418_v4 = vrot.slane %v576_v63, %v417_v62  ;;  %v439_v8 = vrot.slane %v576_v63, %v438_v6  ;;  %v432_v9 = vrot.slane %v576_v63, %v431_v7 }
 0x17f   : > { %427 = vbcast.lane.b32.xlu1 %v425_v3, 256  ;;  %420 = vbcast.lane.b32.xlu0 %v418_v4, 256 }
 0x183   : > { %441 = vbcast.lane.b32.xlu1 %v439_v8, 256  ;;  %434 = vbcast.lane.b32.xlu0 %v432_v9, 256 }
 0x1f1   : > { %v428_v10 = vpop.permute.xlu1 %427  ;;  %v421_v11 = vpop.permute.xlu0 %420 }
 0x1f2   : > { %v444_v12 = vmul.f32 %v428_v10, %v671_v5  ;;  %v443_v13 = vmul.f32 %v421_v11, %v663_v1 }
 0x1f4   : > { %448 = vst [vmem:[%s185_s23 + $0x4] sm:$0xf] %v444_v12  ;;  %447 = vst [vmem:[%s185_s23] sm:$0xf] %v443_v13 }
 0x1f5   : > { %v442_v16 = vpop.permute.xlu1 %441  ;;  %v435_v14 = vpop.permute.xlu0 %434 }
 0x1f6   : > { %v446_v15 = vmul.f32 %v442_v16, %v665_v2  ;;  %v445_v17 = vmul.f32 %v435_v14, %v661_v0 }
 0x1f8   : > { %450 = vst [vmem:[%s185_s23 + $0xc] sm:$0xf] %v446_v15  ;;  %449 = vst [vmem:[%s185_s23 + $0x8] sm:$0xf] %v445_v17 }
 0x1f9 PF: > { %s15_s14 = sadd.s32 1, %s602_s14  }
 0x1fa   : > { %p12_p1 = scmp.ge.s32.totalorder %s15_s14, 4  }
 0x1fc   :  { %14 = sbr.rel (!%p12_p1) target bundleno = 3 (0x3), region = 67 }
 0x203   :  { %472 = vsyncpa [#allocation6], 1 }
 0x204   :  { %474 = vsyncpa [#allocation6 + $0x1], 1 }

// kernel: forward.24
= control target key start
LH: loop header
LB: loop body
LE: loop exit
PB: predicated region body
PF: predicated region fallthrough
CT: control target
= control target key end

     0   :  { %v49_v0 = vmov 0.0   ;;  %vm40_vm0 = vcmask 1040384   ;;  %s81_s1 = inlined_call_operand.vmem [shape: f32[2,128], index: 1, kind: output, shape index: {}]   ;;  %s82_s0 = inlined_call_operand.vmem [shape: f32[32,128], index: 0, kind: input, shape index: {}]  }
   0x1   :  { %12 = vst [vmem:[%s81_s1] sm:$0x3] %v49_v0  ;;  %v13_v1 = vld [vmem:[%s82_s0] sm:$0xff]  ;;  %v14_v2 = vld [vmem:[%s82_s0 + $0x8] sm:$0xff]  ;;  %v15_v3 = vld [vmem:[%s82_s0 + $0x10] sm:$0xff] }
   0x2   :  { %v16_v4 = vld [vmem:[%s82_s0 + $0x18] sm:$0xff]  ;;  %v18_v5 = vadd.f32 %v14_v2, %v13_v1  ;;  %v27_v6 = vmul.f32 %v13_v1, %v13_v1  ;;  %v28_v7 = vmul.f32 %v14_v2, %v14_v2  ;;  %v29_v8 = vmul.f32 %v15_v3, %v15_v3 }
   0x3   :  { %v30_v10 = vmul.f32 %v16_v4, %v16_v4 }
   0x4   :  { %v19_v9 = vadd.f32 %v18_v5, %v15_v3  ;;  %v31_v11 = vadd.f32 %v28_v7, %v27_v6 }
   0x6   :  { %v20_v12 = vadd.f32 %v19_v9, %v16_v4  ;;  %v32_v13 = vadd.f32 %v31_v11, %v29_v8 }
   0x8   :  { %v21_v14 = vrot.slane %v20_v12, 4  ;;  %v33_v15 = vadd.f32 %v32_v13, %v30_v10  ;;  %v17_v26 = vld [vmem:[%s81_s1] sm:$0x3] }
   0xa   :  { %v22_v16 = vadd.f32 %v21_v14, %v20_v12  ;;  %v34_v17 = vrot.slane %v33_v15, 4 }
   0xc   :  { %v23_v18 = vrot.slane %v22_v16, 2  ;;  %v35_v19 = vadd.f32 %v34_v17, %v33_v15 }
   0xe   :  { %v24_v20 = vadd.f32 %v23_v18, %v22_v16  ;;  %v36_v21 = vrot.slane %v35_v19, 2 }
  0x10   :  { %v25_v22 = vrot.slane %v24_v20, 1  ;;  %v37_v23 = vadd.f32 %v36_v21, %v35_v19 }
  0x12   :  { %v26_v24 = vadd.f32 %v25_v22, %v24_v20  ;;  %v38_v25 = vrot.slane %v37_v23, 1 }
  0x14   :  { %v39_v27 = vadd.f32 %v38_v25, %v37_v23 }
  0x16   :  { %v41_v28 = vsel %vm40_vm0, %v26_v24, %v39_v27 }
  0x17   :  { %v42_v29 = vadd.f32 %v41_v28, %v17_v26 }
  0x19   :  { %43 = vst [vmem:[%s81_s1] sm:$0x3] %v42_v29 }

// kernel: forward.25
= control target key start
LH: loop header
LB: loop body
LE: loop exit
PB: predicated region body
PF: predicated region fallthrough
CT: control target
= control target key end

     0   :  { %v29_v4 = vlaneseq  ;;  %s140_s1 = inlined_call_operand.vmem [shape: f32[2,128], index: 1, kind: input, shape index: {}]   ;;  %s141_s0 = inlined_call_operand.vmem [shape: f32[32,128], index: 0, kind: input, shape index: {}]   ;;  %s142_s2 = inlined_call_operand.vmem [shape: f32[1,128], index: 2, kind: input, shape index: {}]   ;;  %s143_s3 = inlined_call_operand.vmem [shape: f32[1,128], index: 3, kind: input, shape index: {}]   ;;  %s144_s4 = inlined_call_operand.vmem [shape: f32[32,128], index: 4, kind: output, shape index: {}]  }
   0x1   :  { %v21_v0 = vld [vmem:[%s140_s1] sm:$0x1]  ;;  %v23_v1 = vld [vmem:[%s140_s1 + $0x1] sm:$0x1]  ;;  %v18_v12 = vld [vmem:[%s141_s0 + $0x8] sm:$0xff] }
   0x2   :  { %v22_v2 = vmul.f32 0.03125, %v21_v0  ;;  %v24_v3 = vmul.f32 0.03125, %v23_v1  ;;  %v30_v7 = vshrl.u32 %v29_v4, 7  ;;  %v17_v10 = vld [vmem:[%s141_s0] sm:$0xff]  ;;  %v19_v13 = vld [vmem:[%s141_s0 + $0x10] sm:$0xff]  ;;  %v20_v14 = vld [vmem:[%s141_s0 + $0x18] sm:$0xff] }
   0x3   :  { %v75_v21 = vld [vmem:[%s142_s2] ss:$0 sm:$0xff] }
   0x4   :  { %v25_v5 = vmul.f32 %v22_v2, %v22_v2  ;;  %v31_v9 = vsub.s32 0, %v30_v7  ;;  %v76_v26 = vld [vmem:[%s143_s3] ss:$0 sm:$0xff] }
   0x6   :  { %v26_v6 = vsub.f32 %v24_v3, %v25_v5  ;;  %v32_v11 = vrot.slane %v22_v2, %v31_v9 }
   0x8   :  { %v27_v8 = vadd.f32 1e-05, %v26_v6  ;;  %v33_v15 = vsub.f32 %v17_v10, %v32_v11  ;;  %v34_v16 = vsub.f32 %v18_v12, %v32_v11  ;;  %v35_v17 = vsub.f32 %v19_v13, %v32_v11 }
   0x9   :  { %v36_v18 = vsub.f32 %v20_v14, %v32_v11 }
   0xa   :  { %77 = vrsqrt.f32 %v27_v8 }
  0x14   :  { %v78_v19 = vpop.eup %77 }
  0x15   :  { %v40_v20 = vrot.slane %v78_v19, %v31_v9 }
  0x17   :  { %v41_v22 = vmul.f32 %v40_v20, %v33_v15  ;;  %v42_v23 = vmul.f32 %v40_v20, %v34_v16  ;;  %v43_v24 = vmul.f32 %v40_v20, %v35_v17  ;;  %v44_v25 = vmul.f32 %v40_v20, %v36_v18 }
  0x19   :  { %v52_v27 = vmul.f32 %v75_v21, %v41_v22  ;;  %v53_v28 = vmul.f32 %v75_v21, %v42_v23  ;;  %v54_v29 = vmul.f32 %v75_v21, %v43_v24  ;;  %v55_v30 = vmul.f32 %v75_v21, %v44_v25 }
  0x1b   :  { %v63_v31 = vadd.f32 %v76_v26, %v52_v27  ;;  %v64_v32 = vadd.f32 %v76_v26, %v53_v28  ;;  %v65_v33 = vadd.f32 %v76_v26, %v54_v29  ;;  %v66_v34 = vadd.f32 %v76_v26, %v55_v30 }
  0x1d   :  { %67 = vst [vmem:[%s144_s4] sm:$0xff] %v63_v31  ;;  %68 = vst [vmem:[%s144_s4 + $0x8] sm:$0xff] %v64_v32 }
  0x1e   :  { %69 = vst [vmem:[%s144_s4 + $0x10] sm:$0xff] %v65_v33  ;;  %70 = vst [vmem:[%s144_s4 + $0x18] sm:$0xff] %v66_v34 }

// kernel: forward.21
= control target key start
LH: loop header
LB: loop body
LE: loop exit
PB: predicated region body
PF: predicated region fallthrough
CT: control target
= control target key end

     0   :  { %s2366_s12 = smov 0   ;;  %s2734_s0 = inlined_call_operand.vmem [shape: f32[2,10,10,128], index: 0, kind: input, shape index: {}]   ;;  %s2735_s1 = inlined_call_operand.vmem [shape: bf16[9,128,128], index: 1, kind: input, shape index: {}]   ;;  %s2736_s2 = inlined_call_operand.vmem [shape: f32[1,128], index: 2, kind: input, shape index: {}]   ;;  %s2737_s3 = inlined_call_operand.vmem [shape: f32[2,8,8,128], index: 3, kind: output, shape index: {}]  }
   0x1 LB: > { %s1593_s13 = sadd.s32 4294967295, %s2344_s12   ;;  %p1597_p0 = scmp.ge.s32.totalorder %s2344_s12, 1  ;;  %s2344_s12 = sphi %s2366_s12, %s13_s12  }
   0x2   : > { %p137_p1 = scmp.lt.s32.totalorder %s2344_s12, 3 }
   0x4   : > { %p138_p2 = pnand %p1597_p0, %p137_p1 }
   0x5   : > { %v2266_v0 = vld [vmem:[%s2735_s1 + $0x40] sm:$0xff] (!%p138_p2)   ;;  %p161_p3 = scmp.lt.s32.totalorder (!%p138_p2), %s1593_s13, 1  ;;  %v2268_v2 = vld [vmem:[%s2735_s1 + $0x48] sm:$0xff] (!%p138_p2)   ;;  %v2270_v4 = vld [vmem:[%s2735_s1 + $0x50] sm:$0xff] (!%p138_p2)  }
   0x6   : > { %141 = sbr.rel (%p138_p2) target bundleno = 389 (0x185), region = 32  ;;  %v2267_v1 = vld [vmem:[%s2735_s1 + $0x100] sm:$0xff] (!%p138_p2)   ;;  %1961 = vmatprep.subr.bf16.mxu1 (!%p138_p2), %v2266_v0  ;;  %v2269_v3 = vld [vmem:[%s2735_s1 + $0x108] sm:$0xff] (!%p138_p2)   ;;  %v2271_v5 = vld [vmem:[%s2735_s1 + $0x110] sm:$0xff] (!%p138_p2)  }
   0x7   : > { %2057 = vmatprep.subr.bf16.mxu0 (!%p138_p2), %v2267_v1  ;;  %1962 = vmatpush3.bf16.msra.mxu1 (!%p138_p2), %v2266_v0  ;;  %v2272_v6 = vld [vmem:[%s2735_s1 + $0x58] sm:$0xff] (!%p138_p2)   ;;  %v2274_v8 = vld [vmem:[%s2735_s1 + $0x60] sm:$0xff] (!%p138_p2)   ;;  %v2276_v10 = vld [vmem:[%s2735_s1 + $0x68] sm:$0xff] (!%p138_p2)  }
   0x8   : > { %2058 = vmatpush3.bf16.msra.mxu0 (!%p138_p2), %v2267_v1  ;;  %1963 = vmatprep.subr.bf16.mxu1 (!%p138_p2), %v2268_v2  ;;  %v2273_v7 = vld [vmem:[%s2735_s1 + $0x118] sm:$0xff] (!%p138_p2)   ;;  %v2275_v9 = vld [vmem:[%s2735_s1 + $0x120] sm:$0xff] (!%p138_p2)   ;;  %v2277_v13 = vld [vmem:[%s2735_s1 + $0x128] sm:$0xff] (!%p138_p2)  }
   0x9   : > { %2059 = vmatprep.subr.bf16.mxu0 (!%p138_p2), %v2269_v3  ;;  %v2278_v17 = vld [vmem:[%s2735_s1 + $0x70] sm:$0xff] (!%p138_p2)   ;;  %v2280_v19 = vld [vmem:[%s2735_s1 + $0x78] sm:$0xff] (!%p138_p2)   ;;  %v2282_v21 = vld [vmem:[%s2735_s1] sm:$0xff] (!%p138_p2)  }
   0xa   : > { %v2279_v18 = vld [vmem:[%s2735_s1 + $0x130] sm:$0xff] (!%p138_p2)   ;;  %v2281_v20 = vld [vmem:[%s2735_s1 + $0x138] sm:$0xff] (!%p138_p2)   ;;  %v2283_v24 = vld [vmem:[%s2735_s1 + $0x140] sm:$0xff] (!%p138_p2)  }
   0xb   : > { %1964 = vmatpush3.bf16.msra.mxu1 (!%p138_p2), %v2268_v2  ;;  %v2284_v29 = vld [vmem:[%s2735_s1 + $0x8] sm:$0xff] (!%p138_p2)   ;;  %v2286_v34 = vld [vmem:[%s2735_s1 + $0x10] sm:$0xff] (!%p138_p2)   ;;  %v2288_v43 = vld [vmem:[%s2735_s1 + $0x18] sm:$0xff] (!%p138_p2)  }
   0xc   : > { %2060 = vmatpush3.bf16.msra.mxu0 (!%p138_p2), %v2269_v3  ;;  %1965 = vmatprep.subr.bf16.mxu1 (!%p138_p2), %v2270_v4  ;;  %v2285_v30 = vld [vmem:[%s2735_s1 + $0x148] sm:$0xff] (!%p138_p2)   ;;  %v2287_v36 = vld [vmem:[%s2735_s1 + $0x150] sm:$0xff] (!%p138_p2)   ;;  %v2289_v44 = vld [vmem:[%s2735_s1 + $0x158] sm:$0xff] (!%p138_p2)  }
   0xd   : > { %s2739_s13 = smov (!%p161_p3, %s1593_s13), 1  ;;  %2061 = vmatprep.subr.bf16.mxu0 %v2271_v5  ;;  %v2290_v47 = vld [vmem:[%s2735_s1 + $0x20] sm:$0xff]   ;;  %v2292_v49 = vld [vmem:[%s2735_s1 + $0x28] sm:$0xff]   ;;  %v2294_v51 = vld [vmem:[%s2735_s1 + $0x30] sm:$0xff]  }
   0xe   : > { %s2257_s30 = smul.u32 160, %s2739_s13  ;;  %v2291_v48 = vld [vmem:[%s2735_s1 + $0x160] sm:$0xff]   ;;  %v2293_v50 = vld [vmem:[%s2735_s1 + $0x168] sm:$0xff]   ;;  %v2295_v52 = vld [vmem:[%s2735_s1 + $0x170] sm:$0xff]   ;;  %s1852_s18 = sshll.u32 %s2739_s13, 6 }
   0xf   : > { %1966 = vmatpush3.bf16.msra.mxu1 %v2270_v4  ;;  %v2296_v53 = vld [vmem:[%s2735_s1 + $0x38] sm:$0xff]   ;;  %v2298_v57 = vld [vmem:[%s2735_s1 + $0x80] sm:$0xff]   ;;  %v2300_v0 = vld [vmem:[%s2735_s1 + $0x88] sm:$0xff]   ;;  %s170_s21 = scalar_lea.vmem %s2737_s3, %s1852_s18 }
  0x10   : > { %2062 = vmatpush3.bf16.msra.mxu0 %v2271_v5  ;;  %1967 = vmatprep.subr.bf16.mxu1 %v2272_v6  ;;  %s2410_s10 = scalar_lea.vmem %s2734_s0, %s2257_s30  ;;  %v2297_v54 = vld [vmem:[%s2735_s1 + $0x178] sm:$0xff]   ;;  %v2299_v59 = vld [vmem:[%s2735_s1 + $0x180] sm:$0xff]   ;;  %v2301_v4 = vld [vmem:[%s2735_s1 + $0x188] sm:$0xff]  }
  0x11   : > { %2063 = vmatprep.subr.bf16.mxu0 %v2273_v7  ;;  %v200_v11 = vld [vmem:[%s2410_s10 + $0x1] sm:$0xff]  ;;  %v201_v12 = vld [vmem:[%s2410_s10 + $0x11] sm:$0xff] }
  0x12   : > { %v208_v14 = vpack.c.bf16 %v201_v12, %v200_v11  ;;  %v1690_v15 = vld [vmem:[%s2410_s10 + $0x21] sm:$0xff]  ;;  %v203_v22 = vld [vmem:[%s2410_s10 + $0x31] sm:$0xff] }
  0x13   : > { %1968 = vmatpush3.bf16.msra.mxu1 %v2272_v6  ;;  %v764_v16 = vpack.c.bf16 %v1690_v15, %v201_v12  ;;  %v1692_v23 = vld [vmem:[%s2410_s10 + $0x41] sm:$0xff]  ;;  %v2441_v25 = vpack.c.bf16 %v203_v22, %v1690_v15  ;;  %v205_v26 = vld [vmem:[%s2410_s10 + $0x51] sm:$0xff] }
  0x14   : > { %2064 = vmatpush3.bf16.msra.mxu0 %v2273_v7  ;;  %1969 = vmatprep.subr.bf16.mxu1 %v2274_v8  ;;  %v765_v27 = vpack.c.bf16 %v1692_v23, %v203_v22  ;;  %v1694_v28 = vld [vmem:[%s2410_s10 + $0x61] sm:$0xff]  ;;  %v2451_v31 = vpack.c.bf16 %v205_v26, %v1692_v23  ;;  %v207_v33 = vld [vmem:[%s2410_s10 + $0x71] sm:$0xff] }
  0x15   : > { %2065 = vmatprep.subr.bf16.mxu0 %v2275_v9  ;;  %1977 = vmatprep.mubr.bf16.mxu1 %v208_v14  ;;  %v766_v32 = vpack.c.bf16 %v1694_v28, %v205_v26  ;;  %v2459_v35 = vld [vmem:[%s2410_s10 + $0x81] sm:$0xff]  ;;  %v2465_v37 = vpack.c.bf16 %v207_v33, %v1694_v28  ;;  %v2469_v39 = vld [vmem:[%s2410_s10 + $0x10] sm:$0xff]  ;;  %v2312_v26 = vld [vmem:[%s2735_s1 + $0xb8] sm:$0xff]  }
  0x16   : > { %2073 = vmatprep.mubr.bf16.mxu0 %v764_v16  ;;  %v172_v38 = vld [vmem:[%s2410_s10] sm:$0xff]  ;;  %v767_v40 = vpack.c.bf16 %v2459_v35, %v207_v33  ;;  %v2473_v41 = vld [vmem:[%s2410_s10 + $0x12] sm:$0xff]  ;;  %v2309_v22 = vld [vmem:[%s2735_s1 + $0x1a8] sm:$0xff]  }
  0x17   : > { %1970 = vmatpush3.bf16.msra.mxu1 %v2274_v8  ;;  %v2476_v42 = vld [vmem:[%s2410_s10 + $0x22] sm:$0xff]  ;;  %v180_v45 = vpack.c.bf16 %v2469_v39, %v172_v38  ;;  %v2516_v56 = vld [vmem:[%s2410_s10 + $0x30] sm:$0xff]  ;;  %v2304_v16 = vld [vmem:[%s2735_s1 + $0x98] sm:$0xff]  }
  0x18   : > { %2066 = vmatpush3.bf16.msra.mxu0 %v2275_v9  ;;  %1971 = vmatprep.subr.bf16.mxu1 %v2276_v10  ;;  %v914_v46 = vpack.c.bf16 %v2476_v42, %v2473_v41  ;;  %v2513_v55 = vld [vmem:[%s2410_s10 + $0x20] sm:$0xff]  ;;  %v2522_v58 = vld [vmem:[%s2410_s10 + $0x32] sm:$0xff]  ;;  %v2317_v33 = vld [vmem:[%s2735_s1 + $0x1c8] sm:$0xff]  }
  0x19   : > { %2067 = vmatprep.subr.bf16.mxu0 %v2277_v13  ;;  %v2528_v60 = vld [vmem:[%s2410_s10 + $0x42] sm:$0xff]  ;;  %v2534_v62 = vld [vmem:[%s2410_s10 + $0x50] sm:$0xff]  ;;  %v181_v63 = vpack.c.bf16 %v2516_v56, %v2513_v55 }
  0x1a   : > { %v2531_v61 = vld [vmem:[%s2410_s10 + $0x40] sm:$0xff]  ;;  %v2542_v1 = vld [vmem:[%s2410_s10 + $0x52] sm:$0xff]  ;;  %v915_v2 = vpack.c.bf16 %v2528_v60, %v2522_v58 }
  0x1b   : > { %1972 = vmatpush3.bf16.msra.mxu1 %v2276_v10  ;;  %v2547_v3 = vld [vmem:[%s2410_s10 + $0x62] sm:$0xff]  ;;  %v2554_v5 = vpack.c.bf16 %v2534_v62, %v2531_v61  ;;  %v2302_v7 = vld [vmem:[%s2735_s1 + $0x90] sm:$0xff]  }
  0x1c   : > { %2068 = vmatpush3.bf16.msra.mxu0 %v2277_v13  ;;  %1973 = vmatprep.subr.bf16.mxu1 %v2278_v17  ;;  %v2557_v6 = vld [vmem:[%s2410_s10 + $0x60] sm:$0xff]  ;;  %v916_v8 = vpack.c.bf16 %v2547_v3, %v2542_v1  ;;  %v2565_v9 = vld [vmem:[%s2410_s10 + $0x70] sm:$0xff] }
  0x1d   : > { %2069 = vmatprep.subr.bf16.mxu0 %v2279_v18  ;;  %v2568_v10 = vld [vmem:[%s2410_s10 + $0x72] sm:$0xff]  ;;  %v2571_v11 = vld [vmem:[%s2410_s10 + $0x82] sm:$0xff]  ;;  %v183_v13 = vpack.c.bf16 %v2565_v9, %v2557_v6 }
  0x1e   : > { %v2303_v12 = vld [vmem:[%s2735_s1 + $0x190] sm:$0xff]   ;;  %v455_v14 = vld [vmem:[%s2410_s10 + $0x2] sm:$0xff]  ;;  %v917_v15 = vpack.c.bf16 %v2571_v11, %v2568_v10 }
  0x1f   : > { %1974 = vmatpush3.bf16.msra.mxu1 %v2278_v17  ;;  %v2305_v17 = vld [vmem:[%s2735_s1 + $0x198] sm:$0xff]   ;;  %v2310_v23 = vld [vmem:[%s2735_s1 + $0xb0] sm:$0xff]   ;;  %v2314_v28 = vld [vmem:[%s2735_s1 + $0xc0] sm:$0xff]  }
  0x20   : > { %2070 = vmatpush3.bf16.msra.mxu0 %v2279_v18  ;;  %1975 = vmatprep.subr.bf16.mxu1 %v2280_v19  ;;  %v463_v18 = vpack.c.bf16 %v2473_v41, %v455_v14  ;;  %v2639_v38 = vld [vmem:[%s2410_s10 + $0x80] sm:$0xff]  ;;  %v2319_v41 = vld [vmem:[%s2735_s1 + $0x1d0] sm:$0xff]  }
  0x21   : > { %2071 = vmatprep.subr.bf16.mxu0 %v2281_v20 }
  0x23   : > { %1976 = vmatpush3.bf16.msra.mxu1 %v2280_v19  ;;  %v2306_v19 = vld [vmem:[%s2735_s1 + $0xa0] sm:$0xff]  }
  0x24   : > { %2072 = vmatpush3.bf16.msra.mxu0 %v2281_v20  ;;  %1985 = vmatprep.subr.bf16.mxu1 %v2282_v21  ;;  %v2307_v20 = vld [vmem:[%s2735_s1 + $0x1a0] sm:$0xff]  }
  0x25   : > { %2081 = vmatprep.subr.bf16.mxu0 %v2283_v24 }
  0x26   : > { %1978 = vmatmul.mubr.bf16.vlgmr.msra.gmra.mrb[0].mxu1 %v2441_v25 }
  0x27   : > { %1986 = vmatpush3.bf16.msra.mxu1 %v2282_v21  ;;  %2074 = vmatmul.mubr.bf16.vlgmr.msra.gmra.mrb[0].mxu0 %v765_v27  ;;  %v2308_v21 = vld [vmem:[%s2735_s1 + $0xa8] sm:$0xff]   ;;  %v2313_v27 = vld [vmem:[%s2735_s1 + $0x1b8] sm:$0xff]  }
  0x28   : > { %2082 = vmatpush3.bf16.msra.mxu0 %v2283_v24  ;;  %1987 = vmatprep.subr.bf16.mxu1 %v2284_v29  ;;  %v2311_v24 = vld [vmem:[%s2735_s1 + $0x1b0] sm:$0xff]  }
  0x29   : > { %2083 = vmatprep.subr.bf16.mxu0 %v2285_v30  ;;  %1981 = vmatprep.mubr.bf16.mxu1 %v2451_v31 }
  0x2a   : > { %2077 = vmatprep.mubr.bf16.mxu0 %v766_v32  ;;  %v2316_v32 = vld [vmem:[%s2735_s1 + $0xc8] sm:$0xff]  }
  0x2b   : > { %1988 = vmatpush3.bf16.msra.mxu1 %v2284_v29  ;;  %v2315_v29 = vld [vmem:[%s2735_s1 + $0x1c0] sm:$0xff]  }
  0x2c   : > { %2084 = vmatpush3.bf16.msra.mxu0 %v2285_v30  ;;  %1989 = vmatprep.subr.bf16.mxu1 %v2286_v34  ;;  %v2621_v30 = vpack.c.bf16 %v2522_v58, %v2476_v42  ;;  %v2648_v42 = vpack.c.bf16 %v2568_v10, %v2547_v3  ;;  %v1792_v58 = vld [vmem:[%s2410_s10 + $0x91] sm:$0xff] }
  0x2d   : > { %2085 = vmatprep.subr.bf16.mxu0 %v2287_v36 }
  0x2e   : > { %1982 = vmatmul.mubr.bf16.gmra.mrb[4].mxu1 %v2465_v37 }
  0x2f   : > { %1990 = vmatpush3.bf16.msra.mxu1 %v2286_v34  ;;  %2078 = vmatmul.mubr.bf16.gmra.mrb[4].mxu0 %v767_v40  ;;  %v2631_v34 = vpack.c.bf16 %v2542_v1, %v2528_v60  ;;  %v1760_v40 = vld [vmem:[%s2410_s10 + $0x90] sm:$0xff]  ;;  %v1218_v60 = vpack.c.bf16 %v1792_v58, %v2459_v35  ;;  %v2335_v35 = vld [vmem:[%s2735_s1 + $0x228] sm:$0xff]  }
  0x30   : > { %2086 = vmatpush3.bf16.msra.mxu0 %v2287_v36  ;;  %1991 = vmatprep.subr.bf16.mxu1 %v2288_v43  ;;  %v2318_v36 = vld [vmem:[%s2735_s1 + $0xd0] sm:$0xff]  }
  0x31   : > { %2087 = vmatprep.subr.bf16.mxu0 %v2289_v44  ;;  %2001 = vmatprep.mubr.bf16.mxu1 %v180_v45  ;;  %v2321_v45 = vld [vmem:[%s2735_s1 + $0x1d8] sm:$0xff]  }
  0x32   : > { %2097 = vmatprep.mubr.bf16.mxu0 %v914_v46  ;;  %v614_v46 = vpack.c.bf16 %v2513_v55, %v2469_v39  ;;  %v2324_v39 = vld [vmem:[%s2735_s1 + $0xe8] sm:$0xff]  }
  0x33   : > { %1992 = vmatpush3.bf16.msra.mxu1 %v2288_v43  ;;  %v1068_v43 = vpack.c.bf16 %v1760_v40, %v2639_v38  ;;  %v2331_v55 = vld [vmem:[%s2735_s1 + $0x208] sm:$0xff]  }
  0x34   : > { %2088 = vmatpush3.bf16.msra.mxu0 %v2289_v44  ;;  %1993 = vmatprep.subr.bf16.mxu1 %v2290_v47  ;;  %v2320_v44 = vld [vmem:[%s2735_s1 + $0xd8] sm:$0xff]  }
  0x35   : > { %2089 = vmatprep.subr.bf16.mxu0 %v2291_v48 }
  0x37   : > { %1994 = vmatpush3.bf16.msra.mxu1 %v2290_v47  ;;  %v2322_v47 = vld [vmem:[%s2735_s1 + $0xe0] sm:$0xff]  }
  0x38   : > { %2090 = vmatpush3.bf16.msra.mxu0 %v2291_v48  ;;  %1995 = vmatprep.subr.bf16.mxu1 %v2292_v49  ;;  %v2323_v48 = vld [vmem:[%s2735_s1 + $0x1e0] sm:$0xff]  }
  0x39   : > { %2091 = vmatprep.subr.bf16.mxu0 %v2293_v50 }
  0x3b   : > { %1996 = vmatpush3.bf16.msra.mxu1 %v2292_v49  ;;  %v2325_v49 = vld [vmem:[%s2735_s1 + $0x1e8] sm:$0xff]  }
  0x3c   : > { %2092 = vmatpush3.bf16.msra.mxu0 %v2293_v50  ;;  %1997 = vmatprep.subr.bf16.mxu1 %v2294_v51  ;;  %v2326_v50 = vld [vmem:[%s2735_s1 + $0xf0] sm:$0xff]  }
  0x3d   : > { %2093 = vmatprep.subr.bf16.mxu0 %v2295_v52 }
  0x3f   : > { %1998 = vmatpush3.bf16.msra.mxu1 %v2294_v51  ;;  %v2328_v51 = vld [vmem:[%s2735_s1 + $0xf8] sm:$0xff]  }
  0x40   : > { %2094 = vmatpush3.bf16.msra.mxu0 %v2295_v52  ;;  %1999 = vmatprep.subr.bf16.mxu1 %v2296_v53  ;;  %v2329_v52 = vld [vmem:[%s2735_s1 + $0x1f8] sm:$0xff]  }
  0x41   : > { %2095 = vmatprep.subr.bf16.mxu0 %v2297_v54 }
  0x43   : > { %2000 = vmatpush3.bf16.msra.mxu1 %v2296_v53  ;;  %v2330_v53 = vld [vmem:[%s2735_s1 + $0x200] sm:$0xff]  }
  0x44   : > { %2096 = vmatpush3.bf16.msra.mxu0 %v2297_v54  ;;  %2009 = vmatprep.subr.bf16.mxu1 %v2298_v57  ;;  %v615_v54 = vpack.c.bf16 %v2531_v61, %v2516_v56  ;;  %v2332_v56 = vld [vmem:[%s2735_s1 + $0x210] sm:$0xff]  }
  0x45   : > { %2105 = vmatprep.subr.bf16.mxu0 %v2299_v59  ;;  %v2336_v61 = vld [vmem:[%s2735_s1 + $0x230] sm:$0xff]  }
  0x46   : > { %2002 = vmatmul.mubr.bf16.vlgmr.msra.gmra.mrb[0].mxu1 %v181_v63 }
  0x47   : > { %2010 = vmatpush3.bf16.msra.mxu1 %v2298_v57  ;;  %2098 = vmatmul.mubr.bf16.vlgmr.msra.gmra.mrb[0].mxu0 %v915_v2  ;;  %v616_v57 = vpack.c.bf16 %v2557_v6, %v2534_v62  ;;  %v2337_v62 = vld [vmem:[%s2735_s1 + $0x238] sm:$0xff]  }
  0x48   : > { %2106 = vmatpush3.bf16.msra.mxu0 %v2299_v59  ;;  %2011 = vmatprep.subr.bf16.mxu1 %v2300_v0  ;;  %v617_v59 = vpack.c.bf16 %v2639_v38, %v2565_v9 }
  0x49   : > { %2107 = vmatprep.subr.bf16.mxu0 %v2301_v4  ;;  %2005 = vmatprep.mubr.bf16.mxu1 %v2554_v5 }
  0x4a   : > { %2101 = vmatprep.mubr.bf16.mxu0 %v916_v8 }
  0x4b   : > { %2012 = vmatpush3.bf16.msra.mxu1 %v2300_v0 }
  0x4c   : > { %2108 = vmatpush3.bf16.msra.mxu0 %v2301_v4  ;;  %2013 = vmatprep.subr.bf16.mxu1 %v2302_v7 }
  0x4d   : > { %2109 = vmatprep.subr.bf16.mxu0 %v2303_v12 }
  0x4e   : > { %2006 = vmatmul.mubr.bf16.gmra.mrb[4].mxu1 %v183_v13 }
  0x4f   : > { %2014 = vmatpush3.bf16.msra.mxu1 %v2302_v7  ;;  %2102 = vmatmul.mubr.bf16.gmra.mrb[4].mxu0 %v917_v15 }
  0x50   : > { %2110 = vmatpush3.bf16.msra.mxu0 %v2303_v12  ;;  %2015 = vmatprep.subr.bf16.mxu1 %v2304_v16 }
  0x51   : > { %2111 = vmatprep.subr.bf16.mxu0 %v2305_v17  ;;  %2025 = vmatprep.mubr.bf16.mxu1 %v463_v18 }
  0x52   : > { %2121 = vmatprep.mubr.bf16.mxu0 %v181_v63  ;;  %v1824_v63 = vld [vmem:[%s2410_s10 + $0x92] sm:$0xff] }
  0x53   : > { %2016 = vmatpush3.bf16.msra.mxu1 %v2304_v16  ;;  %v1368_v0 = vpack.c.bf16 %v1824_v63, %v2571_v11 }
  0x54   : > { %2112 = vmatpush3.bf16.msra.mxu0 %v2305_v17  ;;  %2017 = vmatprep.subr.bf16.mxu1 %v2306_v19  ;;  %v1849_v17 = vld [vmem:[%s2736_s2] ss:$0 sm:$0xff] }
  0x55   : > { %2113 = vmatprep.subr.bf16.mxu0 %v2307_v20 }
  0x57   : > { %2018 = vmatpush3.bf16.msra.mxu1 %v2306_v19 }
  0x58   : > { %2114 = vmatpush3.bf16.msra.mxu0 %v2307_v20  ;;  %2019 = vmatprep.subr.bf16.mxu1 %v2308_v21 }
  0x59   : > { %2115 = vmatprep.subr.bf16.mxu0 %v2309_v22 }
  0x5b   : > { %2020 = vmatpush3.bf16.msra.mxu1 %v2308_v21 }
  0x5c   : > { %2116 = vmatpush3.bf16.msra.mxu0 %v2309_v22  ;;  %2021 = vmatprep.subr.bf16.mxu1 %v2310_v23 }
  0x5d   : > { %2117 = vmatprep.subr.bf16.mxu0 %v2311_v24 }
  0x5f   : > { %2022 = vmatpush3.bf16.msra.mxu1 %v2310_v23 }
  0x60   : > { %2118 = vmatpush3.bf16.msra.mxu0 %v2311_v24  ;;  %2023 = vmatprep.subr.bf16.mxu1 %v2312_v26 }
  0x61   : > { %2119 = vmatprep.subr.bf16.mxu0 %v2313_v27 }
  0x63   : > { %2024 = vmatpush3.bf16.msra.mxu1 %v2312_v26 }
  0x64   : > { %2120 = vmatpush3.bf16.msra.mxu0 %v2313_v27  ;;  %2033 = vmatprep.subr.bf16.mxu1 %v2314_v28 }
  0x65   : > { %2129 = vmatprep.subr.bf16.mxu0 %v2315_v29 }
  0x66   : > { %2026 = vmatmul.mubr.bf16.vlgmr.msra.gmra.mrb[0].mxu1 %v2621_v30 }
  0x67   : > { %2034 = vmatpush3.bf16.msra.mxu1 %v2314_v28  ;;  %2122 = vmatmul.mubr.bf16.vlgmr.msra.gmra.mrb[0].mxu0 %v2554_v5 }
  0x68   : > { %2130 = vmatpush3.bf16.msra.mxu0 %v2315_v29  ;;  %2035 = vmatprep.subr.bf16.mxu1 %v2316_v32 }
  0x69   : > { %2131 = vmatprep.subr.bf16.mxu0 %v2317_v33  ;;  %2029 = vmatprep.mubr.bf16.mxu1 %v2631_v34 }
  0x6a   : > { %2125 = vmatprep.mubr.bf16.mxu0 %v183_v13 }
  0x6b   : > { %2036 = vmatpush3.bf16.msra.mxu1 %v2316_v32 }
  0x6c   : > { %2132 = vmatpush3.bf16.msra.mxu0 %v2317_v33  ;;  %2037 = vmatprep.subr.bf16.mxu1 %v2318_v36 }
  0x6d   : > { %2133 = vmatprep.subr.bf16.mxu0 %v2319_v41 }
  0x6e   : > { %2030 = vmatmul.mubr.bf16.gmra.mrb[4].mxu1 %v2648_v42 }
  0x6f   : > { %2038 = vmatpush3.bf16.msra.mxu1 %v2318_v36  ;;  %2126 = vmatmul.mubr.bf16.gmra.mrb[4].mxu0 %v1068_v43 }
  0x70   : > { %2134 = vmatpush3.bf16.msra.mxu0 %v2319_v41  ;;  %2039 = vmatprep.subr.bf16.mxu1 %v2320_v44 }
  0x71   : > { %2135 = vmatprep.subr.bf16.mxu0 %v2321_v45  ;;  %2049 = vmatprep.mubr.bf16.mxu1 %v614_v46 }
  0x72   : > { %2145 = vmatprep.mubr.bf16.mxu0 %v2441_v25  ;;  %v2327_v25 = vld [vmem:[%s2735_s1 + $0x1f0] sm:$0xff]  }
  0x73   : > { %2040 = vmatpush3.bf16.msra.mxu1 %v2320_v44 }
  0x74   : > { %2136 = vmatpush3.bf16.msra.mxu0 %v2321_v45  ;;  %2041 = vmatprep.subr.bf16.mxu1 %v2322_v47 }
  0x75   : > { %2137 = vmatprep.subr.bf16.mxu0 %v2323_v48 }
  0x77   : > { %2042 = vmatpush3.bf16.msra.mxu1 %v2322_v47 }
  0x78   : > { %2138 = vmatpush3.bf16.msra.mxu0 %v2323_v48  ;;  %2043 = vmatprep.subr.bf16.mxu1 %v2324_v39 }
  0x79   : > { %2139 = vmatprep.subr.bf16.mxu0 %v2325_v49 }
  0x7b   : > { %2044 = vmatpush3.bf16.msra.mxu1 %v2324_v39 }
  0x7c   : > { %2140 = vmatpush3.bf16.msra.mxu0 %v2325_v49  ;;  %2045 = vmatprep.subr.bf16.mxu1 %v2326_v50 }
  0x7d   : > { %2141 = vmatprep.subr.bf16.mxu0 %v2327_v25 }
  0x7f   : > { %2046 = vmatpush3.bf16.msra.mxu1 %v2326_v50 }
  0x80   : > { %2142 = vmatpush3.bf16.msra.mxu0 %v2327_v25  ;;  %2047 = vmatprep.subr.bf16.mxu1 %v2328_v51 }
  0x81   : > { %2143 = vmatprep.subr.bf16.mxu0 %v2329_v52 }
  0x83   : > { %2048 = vmatpush3.bf16.msra.mxu1 %v2328_v51 }
  0x84   : > { %2144 = vmatpush3.bf16.msra.mxu0 %v2329_v52  ;;  %2177 = vmatprep.subr.bf16.mxu1 %v2330_v53 }
  0x85   : > { %2153 = vmatprep.subr.bf16.mxu0 %v2330_v53 }
  0x86   : > { %2050 = vmatmul.mubr.bf16.vlgmr.msra.gmra.mrb[0].mxu1 %v615_v54 }
  0x87   : > { %2146 = vmatmul.mubr.bf16.vlgmr.msra.gmra.mrb[0].mxu0 %v2451_v31  ;;  %2185 = vmatpush3.bf16.msra.mxu1 %v2330_v53  ;;  %v2333_v31 = vld [vmem:[%s2735_s1 + $0x218] sm:$0xff]  }
  0x88   : > { %2154 = vmatpush3.bf16.msra.mxu0 %v2330_v53  ;;  %2178 = vmatprep.subr.bf16.mxu1 %v2331_v55 }
  0x89   : > { %2155 = vmatprep.subr.bf16.mxu0 %v2331_v55  ;;  %2053 = vmatprep.mubr.bf16.mxu1 %v616_v57 }
  0x8a   : > { %2149 = vmatprep.mubr.bf16.mxu0 %v2465_v37  ;;  %v2334_v37 = vld [vmem:[%s2735_s1 + $0x220] sm:$0xff]  }
  0x8b   : > { %2186 = vmatpush3.bf16.msra.mxu1 %v2331_v55 }
  0x8c   : > { %2156 = vmatpush3.bf16.msra.mxu0 %v2331_v55  ;;  %2179 = vmatprep.subr.bf16.mxu1 %v2332_v56 }
  0x8d   : > { %2157 = vmatprep.subr.bf16.mxu0 %v2332_v56 }
  0x8e   : > { %2054 = vmatmul.mubr.bf16.gmra.mrb[4].mxu1 %v617_v59 }
  0x8f   : > { %2150 = vmatmul.mubr.bf16.gmra.mrb[4].mxu0 %v1218_v60  ;;  %2187 = vmatpush3.bf16.msra.mxu1 %v2332_v56 }
  0x90   : > { %2158 = vmatpush3.bf16.msra.mxu0 %v2332_v56  ;;  %2180 = vmatprep.subr.bf16.mxu1 %v2333_v31 }
  0x91   : > { %2159 = vmatprep.subr.bf16.mxu0 %v2333_v31  ;;  %2169 = vmatprep.mubr.bf16.mxu0 %v2621_v30 }
  0x92   : > { %2173 = vmatprep.mubr.bf16.mxu1 %v2648_v42 }
  0x93   : > { %2188 = vmatpush3.bf16.msra.mxu1 %v2333_v31 }
  0x94   : > { %2160 = vmatpush3.bf16.msra.mxu0 %v2333_v31  ;;  %2181 = vmatprep.subr.bf16.mxu1 %v2334_v37 }
  0x95   : > { %2161 = vmatprep.subr.bf16.mxu0 %v2334_v37 }
  0x97   : > { %2189 = vmatpush3.bf16.msra.mxu1 %v2334_v37 }
  0x98   : > { %2162 = vmatpush3.bf16.msra.mxu0 %v2334_v37  ;;  %2182 = vmatprep.subr.bf16.mxu1 %v2335_v35 }
  0x99   : > { %2163 = vmatprep.subr.bf16.mxu0 %v2335_v35 }
  0x9b   : > { %2190 = vmatpush3.bf16.msra.mxu1 %v2335_v35 }
  0x9c   : > { %2164 = vmatpush3.bf16.msra.mxu0 %v2335_v35  ;;  %2183 = vmatprep.subr.bf16.mxu1 %v2336_v61 }
  0x9d   : > { %2165 = vmatprep.subr.bf16.mxu0 %v2336_v61 }
  0x9f   : > { %2191 = vmatpush3.bf16.msra.mxu1 %v2336_v61 }
  0xa0   : > { %2166 = vmatpush3.bf16.msra.mxu0 %v2336_v61  ;;  %2184 = vmatprep.subr.bf16.mxu1 %v2337_v62 }
  0xa1   : > { %2167 = vmatprep.subr.bf16.mxu0 %v2337_v62 }
  0xa3   : > { %2192 = vmatpush3.bf16.msra.mxu1 %v2337_v62 }
  0xa4   : > { %2168 = vmatpush3.bf16.msra.mxu0 %v2337_v62 }
  0xa6   : > { %2174 = vmatmul.mubr.bf16.vlgmr.msra.gmra.mrb[8].mxu1 %v1368_v0 }
  0xa7   : > { %2170 = vmatmul.mubr.bf16.vlgmr.msra.gmra.mrb[0].mxu0 %v2631_v34 }
 0x159   : > { %v2051_v1 = vpop.f32.mrb[0].mxu1 }
 0x15a   : > { %v717_v2 = vpop.f32.mrb[1].mxu1 }
 0x15b   : > { %v2052_v3 = vpop.f32.mrb[2].mxu1 }
 0x15c   : > { %v720_v4 = vpop.f32.mrb[3].mxu1 }
 0x161   : > { %v2055_v5 = vpop.f32.mrb[4].mxu1 }
 0x162   : > { %v2151_v6 = vpop.f32.mrb[4].mxu0  ;;  %v733_v7 = vpop.f32.mrb[5].mxu1 }
 0x163   : > { %v2197_v8 = vadd.f32 %v2151_v6, %v2055_v5  ;;  %v1334_v9 = vpop.f32.mrb[5].mxu0  ;;  %v2056_v10 = vpop.f32.mrb[6].mxu1 }
 0x164   : > { %v2199_v12 = vadd.f32 %v1334_v9, %v733_v7  ;;  %v2152_v13 = vpop.f32.mrb[6].mxu0  ;;  %v736_v14 = vpop.f32.mrb[7].mxu1 }
 0x165   : > { %v2201_v11 = vadd.f32 %v2152_v13, %v2056_v10  ;;  %v1337_v15 = vpop.f32.mrb[7].mxu0 }
 0x166   : > { %v2203_v16 = vadd.f32 %v1337_v15, %v736_v14 }
 0x179   : > { %v2175_v18 = vpop.f32.mrb[8].mxu1 }
 0x17a   : > { %v2171_v19 = vpop.f32.mrb[0].mxu0  ;;  %v2198_v20 = vadd.f32 %v2197_v8, %v2175_v18  ;;  %v1484_v21 = vpop.f32.mrb[9].mxu1 }
 0x17b   : > { %v2193_v22 = vadd.f32 %v2171_v19, %v2051_v1  ;;  %v1468_v23 = vpop.f32.mrb[1].mxu0  ;;  %v2200_v24 = vadd.f32 %v2199_v12, %v1484_v21  ;;  %v2176_v26 = vpop.f32.mrb[10].mxu1 }
 0x17c   : > { %v1520_v27 = vadd.f32 %v2198_v20, %v1849_v17  ;;  %v2194_v28 = vadd.f32 %v1468_v23, %v717_v2  ;;  %v2172_v29 = vpop.f32.mrb[2].mxu0  ;;  %v2202_v30 = vadd.f32 %v2201_v11, %v2176_v26  ;;  %v1487_v32 = vpop.f32.mrb[11].mxu1 }
 0x17d   : > { %v1516_v33 = vadd.f32 %v2193_v22, %v1849_v17  ;;  %v1518_v34 = vadd.f32 %v2200_v24, %v1849_v17  ;;  %v2195_v36 = vadd.f32 %v2172_v29, %v2052_v3  ;;  %v1471_v38 = vpop.f32.mrb[3].mxu0  ;;  %v2204_v40 = vadd.f32 %v2203_v16, %v1487_v32 }
 0x17e   : > { %v1528_v41 = vmax.f32 %v1520_v27, 0.0  ;;  %v1514_v42 = vadd.f32 %v2194_v28, %v1849_v17  ;;  %v1521_v43 = vadd.f32 %v2202_v30, %v1849_v17  ;;  %v2196_v44 = vadd.f32 %v1471_v38, %v720_v4 }
 0x17f   : > { %v1524_v45 = vmax.f32 %v1516_v33, 0.0  ;;  %v1526_v46 = vmax.f32 %v1518_v34, 0.0  ;;  %v1517_v47 = vadd.f32 %v2195_v36, %v1849_v17  ;;  %v1519_v48 = vadd.f32 %v2204_v40, %v1849_v17 }
 0x180   : > { %1536 = vst [vmem:[%s170_s21 + $0x30] sm:$0xff] %v1528_v41  ;;  %v1522_v39 = vmax.f32 %v1514_v42, 0.0  ;;  %v1529_v49 = vmax.f32 %v1521_v43, 0.0  ;;  %v1515_v50 = vadd.f32 %v2196_v44, %v1849_v17 }
 0x181   : > { %1532 = vst [vmem:[%s170_s21 + $0x10] sm:$0xff] %v1524_v45  ;;  %1534 = vst [vmem:[%s170_s21 + $0x20] sm:$0xff] %v1526_v46  ;;  %v1525_v25 = vmax.f32 %v1517_v47, 0.0  ;;  %v1527_v51 = vmax.f32 %v1519_v48, 0.0 }
 0x182   : > { %1530 = vst [vmem:[%s170_s21] sm:$0xff] %v1522_v39  ;;  %1537 = vst [vmem:[%s170_s21 + $0x38] sm:$0xff] %v1529_v49  ;;  %v1523_v52 = vmax.f32 %v1515_v50, 0.0 }
 0x183   : > { %1533 = vst [vmem:[%s170_s21 + $0x18] sm:$0xff] %v1525_v25  ;;  %1535 = vst [vmem:[%s170_s21 + $0x28] sm:$0xff] %v1527_v51 }
 0x184   : > { %1531 = vst [vmem:[%s170_s21 + $0x8] sm:$0xff] %v1523_v52 }
 0x185 PF: > { %s13_s12 = sadd.s32 1, %s2344_s12  }
 0x186   : > { %p10_p4 = scmp.ge.s32.totalorder %s13_s12, 4  }
 0x188   :  { %12 = sbr.rel (!%p10_p4) target bundleno = 1 (0x1), region = 72 }

// kernel: forward.26
= control target key start
LH: loop header
LB: loop body
LE: loop exit
PB: predicated region body
PF: predicated region fallthrough
CT: control target
= control target key end

     0   :  { %s1532_s12 = smov 0   ;;  %s1534_s13 = smov 0   ;;  %s1853_s0 = inlined_call_operand.vmem [shape: f32[2,2048], index: 0, kind: input, shape index: {}]   ;;  %s1854_s1 = inlined_call_operand.vmem [shape: bf16[2048,512], index: 1, kind: input, shape index: {}]   ;;  %s1855_s2 = inlined_call_operand.vmem [shape: f32[1,512], index: 2, kind: input, shape index: {}]   ;;  %s1856_s3 = inlined_call_operand.vmem [shape: f32[2,512], index: 3, kind: output, shape index: {}]  }
   0x1   :  { %s1536_s14 = smov 0   ;;  %s1538_s15 = smov 0  }
   0x2   :  { %s1540_s16 = smov 0   ;;  %s1542_s17 = smov 0  }
   0x3   :  { %s1544_s18 = smov 0  }
   0x4 LB: > { %s25_s19 = sadd.s32 1, %s1500_s16  ;;  %s28_s20 = sadd.s32 1, %s1504_s17  ;;  %s1508_s18 = sphi %s1544_s18, %s13_s18   ;;  %s1504_s17 = sphi %s1542_s17, %s1862_s17   ;;  %s1500_s16 = sphi %s1540_s16, %s1861_s16   ;;  %s1496_s15 = sphi %s1538_s15, %s1860_s15   ;;  %s1492_s14 = sphi %s1536_s14, %s1859_s14   ;;  %s1488_s13 = sphi %s1534_s13, %s1858_s13   ;;  %s1484_s12 = sphi %s1532_s12, %s1857_s12  }
   0x5   : > { %p26_p0 = scmp.ge.s32.totalorder %s25_s19, 4  ;;  %p76_p1 = scmp.ne.s32.totalorder %s1488_s13, %s1484_s12 }
   0x6   : > { %p77_p2 = scmp.eq.s32.totalorder %s1508_s18, 0  ;;  %s69_s24 = sadd.s32 1, %s1488_s13 }
   0x7   : > { %s1864_s19 = smov (%p26_p0, %s25_s19), 0  ;;  %s1866_s20 = smov (!%p26_p0, %s28_s20), %s1504_s17 }
   0x8   : > { %p78_p3 = por %p77_p2, %p76_p1  ;;  %p30_p4 = scmp.ge.s32.totalorder %s1866_s20, 2 }
   0x9   : > { %s64_s21 = ssub.s32 %s1500_s16, %s1864_s19  ;;  %p1215_p6 = scmp.ge.s32.totalorder %s1508_s18, 8 }
   0xa   : > { %s1868_s20 = smov (%p30_p4, %s1866_s20), 0 }
   0xb   : > { %s65_s22 = ssub.s32 %s1504_s17, %s1868_s20  ;;  %156 = sbr.rel (%p1215_p6) target bundleno = 57 (0x39), region = 16 }
   0xc   : > { %s66_s23 = sor.u32 %s65_s22, %s64_s21 }
   0xd   : > { %p67_p5 = scmp.eq.s32.totalorder %s66_s23, 0 }
   0xf   : > { %s1583_s25 = scalar_select %p67_p5, %s1488_s13, %s69_s24  }
  0x12   : > { %172 = sbr.rel (!%p78_p3) target bundleno = 57 (0x39), region = 24  ;;  %s174_s26 = sand.u32 (%p78_p3), 1, %s1488_s13  }
  0x13   : > { %s1218_s27 = sshll.u32 (%p78_p3), %s1504_s17, 1  ;;  %s1216_s28 = sshll.u32 (%p78_p3), %s174_s26, 9 }
  0x14   : > { %s1296_s29 = sshll.u32 (%p78_p3), %s1500_s16, 8  ;;  %s1597_s8 = scalar_lea.vmem (%p78_p3), [#allocation3], %s1216_s28 }
  0x15   : > { %s180_s30 = sadd.s32 (%p78_p3), %s1296_s29, %s1218_s27 }
  0x16   : > { %s1220_s4 = sshll.u32 (%p78_p3), %s180_s30, 2 }
  0x17   : > { %s1592_s7 = scalar_lea.vmem (%p78_p3), %s1854_s1, %s1220_s4 }
  0x18   : > { %v336_v0 = vld [vmem:[%s1592_s7] sm:$0xff] (%p78_p3)  ;;  %v338_v1 = vld [vmem:[%s1592_s7 + $0x10] sm:$0xff] (%p78_p3) }
  0x19   : > { %v340_v2 = vld [vmem:[%s1592_s7 + $0x20] sm:$0xff]  ;;  %337 = vst [vmem:[%s1597_s8] sm:$0xff] %v336_v0  ;;  %339 = vst [vmem:[%s1597_s8 + $0x8] sm:$0xff] %v338_v1  ;;  %v342_v3 = vld [vmem:[%s1592_s7 + $0x30] sm:$0xff] }
  0x1a   : > { %341 = vst [vmem:[%s1597_s8 + $0x10] sm:$0xff] %v340_v2  ;;  %v344_v4 = vld [vmem:[%s1592_s7 + $0x40] sm:$0xff]  ;;  %v346_v5 = vld [vmem:[%s1592_s7 + $0x50] sm:$0xff]  ;;  %343 = vst [vmem:[%s1597_s8 + $0x18] sm:$0xff] %v342_v3 }
  0x1b   : > { %345 = vst [vmem:[%s1597_s8 + $0x20] sm:$0xff] %v344_v4  ;;  %347 = vst [vmem:[%s1597_s8 + $0x28] sm:$0xff] %v346_v5  ;;  %v348_v6 = vld [vmem:[%s1592_s7 + $0x60] sm:$0xff]  ;;  %v350_v7 = vld [vmem:[%s1592_s7 + $0x70] sm:$0xff] }
  0x1c   : > { %v352_v8 = vld [vmem:[%s1592_s7 + $0x80] sm:$0xff]  ;;  %349 = vst [vmem:[%s1597_s8 + $0x30] sm:$0xff] %v348_v6  ;;  %351 = vst [vmem:[%s1597_s8 + $0x38] sm:$0xff] %v350_v7  ;;  %v354_v9 = vld [vmem:[%s1592_s7 + $0x90] sm:$0xff] }
  0x1d   : > { %353 = vst [vmem:[%s1597_s8 + $0x40] sm:$0xff] %v352_v8  ;;  %v356_v10 = vld [vmem:[%s1592_s7 + $0xa0] sm:$0xff]  ;;  %v358_v11 = vld [vmem:[%s1592_s7 + $0xb0] sm:$0xff]  ;;  %355 = vst [vmem:[%s1597_s8 + $0x48] sm:$0xff] %v354_v9 }
  0x1e   : > { %357 = vst [vmem:[%s1597_s8 + $0x50] sm:$0xff] %v356_v10  ;;  %359 = vst [vmem:[%s1597_s8 + $0x58] sm:$0xff] %v358_v11  ;;  %v360_v12 = vld [vmem:[%s1592_s7 + $0xc0] sm:$0xff]  ;;  %v362_v13 = vld [vmem:[%s1592_s7 + $0xd0] sm:$0xff] }
  0x1f   : > { %v364_v14 = vld [vmem:[%s1592_s7 + $0xe0] sm:$0xff]  ;;  %361 = vst [vmem:[%s1597_s8 + $0x60] sm:$0xff] %v360_v12  ;;  %363 = vst [vmem:[%s1597_s8 + $0x68] sm:$0xff] %v362_v13  ;;  %v366_v15 = vld [vmem:[%s1592_s7 + $0xf0] sm:$0xff] }
  0x20   : > { %365 = vst [vmem:[%s1597_s8 + $0x70] sm:$0xff] %v364_v14  ;;  %v368_v16 = vld [vmem:[%s1592_s7 + $0x100] sm:$0xff]  ;;  %v370_v17 = vld [vmem:[%s1592_s7 + $0x110] sm:$0xff]  ;;  %367 = vst [vmem:[%s1597_s8 + $0x78] sm:$0xff] %v366_v15 }
  0x21   : > { %369 = vst [vmem:[%s1597_s8 + $0x80] sm:$0xff] %v368_v16  ;;  %371 = vst [vmem:[%s1597_s8 + $0x88] sm:$0xff] %v370_v17  ;;  %v372_v18 = vld [vmem:[%s1592_s7 + $0x120] sm:$0xff]  ;;  %v374_v19 = vld [vmem:[%s1592_s7 + $0x130] sm:$0xff] }
  0x22   : > { %v376_v20 = vld [vmem:[%s1592_s7 + $0x140] sm:$0xff]  ;;  %373 = vst [vmem:[%s1597_s8 + $0x90] sm:$0xff] %v372_v18  ;;  %375 = vst [vmem:[%s1597_s8 + $0x98] sm:$0xff] %v374_v19  ;;  %v378_v21 = vld [vmem:[%s1592_s7 + $0x150] sm:$0xff] }
  0x23   : > { %377 = vst [vmem:[%s1597_s8 + $0xa0] sm:$0xff] %v376_v20  ;;  %v380_v22 = vld [vmem:[%s1592_s7 + $0x160] sm:$0xff]  ;;  %v382_v23 = vld [vmem:[%s1592_s7 + $0x170] sm:$0xff]  ;;  %379 = vst [vmem:[%s1597_s8 + $0xa8] sm:$0xff] %v378_v21 }
  0x24   : > { %381 = vst [vmem:[%s1597_s8 + $0xb0] sm:$0xff] %v380_v22  ;;  %383 = vst [vmem:[%s1597_s8 + $0xb8] sm:$0xff] %v382_v23  ;;  %v384_v24 = vld [vmem:[%s1592_s7 + $0x180] sm:$0xff]  ;;  %v386_v25 = vld [vmem:[%s1592_s7 + $0x190] sm:$0xff] }
  0x25   : > { %v388_v26 = vld [vmem:[%s1592_s7 + $0x1a0] sm:$0xff]  ;;  %385 = vst [vmem:[%s1597_s8 + $0xc0] sm:$0xff] %v384_v24  ;;  %387 = vst [vmem:[%s1597_s8 + $0xc8] sm:$0xff] %v386_v25  ;;  %v390_v27 = vld [vmem:[%s1592_s7 + $0x1b0] sm:$0xff] }
  0x26   : > { %389 = vst [vmem:[%s1597_s8 + $0xd0] sm:$0xff] %v388_v26  ;;  %v392_v28 = vld [vmem:[%s1592_s7 + $0x1c0] sm:$0xff]  ;;  %v394_v29 = vld [vmem:[%s1592_s7 + $0x1d0] sm:$0xff]  ;;  %391 = vst [vmem:[%s1597_s8 + $0xd8] sm:$0xff] %v390_v27 }
  0x27   : > { %393 = vst [vmem:[%s1597_s8 + $0xe0] sm:$0xff] %v392_v28  ;;  %395 = vst [vmem:[%s1597_s8 + $0xe8] sm:$0xff] %v394_v29  ;;  %v396_v30 = vld [vmem:[%s1592_s7 + $0x1e0] sm:$0xff]  ;;  %v398_v31 = vld [vmem:[%s1592_s7 + $0x1f0] sm:$0xff] }
  0x28   : > { %v400_v32 = vld [vmem:[%s1592_s7 + $0x200] sm:$0xff]  ;;  %397 = vst [vmem:[%s1597_s8 + $0xf0] sm:$0xff] %v396_v30  ;;  %399 = vst [vmem:[%s1597_s8 + $0xf8] sm:$0xff] %v398_v31  ;;  %v402_v33 = vld [vmem:[%s1592_s7 + $0x210] sm:$0xff] }
  0x29   : > { %401 = vst [vmem:[%s1597_s8 + $0x100] sm:$0xff] %v400_v32  ;;  %v404_v34 = vld [vmem:[%s1592_s7 + $0x220] sm:$0xff]  ;;  %v406_v35 = vld [vmem:[%s1592_s7 + $0x230] sm:$0xff]  ;;  %403 = vst [vmem:[%s1597_s8 + $0x108] sm:$0xff] %v402_v33 }
  0x2a   : > { %405 = vst [vmem:[%s1597_s8 + $0x110] sm:$0xff] %v404_v34  ;;  %407 = vst [vmem:[%s1597_s8 + $0x118] sm:$0xff] %v406_v35  ;;  %v408_v36 = vld [vmem:[%s1592_s7 + $0x240] sm:$0xff]  ;;  %v410_v37 = vld [vmem:[%s1592_s7 + $0x250] sm:$0xff] }
  0x2b   : > { %v412_v38 = vld [vmem:[%s1592_s7 + $0x260] sm:$0xff]  ;;  %409 = vst [vmem:[%s1597_s8 + $0x120] sm:$0xff] %v408_v36  ;;  %411 = vst [vmem:[%s1597_s8 + $0x128] sm:$0xff] %v410_v37  ;;  %v414_v39 = vld [vmem:[%s1592_s7 + $0x270] sm:$0xff] }
  0x2c   : > { %413 = vst [vmem:[%s1597_s8 + $0x130] sm:$0xff] %v412_v38  ;;  %v416_v40 = vld [vmem:[%s1592_s7 + $0x280] sm:$0xff]  ;;  %v418_v41 = vld [vmem:[%s1592_s7 + $0x290] sm:$0xff]  ;;  %415 = vst [vmem:[%s1597_s8 + $0x138] sm:$0xff] %v414_v39 }
  0x2d   : > { %417 = vst [vmem:[%s1597_s8 + $0x140] sm:$0xff] %v416_v40  ;;  %419 = vst [vmem:[%s1597_s8 + $0x148] sm:$0xff] %v418_v41  ;;  %v420_v42 = vld [vmem:[%s1592_s7 + $0x2a0] sm:$0xff]  ;;  %v422_v43 = vld [vmem:[%s1592_s7 + $0x2b0] sm:$0xff] }
  0x2e   : > { %v424_v44 = vld [vmem:[%s1592_s7 + $0x2c0] sm:$0xff]  ;;  %421 = vst [vmem:[%s1597_s8 + $0x150] sm:$0xff] %v420_v42  ;;  %423 = vst [vmem:[%s1597_s8 + $0x158] sm:$0xff] %v422_v43  ;;  %v426_v45 = vld [vmem:[%s1592_s7 + $0x2d0] sm:$0xff] }
  0x2f   : > { %425 = vst [vmem:[%s1597_s8 + $0x160] sm:$0xff] %v424_v44  ;;  %v428_v46 = vld [vmem:[%s1592_s7 + $0x2e0] sm:$0xff]  ;;  %v430_v47 = vld [vmem:[%s1592_s7 + $0x2f0] sm:$0xff]  ;;  %427 = vst [vmem:[%s1597_s8 + $0x168] sm:$0xff] %v426_v45 }
  0x30   : > { %429 = vst [vmem:[%s1597_s8 + $0x170] sm:$0xff] %v428_v46  ;;  %431 = vst [vmem:[%s1597_s8 + $0x178] sm:$0xff] %v430_v47  ;;  %v432_v48 = vld [vmem:[%s1592_s7 + $0x300] sm:$0xff]  ;;  %v434_v49 = vld [vmem:[%s1592_s7 + $0x310] sm:$0xff] }
  0x31   : > { %v436_v50 = vld [vmem:[%s1592_s7 + $0x320] sm:$0xff]  ;;  %433 = vst [vmem:[%s1597_s8 + $0x180] sm:$0xff] %v432_v48  ;;  %435 = vst [vmem:[%s1597_s8 + $0x188] sm:$0xff] %v434_v49  ;;  %v438_v51 = vld [vmem:[%s1592_s7 + $0x330] sm:$0xff] }
  0x32   : > { %437 = vst [vmem:[%s1597_s8 + $0x190] sm:$0xff] %v436_v50  ;;  %v440_v52 = vld [vmem:[%s1592_s7 + $0x340] sm:$0xff]  ;;  %v442_v53 = vld [vmem:[%s1592_s7 + $0x350] sm:$0xff]  ;;  %439 = vst [vmem:[%s1597_s8 + $0x198] sm:$0xff] %v438_v51 }
  0x33   : > { %441 = vst [vmem:[%s1597_s8 + $0x1a0] sm:$0xff] %v440_v52  ;;  %443 = vst [vmem:[%s1597_s8 + $0x1a8] sm:$0xff] %v442_v53  ;;  %v444_v54 = vld [vmem:[%s1592_s7 + $0x360] sm:$0xff]  ;;  %v446_v55 = vld [vmem:[%s1592_s7 + $0x370] sm:$0xff] }
  0x34   : > { %v448_v56 = vld [vmem:[%s1592_s7 + $0x380] sm:$0xff]  ;;  %445 = vst [vmem:[%s1597_s8 + $0x1b0] sm:$0xff] %v444_v54  ;;  %447 = vst [vmem:[%s1597_s8 + $0x1b8] sm:$0xff] %v446_v55  ;;  %v450_v57 = vld [vmem:[%s1592_s7 + $0x390] sm:$0xff] }
  0x35   : > { %449 = vst [vmem:[%s1597_s8 + $0x1c0] sm:$0xff] %v448_v56  ;;  %v452_v58 = vld [vmem:[%s1592_s7 + $0x3a0] sm:$0xff]  ;;  %v454_v59 = vld [vmem:[%s1592_s7 + $0x3b0] sm:$0xff]  ;;  %451 = vst [vmem:[%s1597_s8 + $0x1c8] sm:$0xff] %v450_v57 }
  0x36   : > { %453 = vst [vmem:[%s1597_s8 + $0x1d0] sm:$0xff] %v452_v58  ;;  %455 = vst [vmem:[%s1597_s8 + $0x1d8] sm:$0xff] %v454_v59  ;;  %v456_v60 = vld [vmem:[%s1592_s7 + $0x3c0] sm:$0xff]  ;;  %v458_v61 = vld [vmem:[%s1592_s7 + $0x3d0] sm:$0xff] }
  0x37   : > { %v460_v62 = vld [vmem:[%s1592_s7 + $0x3e0] sm:$0xff]  ;;  %457 = vst [vmem:[%s1597_s8 + $0x1e0] sm:$0xff] %v456_v60  ;;  %459 = vst [vmem:[%s1597_s8 + $0x1e8] sm:$0xff] %v458_v61  ;;  %v462_v63 = vld [vmem:[%s1592_s7 + $0x3f0] sm:$0xff] }
  0x38   : > { %461 = vst [vmem:[%s1597_s8 + $0x1f0] sm:$0xff] %v460_v62  ;;  %463 = vst [vmem:[%s1597_s8 + $0x1f8] sm:$0xff] %v462_v63 }
  0x39 PF: > { %p1221_p7 = scmp.ge.s32.totalorder %s1508_s18, 1  ;;  %p476_p8 = scmp.lt.s32.totalorder %s1508_s18, 9 }
  0x3b   : > { %p477_p9 = pnand %p1221_p7, %p476_p8 }
  0x3c   : > { %s483_s9 = sand.u32 (!%p477_p9), 1, %s1484_s12   ;;  %s1223_s10 = sshll.u32 (!%p477_p9), %s1492_s14, 2 }
  0x3d   : > { %480 = sbr.rel (%p477_p9) target bundleno = 378 (0x17a), region = 66  ;;  %s1222_s11 = sshll.u32 (!%p477_p9), %s483_s9, 9 }
  0x3e   : > { %p526_p10 = scmp.lt.s32.totalorder (!%p477_p9), %s1223_s10, 15  ;;  %s1225_s21 = sshll.u32 (!%p477_p9), %s1496_s15, 1 }
  0x3f   : > { %p536_p11 = scmp.lt.s32.totalorder (!%p477_p9), %s1225_s21, 3  ;;  %s1746_s5 = scalar_lea.vmem (!%p477_p9), [#allocation3], %s1222_s11 }
  0x40   : > { %p1228_p12 = scmp.ne.s32.totalorder (!%p477_p9), %s1492_s14, 0 }
  0x44   : > { %s1870_s10 = smov (!%p526_p10, %s1223_s10), 15  ;;  %s1872_s21 = smov (!%p536_p11, %s1225_s21), 3 }
  0x45   : > { %s1224_s22 = sshll.u32 %s1870_s10, 1  ;;  %s538_s12 = scalar_lea.vmem %s1855_s2, %s1872_s21  ;;  %v1510_v0 = vmov (!%p1228_p12), 0.0  }
  0x46   : > { %s1732_s26 = scalar_lea.vmem %s1853_s0, %s1224_s22  ;;  %s1227_s29 = sshll.u32 %s1872_s21, 1  ;;  %554 = vst [vmem:[#allocation2] sm:$0xf] (!%p1228_p12), %v1510_v0 }
  0x47   : > { %s1744_s15 = scalar_lea.vmem %s1856_s3, %s1227_s29  ;;  %553 = sbr.rel (%p1228_p12) target bundleno = 78 (0x4e), region = 74 }
  0x4e PF: > { %v1357_v1 = vld [vmem:[%s1746_s5 + $0x4] ss:$8 sps:$4 sm:$0xff]   ;;  %v1361_v3 = vld [vmem:[%s1746_s5] ss:$8 sps:$4 sm:$0xff]   ;;  %v1363_v5 = vld [vmem:[%s1746_s5 + $0x14] ss:$8 sps:$4 sm:$0xff]   ;;  %v562_v39 = vlaneseq }
  0x4f   : > { %v1359_v2 = vld [vmem:[%s1746_s5 + $0x104] ss:$8 sps:$4 sm:$0xff]   ;;  %967 = vmatprep.subr.bf16.mxu1 %v1357_v1  ;;  %v1362_v4 = vld [vmem:[%s1746_s5 + $0x100] ss:$8 sps:$4 sm:$0xff]   ;;  %v1365_v6 = vld [vmem:[%s1746_s5 + $0x114] ss:$8 sps:$4 sm:$0xff]  }
  0x50   : > { %1008 = vmatprep.subr.bf16.mxu0 %v1359_v2  ;;  %968 = vmatpush1.bf16.msra.mxu1 %v1361_v3  ;;  %v1367_v7 = vld [vmem:[%s1746_s5 + $0x10] ss:$8 sps:$4 sm:$0xff]   ;;  %v1369_v9 = vld [vmem:[%s1746_s5 + $0x24] ss:$8 sps:$4 sm:$0xff]   ;;  %v1373_v11 = vld [vmem:[%s1746_s5 + $0x20] ss:$8 sps:$4 sm:$0xff]  }
  0x51   : > { %1009 = vmatpush1.bf16.msra.mxu0 %v1362_v4  ;;  %969 = vmatprep.subr.bf16.mxu1 %v1363_v5  ;;  %v1368_v8 = vld [vmem:[%s1746_s5 + $0x110] ss:$8 sps:$4 sm:$0xff]   ;;  %v1371_v10 = vld [vmem:[%s1746_s5 + $0x124] ss:$8 sps:$4 sm:$0xff]   ;;  %v1374_v12 = vld [vmem:[%s1746_s5 + $0x120] ss:$8 sps:$4 sm:$0xff]  }
  0x52   : > { %1010 = vmatprep.subr.bf16.mxu0 %v1365_v6  ;;  %v1375_v13 = vld [vmem:[%s1746_s5 + $0x34] ss:$8 sps:$4 sm:$0xff]   ;;  %v1379_v15 = vld [vmem:[%s1746_s5 + $0x30] ss:$8 sps:$4 sm:$0xff]   ;;  %v1381_v17 = vld [vmem:[%s1746_s5 + $0x44] ss:$8 sps:$4 sm:$0xff]  }
  0x53   : > { %v1377_v14 = vld [vmem:[%s1746_s5 + $0x134] ss:$8 sps:$4 sm:$0xff]   ;;  %v1380_v16 = vld [vmem:[%s1746_s5 + $0x130] ss:$8 sps:$4 sm:$0xff]   ;;  %v1383_v18 = vld [vmem:[%s1746_s5 + $0x144] ss:$8 sps:$4 sm:$0xff]  }
  0x54   : > { %970 = vmatpush1.bf16.msra.mxu1 %v1367_v7  ;;  %v1385_v19 = vld [vmem:[%s1746_s5 + $0x40] ss:$8 sps:$4 sm:$0xff]   ;;  %v1387_v21 = vld [vmem:[%s1746_s5 + $0x54] ss:$8 sps:$4 sm:$0xff]   ;;  %v1391_v23 = vld [vmem:[%s1746_s5 + $0x50] ss:$8 sps:$4 sm:$0xff]  }
  0x55   : > { %1011 = vmatpush1.bf16.msra.mxu0 %v1368_v8  ;;  %971 = vmatprep.subr.bf16.mxu1 %v1369_v9  ;;  %v1386_v20 = vld [vmem:[%s1746_s5 + $0x140] ss:$8 sps:$4 sm:$0xff]   ;;  %v1389_v22 = vld [vmem:[%s1746_s5 + $0x154] ss:$8 sps:$4 sm:$0xff]   ;;  %v1392_v24 = vld [vmem:[%s1746_s5 + $0x150] ss:$8 sps:$4 sm:$0xff]  }
  0x56   : > { %1012 = vmatprep.subr.bf16.mxu0 %v1371_v10  ;;  %v1393_v25 = vld [vmem:[%s1746_s5 + $0x64] ss:$8 sps:$4 sm:$0xff]   ;;  %v1397_v27 = vld [vmem:[%s1746_s5 + $0x60] ss:$8 sps:$4 sm:$0xff]   ;;  %v1399_v29 = vld [vmem:[%s1746_s5 + $0x74] ss:$8 sps:$4 sm:$0xff]  }
  0x57   : > { %v1395_v26 = vld [vmem:[%s1746_s5 + $0x164] ss:$8 sps:$4 sm:$0xff]   ;;  %v1398_v28 = vld [vmem:[%s1746_s5 + $0x160] ss:$8 sps:$4 sm:$0xff]   ;;  %v1401_v30 = vld [vmem:[%s1746_s5 + $0x174] ss:$8 sps:$4 sm:$0xff]  }
  0x58   : > { %972 = vmatpush1.bf16.msra.mxu1 %v1373_v11  ;;  %v1403_v31 = vld [vmem:[%s1746_s5 + $0x70] ss:$8 sps:$4 sm:$0xff]   ;;  %v1405_v33 = vld [vmem:[%s1746_s5 + $0x84] ss:$8 sps:$4 sm:$0xff]   ;;  %v1409_v35 = vld [vmem:[%s1746_s5 + $0x80] ss:$8 sps:$4 sm:$0xff]  }
  0x59   : > { %1013 = vmatpush1.bf16.msra.mxu0 %v1374_v12  ;;  %973 = vmatprep.subr.bf16.mxu1 %v1375_v13  ;;  %v1404_v32 = vld [vmem:[%s1746_s5 + $0x170] ss:$8 sps:$4 sm:$0xff]   ;;  %v1407_v34 = vld [vmem:[%s1746_s5 + $0x184] ss:$8 sps:$4 sm:$0xff]   ;;  %v1410_v36 = vld [vmem:[%s1746_s5 + $0x180] ss:$8 sps:$4 sm:$0xff]  }
  0x5a   : > { %1014 = vmatprep.subr.bf16.mxu0 %v1377_v14  ;;  %v1511_v37 = vmov 1983009808   ;;  %v1411_v40 = vld [vmem:[%s1746_s5 + $0x94] ss:$8 sps:$4 sm:$0xff]   ;;  %v1415_v42 = vld [vmem:[%s1746_s5 + $0x90] ss:$8 sps:$4 sm:$0xff]  }
  0x5b   : > { %v560_v38 = vunpack.c.l.s4 %v1511_v37  ;;  %v1413_v41 = vld [vmem:[%s1746_s5 + $0x194] ss:$8 sps:$4 sm:$0xff]   ;;  %v1788_v44 = vshrl.u32 %v562_v39, 7  ;;  %v1416_v45 = vld [vmem:[%s1746_s5 + $0x190] ss:$8 sps:$4 sm:$0xff]   ;;  %p1293_p13 = scmp.ne.s32.totalorder %s1492_s14, 3 }
  0x5c   : > { %974 = vmatpush1.bf16.msra.mxu1 %v1379_v15  ;;  %v1417_v46 = vld [vmem:[%s1746_s5 + $0xa4] ss:$8 sps:$4 sm:$0xff]   ;;  %v1421_v48 = vld [vmem:[%s1746_s5 + $0xa0] ss:$8 sps:$4 sm:$0xff]   ;;  %v1423_v51 = vld [vmem:[%s1746_s5 + $0xb4] ss:$8 sps:$4 sm:$0xff]  }
  0x5d   : > { %1015 = vmatpush1.bf16.msra.mxu0 %v1380_v16  ;;  %975 = vmatprep.subr.bf16.mxu1 %v1381_v17  ;;  %v561_v43 = vunpack.c.0.s8 %v560_v38  ;;  %v1419_v47 = vld [vmem:[%s1746_s5 + $0x1a4] ss:$8 sps:$4 sm:$0xff]   ;;  %v1422_v49 = vld [vmem:[%s1746_s5 + $0x1a0] ss:$8 sps:$4 sm:$0xff]   ;;  %v1425_v52 = vld [vmem:[%s1746_s5 + $0x1b4] ss:$8 sps:$4 sm:$0xff]  }
  0x5e   : > { %1016 = vmatprep.subr.bf16.mxu0 %v1383_v18  ;;  %v556_v53 = vld [vmem:[%s1732_s26] sm:$0xff]  ;;  %v1427_v56 = vld [vmem:[%s1746_s5 + $0xb0] ss:$8 sps:$4 sm:$0xff]   ;;  %v1429_v58 = vld [vmem:[%s1746_s5 + $0xc4] ss:$8 sps:$4 sm:$0xff]  }
  0x5f   : > { %v1796_v50 = vsub.s32 %v561_v43, %v1788_v44  ;;  %v558_v55 = vcombine.high %v556_v53, %v556_v53  ;;  %v1428_v57 = vld [vmem:[%s1746_s5 + $0x1b0] ss:$8 sps:$4 sm:$0xff]   ;;  %v1431_v59 = vld [vmem:[%s1746_s5 + $0x1c4] ss:$8 sps:$4 sm:$0xff]   ;;  %v1433_v0 = vld [vmem:[%s1746_s5 + $0xc0] ss:$8 sps:$4 sm:$0xff]  }
  0x60   : > { %976 = vmatpush1.bf16.msra.mxu1 %v1385_v19  ;;  %v1434_v1 = vld [vmem:[%s1746_s5 + $0x1c0] ss:$8 sps:$4 sm:$0xff]   ;;  %v1435_v2 = vld [vmem:[%s1746_s5 + $0xd4] ss:$8 sps:$4 sm:$0xff]   ;;  %v1439_v5 = vld [vmem:[%s1746_s5 + $0xd0] ss:$8 sps:$4 sm:$0xff]  }
  0x61   : > { %1017 = vmatpush1.bf16.msra.mxu0 %v1386_v20  ;;  %977 = vmatprep.subr.bf16.mxu1 %v1387_v21  ;;  %v565_v54 = vrot.slane %v556_v53, %v1796_v50  ;;  %v572_v61 = vrot.slane %v558_v55, %v1796_v50  ;;  %v1437_v3 = vld [vmem:[%s1746_s5 + $0x1d4] ss:$8 sps:$4 sm:$0xff]   ;;  %v1440_v6 = vld [vmem:[%s1746_s5 + $0x1d0] ss:$8 sps:$4 sm:$0xff]   ;;  %v1441_v7 = vld [vmem:[%s1746_s5 + $0xe4] ss:$8 sps:$4 sm:$0xff]  }
  0x62   : > { %1018 = vmatprep.subr.bf16.mxu0 %v1389_v22  ;;  %v1443_v8 = vld [vmem:[%s1746_s5 + $0x1e4] ss:$8 sps:$4 sm:$0xff]   ;;  %v1445_v9 = vld [vmem:[%s1746_s5 + $0xe0] ss:$8 sps:$4 sm:$0xff]   ;;  %v1447_v11 = vld [vmem:[%s1746_s5 + $0xf4] ss:$8 sps:$4 sm:$0xff]  }
  0x63   : > { %v573_v60 = vcombine.high %v565_v54, %v565_v54  ;;  %v574_v63 = vcombine.high %v572_v61, %v572_v61  ;;  %v1446_v10 = vld [vmem:[%s1746_s5 + $0x1e0] ss:$8 sps:$4 sm:$0xff]   ;;  %v1449_v12 = vld [vmem:[%s1746_s5 + $0x1f4] ss:$8 sps:$4 sm:$0xff]   ;;  %v1451_v13 = vld [vmem:[%s1746_s5 + $0xf0] ss:$8 sps:$4 sm:$0xff]   ;;  %v579_v15 = vpack.c.bf16 %v565_v54, %v565_v54  ;;  %v581_v16 = vpack.c.bf16 %v572_v61, %v572_v61 }
  0x64   : > { %978 = vmatpush1.bf16.msra.mxu1 %v1391_v23  ;;  %v1452_v14 = vld [vmem:[%s1746_s5 + $0x1f0] ss:$8 sps:$4 sm:$0xff]  }
  0x65   : > { %1019 = vmatpush1.bf16.msra.mxu0 %v1392_v24  ;;  %979 = vmatprep.subr.bf16.mxu1 %v1393_v25  ;;  %v580_v62 = vpack.c.bf16 %v573_v60, %v573_v60  ;;  %v582_v4 = vpack.c.bf16 %v574_v63, %v574_v63 }
  0x66   : > { %1020 = vmatprep.subr.bf16.mxu0 %v1395_v26 }
  0x67   : > { %999 = vmatprep.mubr.bf16.mxu1 %v580_v62  ;;  %1040 = vmatprep.mubr.bf16.mxu0 %v582_v4 }
  0x68   : > { %980 = vmatpush1.bf16.msra.mxu1 %v1397_v27 }
  0x69   : > { %1021 = vmatpush1.bf16.msra.mxu0 %v1398_v28  ;;  %981 = vmatprep.subr.bf16.mxu1 %v1399_v29  ;;  %v555_v28 = vld [vmem:[#allocation2] sm:$0xf] }
  0x6a   : > { %1022 = vmatprep.subr.bf16.mxu0 %v1401_v30 }
  0x6c   : > { %982 = vmatpush1.bf16.msra.mxu1 %v1403_v31  ;;  %v1067_v31 = vld [vmem:[%s538_s12] sm:$0x3] (!%p1293_p13) }
  0x6d   : > { %1023 = vmatpush1.bf16.msra.mxu0 %v1404_v32  ;;  %983 = vmatprep.subr.bf16.mxu1 %v1405_v33  ;;  %v1071_v32 = vsub.s32 (!%p1293_p13), 0, %v1788_v44  ;;  %v1075_v33 = vsub.s32 (!%p1293_p13), 1, %v1788_v44 }
  0x6e   : > { %1024 = vmatprep.subr.bf16.mxu0 %v1407_v34 }
  0x6f   : > { %v1072_v34 = vrot.slane (!%p1293_p13), %v1067_v31, %v1071_v32 }
  0x70   : > { %984 = vmatpush1.bf16.msra.mxu1 %v1409_v35  ;;  %v1076_v35 = vrot.slane (!%p1293_p13), %v1067_v31, %v1075_v33 }
  0x71   : > { %1025 = vmatpush1.bf16.msra.mxu0 %v1410_v36  ;;  %985 = vmatprep.subr.bf16.mxu1 %v1411_v40 }
  0x72   : > { %1026 = vmatprep.subr.bf16.mxu0 %v1413_v41  ;;  %v1077_v36 = vcombine.low (!%p1293_p13), %v1072_v34, %v1076_v35 }
  0x74   : > { %986 = vmatpush1.bf16.msra.mxu1 %v1415_v42  ;;  %v1084_v38 = vrot.slane (!%p1293_p13), %v1077_v36, %v1796_v50 }
  0x75   : > { %1027 = vmatpush1.bf16.msra.mxu0 %v1416_v45  ;;  %987 = vmatprep.subr.bf16.mxu1 %v1417_v46 }
  0x76   : > { %1028 = vmatprep.subr.bf16.mxu0 %v1419_v47 }
  0x78   : > { %988 = vmatpush1.bf16.msra.mxu1 %v1421_v48 }
  0x79   : > { %1029 = vmatpush1.bf16.msra.mxu0 %v1422_v49  ;;  %989 = vmatprep.subr.bf16.mxu1 %v1423_v51 }
  0x7a   : > { %1030 = vmatprep.subr.bf16.mxu0 %v1425_v52 }
  0x7c   : > { %990 = vmatpush1.bf16.msra.mxu1 %v1427_v56 }
  0x7d   : > { %1031 = vmatpush1.bf16.msra.mxu0 %v1428_v57  ;;  %991 = vmatprep.subr.bf16.mxu1 %v1429_v58 }
  0x7e   : > { %1032 = vmatprep.subr.bf16.mxu0 %v1431_v59 }
  0x80   : > { %992 = vmatpush1.bf16.msra.mxu1 %v1433_v0 }
  0x81   : > { %1033 = vmatpush1.bf16.msra.mxu0 %v1434_v1  ;;  %993 = vmatprep.subr.bf16.mxu1 %v1435_v2 }
  0x82   : > { %1034 = vmatprep.subr.bf16.mxu0 %v1437_v3 }
  0x84   : > { %994 = vmatpush1.bf16.msra.mxu1 %v1439_v5 }
  0x85   : > { %1035 = vmatpush1.bf16.msra.mxu0 %v1440_v6  ;;  %995 = vmatprep.subr.bf16.mxu1 %v1441_v7 }
  0x86   : > { %1036 = vmatprep.subr.bf16.mxu0 %v1443_v8 }
  0x88   : > { %996 = vmatpush1.bf16.msra.mxu1 %v1445_v9 }
  0x89   : > { %1037 = vmatpush1.bf16.msra.mxu0 %v1446_v10  ;;  %997 = vmatprep.subr.bf16.mxu1 %v1447_v11 }
  0x8a   : > { %1038 = vmatprep.subr.bf16.mxu0 %v1449_v12 }
  0x8c   : > { %998 = vmatpush1.bf16.msra.mxu1 %v1451_v13 }
  0x8d   : > { %1039 = vmatpush1.bf16.msra.mxu0 %v1452_v14 }
  0x8f   : > { %1000 = vmatmul.mubr.bf16.vlgmr.msra.gmra.mrb[0].mxu1 %v579_v15 }
  0x90   : > { %1041 = vmatmul.mubr.bf16.vlgmr.msra.gmra.mrb[0].mxu0 %v581_v16 }
 0x162   : > { %v1001_v17 = vpop.f32.mrb[0].mxu1 }
 0x163   : > { %v1042_v18 = vpop.f32.mrb[0].mxu0  ;;  %v1003_v20 = vpop.f32.mrb[1].mxu1 }
 0x164   : > { %v1043_v19 = vadd.f32 %v1042_v18, %v1001_v17  ;;  %v1044_v21 = vpop.f32.mrb[1].mxu0  ;;  %v1005_v23 = vpop.f32.mrb[2].mxu1 }
 0x165   : > { %v1045_v22 = vadd.f32 %v1044_v21, %v1003_v20  ;;  %v1046_v24 = vpop.f32.mrb[2].mxu0  ;;  %v1006_v25 = vpop.f32.mrb[3].mxu1 }
 0x166   : > { %v1047_v26 = vpop.f32.mrb[3].mxu0 }
 0x167   : > { %v1051_v27 = vcombine.low %v1043_v19, %v1045_v22  ;;  %1065 = sbr.rel (%p1293_p13) target bundleno = 378 (0x17a), region = 78 }
 0x169   : > { %v1058_v29 = vrot.slane %v1051_v27, %v1796_v50 }
 0x16b   : > { %v1060_v30 = vadd.f32 %v1058_v29, %v555_v28 }
 0x16d   : > { %1061 = vst [vmem:[#allocation2] sm:$0xf] %v1060_v30 }
 0x174   : > { %v1066_v37 = vld [vmem:[#allocation2] sm:$0xf] }
 0x175   : > { %v1086_v39 = vadd.f32 %v1084_v38, %v1066_v37 }
 0x177   : > { %v1087_v40 = vmax.f32 %v1086_v39, 0.0 }
 0x179   : > { %1088 = vst [vmem:[%s1744_s15] sm:$0xf] %v1087_v40 }
 0x17a PF: > { %s13_s18 = sadd.s32 1, %s1508_s18   ;;  %s1857_s12 = smov %s1488_s13 }
 0x17b   : > { %p10_p0 = scmp.ge.s32.totalorder %s13_s18, 10   ;;  %s1858_s13 = smov %s1583_s25 }
 0x17c   : > { %s1859_s14 = smov %s1500_s16  ;;  %s1860_s15 = smov %s1504_s17 }
 0x17d   : > { %s1861_s16 = smov %s1864_s19  ;;  %s1862_s17 = smov %s1868_s20 }
 0x17e   :  { %12 = sbr.rel (!%p10_p0) target bundleno = 4 (0x4), region = 119 }

// kernel: forward.27
= control target key start
LH: loop header
LB: loop body
LE: loop exit
PB: predicated region body
PF: predicated region fallthrough
CT: control target
= control target key end

     0   :  { %v29_v30 = vlaneseq  ;;  %s693_s0 = inlined_call_operand.vmem [shape: f32[2,512], index: 0, kind: input, shape index: {}]   ;;  %s694_s1 = inlined_call_operand.vmem [shape: bf16[512,10], index: 1, kind: input, shape index: {}]   ;;  %s695_s2 = inlined_call_operand.vmem [shape: f32[1,10], index: 2, kind: input, shape index: {}]   ;;  %s696_s3 = inlined_call_operand.hbm [shape: f32[2,10], index: 3, kind: output, shape index: {}]  }
   0x1   :  { %v496_v0 = vld [vmem:[%s694_s1 + $0x40] sm:$0xff]   ;;  %v500_v4 = vld [vmem:[%s694_s1 + $0x48] sm:$0xff]   ;;  %v504_v8 = vld [vmem:[%s694_s1 + $0x50] sm:$0xff]  }
   0x2   :  { %v497_v1 = vld [vmem:[%s694_s1 + $0xc0] sm:$0xff]   ;;  %449 = vmatprep.subr.bf16.mxu0 %v496_v0  ;;  %v501_v5 = vld [vmem:[%s694_s1 + $0xc8] sm:$0xff]   ;;  %v505_v9 = vld [vmem:[%s694_s1 + $0xd0] sm:$0xff]  }
   0x3   :  { %v498_v2 = vld [vmem:[%s694_s1] sm:$0xff]   ;;  %471 = vmatprep.subr.bf16.mxu1 %v497_v1  ;;  %v502_v6 = vld [vmem:[%s694_s1 + $0x8] sm:$0xff]   ;;  %v506_v10 = vld [vmem:[%s694_s1 + $0x10] sm:$0xff]  }
   0x4   :  { %v499_v3 = vld [vmem:[%s694_s1 + $0x80] sm:$0xff]   ;;  %450 = vmatpush3.bf16.msra.mxu0 %v498_v2  ;;  %v503_v7 = vld [vmem:[%s694_s1 + $0x88] sm:$0xff]   ;;  %v507_v11 = vld [vmem:[%s694_s1 + $0x90] sm:$0xff]  }
   0x5   :  { %472 = vmatpush3.bf16.msra.mxu1 %v499_v3  ;;  %451 = vmatprep.subr.bf16.mxu0 %v500_v4  ;;  %v508_v12 = vld [vmem:[%s694_s1 + $0x58] sm:$0xff]   ;;  %v512_v16 = vld [vmem:[%s694_s1 + $0x60] sm:$0xff]   ;;  %v516_v20 = vld [vmem:[%s694_s1 + $0x68] sm:$0xff]  }
   0x6   :  { %473 = vmatprep.subr.bf16.mxu1 %v501_v5  ;;  %v509_v13 = vld [vmem:[%s694_s1 + $0xd8] sm:$0xff]   ;;  %v513_v17 = vld [vmem:[%s694_s1 + $0xe0] sm:$0xff]   ;;  %v517_v21 = vld [vmem:[%s694_s1 + $0xe8] sm:$0xff]  }
   0x7   :  { %v510_v14 = vld [vmem:[%s694_s1 + $0x18] sm:$0xff]   ;;  %v514_v18 = vld [vmem:[%s694_s1 + $0x20] sm:$0xff]   ;;  %v518_v22 = vld [vmem:[%s694_s1 + $0x28] sm:$0xff]  }
   0x8   :  { %452 = vmatpush3.bf16.msra.mxu0 %v502_v6  ;;  %v511_v15 = vld [vmem:[%s694_s1 + $0x98] sm:$0xff]   ;;  %v515_v19 = vld [vmem:[%s694_s1 + $0xa0] sm:$0xff]   ;;  %v519_v23 = vld [vmem:[%s694_s1 + $0xa8] sm:$0xff]  }
   0x9   :  { %474 = vmatpush3.bf16.msra.mxu1 %v503_v7  ;;  %453 = vmatprep.subr.bf16.mxu0 %v504_v8  ;;  %v520_v24 = vld [vmem:[%s694_s1 + $0x70] sm:$0xff]   ;;  %v524_v28 = vld [vmem:[%s694_s1 + $0x78] sm:$0xff]   ;;  %v23_v33 = vld [vmem:[%s693_s0] sm:$0xff] }
   0xa   :  { %475 = vmatprep.subr.bf16.mxu1 %v505_v9  ;;  %v521_v25 = vld [vmem:[%s694_s1 + $0xf0] sm:$0xff]   ;;  %v525_v29 = vld [vmem:[%s694_s1 + $0xf8] sm:$0xff]  }
   0xb   :  { %v522_v26 = vld [vmem:[%s694_s1 + $0x30] sm:$0xff]   ;;  %v526_v31 = vld [vmem:[%s694_s1 + $0x38] sm:$0xff]  }
   0xc   :  { %454 = vmatpush3.bf16.msra.mxu0 %v506_v10  ;;  %v523_v27 = vld [vmem:[%s694_s1 + $0xb0] sm:$0xff]   ;;  %v527_v32 = vld [vmem:[%s694_s1 + $0xb8] sm:$0xff]  }
   0xd   :  { %476 = vmatpush3.bf16.msra.mxu1 %v507_v11  ;;  %455 = vmatprep.subr.bf16.mxu0 %v508_v12 }
   0xe   :  { %477 = vmatprep.subr.bf16.mxu1 %v509_v13 }
  0x10   :  { %456 = vmatpush3.bf16.msra.mxu0 %v510_v14 }
  0x11   :  { %478 = vmatpush3.bf16.msra.mxu1 %v511_v15  ;;  %457 = vmatprep.subr.bf16.mxu0 %v512_v16 }
  0x12   :  { %479 = vmatprep.subr.bf16.mxu1 %v513_v17 }
  0x14   :  { %458 = vmatpush3.bf16.msra.mxu0 %v514_v18 }
  0x15   :  { %480 = vmatpush3.bf16.msra.mxu1 %v515_v19  ;;  %459 = vmatprep.subr.bf16.mxu0 %v516_v20 }
  0x16   :  { %481 = vmatprep.subr.bf16.mxu1 %v517_v21 }
  0x18   :  { %460 = vmatpush3.bf16.msra.mxu0 %v518_v22 }
  0x19   :  { %482 = vmatpush3.bf16.msra.mxu1 %v519_v23  ;;  %461 = vmatprep.subr.bf16.mxu0 %v520_v24 }
  0x1a   :  { %483 = vmatprep.subr.bf16.mxu1 %v521_v25 }
  0x1c   :  { %462 = vmatpush3.bf16.msra.mxu0 %v522_v26 }
  0x1d   :  { %484 = vmatpush3.bf16.msra.mxu1 %v523_v27  ;;  %463 = vmatprep.subr.bf16.mxu0 %v524_v28 }
  0x1e   :  { %485 = vmatprep.subr.bf16.mxu1 %v525_v29 }
  0x20   :  { %464 = vmatpush3.bf16.msra.mxu0 %v526_v31 }
  0x21   :  { %8 = vsyncpa [#allocation4], 0  ;;  %486 = vmatpush3.bf16.msra.mxu1 %v527_v32  ;;  %v553_v34 = vmov 1983009808   ;;  %v30_v36 = vshrl.u32 %v29_v30, 7  ;;  %v25_v38 = vcombine.high %v23_v33, %v23_v33  ;;  %vm20_vm0 = vcmask 74752  }
  0x22   :  { %v27_v35 = vunpack.c.l.s4 %v553_v34  ;;  %v554_v48 = vmov 0.0   ;;  %v448_v62 = vld [vmem:[%s695_s2] ss:$0 sm:$0xff]  ;;  %s555_s24 = smov [#allocation3]  }
  0x23   :  { %21 = vst.msk [vmem:[#allocation2] sm:$0x3] %vm20_vm0, %v554_v48  ;;  %s408_s25 = sshll.u32 %s555_s24, 4  ;;  %s409_s25 = int_to_ptr.vmem [resolvable:$true] %s408_s25 }
  0x24   :  { %v28_v37 = vunpack.c.0.s8 %v27_v35  ;;  %s529_s26 = scalar_lea.vmem %s409_s25, 32  ;;  %p534_p1 = scmp.lt.s32.totalorder %s409_s25, %s409_s25 }
  0x25   :  { %p530_p0 = scmp.ne.s32.totalorder %s409_s25, %s529_s26  ;;  %p535_p2 = scmp.lt.s32.totalorder %s529_s26, %s529_s26 }
  0x26   :  { %v31_v39 = vsub.s32 %v28_v37, %v30_v36 }
  0x27   :  { %p536_p3 = por %p535_p2, %p534_p1 }
  0x28   :  { %v32_v40 = vrot.slane %v23_v33, %v31_v39  ;;  %v39_v41 = vrot.slane %v25_v38, %v31_v39 }
  0x29   :  { %p537_p4 = pnand %p536_p3, %p530_p0 }
  0x2a   :  { %v40_v42 = vcombine.high %v32_v40, %v32_v40  ;;  %v41_v43 = vcombine.high %v39_v41, %v39_v41  ;;  %v46_v44 = vpack.c.bf16 %v32_v40, %v32_v40  ;;  %v48_v45 = vpack.c.bf16 %v39_v41, %v39_v41  ;;  %v22_v59 = vld [vmem:[#allocation2] sm:$0x3] }
  0x2c   :  { %v47_v46 = vpack.c.bf16 %v40_v42, %v40_v42  ;;  %v49_v47 = vpack.c.bf16 %v41_v43, %v41_v43 }
  0x2e   :  { %338 = vmatprep.mubr.bf16.mxu0 %v47_v46  ;;  %378 = vmatprep.mubr.bf16.mxu1 %v49_v47 }
  0x2f   :  { %339 = vmatmul.mubr.bf16.vlgmr.msra.gmra.mrb[0].mxu0 %v46_v44  ;;  %379 = vmatmul.mubr.bf16.vlgmr.msra.gmra.mrb[0].mxu1 %v48_v45 }
 0x102   :  { %v465_v49 = vpop.f32.mrb[0].mxu0  ;;  %v487_v50 = vpop.f32.mrb[0].mxu1 }
 0x103   :  { %v466_v51 = vpop.f32.mrb[1].mxu0  ;;  %v488_v52 = vpop.f32.mrb[1].mxu1 }
 0x104   :  { %v467_v53 = vadd.f32 %v466_v51, %v465_v49  ;;  %v489_v54 = vadd.f32 %v488_v52, %v487_v50  ;;  %v468_v55 = vpop.f32.mrb[2].mxu0  ;;  %v490_v56 = vpop.f32.mrb[2].mxu1 }
 0x105   :  { %v469_v57 = vpop.f32.mrb[3].mxu0  ;;  %v491_v58 = vpop.f32.mrb[3].mxu1 }
 0x106   :  { %v381_v60 = vadd.f32 %v489_v54, %v467_v53 }
 0x108   :  { %v386_v61 = vadd.f32 %v381_v60, %v22_v59 }
 0x10a   :  { %388 = vst.msk [vmem:[#allocation2] sm:$0x3] %vm20_vm0, %v386_v61 }
 0x111   :  { %v392_v63 = vld [vmem:[#allocation2] sm:$0x3] }
 0x112   :  { %v400_v0 = vadd.f32 %v448_v62, %v392_v63 }
 0x114   :  { %401 = vst.msk [vmem:[#allocation3] sm:$0x3] %vm20_vm0, %v400_v0 }
 0x115   :  { %540 = shalt.err (!%p537_p4)
}
 0x116   :  { %s541_s29 = scalar_lea.hbm %s696_s3, 32 }
 0x117   :  { %p542_p5 = scmp.ne.s32.totalorder %s696_s3, %s541_s29  ;;  %p545_p6 = scmp.lt.u32.totalorder %s541_s29, %s696_s3 }
 0x119   :  { %p547_p7 = pnand %p545_p6, %p542_p5 }
 0x11b   :  { %550 = shalt.err (!%p547_p7)
}
 0x11c   :  { %411 = dma.vmem_to_hbm [thread:$0]  %s409_s25, 32, %s696_s3, [#allocation4]  }
 0x11d   :  { %551 = dma.done.wait [#allocation4], 32  }
 0x11e   :  { %552 = vsyncadd [#allocation4], 4294967264 }
 0x11f   :  { %415 = vsyncpa [#allocation4], 1 }

</bundles_post_ra>
